<compile_context>
chip_gen: v6e
topology: v6e:2x2x1
jax: 0.10.0
libtpu: 0.0.40
codegen_flags: <defaults>
</compile_context>

<pallas_src>
import functools

import jax
import jax.numpy as jnp
from jax.experimental import pallas as pl
from jax.experimental.pallas import tpu as pltpu


_VMEM_LIMIT = 32 * 1024 * 1024  # explicit budget; well inside v7x 64 MiB VMEM


def _round_up(x, m):
    return (x + m - 1) // m * m


# ---------------------------------------------------------------------------
# In-kernel helpers
# ---------------------------------------------------------------------------
def _zero_border(xp_ref, H, W):
    """Zero the 1-px border of the padded scratch.  Done EVERY grid step so the
    batch grid axis can safely be marked "parallel" (v7x: 2 TensorCores)."""
    Cin = xp_ref.shape[-1]
    zr = jnp.zeros((1, W + 2, Cin), dtype=xp_ref.dtype)
    xp_ref[pl.ds(0, 1), :, :] = zr
    xp_ref[pl.ds(H + 1, 1), :, :] = zr
    zc = jnp.zeros((H + 2, 1, Cin), dtype=xp_ref.dtype)
    xp_ref[:, pl.ds(0, 1), :] = zc
    xp_ref[:, pl.ds(W + 1, 1), :] = zc


def _conv3x3_from_scratch(xp_ref, w_ref, acc_ref, o_ref, sum_ref, sumsq_ref,
                          H, W):
    """3x3 'same' conv via 9 tap matmuls (no materialized im2col patches).

    Each tap is a shifted (H, W, Cin) view of the zero-padded bf16 scratch and
    feeds ONE bf16 MXU matmul; partial products accumulate into an f32 VMEM
    accumulator.  The output store and the per-step BatchNorm statistics are
    lane-dense (last dim = Cp, a multiple of 128)."""
    Cin = xp_ref.shape[-1]
    HW = H * W
    Cp = acc_ref.shape[-1]

    for dy in range(3):
        for dx in range(3):
            t = dy * 3 + dx
            tap = xp_ref[pl.ds(dy, H), pl.ds(dx, W), :].reshape(HW, Cin)
            part = jnp.dot(tap, w_ref[t], preferred_element_type=jnp.float32)
            if t == 0:
                acc_ref[...] = part
            else:
                acc_ref[...] += part

    acc = acc_ref[...]
    # Natural (HW, Cp) matmul layout stored directly -- lane-dense, no relayout.
    o_ref[0] = acc.astype(o_ref.dtype)

    # Per-step BN statistics.  The (1, Cp) channel sums are replicated over 8
    # sublanes so the output block shape (8, Cp) satisfies the (8, 128) tiling
    # rule; the wrapper reads row 0 and reduces over the batch axis.
    s = jnp.sum(acc, axis=0, keepdims=True)
    ss = jnp.sum(acc * acc, axis=0, keepdims=True)
    sum_ref[0] = jnp.broadcast_to(s, (8, Cp))
    sumsq_ref[0] = jnp.broadcast_to(ss, (8, Cp))


def _conv1_kernel(x2_ref, x1_ref, w_ref, o_ref, sum_ref, sumsq_ref,
                  xp_ref, acc_ref, *, H, W):
    """Conv #1 of DoubleConv over cat([x2, x1], channels), no bias (the bias is
    cancelled exactly by train-mode BatchNorm's mean subtraction)."""
    C2 = x2_ref.shape[3]
    C1 = x1_ref.shape[3]
    _zero_border(xp_ref, H, W)
    # Fused zero-pad + channel concat: both inputs written straight into the
    # interior of one padded bf16 scratch (no padded/concat tensor in HBM).
    xp_ref[pl.ds(1, H), pl.ds(1, W), pl.ds(0, C2)] = x2_ref[0]
    xp_ref[pl.ds(1, H), pl.ds(1, W), pl.ds(C2, C1)] = x1_ref[0]
    _conv3x3_from_scratch(xp_ref, w_ref, acc_ref, o_ref, sum_ref, sumsq_ref,
                          H, W)


def _conv2_kernel(y1_ref, scale_ref, shift_ref, w_ref, o_ref, sum_ref,
                  sumsq_ref, xp_ref, acc_ref, *, H, W):
    """Conv #2 of DoubleConv with BatchNorm#1 affine + ReLU fused as prologue."""
    C = scale_ref.shape[1]                      # real (un-padded) channel count
    _zero_border(xp_ref, H, W)
    # BN#1 affine + ReLU in f32 on the VPU (v5e-safe), then cast to bf16 for
    # the MXU and write into the padded scratch interior (only the C real
    # channels -- the Cp padding lanes of y1 are zeros by construction).
    y1 = y1_ref[0][:, :C].astype(jnp.float32)                    # (HW, C)
    a1 = jnp.maximum(y1 * scale_ref[...] + shift_ref[...], 0.0)
    xp_ref[pl.ds(1, H), pl.ds(1, W), :] = a1.astype(xp_ref.dtype).reshape(H, W, C)
    _conv3x3_from_scratch(xp_ref, w_ref, acc_ref, o_ref, sum_ref, sumsq_ref,
                          H, W)


def _bn_relu_kernel(y_ref, scale_ref, shift_ref, o_ref):
    # y/o blocks: (1, HW, Cp) lane-dense; scale/shift: (1, Cp) broadcast
    # in-kernel (no tiled per-pixel planes in HBM).
    o_ref[0] = jnp.maximum(y_ref[0] * scale_ref[...] + shift_ref[...], 0.0)


# ---------------------------------------------------------------------------
# Pallas wrappers
# ---------------------------------------------------------------------------
def conv1_fused(x2, x1, w1p):
    """conv3x3('same') over cat([x2, x1], channels); bf16 MXU with f32 accum.
    Also emits per-image channel sums / sums-of-squares of the bias-free f32
    output for BatchNorm (per-step outputs => parallel grid)."""
    N, H, W, C2 = x2.shape
    C1 = x1.shape[3]
    Cin = C2 + C1
    Cp = w1p.shape[-1]
    HW = H * W
    kernel = functools.partial(_conv1_kernel, H=H, W=W)
    return pl.pallas_call(
        kernel,
        out_shape=(
            jax.ShapeDtypeStruct((N, HW, Cp), jnp.bfloat16),
            jax.ShapeDtypeStruct((N, 8, Cp), jnp.float32),
            jax.ShapeDtypeStruct((N, 8, Cp), jnp.float32),
        ),
        grid=(N,),
        in_specs=[
            pl.BlockSpec((1, H, W, C2), lambda n: (n, 0, 0, 0)),
            pl.BlockSpec((1, H, W, C1), lambda n: (n, 0, 0, 0)),
            pl.BlockSpec((9, Cin, Cp), lambda n: (0, 0, 0)),   # resident weights
        ],
        out_specs=(
            pl.BlockSpec((1, HW, Cp), lambda n: (n, 0, 0)),
            pl.BlockSpec((1, 8, Cp), lambda n: (n, 0, 0)),
            pl.BlockSpec((1, 8, Cp), lambda n: (n, 0, 0)),
        ),
        scratch_shapes=[
            pltpu.VMEM((H + 2, W + 2, Cin), jnp.bfloat16),   # padded input
            pltpu.VMEM((HW, Cp), jnp.float32),               # f32 accumulator
        ],
        compiler_params=pltpu.CompilerParams(
            dimension_semantics=("parallel",),
            vmem_limit_bytes=_VMEM_LIMIT),
    )(x2, x1, w1p)


def conv2_fused(y1, scale1, shift1, w2p, H, W):
    """BN#1 affine + ReLU + conv3x3('same'); emits per-image BN statistics."""
    N, HW, Cp = y1.shape
    C = scale1.shape[1]
    kernel = functools.partial(_conv2_kernel, H=H, W=W)
    return pl.pallas_call(
        kernel,
        out_shape=(
            jax.ShapeDtypeStruct((N, HW, Cp), jnp.float32),
            jax.ShapeDtypeStruct((N, 8, Cp), jnp.float32),
            jax.ShapeDtypeStruct((N, 8, Cp), jnp.float32),
        ),
        grid=(N,),
        in_specs=[
            pl.BlockSpec((1, HW, Cp), lambda n: (n, 0, 0)),
            pl.BlockSpec((1, C), lambda n: (0, 0)),
            pl.BlockSpec((1, C), lambda n: (0, 0)),
            pl.BlockSpec((9, C, Cp), lambda n: (0, 0, 0)),
        ],
        out_specs=(
            pl.BlockSpec((1, HW, Cp), lambda n: (n, 0, 0)),
            pl.BlockSpec((1, 8, Cp), lambda n: (n, 0, 0)),
            pl.BlockSpec((1, 8, Cp), lambda n: (n, 0, 0)),
        ),
        scratch_shapes=[
            pltpu.VMEM((H + 2, W + 2, C), jnp.bfloat16),
            pltpu.VMEM((HW, Cp), jnp.float32),
        ],
        compiler_params=pltpu.CompilerParams(
            dimension_semantics=("parallel",),
            vmem_limit_bytes=_VMEM_LIMIT),
    )(y1, scale1, shift1, w2p)


def bn_relu_lanedense(y, scale_p, shift_p):
    """Final BN affine + ReLU on the lane-dense (N, H*W, Cp) conv output."""
    N, HW, Cp = y.shape
    return pl.pallas_call(
        _bn_relu_kernel,
        out_shape=jax.ShapeDtypeStruct((N, HW, Cp), jnp.float32),
        grid=(N,),
        in_specs=[
            pl.BlockSpec((1, HW, Cp), lambda n: (n, 0, 0)),
            pl.BlockSpec((1, Cp), lambda n: (0, 0)),
            pl.BlockSpec((1, Cp), lambda n: (0, 0)),
        ],
        out_specs=pl.BlockSpec((1, HW, Cp), lambda n: (n, 0, 0)),
        compiler_params=pltpu.CompilerParams(
            dimension_semantics=("parallel",),
            vmem_limit_bytes=_VMEM_LIMIT),
    )(y, scale_p, shift_p)


# ---------------------------------------------------------------------------
# Glue (plain JAX)
# ---------------------------------------------------------------------------
def upsample_bilinear_2x_align_corners(x_nhwc):
    """nn.Upsample(scale_factor=2, mode='bilinear', align_corners=True)."""
    N, H, W, C = x_nhwc.shape
    Ho, Wo = 2 * H, 2 * W
    ys = jnp.arange(Ho, dtype=jnp.float32) * ((H - 1) / (Ho - 1))
    xs = jnp.arange(Wo, dtype=jnp.float32) * ((W - 1) / (Wo - 1))
    y0 = jnp.floor(ys).astype(jnp.int32)
    x0 = jnp.floor(xs).astype(jnp.int32)
    y1 = jnp.minimum(y0 + 1, H - 1)
    x1 = jnp.minimum(x0 + 1, W - 1)
    wy = (ys - y0.astype(jnp.float32))[None, :, None, None]
    wx = (xs - x0.astype(jnp.float32))[None, None, :, None]

    def g(yi, xi):
        return x_nhwc[:, yi[:, None], xi[None, :], :]

    top = g(y0, x0) * (1.0 - wx) + g(y0, x1) * wx
    bot = g(y1, x0) * (1.0 - wx) + g(y1, x1) * wx
    return top * (1.0 - wy) + bot * wy


def bn_affine_from_stats(s, ss, count, gamma, beta, eps=1e-5):
    """Per-channel scale/shift for training-mode BatchNorm (biased variance).
    Single-pass E[x^2]-E[x]^2 in f32: conv outputs here are zero-mean-ish
    (bias dropped), so there is no catastrophic cancellation."""
    mean = s / count
    var = jnp.maximum(ss / count - mean * mean, 0.0)
    scale = gamma * jax.lax.rsqrt(var + eps)
    shift = beta - mean * scale
    return scale, shift


def _reduce_stats(s):
    # Rows 0..7 of each per-image stats block are identical copies (sublane
    # replication for the (8,128) block rule): take row 0, sum over batch.
    return s[:, 0, :].sum(axis=0)


def _pack_weights(w_hwio, cp):
    kh, kw, cin, cout = w_hwio.shape
    w = w_hwio.reshape(kh * kw, cin, cout).astype(jnp.float32)
    if cout != cp:
        w = jnp.pad(w, ((0, 0), (0, 0), (0, cp - cout)))
    return w.astype(jnp.bfloat16)


def _pad_channels(v, cp):
    c = v.shape[-1]
    if c != cp:
        v = jnp.pad(v, (0, cp - c))
    return v.reshape(1, cp).astype(jnp.float32)


@jax.jit
def up_forward(x1_nchw, x2_nchw, params):
    """Up.forward(x1, x2) with bilinear=True.  Inputs/outputs are NCHW."""
    # TODO(synk): accept/return NHWC to drop these full-tensor relayouts.
    x1 = jnp.transpose(x1_nchw, (0, 2, 3, 1)).astype(jnp.float32)
    x2 = jnp.transpose(x2_nchw, (0, 2, 3, 1)).astype(jnp.float32)

    x1 = upsample_bilinear_2x_align_corners(x1)

    # F.pad to the skip connection's spatial size (negative diff => crop).
    diffY = x2.shape[1] - x1.shape[1]
    diffX = x2.shape[2] - x1.shape[2]
    if diffY or diffX:
        x1 = jax.lax.pad(
            x1, jnp.array(0.0, x1.dtype),
            ((0, 0, 0),
             (diffY // 2, diffY - diffY // 2, 0),
             (diffX // 2, diffX - diffX // 2, 0),
             (0, 0, 0)))

    N, H, W, _ = x2.shape
    assert (H * W) % 8 == 0, "spatial size must be a multiple of 8"
    Cout = params["w1"].shape[-1]
    Cp = _round_up(Cout, 128)          # lane-dense channel padding
    count = float(N * H * W)

    x2b = x2.astype(jnp.bfloat16)
    x1b = x1.astype(jnp.bfloat16)
    w1p = _pack_weights(params["w1"], Cp)
    w2p = _pack_weights(params["w2"], Cp)

    # Conv1 over cat([x2, x1]); concat + zero-pad fused into the kernel.
    y1, s1, ss1 = conv1_fused(x2b, x1b, w1p)          # y1: (N, H*W, Cp) bf16
    scale1, shift1 = bn_affine_from_stats(
        _reduce_stats(s1)[:Cout], _reduce_stats(ss1)[:Cout], count,
        params["g1"], params["bt1"])

    # BN#1 affine + ReLU fused into conv2's prologue.
    y2, s2, ss2 = conv2_fused(y1, scale1.reshape(1, Cout),
                              shift1.reshape(1, Cout), w2p, H, W)
    scale2, shift2 = bn_affine_from_stats(
        _reduce_stats(s2)[:Cout], _reduce_stats(ss2)[:Cout], count,
        params["g2"], params["bt2"])

    out = bn_relu_lanedense(y2, _pad_channels(scale2, Cp),
                            _pad_channels(shift2, Cp))
    out = out[..., :Cout].reshape(N, H, W, Cout)
    return jnp.transpose(out, (0, 3, 1, 2))           # back to NCHW


# ---------------------------------------------------------------------------
# Parameters, pure-JAX reference, and smoke test
# ---------------------------------------------------------------------------
def init_params(key, in_channels, out_channels):
    """Deterministic synthetic parameters (shapes follow DoubleConv).

    b1/b2 exist for parity with nn.Conv2d but are not used by the kernels:
    train-mode BatchNorm subtracts the batch mean, which cancels the conv
    bias exactly, so the final output is unchanged."""
    k1, k2, k3, k4 = jax.random.split(key, 4)
    fan1 = in_channels * 9
    fan2 = out_channels * 9
    return {
        "w1": jax.random.normal(k1, (3, 3, in_channels, out_channels),
                                jnp.float32) * (1.0 / fan1) ** 0.5,   # HWIO
        "b1": jax.random.normal(k2, (out_channels,), jnp.float32) * 0.05,
        "g1": jnp.ones((out_channels,), jnp.float32),
        "bt1": jnp.zeros((out_channels,), jnp.float32),
        "w2": jax.random.normal(k3, (3, 3, out_channels, out_channels),
                                jnp.float32) * (1.0 / fan2) ** 0.5,
        "b2": jax.random.normal(k4, (out_channels,), jnp.float32) * 0.05,
        "g2": jnp.ones((out_channels,), jnp.float32),
        "bt2": jnp.zeros((out_channels,), jnp.float32),
    }


def _ref_conv_bn_relu(x, w, gamma, beta, eps=1e-5):
    y = jax.lax.conv_general_dilated(
        x, w, (1, 1), "SAME", dimension_numbers=("NHWC", "HWIO", "NHWC"))
    mean = jnp.mean(y, axis=(0, 1, 2))
    var = jnp.mean((y - mean) ** 2, axis=(0, 1, 2))
    return jnp.maximum((y - mean) / jnp.sqrt(var + eps) * gamma + beta, 0.0)


def reference_up_forward(x1_nchw, x2_nchw, params):
    x1 = jnp.transpose(x1_nchw, (0, 2, 3, 1)).astype(jnp.float32)
    x2 = jnp.transpose(x2_nchw, (0, 2, 3, 1)).astype(jnp.float32)
    x1 = upsample_bilinear_2x_align_corners(x1)
    diffY = x2.shape[1] - x1.shape[1]
    diffX = x2.shape[2] - x1.shape[2]
    if diffY or diffX:
        x1 = jnp.pad(x1, ((0, 0), (diffY // 2, diffY - diffY // 2),
                          (diffX // 2, diffX - diffX // 2), (0, 0)))
    x = jnp.concatenate([x2, x1], axis=-1)
    y = _ref_conv_bn_relu(x, params["w1"], params["g1"], params["bt1"])
    y = _ref_conv_bn_relu(y, params["w2"], params["g2"], params["bt2"])
    return jnp.transpose(y, (0, 3, 1, 2))


if __name__ == "__main__":
    key = jax.random.PRNGKey(0)
    kx1, kx2, kp = jax.random.split(key, 3)

    in_channels, out_channels = 8, 4          # Up(8, 4, bilinear=True)
    # x1: deeper feature map (4 ch, 8x8); x2: skip connection (4 ch, 16x16).
    # After upsample + concat the DoubleConv sees 8 input channels.
    x1 = jax.random.normal(kx1, (2, 4, 8, 8), jnp.float32)    # NCHW
    x2 = jax.random.normal(kx2, (2, 4, 16, 16), jnp.float32)  # NCHW
    params = init_params(kp, in_channels, out_channels)

    out = up_forward(x1, x2, params)
    jax.block_until_ready(out)
    assert out.shape == (2, out_channels, 16, 16), out.shape
    assert out.dtype == jnp.float32

    ref = reference_up_forward(x1, x2, params)
    err = float(jnp.max(jnp.abs(out - ref)))
    # bf16 MXU operands (f32 accumulation) vs. the all-f32 reference:
    # expected max deviation ~1e-2 on O(1) BatchNorm'd outputs.
    assert err < 5e-2, f"max abs error vs reference: {err}"

    print("KERNEL_OK")
</pallas_src>

<mosaic_0001>
module attributes {stable_mosaic.version = 11 : i64} {
  func.func @_conv1_kernel(%arg0: i32, %arg1: memref<1x16x16x4xbf16, #tpu.memory_space<vmem>>, %arg2: memref<1x16x16x4xbf16, #tpu.memory_space<vmem>>, %arg3: memref<9x8x128xbf16, #tpu.memory_space<vmem>>, %arg4: memref<1x256x128xbf16, #tpu.memory_space<vmem>>, %arg5: memref<1x8x128xf32, #tpu.memory_space<vmem>>, %arg6: memref<1x8x128xf32, #tpu.memory_space<vmem>>, %arg7: memref<18x18x8xbf16, #tpu.memory_space<vmem>>, %arg8: memref<256x128xf32, #tpu.memory_space<vmem>>) attributes {dimension_semantics = [#tpu.dimension_semantics<parallel>], iteration_bounds = array<i64: 2>, scalar_prefetch = 0 : i64, scratch_operands = 2 : i64, tpu.core_type = #tpu.core_type<tc>, window_params = [{transform_indices = @transform_0, window_bounds = array<i64: 1, 16, 16, 4>}, {transform_indices = @transform_1, window_bounds = array<i64: 1, 16, 16, 4>}, {pipeline_mode = #tpu.pipeline_mode<synchronous>, transform_indices = @transform_2, window_bounds = array<i64: 9, 8, 128>}, {transform_indices = @transform_3, window_bounds = array<i64: 1, 256, 128>}, {transform_indices = @transform_4, window_bounds = array<i64: 1, 8, 128>}, {transform_indices = @transform_5, window_bounds = array<i64: 1, 8, 128>}]} {
    %cst = arith.constant 0.000000e+00 : bf16
    %0 = vector.broadcast %cst : bf16 to vector<1x18x8xbf16>
    %c0 = arith.constant 0 : index
    %c0_0 = arith.constant 0 : index
    %c0_1 = arith.constant 0 : index
    %1 = vector.load %arg7[%c0, %c0_0, %c0_1] : memref<18x18x8xbf16, #tpu.memory_space<vmem>>, vector<1x18x8xbf16>
    tpu.vector_store %arg7[%c0, %c0_0, %c0_1], %0 {strides = array<i32>} : memref<18x18x8xbf16, #tpu.memory_space<vmem>>, vector<1x18x8xbf16>,
    %c17 = arith.constant 17 : index
    %c0_2 = arith.constant 0 : index
    %c0_3 = arith.constant 0 : index
    %2 = vector.load %arg7[%c17, %c0_2, %c0_3] : memref<18x18x8xbf16, #tpu.memory_space<vmem>>, vector<1x18x8xbf16>
    tpu.vector_store %arg7[%c17, %c0_2, %c0_3], %0 {strides = array<i32>} : memref<18x18x8xbf16, #tpu.memory_space<vmem>>, vector<1x18x8xbf16>,
    %cst_4 = arith.constant 0.000000e+00 : bf16
    %3 = vector.broadcast %cst_4 : bf16 to vector<18x1x8xbf16>
    %c0_5 = arith.constant 0 : index
    %c0_6 = arith.constant 0 : index
    %c0_7 = arith.constant 0 : index
    %4 = vector.load %arg7[%c0_5, %c0_6, %c0_7] : memref<18x18x8xbf16, #tpu.memory_space<vmem>>, vector<18x1x8xbf16>
    tpu.vector_store %arg7[%c0_5, %c0_6, %c0_7], %3 {strides = array<i32>} : memref<18x18x8xbf16, #tpu.memory_space<vmem>>, vector<18x1x8xbf16>,
    %c0_8 = arith.constant 0 : index
    %c17_9 = arith.constant 17 : index
    %c0_10 = arith.constant 0 : index
    %5 = vector.load %arg7[%c0_8, %c17_9, %c0_10] : memref<18x18x8xbf16, #tpu.memory_space<vmem>>, vector<18x1x8xbf16>
    tpu.vector_store %arg7[%c0_8, %c17_9, %c0_10], %3 {strides = array<i32>} : memref<18x18x8xbf16, #tpu.memory_space<vmem>>, vector<18x1x8xbf16>,
    %c0_11 = arith.constant 0 : index
    %c0_12 = arith.constant 0 : index
    %c0_13 = arith.constant 0 : index
    %c0_14 = arith.constant 0 : index
    %6 = vector.load %arg1[%c0_11, %c0_12, %c0_13, %c0_14] : memref<1x16x16x4xbf16, #tpu.memory_space<vmem>>, vector<1x16x16x4xbf16>
    %7 = vector.shape_cast %6 : vector<1x16x16x4xbf16> to vector<16x16x4xbf16>
    %c1 = arith.constant 1 : index
    %c1_15 = arith.constant 1 : index
    %c0_16 = arith.constant 0 : index
    %8 = vector.load %arg7[%c1, %c1_15, %c0_16] : memref<18x18x8xbf16, #tpu.memory_space<vmem>>, vector<16x16x4xbf16>
    tpu.vector_store %arg7[%c1, %c1_15, %c0_16], %7 {strides = array<i32>} : memref<18x18x8xbf16, #tpu.memory_space<vmem>>, vector<16x16x4xbf16>,
    %c0_17 = arith.constant 0 : index
    %c0_18 = arith.constant 0 : index
    %c0_19 = arith.constant 0 : index
    %c0_20 = arith.constant 0 : index
    %9 = vector.load %arg2[%c0_17, %c0_18, %c0_19, %c0_20] : memref<1x16x16x4xbf16, #tpu.memory_space<vmem>>, vector<1x16x16x4xbf16>
    %10 = vector.shape_cast %9 : vector<1x16x16x4xbf16> to vector<16x16x4xbf16>
    %c1_21 = arith.constant 1 : index
    %c1_22 = arith.constant 1 : index
    %c4 = arith.constant 4 : index
    %11 = vector.load %arg7[%c1_21, %c1_22, %c4] : memref<18x18x8xbf16, #tpu.memory_space<vmem>>, vector<16x16x4xbf16>
    tpu.vector_store %arg7[%c1_21, %c1_22, %c4], %10 {strides = array<i32>} : memref<18x18x8xbf16, #tpu.memory_space<vmem>>, vector<16x16x4xbf16>,
    %c0_23 = arith.constant 0 : index
    %c0_24 = arith.constant 0 : index
    %c0_25 = arith.constant 0 : index
    %12 = vector.load %arg7[%c0_23, %c0_24, %c0_25] : memref<18x18x8xbf16, #tpu.memory_space<vmem>>, vector<16x16x8xbf16>
    %13 = vector.shape_cast %12 : vector<16x16x8xbf16> to vector<256x8xbf16>
    %c0_26 = arith.constant 0 : index
    %c0_27 = arith.constant 0 : index
    %c0_28 = arith.constant 0 : index
    %14 = vector.load %arg3[%c0_26, %c0_27, %c0_28] : memref<9x8x128xbf16, #tpu.memory_space<vmem>>, vector<1x8x128xbf16>
    %15 = vector.shape_cast %14 : vector<1x8x128xbf16> to vector<8x128xbf16>
    %cst_29 = arith.constant dense<0.000000e+00> : vector<256x128xf32>
    %16 = tpu.matmul %13, %15, %cst_29 {dimension_numbers = #tpu.dot_dimension_numbers<[1], [0], [0], [1], [0, 0, 1, 1], [], []>} : vector<256x8xbf16>, vector<8x128xbf16>, vector<256x128xf32> -> vector<256x128xf32>
    %c0_30 = arith.constant 0 : index
    %c0_31 = arith.constant 0 : index
    %17 = vector.load %arg8[%c0_30, %c0_31] : memref<256x128xf32, #tpu.memory_space<vmem>>, vector<256x128xf32>
    tpu.vector_store %arg8[%c0_30, %c0_31], %16 {strides = array<i32>} : memref<256x128xf32, #tpu.memory_space<vmem>>, vector<256x128xf32>,
    %c0_32 = arith.constant 0 : index
    %c1_33 = arith.constant 1 : index
    %c0_34 = arith.constant 0 : index
    %18 = vector.load %arg7[%c0_32, %c1_33, %c0_34] : memref<18x18x8xbf16, #tpu.memory_space<vmem>>, vector<16x16x8xbf16>
    %19 = vector.shape_cast %18 : vector<16x16x8xbf16> to vector<256x8xbf16>
    %c1_35 = arith.constant 1 : index
    %c0_36 = arith.constant 0 : index
    %c0_37 = arith.constant 0 : index
    %20 = vector.load %arg3[%c1_35, %c0_36, %c0_37] : memref<9x8x128xbf16, #tpu.memory_space<vmem>>, vector<1x8x128xbf16>
    %21 = vector.shape_cast %20 : vector<1x8x128xbf16> to vector<8x128xbf16>
    %cst_38 = arith.constant dense<0.000000e+00> : vector<256x128xf32>
    %22 = tpu.matmul %19, %21, %cst_38 {dimension_numbers = #tpu.dot_dimension_numbers<[1], [0], [0], [1], [0, 0, 1, 1], [], []>} : vector<256x8xbf16>, vector<8x128xbf16>, vector<256x128xf32> -> vector<256x128xf32>
    %c0_39 = arith.constant 0 : index
    %c0_40 = arith.constant 0 : index
    %23 = vector.load %arg8[%c0_39, %c0_40] : memref<256x128xf32, #tpu.memory_space<vmem>>, vector<256x128xf32>
    %24 = arith.addf %23, %22 : vector<256x128xf32>
    %c0_41 = arith.constant 0 : index
    %c0_42 = arith.constant 0 : index
    %25 = vector.load %arg8[%c0_41, %c0_42] : memref<256x128xf32, #tpu.memory_space<vmem>>, vector<256x128xf32>
    tpu.vector_store %arg8[%c0_41, %c0_42], %24 {strides = array<i32>} : memref<256x128xf32, #tpu.memory_space<vmem>>, vector<256x128xf32>,
    %c0_43 = arith.constant 0 : index
    %c2 = arith.constant 2 : index
    %c0_44 = arith.constant 0 : index
    %26 = vector.load %arg7[%c0_43, %c2, %c0_44] : memref<18x18x8xbf16, #tpu.memory_space<vmem>>, vector<16x16x8xbf16>
    %27 = vector.shape_cast %26 : vector<16x16x8xbf16> to vector<256x8xbf16>
    %c2_45 = arith.constant 2 : index
    %c0_46 = arith.constant 0 : index
    %c0_47 = arith.constant 0 : index
    %28 = vector.load %arg3[%c2_45, %c0_46, %c0_47] : memref<9x8x128xbf16, #tpu.memory_space<vmem>>, vector<1x8x128xbf16>
    %29 = vector.shape_cast %28 : vector<1x8x128xbf16> to vector<8x128xbf16>
    %cst_48 = arith.constant dense<0.000000e+00> : vector<256x128xf32>
    %30 = tpu.matmul %27, %29, %cst_48 {dimension_numbers = #tpu.dot_dimension_numbers<[1], [0], [0], [1], [0, 0, 1, 1], [], []>} : vector<256x8xbf16>, vector<8x128xbf16>, vector<256x128xf32> -> vector<256x128xf32>
    %c0_49 = arith.constant 0 : index
    %c0_50 = arith.constant 0 : index
    %31 = vector.load %arg8[%c0_49, %c0_50] : memref<256x128xf32, #tpu.memory_space<vmem>>, vector<256x128xf32>
    %32 = arith.addf %31, %30 : vector<256x128xf32>
    %c0_51 = arith.constant 0 : index
    %c0_52 = arith.constant 0 : index
    %33 = vector.load %arg8[%c0_51, %c0_52] : memref<256x128xf32, #tpu.memory_space<vmem>>, vector<256x128xf32>
    tpu.vector_store %arg8[%c0_51, %c0_52], %32 {strides = array<i32>} : memref<256x128xf32, #tpu.memory_space<vmem>>, vector<256x128xf32>,
    %c1_53 = arith.constant 1 : index
    %c0_54 = arith.constant 0 : index
    %c0_55 = arith.constant 0 : index
    %34 = vector.load %arg7[%c1_53, %c0_54, %c0_55] : memref<18x18x8xbf16, #tpu.memory_space<vmem>>, vector<16x16x8xbf16>
    %35 = vector.shape_cast %34 : vector<16x16x8xbf16> to vector<256x8xbf16>
    %c3 = arith.constant 3 : index
    %c0_56 = arith.constant 0 : index
    %c0_57 = arith.constant 0 : index
    %36 = vector.load %arg3[%c3, %c0_56, %c0_57] : memref<9x8x128xbf16, #tpu.memory_space<vmem>>, vector<1x8x128xbf16>
    %37 = vector.shape_cast %36 : vector<1x8x128xbf16> to vector<8x128xbf16>
    %cst_58 = arith.constant dense<0.000000e+00> : vector<256x128xf32>
    %38 = tpu.matmul %35, %37, %cst_58 {dimension_numbers = #tpu.dot_dimension_numbers<[1], [0], [0], [1], [0, 0, 1, 1], [], []>} : vector<256x8xbf16>, vector<8x128xbf16>, vector<256x128xf32> -> vector<256x128xf32>
    %c0_59 = arith.constant 0 : index
    %c0_60 = arith.constant 0 : index
    %39 = vector.load %arg8[%c0_59, %c0_60] : memref<256x128xf32, #tpu.memory_space<vmem>>, vector<256x128xf32>
    %40 = arith.addf %39, %38 : vector<256x128xf32>
    %c0_61 = arith.constant 0 : index
    %c0_62 = arith.constant 0 : index
    %41 = vector.load %arg8[%c0_61, %c0_62] : memref<256x128xf32, #tpu.memory_space<vmem>>, vector<256x128xf32>
    tpu.vector_store %arg8[%c0_61, %c0_62], %40 {strides = array<i32>} : memref<256x128xf32, #tpu.memory_space<vmem>>, vector<256x128xf32>,
    %c1_63 = arith.constant 1 : index
    %c1_64 = arith.constant 1 : index
    %c0_65 = arith.constant 0 : index
    %42 = vector.load %arg7[%c1_63, %c1_64, %c0_65] : memref<18x18x8xbf16, #tpu.memory_space<vmem>>, vector<16x16x8xbf16>
    %43 = vector.shape_cast %42 : vector<16x16x8xbf16> to vector<256x8xbf16>
    %c4_66 = arith.constant 4 : index
    %c0_67 = arith.constant 0 : index
    %c0_68 = arith.constant 0 : index
    %44 = vector.load %arg3[%c4_66, %c0_67, %c0_68] : memref<9x8x128xbf16, #tpu.memory_space<vmem>>, vector<1x8x128xbf16>
    %45 = vector.shape_cast %44 : vector<1x8x128xbf16> to vector<8x128xbf16>
    %cst_69 = arith.constant dense<0.000000e+00> : vector<256x128xf32>
    %46 = tpu.matmul %43, %45, %cst_69 {dimension_numbers = #tpu.dot_dimension_numbers<[1], [0], [0], [1], [0, 0, 1, 1], [], []>} : vector<256x8xbf16>, vector<8x128xbf16>, vector<256x128xf32> -> vector<256x128xf32>
    %c0_70 = arith.constant 0 : index
    %c0_71 = arith.constant 0 : index
    %47 = vector.load %arg8[%c0_70, %c0_71] : memref<256x128xf32, #tpu.memory_space<vmem>>, vector<256x128xf32>
    %48 = arith.addf %47, %46 : vector<256x128xf32>
    %c0_72 = arith.constant 0 : index
    %c0_73 = arith.constant 0 : index
    %49 = vector.load %arg8[%c0_72, %c0_73] : memref<256x128xf32, #tpu.memory_space<vmem>>, vector<256x128xf32>
    tpu.vector_store %arg8[%c0_72, %c0_73], %48 {strides = array<i32>} : memref<256x128xf32, #tpu.memory_space<vmem>>, vector<256x128xf32>,
    %c1_74 = arith.constant 1 : index
    %c2_75 = arith.constant 2 : index
    %c0_76 = arith.constant 0 : index
    %50 = vector.load %arg7[%c1_74, %c2_75, %c0_76] : memref<18x18x8xbf16, #tpu.memory_space<vmem>>, vector<16x16x8xbf16>
    %51 = vector.shape_cast %50 : vector<16x16x8xbf16> to vector<256x8xbf16>
    %c5 = arith.constant 5 : index
    %c0_77 = arith.constant 0 : index
    %c0_78 = arith.constant 0 : index
    %52 = vector.load %arg3[%c5, %c0_77, %c0_78] : memref<9x8x128xbf16, #tpu.memory_space<vmem>>, vector<1x8x128xbf16>
    %53 = vector.shape_cast %52 : vector<1x8x128xbf16> to vector<8x128xbf16>
    %cst_79 = arith.constant dense<0.000000e+00> : vector<256x128xf32>
    %54 = tpu.matmul %51, %53, %cst_79 {dimension_numbers = #tpu.dot_dimension_numbers<[1], [0], [0], [1], [0, 0, 1, 1], [], []>} : vector<256x8xbf16>, vector<8x128xbf16>, vector<256x128xf32> -> vector<256x128xf32>
    %c0_80 = arith.constant 0 : index
    %c0_81 = arith.constant 0 : index
    %55 = vector.load %arg8[%c0_80, %c0_81] : memref<256x128xf32, #tpu.memory_space<vmem>>, vector<256x128xf32>
    %56 = arith.addf %55, %54 : vector<256x128xf32>
    %c0_82 = arith.constant 0 : index
    %c0_83 = arith.constant 0 : index
    %57 = vector.load %arg8[%c0_82, %c0_83] : memref<256x128xf32, #tpu.memory_space<vmem>>, vector<256x128xf32>
    tpu.vector_store %arg8[%c0_82, %c0_83], %56 {strides = array<i32>} : memref<256x128xf32, #tpu.memory_space<vmem>>, vector<256x128xf32>,
    %c2_84 = arith.constant 2 : index
    %c0_85 = arith.constant 0 : index
    %c0_86 = arith.constant 0 : index
    %58 = vector.load %arg7[%c2_84, %c0_85, %c0_86] : memref<18x18x8xbf16, #tpu.memory_space<vmem>>, vector<16x16x8xbf16>
    %59 = vector.shape_cast %58 : vector<16x16x8xbf16> to vector<256x8xbf16>
    %c6 = arith.constant 6 : index
    %c0_87 = arith.constant 0 : index
    %c0_88 = arith.constant 0 : index
    %60 = vector.load %arg3[%c6, %c0_87, %c0_88] : memref<9x8x128xbf16, #tpu.memory_space<vmem>>, vector<1x8x128xbf16>
    %61 = vector.shape_cast %60 : vector<1x8x128xbf16> to vector<8x128xbf16>
    %cst_89 = arith.constant dense<0.000000e+00> : vector<256x128xf32>
    %62 = tpu.matmul %59, %61, %cst_89 {dimension_numbers = #tpu.dot_dimension_numbers<[1], [0], [0], [1], [0, 0, 1, 1], [], []>} : vector<256x8xbf16>, vector<8x128xbf16>, vector<256x128xf32> -> vector<256x128xf32>
    %c0_90 = arith.constant 0 : index
    %c0_91 = arith.constant 0 : index
    %63 = vector.load %arg8[%c0_90, %c0_91] : memref<256x128xf32, #tpu.memory_space<vmem>>, vector<256x128xf32>
    %64 = arith.addf %63, %62 : vector<256x128xf32>
    %c0_92 = arith.constant 0 : index
    %c0_93 = arith.constant 0 : index
    %65 = vector.load %arg8[%c0_92, %c0_93] : memref<256x128xf32, #tpu.memory_space<vmem>>, vector<256x128xf32>
    tpu.vector_store %arg8[%c0_92, %c0_93], %64 {strides = array<i32>} : memref<256x128xf32, #tpu.memory_space<vmem>>, vector<256x128xf32>,
    %c2_94 = arith.constant 2 : index
    %c1_95 = arith.constant 1 : index
    %c0_96 = arith.constant 0 : index
    %66 = vector.load %arg7[%c2_94, %c1_95, %c0_96] : memref<18x18x8xbf16, #tpu.memory_space<vmem>>, vector<16x16x8xbf16>
    %67 = vector.shape_cast %66 : vector<16x16x8xbf16> to vector<256x8xbf16>
    %c7 = arith.constant 7 : index
    %c0_97 = arith.constant 0 : index
    %c0_98 = arith.constant 0 : index
    %68 = vector.load %arg3[%c7, %c0_97, %c0_98] : memref<9x8x128xbf16, #tpu.memory_space<vmem>>, vector<1x8x128xbf16>
    %69 = vector.shape_cast %68 : vector<1x8x128xbf16> to vector<8x128xbf16>
    %cst_99 = arith.constant dense<0.000000e+00> : vector<256x128xf32>
    %70 = tpu.matmul %67, %69, %cst_99 {dimension_numbers = #tpu.dot_dimension_numbers<[1], [0], [0], [1], [0, 0, 1, 1], [], []>} : vector<256x8xbf16>, vector<8x128xbf16>, vector<256x128xf32> -> vector<256x128xf32>
    %c0_100 = arith.constant 0 : index
    %c0_101 = arith.constant 0 : index
    %71 = vector.load %arg8[%c0_100, %c0_101] : memref<256x128xf32, #tpu.memory_space<vmem>>, vector<256x128xf32>
    %72 = arith.addf %71, %70 : vector<256x128xf32>
    %c0_102 = arith.constant 0 : index
    %c0_103 = arith.constant 0 : index
    %73 = vector.load %arg8[%c0_102, %c0_103] : memref<256x128xf32, #tpu.memory_space<vmem>>, vector<256x128xf32>
    tpu.vector_store %arg8[%c0_102, %c0_103], %72 {strides = array<i32>} : memref<256x128xf32, #tpu.memory_space<vmem>>, vector<256x128xf32>,
    %c2_104 = arith.constant 2 : index
    %c2_105 = arith.constant 2 : index
    %c0_106 = arith.constant 0 : index
    %74 = vector.load %arg7[%c2_104, %c2_105, %c0_106] : memref<18x18x8xbf16, #tpu.memory_space<vmem>>, vector<16x16x8xbf16>
    %75 = vector.shape_cast %74 : vector<16x16x8xbf16> to vector<256x8xbf16>
    %c8 = arith.constant 8 : index
    %c0_107 = arith.constant 0 : index
    %c0_108 = arith.constant 0 : index
    %76 = vector.load %arg3[%c8, %c0_107, %c0_108] : memref<9x8x128xbf16, #tpu.memory_space<vmem>>, vector<1x8x128xbf16>
    %77 = vector.shape_cast %76 : vector<1x8x128xbf16> to vector<8x128xbf16>
    %cst_109 = arith.constant dense<0.000000e+00> : vector<256x128xf32>
    %78 = tpu.matmul %75, %77, %cst_109 {dimension_numbers = #tpu.dot_dimension_numbers<[1], [0], [0], [1], [0, 0, 1, 1], [], []>} : vector<256x8xbf16>, vector<8x128xbf16>, vector<256x128xf32> -> vector<256x128xf32>
    %c0_110 = arith.constant 0 : index
    %c0_111 = arith.constant 0 : index
    %79 = vector.load %arg8[%c0_110, %c0_111] : memref<256x128xf32, #tpu.memory_space<vmem>>, vector<256x128xf32>
    %80 = arith.addf %79, %78 : vector<256x128xf32>
    %c0_112 = arith.constant 0 : index
    %c0_113 = arith.constant 0 : index
    %81 = vector.load %arg8[%c0_112, %c0_113] : memref<256x128xf32, #tpu.memory_space<vmem>>, vector<256x128xf32>
    tpu.vector_store %arg8[%c0_112, %c0_113], %80 {strides = array<i32>} : memref<256x128xf32, #tpu.memory_space<vmem>>, vector<256x128xf32>,
    %c0_114 = arith.constant 0 : index
    %c0_115 = arith.constant 0 : index
    %82 = vector.load %arg8[%c0_114, %c0_115] : memref<256x128xf32, #tpu.memory_space<vmem>>, vector<256x128xf32>
    %83 = arith.truncf %82 : vector<256x128xf32> to vector<256x128xbf16>
    %c0_116 = arith.constant 0 : index
    %c0_117 = arith.constant 0 : index
    %c0_118 = arith.constant 0 : index
    %84 = vector.load %arg4[%c0_116, %c0_117, %c0_118] : memref<1x256x128xbf16, #tpu.memory_space<vmem>>, vector<1x256x128xbf16>
    %85 = vector.shape_cast %84 : vector<1x256x128xbf16> to vector<256x128xbf16>
    %86 = vector.shape_cast %83 : vector<256x128xbf16> to vector<1x256x128xbf16>
    tpu.vector_store %arg4[%c0_116, %c0_117, %c0_118], %86 {strides = array<i32>} : memref<1x256x128xbf16, #tpu.memory_space<vmem>>, vector<1x256x128xbf16>,
    %cst_119 = arith.constant dense<0.000000e+00> : vector<128xf32>
    %87 = vector.multi_reduction <add>, %82, %cst_119 [0] : vector<256x128xf32> to vector<128xf32>
    %88 = vector.shape_cast %87 : vector<128xf32> to vector<1x128xf32>
    %89 = arith.mulf %82, %82 : vector<256x128xf32>
    %cst_120 = arith.constant dense<0.000000e+00> : vector<128xf32>
    %90 = vector.multi_reduction <add>, %89, %cst_120 [0] : vector<256x128xf32> to vector<128xf32>
    %91 = vector.shape_cast %90 : vector<128xf32> to vector<1x128xf32>
    %92 = vector.shape_cast %88 : vector<1x128xf32> to vector<1x128xf32>
    %93 = vector.broadcast %92 : vector<1x128xf32> to vector<8x128xf32>
    %c0_121 = arith.constant 0 : index
    %c0_122 = arith.constant 0 : index
    %c0_123 = arith.constant 0 : index
    %94 = vector.load %arg5[%c0_121, %c0_122, %c0_123] : memref<1x8x128xf32, #tpu.memory_space<vmem>>, vector<1x8x128xf32>
    %95 = vector.shape_cast %94 : vector<1x8x128xf32> to vector<8x128xf32>
    %96 = vector.shape_cast %93 : vector<8x128xf32> to vector<1x8x128xf32>
    tpu.vector_store %arg5[%c0_121, %c0_122, %c0_123], %96 {strides = array<i32>} : memref<1x8x128xf32, #tpu.memory_space<vmem>>, vector<1x8x128xf32>,
    %97 = vector.shape_cast %91 : vector<1x128xf32> to vector<1x128xf32>
    %98 = vector.broadcast %97 : vector<1x128xf32> to vector<8x128xf32>
    %c0_124 = arith.constant 0 : index
    %c0_125 = arith.constant 0 : index
    %c0_126 = arith.constant 0 : index
    %99 = vector.load %arg6[%c0_124, %c0_125, %c0_126] : memref<1x8x128xf32, #tpu.memory_space<vmem>>, vector<1x8x128xf32>
    %100 = vector.shape_cast %99 : vector<1x8x128xf32> to vector<8x128xf32>
    %101 = vector.shape_cast %98 : vector<8x128xf32> to vector<1x8x128xf32>
    tpu.vector_store %arg6[%c0_124, %c0_125, %c0_126], %101 {strides = array<i32>} : memref<1x8x128xf32, #tpu.memory_space<vmem>>, vector<1x8x128xf32>,
    return
  }
  func.func @transform_0(%arg0: i32) -> (i32, i32, i32, i32) {
    %c0_i32 = arith.constant 0 : i32
    %c0_i32_0 = arith.constant 0 : i32
    %c0_i32_1 = arith.constant 0 : i32
    %c0_i32_2 = arith.constant 0 : i32
    return %arg0, %c0_i32, %c0_i32_0, %c0_i32_1 : i32, i32, i32, i32
  }
  func.func @transform_1(%arg0: i32) -> (i32, i32, i32, i32) {
    %c0_i32 = arith.constant 0 : i32
    %c0_i32_0 = arith.constant 0 : i32
    %c0_i32_1 = arith.constant 0 : i32
    %c0_i32_2 = arith.constant 0 : i32
    return %arg0, %c0_i32, %c0_i32_0, %c0_i32_1 : i32, i32, i32, i32
  }
  func.func @transform_2(%arg0: i32) -> (i32, i32, i32) {
    %c0_i32 = arith.constant 0 : i32
    %c0_i32_0 = arith.constant 0 : i32
    %c0_i32_1 = arith.constant 0 : i32
    %c0_i32_2 = arith.constant 0 : i32
    return %c0_i32, %c0_i32_0, %c0_i32_1 : i32, i32, i32
  }
  func.func @transform_3(%arg0: i32) -> (i32, i32, i32) {
    %c0_i32 = arith.constant 0 : i32
    %c0_i32_0 = arith.constant 0 : i32
    %c0_i32_1 = arith.constant 0 : i32
    return %arg0, %c0_i32, %c0_i32_0 : i32, i32, i32
  }
  func.func @transform_4(%arg0: i32) -> (i32, i32, i32) {
    %c0_i32 = arith.constant 0 : i32
    %c0_i32_0 = arith.constant 0 : i32
    %c0_i32_1 = arith.constant 0 : i32
    return %arg0, %c0_i32, %c0_i32_0 : i32, i32, i32
  }
  func.func @transform_5(%arg0: i32) -> (i32, i32, i32) {
    %c0_i32 = arith.constant 0 : i32
    %c0_i32_0 = arith.constant 0 : i32
    %c0_i32_1 = arith.constant 0 : i32
    return %arg0, %c0_i32, %c0_i32_0 : i32, i32, i32
  }
}

module attributes {stable_mosaic.version = 11 : i64} {
  func.func @_conv2_kernel(%arg0: i32, %arg1: memref<1x256x128xbf16, #tpu.memory_space<vmem>>, %arg2: memref<1x4xf32, #tpu.memory_space<vmem>>, %arg3: memref<1x4xf32, #tpu.memory_space<vmem>>, %arg4: memref<9x4x128xbf16, #tpu.memory_space<vmem>>, %arg5: memref<1x256x128xf32, #tpu.memory_space<vmem>>, %arg6: memref<1x8x128xf32, #tpu.memory_space<vmem>>, %arg7: memref<1x8x128xf32, #tpu.memory_space<vmem>>, %arg8: memref<18x18x4xbf16, #tpu.memory_space<vmem>>, %arg9: memref<256x128xf32, #tpu.memory_space<vmem>>) attributes {dimension_semantics = [#tpu.dimension_semantics<parallel>], iteration_bounds = array<i64: 2>, scalar_prefetch = 0 : i64, scratch_operands = 2 : i64, tpu.core_type = #tpu.core_type<tc>, window_params = [{transform_indices = @transform_0, window_bounds = array<i64: 1, 256, 128>}, {pipeline_mode = #tpu.pipeline_mode<synchronous>, transform_indices = @transform_1, window_bounds = array<i64: 1, 4>}, {pipeline_mode = #tpu.pipeline_mode<synchronous>, transform_indices = @transform_2, window_bounds = array<i64: 1, 4>}, {pipeline_mode = #tpu.pipeline_mode<synchronous>, transform_indices = @transform_3, window_bounds = array<i64: 9, 4, 128>}, {transform_indices = @transform_4, window_bounds = array<i64: 1, 256, 128>}, {transform_indices = @transform_5, window_bounds = array<i64: 1, 8, 128>}, {transform_indices = @transform_6, window_bounds = array<i64: 1, 8, 128>}]} {
    %cst = arith.constant 0.000000e+00 : bf16
    %0 = vector.broadcast %cst : bf16 to vector<1x18x4xbf16>
    %c0 = arith.constant 0 : index
    %c0_0 = arith.constant 0 : index
    %c0_1 = arith.constant 0 : index
    %1 = vector.load %arg8[%c0, %c0_0, %c0_1] : memref<18x18x4xbf16, #tpu.memory_space<vmem>>, vector<1x18x4xbf16>
    tpu.vector_store %arg8[%c0, %c0_0, %c0_1], %0 {strides = array<i32>} : memref<18x18x4xbf16, #tpu.memory_space<vmem>>, vector<1x18x4xbf16>,
    %c17 = arith.constant 17 : index
    %c0_2 = arith.constant 0 : index
    %c0_3 = arith.constant 0 : index
    %2 = vector.load %arg8[%c17, %c0_2, %c0_3] : memref<18x18x4xbf16, #tpu.memory_space<vmem>>, vector<1x18x4xbf16>
    tpu.vector_store %arg8[%c17, %c0_2, %c0_3], %0 {strides = array<i32>} : memref<18x18x4xbf16, #tpu.memory_space<vmem>>, vector<1x18x4xbf16>,
    %cst_4 = arith.constant 0.000000e+00 : bf16
    %3 = vector.broadcast %cst_4 : bf16 to vector<18x1x4xbf16>
    %c0_5 = arith.constant 0 : index
    %c0_6 = arith.constant 0 : index
    %c0_7 = arith.constant 0 : index
    %4 = vector.load %arg8[%c0_5, %c0_6, %c0_7] : memref<18x18x4xbf16, #tpu.memory_space<vmem>>, vector<18x1x4xbf16>
    tpu.vector_store %arg8[%c0_5, %c0_6, %c0_7], %3 {strides = array<i32>} : memref<18x18x4xbf16, #tpu.memory_space<vmem>>, vector<18x1x4xbf16>,
    %c0_8 = arith.constant 0 : index
    %c17_9 = arith.constant 17 : index
    %c0_10 = arith.constant 0 : index
    %5 = vector.load %arg8[%c0_8, %c17_9, %c0_10] : memref<18x18x4xbf16, #tpu.memory_space<vmem>>, vector<18x1x4xbf16>
    tpu.vector_store %arg8[%c0_8, %c17_9, %c0_10], %3 {strides = array<i32>} : memref<18x18x4xbf16, #tpu.memory_space<vmem>>, vector<18x1x4xbf16>,
    %c0_11 = arith.constant 0 : index
    %c0_12 = arith.constant 0 : index
    %c0_13 = arith.constant 0 : index
    %6 = vector.load %arg1[%c0_11, %c0_12, %c0_13] : memref<1x256x128xbf16, #tpu.memory_space<vmem>>, vector<1x256x128xbf16>
    %7 = vector.shape_cast %6 : vector<1x256x128xbf16> to vector<256x128xbf16>
    %8 = vector.extract_strided_slice %7 {offsets = [0, 0], sizes = [256, 4], strides = [1, 1]} : vector<256x128xbf16> to vector<256x4xbf16>
    %9 = arith.extf %8 : vector<256x4xbf16> to vector<256x4xf32>
    %c0_14 = arith.constant 0 : index
    %c0_15 = arith.constant 0 : index
    %10 = vector.load %arg2[%c0_14, %c0_15] : memref<1x4xf32, #tpu.memory_space<vmem>>, vector<1x4xf32>
    %11 = vector.broadcast %10 : vector<1x4xf32> to vector<256x4xf32>
    %12 = arith.mulf %9, %11 : vector<256x4xf32>
    %c0_16 = arith.constant 0 : index
    %c0_17 = arith.constant 0 : index
    %13 = vector.load %arg3[%c0_16, %c0_17] : memref<1x4xf32, #tpu.memory_space<vmem>>, vector<1x4xf32>
    %14 = vector.broadcast %13 : vector<1x4xf32> to vector<256x4xf32>
    %15 = arith.addf %12, %14 : vector<256x4xf32>
    %cst_18 = arith.constant 0.000000e+00 : f32
    %16 = vector.broadcast %cst_18 : f32 to vector<256x4xf32>
    %17 = arith.maximumf %15, %16 : vector<256x4xf32>
    %18 = arith.truncf %17 : vector<256x4xf32> to vector<256x4xbf16>
    %19 = vector.shape_cast %18 : vector<256x4xbf16> to vector<16x16x4xbf16>
    %c1 = arith.constant 1 : index
    %c1_19 = arith.constant 1 : index
    %c0_20 = arith.constant 0 : index
    %20 = vector.load %arg8[%c1, %c1_19, %c0_20] : memref<18x18x4xbf16, #tpu.memory_space<vmem>>, vector<16x16x4xbf16>
    tpu.vector_store %arg8[%c1, %c1_19, %c0_20], %19 {strides = array<i32>} : memref<18x18x4xbf16, #tpu.memory_space<vmem>>, vector<16x16x4xbf16>,
    %c0_21 = arith.constant 0 : index
    %c0_22 = arith.constant 0 : index
    %c0_23 = arith.constant 0 : index
    %21 = vector.load %arg8[%c0_21, %c0_22, %c0_23] : memref<18x18x4xbf16, #tpu.memory_space<vmem>>, vector<16x16x4xbf16>
    %22 = vector.shape_cast %21 : vector<16x16x4xbf16> to vector<256x4xbf16>
    %c0_24 = arith.constant 0 : index
    %c0_25 = arith.constant 0 : index
    %c0_26 = arith.constant 0 : index
    %23 = vector.load %arg4[%c0_24, %c0_25, %c0_26] : memref<9x4x128xbf16, #tpu.memory_space<vmem>>, vector<1x4x128xbf16>
    %24 = vector.shape_cast %23 : vector<1x4x128xbf16> to vector<4x128xbf16>
    %cst_27 = arith.constant dense<0.000000e+00> : vector<256x128xf32>
    %25 = tpu.matmul %22, %24, %cst_27 {dimension_numbers = #tpu.dot_dimension_numbers<[1], [0], [0], [1], [0, 0, 1, 1], [], []>} : vector<256x4xbf16>, vector<4x128xbf16>, vector<256x128xf32> -> vector<256x128xf32>
    %c0_28 = arith.constant 0 : index
    %c0_29 = arith.constant 0 : index
    %26 = vector.load %arg9[%c0_28, %c0_29] : memref<256x128xf32, #tpu.memory_space<vmem>>, vector<256x128xf32>
    tpu.vector_store %arg9[%c0_28, %c0_29], %25 {strides = array<i32>} : memref<256x128xf32, #tpu.memory_space<vmem>>, vector<256x128xf32>,
    %c0_30 = arith.constant 0 : index
    %c1_31 = arith.constant 1 : index
    %c0_32 = arith.constant 0 : index
    %27 = vector.load %arg8[%c0_30, %c1_31, %c0_32] : memref<18x18x4xbf16, #tpu.memory_space<vmem>>, vector<16x16x4xbf16>
    %28 = vector.shape_cast %27 : vector<16x16x4xbf16> to vector<256x4xbf16>
    %c1_33 = arith.constant 1 : index
    %c0_34 = arith.constant 0 : index
    %c0_35 = arith.constant 0 : index
    %29 = vector.load %arg4[%c1_33, %c0_34, %c0_35] : memref<9x4x128xbf16, #tpu.memory_space<vmem>>, vector<1x4x128xbf16>
    %30 = vector.shape_cast %29 : vector<1x4x128xbf16> to vector<4x128xbf16>
    %cst_36 = arith.constant dense<0.000000e+00> : vector<256x128xf32>
    %31 = tpu.matmul %28, %30, %cst_36 {dimension_numbers = #tpu.dot_dimension_numbers<[1], [0], [0], [1], [0, 0, 1, 1], [], []>} : vector<256x4xbf16>, vector<4x128xbf16>, vector<256x128xf32> -> vector<256x128xf32>
    %c0_37 = arith.constant 0 : index
    %c0_38 = arith.constant 0 : index
    %32 = vector.load %arg9[%c0_37, %c0_38] : memref<256x128xf32, #tpu.memory_space<vmem>>, vector<256x128xf32>
    %33 = arith.addf %32, %31 : vector<256x128xf32>
    %c0_39 = arith.constant 0 : index
    %c0_40 = arith.constant 0 : index
    %34 = vector.load %arg9[%c0_39, %c0_40] : memref<256x128xf32, #tpu.memory_space<vmem>>, vector<256x128xf32>
    tpu.vector_store %arg9[%c0_39, %c0_40], %33 {strides = array<i32>} : memref<256x128xf32, #tpu.memory_space<vmem>>, vector<256x128xf32>,
    %c0_41 = arith.constant 0 : index
    %c2 = arith.constant 2 : index
    %c0_42 = arith.constant 0 : index
    %35 = vector.load %arg8[%c0_41, %c2, %c0_42] : memref<18x18x4xbf16, #tpu.memory_space<vmem>>, vector<16x16x4xbf16>
    %36 = vector.shape_cast %35 : vector<16x16x4xbf16> to vector<256x4xbf16>
    %c2_43 = arith.constant 2 : index
    %c0_44 = arith.constant 0 : index
    %c0_45 = arith.constant 0 : index
    %37 = vector.load %arg4[%c2_43, %c0_44, %c0_45] : memref<9x4x128xbf16, #tpu.memory_space<vmem>>, vector<1x4x128xbf16>
    %38 = vector.shape_cast %37 : vector<1x4x128xbf16> to vector<4x128xbf16>
    %cst_46 = arith.constant dense<0.000000e+00> : vector<256x128xf32>
    %39 = tpu.matmul %36, %38, %cst_46 {dimension_numbers = #tpu.dot_dimension_numbers<[1], [0], [0], [1], [0, 0, 1, 1], [], []>} : vector<256x4xbf16>, vector<4x128xbf16>, vector<256x128xf32> -> vector<256x128xf32>
    %c0_47 = arith.constant 0 : index
    %c0_48 = arith.constant 0 : index
    %40 = vector.load %arg9[%c0_47, %c0_48] : memref<256x128xf32, #tpu.memory_space<vmem>>, vector<256x128xf32>
    %41 = arith.addf %40, %39 : vector<256x128xf32>
    %c0_49 = arith.constant 0 : index
    %c0_50 = arith.constant 0 : index
    %42 = vector.load %arg9[%c0_49, %c0_50] : memref<256x128xf32, #tpu.memory_space<vmem>>, vector<256x128xf32>
    tpu.vector_store %arg9[%c0_49, %c0_50], %41 {strides = array<i32>} : memref<256x128xf32, #tpu.memory_space<vmem>>, vector<256x128xf32>,
    %c1_51 = arith.constant 1 : index
    %c0_52 = arith.constant 0 : index
    %c0_53 = arith.constant 0 : index
    %43 = vector.load %arg8[%c1_51, %c0_52, %c0_53] : memref<18x18x4xbf16, #tpu.memory_space<vmem>>, vector<16x16x4xbf16>
    %44 = vector.shape_cast %43 : vector<16x16x4xbf16> to vector<256x4xbf16>
    %c3 = arith.constant 3 : index
    %c0_54 = arith.constant 0 : index
    %c0_55 = arith.constant 0 : index
    %45 = vector.load %arg4[%c3, %c0_54, %c0_55] : memref<9x4x128xbf16, #tpu.memory_space<vmem>>, vector<1x4x128xbf16>
    %46 = vector.shape_cast %45 : vector<1x4x128xbf16> to vector<4x128xbf16>
    %cst_56 = arith.constant dense<0.000000e+00> : vector<256x128xf32>
    %47 = tpu.matmul %44, %46, %cst_56 {dimension_numbers = #tpu.dot_dimension_numbers<[1], [0], [0], [1], [0, 0, 1, 1], [], []>} : vector<256x4xbf16>, vector<4x128xbf16>, vector<256x128xf32> -> vector<256x128xf32>
    %c0_57 = arith.constant 0 : index
    %c0_58 = arith.constant 0 : index
    %48 = vector.load %arg9[%c0_57, %c0_58] : memref<256x128xf32, #tpu.memory_space<vmem>>, vector<256x128xf32>
    %49 = arith.addf %48, %47 : vector<256x128xf32>
    %c0_59 = arith.constant 0 : index
    %c0_60 = arith.constant 0 : index
    %50 = vector.load %arg9[%c0_59, %c0_60] : memref<256x128xf32, #tpu.memory_space<vmem>>, vector<256x128xf32>
    tpu.vector_store %arg9[%c0_59, %c0_60], %49 {strides = array<i32>} : memref<256x128xf32, #tpu.memory_space<vmem>>, vector<256x128xf32>,
    %c1_61 = arith.constant 1 : index
    %c1_62 = arith.constant 1 : index
    %c0_63 = arith.constant 0 : index
    %51 = vector.load %arg8[%c1_61, %c1_62, %c0_63] : memref<18x18x4xbf16, #tpu.memory_space<vmem>>, vector<16x16x4xbf16>
    %52 = vector.shape_cast %51 : vector<16x16x4xbf16> to vector<256x4xbf16>
    %c4 = arith.constant 4 : index
    %c0_64 = arith.constant 0 : index
    %c0_65 = arith.constant 0 : index
    %53 = vector.load %arg4[%c4, %c0_64, %c0_65] : memref<9x4x128xbf16, #tpu.memory_space<vmem>>, vector<1x4x128xbf16>
    %54 = vector.shape_cast %53 : vector<1x4x128xbf16> to vector<4x128xbf16>
    %cst_66 = arith.constant dense<0.000000e+00> : vector<256x128xf32>
    %55 = tpu.matmul %52, %54, %cst_66 {dimension_numbers = #tpu.dot_dimension_numbers<[1], [0], [0], [1], [0, 0, 1, 1], [], []>} : vector<256x4xbf16>, vector<4x128xbf16>, vector<256x128xf32> -> vector<256x128xf32>
    %c0_67 = arith.constant 0 : index
    %c0_68 = arith.constant 0 : index
    %56 = vector.load %arg9[%c0_67, %c0_68] : memref<256x128xf32, #tpu.memory_space<vmem>>, vector<256x128xf32>
    %57 = arith.addf %56, %55 : vector<256x128xf32>
    %c0_69 = arith.constant 0 : index
    %c0_70 = arith.constant 0 : index
    %58 = vector.load %arg9[%c0_69, %c0_70] : memref<256x128xf32, #tpu.memory_space<vmem>>, vector<256x128xf32>
    tpu.vector_store %arg9[%c0_69, %c0_70], %57 {strides = array<i32>} : memref<256x128xf32, #tpu.memory_space<vmem>>, vector<256x128xf32>,
    %c1_71 = arith.constant 1 : index
    %c2_72 = arith.constant 2 : index
    %c0_73 = arith.constant 0 : index
    %59 = vector.load %arg8[%c1_71, %c2_72, %c0_73] : memref<18x18x4xbf16, #tpu.memory_space<vmem>>, vector<16x16x4xbf16>
    %60 = vector.shape_cast %59 : vector<16x16x4xbf16> to vector<256x4xbf16>
    %c5 = arith.constant 5 : index
    %c0_74 = arith.constant 0 : index
    %c0_75 = arith.constant 0 : index
    %61 = vector.load %arg4[%c5, %c0_74, %c0_75] : memref<9x4x128xbf16, #tpu.memory_space<vmem>>, vector<1x4x128xbf16>
    %62 = vector.shape_cast %61 : vector<1x4x128xbf16> to vector<4x128xbf16>
    %cst_76 = arith.constant dense<0.000000e+00> : vector<256x128xf32>
    %63 = tpu.matmul %60, %62, %cst_76 {dimension_numbers = #tpu.dot_dimension_numbers<[1], [0], [0], [1], [0, 0, 1, 1], [], []>} : vector<256x4xbf16>, vector<4x128xbf16>, vector<256x128xf32> -> vector<256x128xf32>
    %c0_77 = arith.constant 0 : index
    %c0_78 = arith.constant 0 : index
    %64 = vector.load %arg9[%c0_77, %c0_78] : memref<256x128xf32, #tpu.memory_space<vmem>>, vector<256x128xf32>
    %65 = arith.addf %64, %63 : vector<256x128xf32>
    %c0_79 = arith.constant 0 : index
    %c0_80 = arith.constant 0 : index
    %66 = vector.load %arg9[%c0_79, %c0_80] : memref<256x128xf32, #tpu.memory_space<vmem>>, vector<256x128xf32>
    tpu.vector_store %arg9[%c0_79, %c0_80], %65 {strides = array<i32>} : memref<256x128xf32, #tpu.memory_space<vmem>>, vector<256x128xf32>,
    %c2_81 = arith.constant 2 : index
    %c0_82 = arith.constant 0 : index
    %c0_83 = arith.constant 0 : index
    %67 = vector.load %arg8[%c2_81, %c0_82, %c0_83] : memref<18x18x4xbf16, #tpu.memory_space<vmem>>, vector<16x16x4xbf16>
    %68 = vector.shape_cast %67 : vector<16x16x4xbf16> to vector<256x4xbf16>
    %c6 = arith.constant 6 : index
    %c0_84 = arith.constant 0 : index
    %c0_85 = arith.constant 0 : index
    %69 = vector.load %arg4[%c6, %c0_84, %c0_85] : memref<9x4x128xbf16, #tpu.memory_space<vmem>>, vector<1x4x128xbf16>
    %70 = vector.shape_cast %69 : vector<1x4x128xbf16> to vector<4x128xbf16>
    %cst_86 = arith.constant dense<0.000000e+00> : vector<256x128xf32>
    %71 = tpu.matmul %68, %70, %cst_86 {dimension_numbers = #tpu.dot_dimension_numbers<[1], [0], [0], [1], [0, 0, 1, 1], [], []>} : vector<256x4xbf16>, vector<4x128xbf16>, vector<256x128xf32> -> vector<256x128xf32>
    %c0_87 = arith.constant 0 : index
    %c0_88 = arith.constant 0 : index
    %72 = vector.load %arg9[%c0_87, %c0_88] : memref<256x128xf32, #tpu.memory_space<vmem>>, vector<256x128xf32>
    %73 = arith.addf %72, %71 : vector<256x128xf32>
    %c0_89 = arith.constant 0 : index
    %c0_90 = arith.constant 0 : index
    %74 = vector.load %arg9[%c0_89, %c0_90] : memref<256x128xf32, #tpu.memory_space<vmem>>, vector<256x128xf32>
    tpu.vector_store %arg9[%c0_89, %c0_90], %73 {strides = array<i32>} : memref<256x128xf32, #tpu.memory_space<vmem>>, vector<256x128xf32>,
    %c2_91 = arith.constant 2 : index
    %c1_92 = arith.constant 1 : index
    %c0_93 = arith.constant 0 : index
    %75 = vector.load %arg8[%c2_91, %c1_92, %c0_93] : memref<18x18x4xbf16, #tpu.memory_space<vmem>>, vector<16x16x4xbf16>
    %76 = vector.shape_cast %75 : vector<16x16x4xbf16> to vector<256x4xbf16>
    %c7 = arith.constant 7 : index
    %c0_94 = arith.constant 0 : index
    %c0_95 = arith.constant 0 : index
    %77 = vector.load %arg4[%c7, %c0_94, %c0_95] : memref<9x4x128xbf16, #tpu.memory_space<vmem>>, vector<1x4x128xbf16>
    %78 = vector.shape_cast %77 : vector<1x4x128xbf16> to vector<4x128xbf16>
    %cst_96 = arith.constant dense<0.000000e+00> : vector<256x128xf32>
    %79 = tpu.matmul %76, %78, %cst_96 {dimension_numbers = #tpu.dot_dimension_numbers<[1], [0], [0], [1], [0, 0, 1, 1], [], []>} : vector<256x4xbf16>, vector<4x128xbf16>, vector<256x128xf32> -> vector<256x128xf32>
    %c0_97 = arith.constant 0 : index
    %c0_98 = arith.constant 0 : index
    %80 = vector.load %arg9[%c0_97, %c0_98] : memref<256x128xf32, #tpu.memory_space<vmem>>, vector<256x128xf32>
    %81 = arith.addf %80, %79 : vector<256x128xf32>
    %c0_99 = arith.constant 0 : index
    %c0_100 = arith.constant 0 : index
    %82 = vector.load %arg9[%c0_99, %c0_100] : memref<256x128xf32, #tpu.memory_space<vmem>>, vector<256x128xf32>
    tpu.vector_store %arg9[%c0_99, %c0_100], %81 {strides = array<i32>} : memref<256x128xf32, #tpu.memory_space<vmem>>, vector<256x128xf32>,
    %c2_101 = arith.constant 2 : index
    %c2_102 = arith.constant 2 : index
    %c0_103 = arith.constant 0 : index
    %83 = vector.load %arg8[%c2_101, %c2_102, %c0_103] : memref<18x18x4xbf16, #tpu.memory_space<vmem>>, vector<16x16x4xbf16>
    %84 = vector.shape_cast %83 : vector<16x16x4xbf16> to vector<256x4xbf16>
    %c8 = arith.constant 8 : index
    %c0_104 = arith.constant 0 : index
    %c0_105 = arith.constant 0 : index
    %85 = vector.load %arg4[%c8, %c0_104, %c0_105] : memref<9x4x128xbf16, #tpu.memory_space<vmem>>, vector<1x4x128xbf16>
    %86 = vector.shape_cast %85 : vector<1x4x128xbf16> to vector<4x128xbf16>
    %cst_106 = arith.constant dense<0.000000e+00> : vector<256x128xf32>
    %87 = tpu.matmul %84, %86, %cst_106 {dimension_numbers = #tpu.dot_dimension_numbers<[1], [0], [0], [1], [0, 0, 1, 1], [], []>} : vector<256x4xbf16>, vector<4x128xbf16>, vector<256x128xf32> -> vector<256x128xf32>
    %c0_107 = arith.constant 0 : index
    %c0_108 = arith.constant 0 : index
    %88 = vector.load %arg9[%c0_107, %c0_108] : memref<256x128xf32, #tpu.memory_space<vmem>>, vector<256x128xf32>
    %89 = arith.addf %88, %87 : vector<256x128xf32>
    %c0_109 = arith.constant 0 : index
    %c0_110 = arith.constant 0 : index
    %90 = vector.load %arg9[%c0_109, %c0_110] : memref<256x128xf32, #tpu.memory_space<vmem>>, vector<256x128xf32>
    tpu.vector_store %arg9[%c0_109, %c0_110], %89 {strides = array<i32>} : memref<256x128xf32, #tpu.memory_space<vmem>>, vector<256x128xf32>,
    %c0_111 = arith.constant 0 : index
    %c0_112 = arith.constant 0 : index
    %91 = vector.load %arg9[%c0_111, %c0_112] : memref<256x128xf32, #tpu.memory_space<vmem>>, vector<256x128xf32>
    %c0_113 = arith.constant 0 : index
    %c0_114 = arith.constant 0 : index
    %c0_115 = arith.constant 0 : index
    %92 = vector.load %arg5[%c0_113, %c0_114, %c0_115] : memref<1x256x128xf32, #tpu.memory_space<vmem>>, vector<1x256x128xf32>
    %93 = vector.shape_cast %92 : vector<1x256x128xf32> to vector<256x128xf32>
    %94 = vector.shape_cast %91 : vector<256x128xf32> to vector<1x256x128xf32>
    tpu.vector_store %arg5[%c0_113, %c0_114, %c0_115], %94 {strides = array<i32>} : memref<1x256x128xf32, #tpu.memory_space<vmem>>, vector<1x256x128xf32>,
    %cst_116 = arith.constant dense<0.000000e+00> : vector<128xf32>
    %95 = vector.multi_reduction <add>, %91, %cst_116 [0] : vector<256x128xf32> to vector<128xf32>
    %96 = vector.shape_cast %95 : vector<128xf32> to vector<1x128xf32>
    %97 = arith.mulf %91, %91 : vector<256x128xf32>
    %cst_117 = arith.constant dense<0.000000e+00> : vector<128xf32>
    %98 = vector.multi_reduction <add>, %97, %cst_117 [0] : vector<256x128xf32> to vector<128xf32>
    %99 = vector.shape_cast %98 : vector<128xf32> to vector<1x128xf32>
    %100 = vector.shape_cast %96 : vector<1x128xf32> to vector<1x128xf32>
    %101 = vector.broadcast %100 : vector<1x128xf32> to vector<8x128xf32>
    %c0_118 = arith.constant 0 : index
    %c0_119 = arith.constant 0 : index
    %c0_120 = arith.constant 0 : index
    %102 = vector.load %arg6[%c0_118, %c0_119, %c0_120] : memref<1x8x128xf32, #tpu.memory_space<vmem>>, vector<1x8x128xf32>
    %103 = vector.shape_cast %102 : vector<1x8x128xf32> to vector<8x128xf32>
    %104 = vector.shape_cast %101 : vector<8x128xf32> to vector<1x8x128xf32>
    tpu.vector_store %arg6[%c0_118, %c0_119, %c0_120], %104 {strides = array<i32>} : memref<1x8x128xf32, #tpu.memory_space<vmem>>, vector<1x8x128xf32>,
    %105 = vector.shape_cast %99 : vector<1x128xf32> to vector<1x128xf32>
    %106 = vector.broadcast %105 : vector<1x128xf32> to vector<8x128xf32>
    %c0_121 = arith.constant 0 : index
    %c0_122 = arith.constant 0 : index
    %c0_123 = arith.constant 0 : index
    %107 = vector.load %arg7[%c0_121, %c0_122, %c0_123] : memref<1x8x128xf32, #tpu.memory_space<vmem>>, vector<1x8x128xf32>
    %108 = vector.shape_cast %107 : vector<1x8x128xf32> to vector<8x128xf32>
    %109 = vector.shape_cast %106 : vector<8x128xf32> to vector<1x8x128xf32>
    tpu.vector_store %arg7[%c0_121, %c0_122, %c0_123], %109 {strides = array<i32>} : memref<1x8x128xf32, #tpu.memory_space<vmem>>, vector<1x8x128xf32>,
    return
  }
  func.func @transform_0(%arg0: i32) -> (i32, i32, i32) {
    %c0_i32 = arith.constant 0 : i32
    %c0_i32_0 = arith.constant 0 : i32
    %c0_i32_1 = arith.constant 0 : i32
    return %arg0, %c0_i32, %c0_i32_0 : i32, i32, i32
  }
  func.func @transform_1(%arg0: i32) -> (i32, i32) {
    %c0_i32 = arith.constant 0 : i32
    %c0_i32_0 = arith.constant 0 : i32
    %c0_i32_1 = arith.constant 0 : i32
    return %c0_i32, %c0_i32_0 : i32, i32
  }
  func.func @transform_2(%arg0: i32) -> (i32, i32) {
    %c0_i32 = arith.constant 0 : i32
    %c0_i32_0 = arith.constant 0 : i32
    %c0_i32_1 = arith.constant 0 : i32
    return %c0_i32, %c0_i32_0 : i32, i32
  }
  func.func @transform_3(%arg0: i32) -> (i32, i32, i32) {
    %c0_i32 = arith.constant 0 : i32
    %c0_i32_0 = arith.constant 0 : i32
    %c0_i32_1 = arith.constant 0 : i32
    %c0_i32_2 = arith.constant 0 : i32
    return %c0_i32, %c0_i32_0, %c0_i32_1 : i32, i32, i32
  }
  func.func @transform_4(%arg0: i32) -> (i32, i32, i32) {
    %c0_i32 = arith.constant 0 : i32
    %c0_i32_0 = arith.constant 0 : i32
    %c0_i32_1 = arith.constant 0 : i32
    return %arg0, %c0_i32, %c0_i32_0 : i32, i32, i32
  }
  func.func @transform_5(%arg0: i32) -> (i32, i32, i32) {
    %c0_i32 = arith.constant 0 : i32
    %c0_i32_0 = arith.constant 0 : i32
    %c0_i32_1 = arith.constant 0 : i32
    return %arg0, %c0_i32, %c0_i32_0 : i32, i32, i32
  }
  func.func @transform_6(%arg0: i32) -> (i32, i32, i32) {
    %c0_i32 = arith.constant 0 : i32
    %c0_i32_0 = arith.constant 0 : i32
    %c0_i32_1 = arith.constant 0 : i32
    return %arg0, %c0_i32, %c0_i32_0 : i32, i32, i32
  }
}

module attributes {stable_mosaic.version = 11 : i64} {
  func.func @_bn_relu_kernel(%arg0: i32, %arg1: memref<1x256x128xf32, #tpu.memory_space<vmem>>, %arg2: memref<1x128xf32, #tpu.memory_space<vmem>>, %arg3: memref<1x128xf32, #tpu.memory_space<vmem>>, %arg4: memref<1x256x128xf32, #tpu.memory_space<vmem>>) attributes {dimension_semantics = [#tpu.dimension_semantics<parallel>], iteration_bounds = array<i64: 2>, scalar_prefetch = 0 : i64, scratch_operands = 0 : i64, tpu.core_type = #tpu.core_type<tc>, window_params = [{transform_indices = @transform_0, window_bounds = array<i64: 1, 256, 128>}, {pipeline_mode = #tpu.pipeline_mode<synchronous>, transform_indices = @transform_1, window_bounds = array<i64: 1, 128>}, {pipeline_mode = #tpu.pipeline_mode<synchronous>, transform_indices = @transform_2, window_bounds = array<i64: 1, 128>}, {transform_indices = @transform_3, window_bounds = array<i64: 1, 256, 128>}]} {
    %c0 = arith.constant 0 : index
    %c0_0 = arith.constant 0 : index
    %c0_1 = arith.constant 0 : index
    %0 = vector.load %arg1[%c0, %c0_0, %c0_1] : memref<1x256x128xf32, #tpu.memory_space<vmem>>, vector<1x256x128xf32>
    %1 = vector.shape_cast %0 : vector<1x256x128xf32> to vector<256x128xf32>
    %c0_2 = arith.constant 0 : index
    %c0_3 = arith.constant 0 : index
    %2 = vector.load %arg2[%c0_2, %c0_3] : memref<1x128xf32, #tpu.memory_space<vmem>>, vector<1x128xf32>
    %3 = vector.broadcast %2 : vector<1x128xf32> to vector<256x128xf32>
    %4 = arith.mulf %1, %3 : vector<256x128xf32>
    %c0_4 = arith.constant 0 : index
    %c0_5 = arith.constant 0 : index
    %5 = vector.load %arg3[%c0_4, %c0_5] : memref<1x128xf32, #tpu.memory_space<vmem>>, vector<1x128xf32>
    %6 = vector.broadcast %5 : vector<1x128xf32> to vector<256x128xf32>
    %7 = arith.addf %4, %6 : vector<256x128xf32>
    %cst = arith.constant 0.000000e+00 : f32
    %8 = vector.broadcast %cst : f32 to vector<256x128xf32>
    %9 = arith.maximumf %7, %8 : vector<256x128xf32>
    %c0_6 = arith.constant 0 : index
    %c0_7 = arith.constant 0 : index
    %c0_8 = arith.constant 0 : index
    %10 = vector.load %arg4[%c0_6, %c0_7, %c0_8] : memref<1x256x128xf32, #tpu.memory_space<vmem>>, vector<1x256x128xf32>
    %11 = vector.shape_cast %10 : vector<1x256x128xf32> to vector<256x128xf32>
    %12 = vector.shape_cast %9 : vector<256x128xf32> to vector<1x256x128xf32>
    tpu.vector_store %arg4[%c0_6, %c0_7, %c0_8], %12 {strides = array<i32>} : memref<1x256x128xf32, #tpu.memory_space<vmem>>, vector<1x256x128xf32>,
    return
  }
  func.func @transform_0(%arg0: i32) -> (i32, i32, i32) {
    %c0_i32 = arith.constant 0 : i32
    %c0_i32_0 = arith.constant 0 : i32
    %c0_i32_1 = arith.constant 0 : i32
    return %arg0, %c0_i32, %c0_i32_0 : i32, i32, i32
  }
  func.func @transform_1(%arg0: i32) -> (i32, i32) {
    %c0_i32 = arith.constant 0 : i32
    %c0_i32_0 = arith.constant 0 : i32
    %c0_i32_1 = arith.constant 0 : i32
    return %c0_i32, %c0_i32_0 : i32, i32
  }
  func.func @transform_2(%arg0: i32) -> (i32, i32) {
    %c0_i32 = arith.constant 0 : i32
    %c0_i32_0 = arith.constant 0 : i32
    %c0_i32_1 = arith.constant 0 : i32
    return %c0_i32, %c0_i32_0 : i32, i32
  }
  func.func @transform_3(%arg0: i32) -> (i32, i32, i32) {
    %c0_i32 = arith.constant 0 : i32
    %c0_i32_0 = arith.constant 0 : i32
    %c0_i32_1 = arith.constant 0 : i32
    return %arg0, %c0_i32, %c0_i32_0 : i32, i32, i32
  }
}

</mosaic_0001>

<bundles_post_ra>
// kernel: up_forward.5
= control target key start
LH: loop header
LB: loop body
LE: loop exit
PB: predicated region body
PF: predicated region fallthrough
CT: control target
= control target key end

     0   :  { %s451_s12 = smov 0   ;;  %s610_s0 = inlined_call_operand.vmem [shape: f32[2,256,128], index: 0, kind: input, shape index: {}]   ;;  %s611_s1 = inlined_call_operand.vmem [shape: f32[1,128], index: 1, kind: input, shape index: {}]   ;;  %s612_s2 = inlined_call_operand.vmem [shape: f32[1,128], index: 2, kind: input, shape index: {}]   ;;  %s613_s3 = inlined_call_operand.vmem [shape: f32[2,256,128], index: 3, kind: output, shape index: {}]  }
   0x1 LB: > { %s400_s13 = sadd.s32 4294967295, %s429_s12   ;;  %p404_p0 = scmp.ge.s32.totalorder %s429_s12, 1  ;;  %s429_s12 = sphi %s451_s12, %s13_s12  }
   0x2   : > { %p137_p1 = scmp.lt.s32.totalorder %s429_s12, 3 }
   0x4   : > { %p138_p2 = pnand %p404_p0, %p137_p1 }
   0x5   : > { %p161_p3 = scmp.lt.s32.totalorder (!%p138_p2), %s400_s13, 1 }
   0x6   : > { %141 = sbr.rel (%p138_p2) target bundleno = 44 (0x2c), region = 32 }
   0xb   : > { %s615_s13 = smov (!%p161_p3, %s400_s13), 1  ;;  %v462_v0 = vld [vmem:[%s611_s1] ss:$0 sm:$0xff] }
   0xc   : > { %s413_s14 = sshll.u32 %s615_s13, 8  ;;  %v472_v1 = vld [vmem:[%s612_s2] ss:$0 sm:$0xff] }
   0xd   : > { %s467_s19 = scalar_lea.vmem %s610_s0, %s413_s14  ;;  %s495_s24 = scalar_lea.vmem %s613_s3, %s413_s14 }
   0xe   : > { %v171_v2 = vld [vmem:[%s467_s19] sm:$0xff]  ;;  %v172_v3 = vld [vmem:[%s467_s19 + $0x8] sm:$0xff]  ;;  %v173_v4 = vld [vmem:[%s467_s19 + $0x10] sm:$0xff] }
   0xf   : > { %v210_v5 = vmul.f32 %v462_v0, %v171_v2  ;;  %v211_v6 = vmul.f32 %v462_v0, %v172_v3  ;;  %v212_v7 = vmul.f32 %v462_v0, %v173_v4  ;;  %v174_v8 = vld [vmem:[%s467_s19 + $0x18] sm:$0xff]  ;;  %v175_v9 = vld [vmem:[%s467_s19 + $0x20] sm:$0xff]  ;;  %v176_v10 = vld [vmem:[%s467_s19 + $0x28] sm:$0xff] }
  0x10   : > { %v213_v11 = vmul.f32 %v462_v0, %v174_v8  ;;  %v214_v12 = vmul.f32 %v462_v0, %v175_v9  ;;  %v215_v13 = vmul.f32 %v462_v0, %v176_v10  ;;  %v177_v14 = vld [vmem:[%s467_s19 + $0x30] sm:$0xff]  ;;  %v178_v15 = vld [vmem:[%s467_s19 + $0x38] sm:$0xff]  ;;  %v179_v24 = vld [vmem:[%s467_s19 + $0x40] sm:$0xff] }
  0x11   : > { %v249_v16 = vadd.f32 %v472_v1, %v210_v5  ;;  %v250_v17 = vadd.f32 %v472_v1, %v211_v6  ;;  %v251_v18 = vadd.f32 %v472_v1, %v212_v7  ;;  %v216_v19 = vmul.f32 %v462_v0, %v177_v14  ;;  %v180_v25 = vld [vmem:[%s467_s19 + $0x48] sm:$0xff]  ;;  %v181_v26 = vld [vmem:[%s467_s19 + $0x50] sm:$0xff]  ;;  %v182_v31 = vld [vmem:[%s467_s19 + $0x58] sm:$0xff] }
  0x12   : > { %v252_v20 = vadd.f32 %v472_v1, %v213_v11  ;;  %v253_v21 = vadd.f32 %v472_v1, %v214_v12  ;;  %v254_v22 = vadd.f32 %v472_v1, %v215_v13  ;;  %v217_v23 = vmul.f32 %v462_v0, %v178_v15  ;;  %v183_v32 = vld [vmem:[%s467_s19 + $0x60] sm:$0xff]  ;;  %v184_v33 = vld [vmem:[%s467_s19 + $0x68] sm:$0xff]  ;;  %v185_v38 = vld [vmem:[%s467_s19 + $0x70] sm:$0xff] }
  0x13   : > { %v281_v27 = vmax.f32 %v249_v16, 0.0  ;;  %v282_v28 = vmax.f32 %v250_v17, 0.0  ;;  %v283_v29 = vmax.f32 %v251_v18, 0.0  ;;  %v255_v30 = vadd.f32 %v472_v1, %v216_v19  ;;  %v186_v43 = vld [vmem:[%s467_s19 + $0x78] sm:$0xff]  ;;  %v187_v56 = vld [vmem:[%s467_s19 + $0x80] sm:$0xff]  ;;  %v188_v57 = vld [vmem:[%s467_s19 + $0x88] sm:$0xff] }
  0x14   : > { %v284_v34 = vmax.f32 %v252_v20, 0.0  ;;  %v285_v35 = vmax.f32 %v253_v21, 0.0  ;;  %v286_v36 = vmax.f32 %v254_v22, 0.0  ;;  %v256_v37 = vadd.f32 %v472_v1, %v217_v23  ;;  %v189_v58 = vld [vmem:[%s467_s19 + $0x90] sm:$0xff]  ;;  %v190_v63 = vld [vmem:[%s467_s19 + $0x98] sm:$0xff]  ;;  %v191_v2 = vld [vmem:[%s467_s19 + $0xa0] sm:$0xff] }
  0x15   : > { %313 = vst [vmem:[%s495_s24] sm:$0xff] %v281_v27  ;;  %314 = vst [vmem:[%s495_s24 + $0x8] sm:$0xff] %v282_v28  ;;  %v287_v39 = vmax.f32 %v255_v30, 0.0  ;;  %v218_v40 = vmul.f32 %v462_v0, %v179_v24  ;;  %v219_v41 = vmul.f32 %v462_v0, %v180_v25  ;;  %v220_v42 = vmul.f32 %v462_v0, %v181_v26  ;;  %v192_v3 = vld [vmem:[%s467_s19 + $0xa8] sm:$0xff]  ;;  %v193_v8 = vld [vmem:[%s467_s19 + $0xb0] sm:$0xff] }
  0x16   : > { %315 = vst [vmem:[%s495_s24 + $0x10] sm:$0xff] %v283_v29  ;;  %316 = vst [vmem:[%s495_s24 + $0x18] sm:$0xff] %v284_v34  ;;  %v288_v44 = vmax.f32 %v256_v37, 0.0  ;;  %v221_v45 = vmul.f32 %v462_v0, %v182_v31  ;;  %v222_v46 = vmul.f32 %v462_v0, %v183_v32  ;;  %v223_v47 = vmul.f32 %v462_v0, %v184_v33  ;;  %v194_v13 = vld [vmem:[%s467_s19 + $0xb8] sm:$0xff]  ;;  %v195_v26 = vld [vmem:[%s467_s19 + $0xc0] sm:$0xff] }
  0x17   : > { %317 = vst [vmem:[%s495_s24 + $0x20] sm:$0xff] %v285_v35  ;;  %318 = vst [vmem:[%s495_s24 + $0x28] sm:$0xff] %v286_v36  ;;  %v257_v48 = vadd.f32 %v472_v1, %v218_v40  ;;  %v258_v49 = vadd.f32 %v472_v1, %v219_v41  ;;  %v259_v50 = vadd.f32 %v472_v1, %v220_v42  ;;  %v196_v27 = vld [vmem:[%s467_s19 + $0xc8] sm:$0xff]  ;;  %v197_v28 = vld [vmem:[%s467_s19 + $0xd0] sm:$0xff] }
  0x18   : > { %319 = vst [vmem:[%s495_s24 + $0x30] sm:$0xff] %v287_v39  ;;  %v224_v51 = vmul.f32 %v462_v0, %v185_v38  ;;  %320 = vst [vmem:[%s495_s24 + $0x38] sm:$0xff] %v288_v44  ;;  %v260_v52 = vadd.f32 %v472_v1, %v221_v45  ;;  %v261_v53 = vadd.f32 %v472_v1, %v222_v46  ;;  %v198_v33 = vld [vmem:[%s467_s19 + $0xd8] sm:$0xff]  ;;  %v199_v34 = vld [vmem:[%s467_s19 + $0xe0] sm:$0xff] }
  0x19   : > { %v262_v54 = vadd.f32 %v472_v1, %v223_v47  ;;  %v225_v55 = vmul.f32 %v462_v0, %v186_v43  ;;  %v289_v59 = vmax.f32 %v257_v48, 0.0  ;;  %v290_v60 = vmax.f32 %v258_v49, 0.0  ;;  %v200_v35 = vld [vmem:[%s467_s19 + $0xe8] sm:$0xff]  ;;  %v201_v40 = vld [vmem:[%s467_s19 + $0xf0] sm:$0xff]  ;;  %v202_v45 = vld [vmem:[%s467_s19 + $0xf8] sm:$0xff] }
  0x1a   : > { %v291_v61 = vmax.f32 %v259_v50, 0.0  ;;  %v263_v62 = vadd.f32 %v472_v1, %v224_v51  ;;  %v292_v4 = vmax.f32 %v260_v52, 0.0  ;;  %v293_v5 = vmax.f32 %v261_v53, 0.0 }
  0x1b   : > { %v294_v6 = vmax.f32 %v262_v54, 0.0  ;;  %v264_v7 = vadd.f32 %v472_v1, %v225_v55  ;;  %321 = vst [vmem:[%s495_s24 + $0x40] sm:$0xff] %v289_v59  ;;  %322 = vst [vmem:[%s495_s24 + $0x48] sm:$0xff] %v290_v60  ;;  %v226_v10 = vmul.f32 %v462_v0, %v187_v56  ;;  %v227_v11 = vmul.f32 %v462_v0, %v188_v57 }
  0x1c   : > { %323 = vst [vmem:[%s495_s24 + $0x50] sm:$0xff] %v291_v61  ;;  %v295_v9 = vmax.f32 %v263_v62, 0.0  ;;  %v228_v12 = vmul.f32 %v462_v0, %v189_v58  ;;  %324 = vst [vmem:[%s495_s24 + $0x58] sm:$0xff] %v292_v4  ;;  %v229_v15 = vmul.f32 %v462_v0, %v190_v63  ;;  %v230_v16 = vmul.f32 %v462_v0, %v191_v2 }
  0x1d   : > { %325 = vst [vmem:[%s495_s24 + $0x60] sm:$0xff] %v293_v5  ;;  %326 = vst [vmem:[%s495_s24 + $0x68] sm:$0xff] %v294_v6  ;;  %v296_v14 = vmax.f32 %v264_v7, 0.0  ;;  %v231_v17 = vmul.f32 %v462_v0, %v192_v3  ;;  %v265_v18 = vadd.f32 %v472_v1, %v226_v10  ;;  %v266_v19 = vadd.f32 %v472_v1, %v227_v11 }
  0x1e   : > { %327 = vst [vmem:[%s495_s24 + $0x70] sm:$0xff] %v295_v9  ;;  %v267_v20 = vadd.f32 %v472_v1, %v228_v12  ;;  %v232_v21 = vmul.f32 %v462_v0, %v193_v8  ;;  %v268_v22 = vadd.f32 %v472_v1, %v229_v15  ;;  %v269_v23 = vadd.f32 %v472_v1, %v230_v16 }
  0x1f   : > { %328 = vst [vmem:[%s495_s24 + $0x78] sm:$0xff] %v296_v14  ;;  %v270_v24 = vadd.f32 %v472_v1, %v231_v17  ;;  %v233_v25 = vmul.f32 %v462_v0, %v194_v13  ;;  %v297_v29 = vmax.f32 %v265_v18, 0.0  ;;  %v298_v30 = vmax.f32 %v266_v19, 0.0 }
  0x20   : > { %v299_v31 = vmax.f32 %v267_v20, 0.0  ;;  %v271_v32 = vadd.f32 %v472_v1, %v232_v21  ;;  %v300_v36 = vmax.f32 %v268_v22, 0.0  ;;  %v301_v37 = vmax.f32 %v269_v23, 0.0 }
  0x21   : > { %v302_v38 = vmax.f32 %v270_v24, 0.0  ;;  %v272_v39 = vadd.f32 %v472_v1, %v233_v25  ;;  %329 = vst [vmem:[%s495_s24 + $0x80] sm:$0xff] %v297_v29  ;;  %330 = vst [vmem:[%s495_s24 + $0x88] sm:$0xff] %v298_v30  ;;  %v234_v42 = vmul.f32 %v462_v0, %v195_v26  ;;  %v235_v43 = vmul.f32 %v462_v0, %v196_v27 }
  0x22   : > { %331 = vst [vmem:[%s495_s24 + $0x90] sm:$0xff] %v299_v31  ;;  %v303_v41 = vmax.f32 %v271_v32, 0.0  ;;  %v236_v44 = vmul.f32 %v462_v0, %v197_v28  ;;  %332 = vst [vmem:[%s495_s24 + $0x98] sm:$0xff] %v300_v36  ;;  %v237_v47 = vmul.f32 %v462_v0, %v198_v33  ;;  %v238_v48 = vmul.f32 %v462_v0, %v199_v34 }
  0x23   : > { %333 = vst [vmem:[%s495_s24 + $0xa0] sm:$0xff] %v301_v37  ;;  %334 = vst [vmem:[%s495_s24 + $0xa8] sm:$0xff] %v302_v38  ;;  %v304_v46 = vmax.f32 %v272_v39, 0.0  ;;  %v239_v49 = vmul.f32 %v462_v0, %v200_v35  ;;  %v273_v50 = vadd.f32 %v472_v1, %v234_v42  ;;  %v274_v51 = vadd.f32 %v472_v1, %v235_v43 }
  0x24   : > { %335 = vst [vmem:[%s495_s24 + $0xb0] sm:$0xff] %v303_v41  ;;  %v275_v52 = vadd.f32 %v472_v1, %v236_v44  ;;  %v240_v53 = vmul.f32 %v462_v0, %v201_v40  ;;  %v276_v54 = vadd.f32 %v472_v1, %v237_v47  ;;  %v277_v55 = vadd.f32 %v472_v1, %v238_v48 }
  0x25   : > { %336 = vst [vmem:[%s495_s24 + $0xb8] sm:$0xff] %v304_v46  ;;  %v278_v56 = vadd.f32 %v472_v1, %v239_v49  ;;  %v241_v57 = vmul.f32 %v462_v0, %v202_v45  ;;  %v305_v58 = vmax.f32 %v273_v50, 0.0  ;;  %v306_v59 = vmax.f32 %v274_v51, 0.0 }
  0x26   : > { %v307_v60 = vmax.f32 %v275_v52, 0.0  ;;  %v279_v61 = vadd.f32 %v472_v1, %v240_v53  ;;  %v308_v62 = vmax.f32 %v276_v54, 0.0  ;;  %v309_v63 = vmax.f32 %v277_v55, 0.0 }
  0x27   : > { %v310_v2 = vmax.f32 %v278_v56, 0.0  ;;  %v280_v3 = vadd.f32 %v472_v1, %v241_v57  ;;  %337 = vst [vmem:[%s495_s24 + $0xc0] sm:$0xff] %v305_v58  ;;  %338 = vst [vmem:[%s495_s24 + $0xc8] sm:$0xff] %v306_v59 }
  0x28   : > { %339 = vst [vmem:[%s495_s24 + $0xd0] sm:$0xff] %v307_v60  ;;  %v311_v4 = vmax.f32 %v279_v61, 0.0  ;;  %340 = vst [vmem:[%s495_s24 + $0xd8] sm:$0xff] %v308_v62 }
  0x29   : > { %341 = vst [vmem:[%s495_s24 + $0xe0] sm:$0xff] %v309_v63  ;;  %342 = vst [vmem:[%s495_s24 + $0xe8] sm:$0xff] %v310_v2  ;;  %v312_v0 = vmax.f32 %v280_v3, 0.0 }
  0x2a   : > { %343 = vst [vmem:[%s495_s24 + $0xf0] sm:$0xff] %v311_v4 }
  0x2b   : > { %344 = vst [vmem:[%s495_s24 + $0xf8] sm:$0xff] %v312_v0 }
  0x2c PF: > { %s13_s12 = sadd.s32 1, %s429_s12  }
  0x2d   : > { %p10_p4 = scmp.ge.s32.totalorder %s13_s12, 4  }
  0x2f   :  { %12 = sbr.rel (!%p10_p4) target bundleno = 1 (0x1), region = 62 }

// kernel: up_forward.3
= control target key start
LH: loop header
LB: loop body
LE: loop exit
PB: predicated region body
PF: predicated region fallthrough
CT: control target
= control target key end

     0   :  { %s8223_s18 = smov 0   ;;  %s10835_s0 = inlined_call_operand.vmem [shape: bf16[2,16,16,4], index: 0, kind: input, shape index: {}]   ;;  %s10836_s1 = inlined_call_operand.vmem [shape: bf16[2,16,16,4], index: 1, kind: input, shape index: {}]   ;;  %s10837_s2 = inlined_call_operand.vmem [shape: bf16[9,8,128], index: 2, kind: input, shape index: {}]   ;;  %s10838_s3 = inlined_call_operand.vmem [shape: bf16[2,256,128], index: 3, kind: output, shape index: {0}]   ;;  %s10839_s4 = inlined_call_operand.vmem [shape: f32[2,8,128], index: 4, kind: output, shape index: {1}]   ;;  %s10840_s5 = inlined_call_operand.vmem [shape: f32[2,8,128], index: 5, kind: output, shape index: {2}]  }
   0x1 LB: > { %s7133_s19 = sadd.s32 4294967295, %s8189_s18   ;;  %p7137_p0 = scmp.ge.s32.totalorder %s8189_s18, 1  ;;  %s8189_s18 = sphi %s8223_s18, %s16_s18  }
   0x2   : > { %p202_p1 = scmp.lt.s32.totalorder %s8189_s18, 3 }
   0x4   : > { %p203_p2 = pnand %p7137_p0, %p202_p1 }
   0x6   : > { %206 = sbr.rel (%p203_p2) target bundleno = 712 (0x2c8), region = 32 }
   0xb   : > { %p243_p3 = scmp.lt.s32.totalorder %s7133_s19, 1  ;;  %vm277_vm0 = vsmask.f32 256  ;;  %vm270_vm1 = vcmask 57344   ;;  %v306_v0 = vld [vmem:[#allocation2 + $0x6c] sm:$0x1] }
   0xc   : > { %vm8235_vm2 = vmand %vm270_vm1, %vm277_vm0  ;;  %v10864_v1 = vmov 0  ;;  %v303_v2 = vld [vmem:[#allocation2 + $0x60] sm:$0x1]  ;;  %v282_v3 = vld [vmem:[#allocation2 + $0xc] sm:$0x1]  ;;  %vm267_vm3 = vcmask 60416  }
   0xd   : > { %s11018_s19 = smov (!%p243_p3, %s7133_s19), 1  ;;  %v10865_v1 = vsel %vm8235_vm2, 4294967295, %v10864_v1  ;;  %v307_v4 = vsel %vm8235_vm2, 0, %v306_v0  ;;  %v304_v5 = vsel %vm8235_vm2, 0, %v303_v2  ;;  %v283_v6 = vsel %vm8235_vm2, 0, %v282_v3  ;;  %s8192_s24 = smov 4  }
   0xe   : > { %10866 = vst [vmem:[#allocation4_spill] sm:$0xff] %v10865_v1  ;;  %v309_v7 = vld [vmem:[#allocation2 + $0x78] sm:$0x1]  ;;  %s8246_s20 = sshll.u32 %s11018_s19, 7  ;;  %308 = vst [vmem:[#allocation2 + $0x6c] sm:$0x1] %v307_v4 }
   0xf   : > { %305 = vst [vmem:[#allocation2 + $0x60] sm:$0x1] %v304_v5  ;;  %284 = vst [vmem:[#allocation2 + $0xc] sm:$0x1] %v283_v6  ;;  %v310_v8 = vsel %vm8235_vm2, 0, %v309_v7  ;;  %s8254_s23 = scalar_lea.vmem %s10836_s1, %s8246_s20  ;;  %v8191_v16 = vmov 0   ;;  %s8400_s27 = scalar_lea.vmem %s10835_s0, %s8246_s20 }
  0x10   : > { %v285_v9 = vld [vmem:[#allocation2 + $0x18] sm:$0x1]  ;;  %v312_v10 = vld [vmem:[#allocation2 + $0x84] sm:$0x1]  ;;  %vm421_vm4 = vsmask.f32 4368  ;;  %s10757_s26 = scalar_lea.vmem %s10838_s3, %s8246_s20 }
  0x11   : > { %311 = vst [vmem:[#allocation2 + $0x78] sm:$0x1] %v310_v8  ;;  %v286_v11 = vsel %vm8235_vm2, 0, %v285_v9  ;;  %v313_v12 = vsel %vm8235_vm2, 0, %v312_v10  ;;  %v877_v13 = vld [vmem:[%s8254_s23 + $0x40] sm:$0xf]  ;;  %vm8280_vm5 = vmor %vm277_vm0, %vm421_vm4 }
  0x12   : > { %v875_v14 = vld [vmem:[%s8254_s23 + $0x38] sm:$0xf]  ;;  %v878_v15 = vld [vmem:[%s8254_s23 + $0x44] sm:$0xf]  ;;  %287 = vst [vmem:[#allocation2 + $0x18] sm:$0x1] %v286_v11 }
  0x13   : > { %314 = vst [vmem:[#allocation2 + $0x84] sm:$0x1] %v313_v12  ;;  %268 = vst.msk [vmem:[#allocation2] sm:$0xf] %vm267_vm3, %v8191_v16  ;;  %v1030_v17 = vshrl.u32 %v877_v13, 16  ;;  %v1033_v18 = vshll.u32 %v877_v13, 16 }
  0x14   : > { %269 = vst.msk [vmem:[#allocation2 + $0x4] sm:$0xf] %vm267_vm3, %v8191_v16  ;;  %273 = vst.msk [vmem:[#allocation2 + $0xcc] sm:$0xf] %vm267_vm3, %v8191_v16  ;;  %v1013_v19 = vshrl.u32 %v875_v14, 16  ;;  %v1016_v20 = vshll.u32 %v875_v14, 16 }
  0x15   : > { %271 = vst.msk [vmem:[#allocation2 + $0x8] sm:$0x1] %vm270_vm1, %v8191_v16  ;;  %275 = vst.msk [vmem:[#allocation2 + $0xd4] sm:$0x1] %vm270_vm1, %v8191_v16  ;;  %v861_v21 = vld [vmem:[%s8254_s23] sm:$0xf] }
  0x16   : > { %274 = vst.msk [vmem:[#allocation2 + $0xd0] sm:$0xf] %vm267_vm3, %v8191_v16  ;;  %v1038_v22 = vshrl.u32 %v878_v15, 16  ;;  %v1041_v23 = vshll.u32 %v878_v15, 16  ;;  %v894_v24 = vshrl.u32 %v861_v21, 16  ;;  %v897_v25 = vshll.u32 %v861_v21, 16 }
  0x17   : > { %v862_v26 = vld [vmem:[%s8254_s23 + $0x4] sm:$0xf]  ;;  %v1032_v27 = vrot.slane %v1030_v17, 7  ;;  %v8271_v28 = vrot.slane %v1013_v19, 7  ;;  %v879_v30 = vld [vmem:[%s8254_s23 + $0x48] sm:$0xf] }
  0x18   : > { %v902_v29 = vshrl.u32 %v862_v26, 16  ;;  %v8274_v31 = vrot.slane %v1038_v22, 7  ;;  %v896_v32 = vrot.slane %v894_v24, 7  ;;  %v905_v33 = vshll.u32 %v862_v26, 16  ;;  %v880_v35 = vld [vmem:[%s8254_s23 + $0x4c] sm:$0xf] }
  0x19   : > { %v1047_v34 = vshrl.u32 %v879_v30, 16  ;;  %v1035_v36 = vor.u32 %v1033_v18, %v1032_v27  ;;  %v1036_v37 = vrot.slane %v1032_v27, 4  ;;  %v1018_v38 = vor.u32 %v1016_v20, %v8271_v28  ;;  %v876_v40 = vld [vmem:[%s8254_s23 + $0x3c] sm:$0xf]  ;;  %v863_v45 = vld [vmem:[%s8254_s23 + $0x8] sm:$0xf] }
  0x1a   : > { %v10867_v39 = vmov 0  ;;  %v1043_v41 = vor.u32 %v1041_v23, %v8274_v31  ;;  %v899_v42 = vor.u32 %v897_v25, %v896_v32  ;;  %v8286_v43 = vrot.slane %v902_v29, 7  ;;  %v881_v54 = vld [vmem:[%s8254_s23 + $0x50] sm:$0xf]  ;;  %v864_v55 = vld [vmem:[%s8254_s23 + $0xc] sm:$0xf] }
  0x1b   : > { %v10868_v39 = vsel %vm8280_vm5, 4294967295, %v10867_v39  ;;  %v1050_v44 = vshll.u32 %v879_v30, 16  ;;  %1213 = vrot.lane.b32.xlu1 %v1035_v36, %s8192_s24  ;;  %1207 = vrot.lane.b32.xlu0 %v1018_v38, %s8192_s24  ;;  %v900_v46 = vrot.slane %v896_v32, 4  ;;  %v1049_v47 = vrot.slane %v1047_v34, 7  ;;  %v882_v59 = vld [vmem:[%s8254_s23 + $0x54] sm:$0xf] }
  0x1c   : > { %10869 = vst [vmem:[#allocation5_spill] sm:$0xff] %v10868_v39  ;;  %v1055_v48 = vshrl.u32 %v880_v35, 16  ;;  %v1021_v49 = vshrl.u32 %v876_v40, 16  ;;  %v1044_v50 = vsel %vm8280_vm5, %v1036_v37, %v1043_v41  ;;  %v907_v51 = vor.u32 %v905_v33, %v8286_v43  ;;  %v865_v0 = vld [vmem:[%s8254_s23 + $0x10] sm:$0xf]  ;;  %s7144_s20 = sshll.u32 %s11018_s19, 3 }
  0x1d   : > { %v1058_v52 = vshll.u32 %v880_v35, 16  ;;  %v1024_v53 = vshll.u32 %v876_v40, 16  ;;  %v911_v58 = vshrl.u32 %v863_v45, 16  ;;  %v1019_v60 = vrot.slane %v8271_v28, 4  ;;  %v866_v6 = vld [vmem:[%s8254_s23 + $0x14] sm:$0xf]  ;;  %s261_s29 = scalar_lea.vmem %s10839_s4, %s7144_s20  ;;  %s265_s7 = scalar_lea.vmem %s10840_s5, %s7144_s20 }
  0x1e   : > { %v8296_v56 = vrot.slane %v1055_v48, 7  ;;  %v8298_v57 = vrot.slane %v1021_v49, 7  ;;  %v1052_v61 = vor.u32 %v1050_v44, %v1049_v47  ;;  %v1064_v62 = vshrl.u32 %v881_v54, 16  ;;  %v883_v7 = vld [vmem:[%s8254_s23 + $0x58] sm:$0xf] }
  0x1f   : > { %1215 = vrot.lane.b32.xlu1 %v1044_v50, %s8192_s24  ;;  %1165 = vrot.lane.b32.xlu0 %v899_v42, %s8192_s24  ;;  %v919_v63 = vshrl.u32 %v864_v55, 16  ;;  %v908_v2 = vsel %vm8280_vm5, %v900_v46, %v907_v51  ;;  %v1053_v3 = vrot.slane %v1049_v47, 4  ;;  %v913_v8 = vrot.slane %v911_v58, 7  ;;  %v884_v11 = vld [vmem:[%s8254_s23 + $0x5c] sm:$0xf] }
  0x20   : > { %v1060_v4 = vor.u32 %v1058_v52, %v8296_v56  ;;  %v1026_v5 = vor.u32 %v1024_v53, %v8298_v57  ;;  %v914_v9 = vshll.u32 %v863_v45, 16  ;;  %v1072_v10 = vshrl.u32 %v882_v59, 16  ;;  %v867_v30 = vld [vmem:[%s8254_s23 + $0x18] sm:$0xf]  ;;  %v8330_v36 = vld [vmem:[%s8254_s23 + $0x60] sm:$0xf] }
  0x21   : > { %v1067_v12 = vshll.u32 %v881_v54, 16  ;;  %v8312_v13 = vrot.slane %v919_v63, 7  ;;  %v922_v14 = vshll.u32 %v864_v55, 16  ;;  %v928_v15 = vshrl.u32 %v865_v0, 16  ;;  %v868_v37 = vld [vmem:[%s8254_s23 + $0x1c] sm:$0xf] }
  0x22   : > { %v1066_v16 = vrot.slane %v1064_v62, 7  ;;  %v8316_v17 = vrot.slane %v1072_v10, 7  ;;  %v1075_v18 = vshll.u32 %v882_v59, 16  ;;  %v936_v19 = vshrl.u32 %v866_v6, 16  ;;  %v886_v42 = vld [vmem:[%s8254_s23 + $0x64] sm:$0xf] }
  0x23   : > { %1167 = vrot.lane.b32.xlu1 %v908_v2, %s8192_s24  ;;  %1219 = vrot.lane.b32.xlu0 %v1052_v61, %s8192_s24  ;;  %v1061_v20 = vsel %vm8280_vm5, %v1053_v3, %v1060_v4  ;;  %v1027_v21 = vsel %vm8280_vm5, %v1019_v60, %v1026_v5  ;;  %v1081_v22 = vshrl.u32 %v883_v7, 16  ;;  %v1089_v23 = vshrl.u32 %v884_v11, 16  ;;  %v8338_v48 = vld [vmem:[%s8254_s23 + $0x20] sm:$0xf]  ;;  %v870_v51 = vld [vmem:[%s8254_s23 + $0x24] sm:$0xf] }
  0x24   : > { %v930_v24 = vrot.slane %v928_v15, 7  ;;  %v8322_v25 = vrot.slane %v936_v19, 7  ;;  %v939_v26 = vshll.u32 %v866_v6, 16  ;;  %v916_v27 = vor.u32 %v914_v9, %v913_v8  ;;  %v8349_v58 = vld [vmem:[%s8254_s23 + $0x68] sm:$0xf] }
  0x25   : > { %v917_v28 = vrot.slane %v913_v8, 4  ;;  %v924_v29 = vor.u32 %v922_v14, %v8312_v13  ;;  %v1069_v32 = vor.u32 %v1067_v12, %v1066_v16  ;;  %v1070_v33 = vrot.slane %v1066_v16, 4  ;;  %v888_v59 = vld [vmem:[%s8254_s23 + $0x6c] sm:$0xf]  ;;  %v8359_v9 = vld [vmem:[%s8254_s23 + $0x28] sm:$0xf] }
  0x26   : > { %v1077_v34 = vor.u32 %v1075_v18, %v8316_v17  ;;  %v931_v35 = vshll.u32 %v865_v0, 16  ;;  %v1083_v38 = vrot.slane %v1081_v22, 7  ;;  %v8333_v40 = vrot.slane %v1089_v23, 7  ;;  %v889_v15 = vld [vmem:[%s8254_s23 + $0x70] sm:$0xf] }
  0x27   : > { %1221 = vrot.lane.b32.xlu1 %v1061_v20, %s8192_s24  ;;  %1209 = vrot.lane.b32.xlu0 %v1027_v21, %s8192_s24  ;;  %v1092_v41 = vshll.u32 %v884_v11, 16  ;;  %v934_v44 = vrot.slane %v930_v24, 4  ;;  %v941_v45 = vor.u32 %v939_v26, %v8322_v25  ;;  %v1084_v46 = vshll.u32 %v883_v7, 16  ;;  %v872_v21 = vld [vmem:[%s8254_s23 + $0x2c] sm:$0xf] }
  0x28   : > { %v945_v47 = vshrl.u32 %v867_v30, 16  ;;  %v925_v49 = vsel %vm8280_vm5, %v917_v28, %v924_v29  ;;  %v1098_v50 = vshrl.u32 %v8330_v36, 16  ;;  %v1078_v52 = vsel %vm8280_vm5, %v1070_v33, %v1077_v34 }
  0x29   : > { %v933_v53 = vor.u32 %v931_v35, %v930_v24  ;;  %v953_v54 = vshrl.u32 %v868_v37, 16  ;;  %v1106_v55 = vshrl.u32 %v886_v42, 16  ;;  %v1087_v60 = vrot.slane %v1083_v38, 4 }
  0x2a   : > { %v1094_v61 = vor.u32 %v1092_v41, %v8333_v40  ;;  %v948_v62 = vshll.u32 %v867_v30, 16  ;;  %v962_v63 = vshrl.u32 %v8338_v48, 16  ;;  %v942_v0 = vsel %vm8280_vm5, %v934_v44, %v941_v45  ;;  %v8385_v44 = vld [vmem:[%s8254_s23 + $0x30] sm:$0xf] }
  0x2b   : > { %1171 = vrot.lane.b32.xlu1 %v916_v27, %s8192_s24  ;;  %1225 = vrot.lane.b32.xlu0 %v1069_v32, %s8192_s24  ;;  %v1086_v2 = vor.u32 %v1084_v46, %v1083_v38  ;;  %v947_v3 = vrot.slane %v945_v47, 7  ;;  %v970_v4 = vshrl.u32 %v870_v51, 16  ;;  %v1100_v5 = vrot.slane %v1098_v50, 7  ;;  %v890_v27 = vld [vmem:[%s8254_s23 + $0x74] sm:$0xf] }
  0x2c   : > { %v1101_v6 = vshll.u32 %v8330_v36, 16  ;;  %v1115_v7 = vshrl.u32 %v8349_v58, 16  ;;  %v1123_v8 = vshrl.u32 %v888_v59, 16  ;;  %v8363_v10 = vrot.slane %v953_v54, 7 }
  0x2d   : > { %v956_v11 = vshll.u32 %v868_v37, 16  ;;  %v8365_v12 = vrot.slane %v1106_v55, 7  ;;  %v1109_v14 = vshll.u32 %v886_v42, 16  ;;  %v1095_v16 = vsel %vm8280_vm5, %v1087_v60, %v1094_v61 }
  0x2e   : > { %v964_v18 = vrot.slane %v962_v63, 7  ;;  %v8370_v19 = vrot.slane %v970_v4, 7  ;;  %v973_v20 = vshll.u32 %v870_v51, 16  ;;  %v950_v22 = vor.u32 %v948_v62, %v947_v3 }
  0x2f   : > { %1173 = vrot.lane.b32.xlu1 %v925_v49, %s8192_s24  ;;  %1227 = vrot.lane.b32.xlu0 %v1078_v52, %s8192_s24  ;;  %v951_v23 = vrot.slane %v947_v3, 4  ;;  %v1104_v24 = vrot.slane %v1100_v5, 4  ;;  %v1117_v26 = vrot.slane %v1115_v7, 7  ;;  %v965_v28 = vshll.u32 %v8338_v48, 16  ;;  %v8389_v49 = vld [vmem:[%s8254_s23 + $0x34] sm:$0xf] }
  0x30   : > { %v8375_v29 = vrot.slane %v1123_v8, 7  ;;  %v1126_v30 = vshll.u32 %v888_v59, 16  ;;  %v979_v32 = vshrl.u32 %v8359_v9, 16  ;;  %v958_v33 = vor.u32 %v956_v11, %v8363_v10  ;;  %v403_v11 = vld [vmem:[%s8400_s27 + $0x38] sm:$0xf] }
  0x31   : > { %v1111_v34 = vor.u32 %v1109_v14, %v8365_v12  ;;  %v1118_v35 = vshll.u32 %v8349_v58, 16  ;;  %v1132_v36 = vshrl.u32 %v889_v15, 16  ;;  %v968_v37 = vrot.slane %v964_v18, 4 }
  0x32   : > { %v975_v38 = vor.u32 %v973_v20, %v8370_v19  ;;  %v987_v41 = vshrl.u32 %v872_v21, 16  ;;  %v1140_v42 = vshrl.u32 %v890_v27, 16  ;;  %v1121_v45 = vrot.slane %v1117_v26, 4  ;;  %v406_v20 = vld [vmem:[%s8400_s27 + $0x44] sm:$0xf] }
  0x33   : > { %1179 = vrot.lane.b32.xlu1 %v942_v0, %s8192_s24  ;;  %1177 = vrot.lane.b32.xlu0 %v933_v53, %s8192_s24  ;;  %v982_v46 = vshll.u32 %v8359_v9, 16  ;;  %v990_v47 = vshll.u32 %v872_v21, 16  ;;  %v1143_v48 = vshll.u32 %v890_v27, 16  ;;  %v1128_v50 = vor.u32 %v1126_v30, %v8375_v29  ;;  %v405_v9 = vld [vmem:[%s8400_s27 + $0x40] sm:$0xf] }
  0x34   : > { %v981_v51 = vrot.slane %v979_v32, 7  ;;  %v8392_v52 = vrot.slane %v987_v41, 7  ;;  %v8394_v53 = vrot.slane %v1140_v42, 7  ;;  %vm333_vm6 = vsmask.f32 7938 }
  0x35   : > { %vm10841_vm7 = vcmask 27648   ;;  %v1103_v54 = vor.u32 %v1101_v6, %v1100_v5  ;;  %v959_v55 = vsel %vm8280_vm5, %v951_v23, %v958_v33  ;;  %v1134_v58 = vrot.slane %v1132_v36, 7  ;;  %v390_v33 = vld [vmem:[%s8400_s27 + $0x4] sm:$0xf]  ;;  %vm8693_vm11 = vmand %vm270_vm1, %vm333_vm6 }
  0x36   : > { %v1135_v59 = vshll.u32 %v889_v15, 16  ;;  %v1112_v60 = vsel %vm8280_vm5, %v1104_v24, %v1111_v34  ;;  %v967_v61 = vor.u32 %v965_v28, %v964_v18  ;;  %v985_v62 = vrot.slane %v981_v51, 4  ;;  %vm8458_vm8 = vmand %vm10841_vm7, %vm333_vm6 }
  0x37   : > { %1233 = vrot.lane.b32.xlu1 %v1095_v16, %s8192_s24  ;;  %1231 = vrot.lane.b32.xlu0 %v1086_v2, %s8192_s24  ;;  %v996_v63 = vshrl.u32 %v8385_v44, 16  ;;  %v992_v0 = vor.u32 %v990_v47, %v8392_v52  ;;  %v1138_v3 = vrot.slane %v1134_v58, 4  ;;  %v1145_v2 = vor.u32 %v1143_v48, %v8394_v53 }
  0x38   : > { %v1004_v4 = vshrl.u32 %v8389_v49, 16  ;;  %v976_v5 = vsel %vm8280_vm5, %v968_v37, %v975_v38  ;;  %v8416_v6 = vsel %vm8280_vm5, %v1121_v45, %v1128_v50  ;;  %v8418_v7 = vor.u32 %v1118_v35, %v1117_v26  ;;  %v389_v26 = vld [vmem:[%s8400_s27] sm:$0xf]  ;;  %v407_v38 = vld [vmem:[%s8400_s27 + $0x48] sm:$0xf] }
  0x39   : > { %v8420_v8 = vor.u32 %v982_v46, %v981_v51  ;;  %v8426_v14 = vor.u32 %v1135_v59, %v1134_v58  ;;  %v909_v15 = vrot.slane %v8286_v43, 4  ;;  %v999_v16 = vshll.u32 %v8385_v44, 16  ;;  %v805_v46 = vld [vmem:[#allocation2 + $0x6c] sm:$0xf]  ;;  %v798_v58 = vld [vmem:[#allocation2 + $0x60] sm:$0xf] }
  0x3a   : > { %v926_v18 = vrot.slane %v8312_v13, 4  ;;  %v8432_v21 = vrot.slane %v996_v63, 7  ;;  %v1007_v23 = vshll.u32 %v8389_v49, 16  ;;  %v960_v24 = vrot.slane %v8363_v10, 4 }
  0x3b   : > { %1183 = vrot.lane.b32.xlu1 %v950_v22, %s8192_s24  ;;  %1237 = vrot.lane.b32.xlu0 %v1103_v54, %s8192_s24  ;;  %v943_v22 = vrot.slane %v8322_v25, 4  ;;  %v8440_v27 = vsel %vm8280_vm5, %v985_v62, %v992_v0  ;;  %v8444_v28 = vsel %vm8280_vm5, %v1138_v3, %v1145_v2  ;;  %v8446_v30 = vrot.slane %v1004_v4, 7  ;;  %v746_v2 = vld [vmem:[#allocation2 + $0xc] sm:$0xf] }
  0x3c   : > { %v994_v32 = vrot.slane %v8392_v52, 4  ;;  %v977_v34 = vrot.slane %v8370_v19, 4  ;;  %v560_v35 = vshrl.u32 %v405_v9, 16  ;;  %v563_v36 = vshll.u32 %v405_v9, 16 }
  0x3d   : > { %v543_v37 = vshrl.u32 %v403_v11, 16  ;;  %v546_v41 = vshll.u32 %v403_v11, 16  ;;  %v568_v42 = vshrl.u32 %v406_v20, 16  ;;  %v571_v44 = vshll.u32 %v406_v20, 16 }
  0x3e   : > { %v424_v45 = vshrl.u32 %v389_v26, 16  ;;  %v562_v47 = vrot.slane %v560_v35, 7  ;;  %v427_v50 = vshll.u32 %v389_v26, 16  ;;  %v432_v51 = vshrl.u32 %v390_v33, 16 }
  0x3f   : > { %1185 = vrot.lane.b32.xlu1 %v959_v55, %s8192_s24  ;;  %1239 = vrot.lane.b32.xlu0 %v1112_v60, %s8192_s24  ;;  %v8454_v48 = vrot.slane %v543_v37, 7  ;;  %v10870_v54 = vmov 0  ;;  %v8462_v55 = vrot.slane %v568_v42, 7  ;;  %v435_v60 = vshll.u32 %v390_v33, 16  ;;  %v408_v33 = vld [vmem:[%s8400_s27 + $0x4c] sm:$0xf] }
  0x40   : > { %v10871_v54 = vsel %vm8458_vm8, 4294967295, %v10870_v54  ;;  %v426_v59 = vrot.slane %v424_v45, 7  ;;  %v577_v62 = vshrl.u32 %v407_v38, 16  ;;  %v565_v63 = vor.u32 %v563_v36, %v562_v47 }
  0x41   : > { %10872 = vst [vmem:[#allocation6_spill] sm:$0xff] %v10871_v54  ;;  %v548_v0 = vor.u32 %v546_v41, %v8454_v48  ;;  %v566_v3 = vrot.slane %v562_v47, 4  ;;  %v8465_v4 = vrot.slane %v432_v51, 7  ;;  %v8470_v9 = vor.u32 %v999_v16, %v8432_v21  ;;  %v404_v16 = vld [vmem:[%s8400_s27 + $0x3c] sm:$0xf] }
  0x42   : > { %v573_v11 = vor.u32 %v571_v44, %v8462_v55  ;;  %v429_v20 = vor.u32 %v427_v50, %v426_v59  ;;  %v430_v26 = vrot.slane %v426_v59, 4  ;;  %v1002_v35 = vrot.slane %v8432_v21, 4  ;;  %v391_v47 = vld [vmem:[%s8400_s27 + $0x8] sm:$0xf] }
  0x43   : > { %1191 = vrot.lane.b32.xlu1 %v976_v5, %s8192_s24  ;;  %1189 = vrot.lane.b32.xlu0 %v967_v61, %s8192_s24  ;;  %v806_v36 = vsel %vm8458_vm8, %v565_v63, %v805_v46  ;;  %v799_v37 = vsel %vm8458_vm8, %v548_v0, %v798_v58  ;;  %v437_v5 = vor.u32 %v435_v60, %v8465_v4  ;;  %v812_v61 = vld [vmem:[#allocation2 + $0x78] sm:$0xf]  ;;  %v579_v44 = vrot.slane %v577_v62, 7  ;;  %v1458_v46 = vld [vmem:[%s10837_s2] sm:$0xf] }
  0x44   : > { %807 = vst [vmem:[#allocation2 + $0x6c] sm:$0xf] %v806_v36  ;;  %800 = vst [vmem:[#allocation2 + $0x60] sm:$0xf] %v799_v37  ;;  %v574_v41 = vsel %vm8280_vm5, %v566_v3, %v573_v11  ;;  %v747_v42 = vsel %vm8458_vm8, %v429_v20, %v746_v2  ;;  %v580_v45 = vshll.u32 %v407_v38, 16  ;;  %v585_v51 = vshrl.u32 %v408_v33, 16 }
  0x45   : > { %808 = vst.msk [vmem:[#allocation2 + $0x70] sm:$0xf] %vm10841_vm7, %v574_v41  ;;  %748 = vst [vmem:[#allocation2 + $0xc] sm:$0xf] %v747_v42  ;;  %v438_v50 = vsel %vm8280_vm5, %v430_v26, %v437_v5  ;;  %v588_v58 = vshll.u32 %v408_v33, 16  ;;  %v549_v59 = vrot.slane %v8454_v48, 4 }
  0x46   : > { %v409_v60 = vld [vmem:[%s8400_s27 + $0x50] sm:$0xf]  ;;  %750 = vst.msk [vmem:[#allocation2 + $0x10] sm:$0xf] %vm10841_vm7, %v438_v50  ;;  %v582_v38 = vor.u32 %v580_v45, %v579_v44  ;;  %v583_v62 = vrot.slane %v579_v44, 4  ;;  %v551_v63 = vshrl.u32 %v404_v16, 16 }
  0x47   : > { %1245 = vrot.lane.b32.xlu1 %v8416_v6, %s8192_s24  ;;  %1243 = vrot.lane.b32.xlu0 %v8418_v7, %s8192_s24  ;;  %v554_v0 = vshll.u32 %v404_v16, 16  ;;  %v279_v3 = vld [vmem:[#allocation2] sm:$0x1]  ;;  %v8499_v2 = vrot.slane %v585_v51, 7  ;;  %vm1588_vm9 = vcmask 1043456   ;;  %v441_v11 = vshrl.u32 %v391_v47, 16 }
  0x48   : > { %v444_v20 = vshll.u32 %v391_v47, 16  ;;  %v8504_v6 = vld [vmem:[%s10837_s2 + $0x4] sm:$0xf]  ;;  %v813_v7 = vsel %vm8458_vm8, %v582_v38, %v812_v61  ;;  %v8508_v48 = vrot.slane %v551_v63, 7  ;;  %8115 = vmatprep.subr.msk.bf16.mxu0 %vm1588_vm9, %v1458_v46  ;;  %v1590_v26 = vsel %vm1588_vm9, %v1458_v46, 0  ;;  %8116 = vmatprep.subr.msk.bf16.mxu1 %vm1588_vm9, %v1458_v46 }
  0x49   : > { %v756_v33 = vld [vmem:[#allocation2 + $0x18] sm:$0xf]  ;;  %v594_v36 = vshrl.u32 %v409_v60, 16  ;;  %v8516_v37 = vld [vmem:[%s10837_s2 + $0x8] sm:$0xf]  ;;  %v1028_v5 = vrot.slane %v8298_v57, 4  ;;  %v590_v61 = vor.u32 %v588_v58, %v8499_v2  ;;  %7808 = vmatpush3.bf16.msra.mxu0 %v1590_v26  ;;  %8114 = vmatpush3.bf16.msra.mxu1 %v1590_v26  ;;  %v1009_v51 = vor.u32 %v1007_v23, %v8446_v30 }
  0x4a   : > { %814 = vst [vmem:[#allocation2 + $0x78] sm:$0xf] %v813_v7  ;;  %v8520_v16 = vrot.slane %v441_v11, 7  ;;  %v597_v41 = vshll.u32 %v409_v60, 16  ;;  %v392_v42 = vld [vmem:[%s8400_s27 + $0xc] sm:$0xf]  ;;  %v556_v45 = vor.u32 %v554_v0, %v8508_v48  ;;  %8117 = vmatprep.subr.msk.bf16.mxu1 %vm1588_vm9, %v8504_v6  ;;  %8118 = vmatprep.subr.msk.bf16.mxu0 %vm1588_vm9, %v8516_v37 }
  0x4b   : > { %1195 = vrot.lane.b32.xlu1 %v8420_v8, %s8192_s24  ;;  %1249 = vrot.lane.b32.xlu0 %v8426_v14, %s8192_s24  ;;  %v1062_v44 = vrot.slane %v8296_v56, 4  ;;  %v596_v46 = vrot.slane %v594_v36, 7  ;;  %v280_v47 = vsel %vm8235_vm2, 0, %v279_v3  ;;  %v410_v50 = vld [vmem:[%s8400_s27 + $0x54] sm:$0xf]  ;;  %v1011_v58 = vrot.slane %v8446_v30, 4 }
  0x4c   : > { %v591_v8 = vsel %vm8280_vm5, %v583_v62, %v590_v61  ;;  %v446_v14 = vor.u32 %v444_v20, %v8520_v16  ;;  %v819_v60 = vld [vmem:[#allocation2 + $0x84] sm:$0xf]  ;;  %281 = vst [vmem:[#allocation2] sm:$0x1] %v280_v47  ;;  %v393_v38 = vld [vmem:[%s8400_s27 + $0x10] sm:$0xf]  ;;  %v557_v49 = vsel %vm8280_vm5, %v549_v59, %v556_v45 }
  0x4d   : > { %815 = vst.msk [vmem:[#allocation2 + $0x7c] sm:$0xf] %vm10841_vm7, %v591_v8  ;;  %v599_v23 = vor.u32 %v597_v41, %v596_v46  ;;  %v449_v63 = vshrl.u32 %v392_v42, 16  ;;  %v452_v62 = vshll.u32 %v392_v42, 16  ;;  %v394_v0 = vld [vmem:[%s8400_s27 + $0x14] sm:$0xf] }
  0x4e   : > { %v288_v3 = vld [vmem:[#allocation2 + $0x24] sm:$0x1]  ;;  %801 = vst.msk [vmem:[#allocation2 + $0x64] sm:$0xf] %vm10841_vm7, %v557_v49  ;;  %v757_v11 = vsel %vm8458_vm8, %v446_v14, %v756_v33  ;;  %v447_v20 = vrot.slane %v8520_v16, 4  ;;  %v602_v7 = vshrl.u32 %v410_v50, 16 }
  0x4f   : > { %v605_v26 = vshll.u32 %v410_v50, 16  ;;  %v8553_v36 = vld [vmem:[%s8400_s27 + $0x58] sm:$0xf]  ;;  %1197 = vrot.lane.b32.xlu1 %v8440_v27, %s8192_s24  ;;  %1251 = vrot.lane.b32.xlu0 %v8444_v28, %s8192_s24  ;;  %758 = vst [vmem:[#allocation2 + $0x18] sm:$0xf] %v757_v11  ;;  %v820_v59 = vsel %vm8458_vm8, %v599_v23, %v819_v60  ;;  %v8561_v61 = vrot.slane %v449_v63, 7 }
  0x50   : > { %v600_v33 = vrot.slane %v596_v46, 4  ;;  %v458_v41 = vshrl.u32 %v393_v38, 16  ;;  %821 = vst [vmem:[#allocation2 + $0x84] sm:$0xf] %v820_v59  ;;  %v8563_v16 = vrot.slane %v602_v7, 7  ;;  %v466_v42 = vshrl.u32 %v394_v0, 16 }
  0x51   : > { %v469_v45 = vshll.u32 %v394_v0, 16  ;;  %v289_v27 = vsel %vm8235_vm2, 0, %v288_v3  ;;  %v412_v47 = vld [vmem:[%s8400_s27 + $0x5c] sm:$0xf]  ;;  %v454_v28 = vor.u32 %v452_v62, %v8561_v61  ;;  %v461_v8 = vshll.u32 %v393_v38, 16 }
  0x52   : > { %v460_v50 = vrot.slane %v458_v41, 7  ;;  %290 = vst [vmem:[#allocation2 + $0x24] sm:$0x1] %v289_v27  ;;  %v611_v14 = vshrl.u32 %v8553_v36, 16  ;;  %v315_v60 = vld [vmem:[#allocation2 + $0x90] sm:$0x1]  ;;  %v607_v46 = vor.u32 %v605_v26, %v8563_v16  ;;  %v1010_v38 = vsel %vm8280_vm5, %v1002_v35, %v1009_v51 }
  0x53   : > { %vm1539_vm10 = vcmask 64512   ;;  %v8571_v49 = vrot.slane %v466_v42, 7  ;;  %v291_v23 = vld [vmem:[#allocation2 + $0x30] sm:$0x1]  ;;  %v395_v63 = vld [vmem:[%s8400_s27 + $0x18] sm:$0xf]  ;;  %1169 = vrot.lane.b32.xlu1 %v909_v15, %s8192_s24  ;;  %1201 = vrot.lane.b32.xlu0 %v8470_v9, %s8192_s24  ;;  %v455_v0 = vsel %vm8280_vm5, %v447_v20, %v454_v28 }
  0x54   : > { %v8135_v62 = vld [vmem:[#allocation2] sm:$0xff]   ;;  %v464_v3 = vrot.slane %v460_v50, 4  ;;  %v613_v11 = vrot.slane %v611_v14, 7  ;;  %759 = vst.msk [vmem:[#allocation2 + $0x1c] sm:$0xf] %vm10841_vm7, %v455_v0  ;;  %v608_v43 = vsel %vm8280_vm5, %v600_v33, %v607_v46  ;;  %v614_v9 = vshll.u32 %v8553_v36, 16 }
  0x55   : > { %v471_v15 = vor.u32 %v469_v45, %v8571_v49  ;;  %v619_v21 = vshrl.u32 %v412_v47, 16  ;;  %v318_v7 = vld [vmem:[#allocation2 + $0x9c] sm:$0x1]  ;;  %v413_v35 = vld [vmem:[%s8400_s27 + $0x60] sm:$0xf]  ;;  %7809 = vmatprep.mubr.msk.bf16.mxu0 %vm1539_vm10, %v8135_v62  ;;  %v463_v51 = vor.u32 %v461_v8, %v460_v50  ;;  %v622_v26 = vshll.u32 %v412_v47, 16 }
  0x56   : > { %822 = vst.msk [vmem:[#allocation2 + $0x88] sm:$0xf] %vm10841_vm7, %v608_v43  ;;  %v617_v20 = vrot.slane %v613_v11, 4  ;;  %v316_v59 = vsel %vm8235_vm2, 0, %v315_v60  ;;  %v396_v41 = vld [vmem:[%s8400_s27 + $0x1c] sm:$0xf] }
  0x57   : > { %v472_v33 = vsel %vm8280_vm5, %v464_v3, %v471_v15  ;;  %v8598_v42 = vrot.slane %v619_v21, 7  ;;  %317 = vst [vmem:[#allocation2 + $0x90] sm:$0x1] %v316_v59  ;;  %v292_v36 = vsel %vm8235_vm2, 0, %v291_v23  ;;  %v475_v45 = vshrl.u32 %v395_v63, 16  ;;  %1175 = vrot.lane.b32.xlu1 %v926_v18, %s8192_s24  ;;  %1203 = vrot.lane.b32.xlu0 %v1010_v38, %s8192_s24 }
  0x58   : > { %v414_v27 = vld [vmem:[%s8400_s27 + $0x64] sm:$0xf]  ;;  %v1045_v47 = vrot.slane %v8274_v31, 4  ;;  %766 = vst.msk [vmem:[#allocation2 + $0x28] sm:$0xf] %vm10841_vm7, %v472_v33  ;;  %v478_v28 = vshll.u32 %v395_v63, 16  ;;  %v616_v63 = vor.u32 %v614_v9, %v613_v11 }
  0x59   : > { %293 = vst [vmem:[#allocation2 + $0x30] sm:$0x1] %v292_v36  ;;  %v319_v50 = vsel %vm8235_vm2, 0, %v318_v7  ;;  %v628_v8 = vshrl.u32 %v413_v35, 16  ;;  %v763_v14 = vld [vmem:[#allocation2 + $0x24] sm:$0xf]  ;;  %v624_v60 = vor.u32 %v622_v26, %v8598_v42 }
  0x5a   : > { %v477_v46 = vrot.slane %v475_v45, 7  ;;  %320 = vst [vmem:[#allocation2 + $0x9c] sm:$0x1] %v319_v50  ;;  %v631_v13 = vshll.u32 %v413_v35, 16  ;;  %v483_v18 = vshrl.u32 %v396_v41, 16  ;;  %v764_v23 = vsel %vm8458_vm8, %v463_v51, %v763_v14 }
  0x5b   : > { %v630_v38 = vrot.slane %v628_v8, 7  ;;  %v486_v62 = vshll.u32 %v396_v41, 16  ;;  %v636_v0 = vshrl.u32 %v414_v27, 16  ;;  %v8615_v3 = vld [vmem:[%s8400_s27 + $0x20] sm:$0xf]  ;;  %v625_v43 = vsel %vm8280_vm5, %v617_v20, %v624_v60  ;;  %1187 = vrot.lane.b32.xlu1 %v960_v24, %s8192_s24  ;;  %1181 = vrot.lane.b32.xlu0 %v943_v22, %s8192_s24 }
  0x5c   : > { %765 = vst [vmem:[#allocation2 + $0x24] sm:$0xf] %v764_v23  ;;  %v481_v15 = vrot.slane %v477_v46, 4  ;;  %v8619_v21 = vrot.slane %v483_v18, 7  ;;  %v398_v7 = vld [vmem:[%s8400_s27 + $0x24] sm:$0xf]  ;;  %v480_v35 = vor.u32 %v478_v28, %v477_v46 }
  0x5d   : > { %829 = vst.msk [vmem:[#allocation2 + $0x94] sm:$0xf] %vm10841_vm7, %v625_v43  ;;  %v634_v11 = vrot.slane %v630_v38, 4  ;;  %v8629_v9 = vrot.slane %v636_v0, 7  ;;  %v639_v51 = vshll.u32 %v414_v27, 16  ;;  %v1096_v26 = vrot.slane %v8333_v40, 4 }
  0x5e   : > { %v294_v20 = vld [vmem:[#allocation2 + $0x3c] sm:$0x1]  ;;  %v633_v59 = vor.u32 %v631_v13, %v630_v38  ;;  %v488_v41 = vor.u32 %v486_v62, %v8619_v21  ;;  %v492_v10 = vshrl.u32 %v8615_v3, 16  ;;  %v8635_v24 = vld [vmem:[%s8400_s27 + $0x68] sm:$0xf]  ;;  %v495_v33 = vshll.u32 %v8615_v3, 16 }
  0x5f   : > { %v826_v25 = vld [vmem:[#allocation2 + $0x90] sm:$0xf]  ;;  %v641_v22 = vor.u32 %v639_v51, %v8629_v9  ;;  %v500_v36 = vshrl.u32 %v398_v7, 16  ;;  %v503_v45 = vshll.u32 %v398_v7, 16  ;;  %v295_v14 = vsel %vm8235_vm2, 0, %v294_v20  ;;  %1199 = vrot.lane.b32.xlu1 %v994_v32, %s8192_s24  ;;  %1193 = vrot.lane.b32.xlu0 %v977_v34, %s8192_s24 }
  0x60   : > { %v827_v27 = vsel %vm8458_vm8, %v616_v63, %v826_v25  ;;  %v770_v28 = vld [vmem:[#allocation2 + $0x30] sm:$0xf]  ;;  %v489_v50 = vsel %vm8280_vm5, %v481_v15, %v488_v41  ;;  %v494_v8 = vrot.slane %v492_v10, 7  ;;  %v416_v60 = vld [vmem:[%s8400_s27 + $0x6c] sm:$0xf]  ;;  %v645_v52 = vshrl.u32 %v8635_v24, 16 }
  0x61   : > { %828 = vst [vmem:[#allocation2 + $0x90] sm:$0xf] %v827_v27  ;;  %v771_v46 = vsel %vm8458_vm8, %v480_v35, %v770_v28  ;;  %v833_v13 = vld [vmem:[#allocation2 + $0x9c] sm:$0xf]  ;;  %773 = vst.msk [vmem:[#allocation2 + $0x34] sm:$0xf] %vm10841_vm7, %v489_v50  ;;  %v642_v18 = vsel %vm8280_vm5, %v634_v11, %v641_v22 }
  0x62   : > { %v8657_v23 = vrot.slane %v500_v36, 7  ;;  %296 = vst [vmem:[#allocation2 + $0x3c] sm:$0x1] %v295_v14  ;;  %v321_v32 = vld [vmem:[#allocation2 + $0xa8] sm:$0x1]  ;;  %v1079_v19 = vrot.slane %v8316_v17, 4  ;;  %v834_v38 = vsel %vm8458_vm8, %v633_v59, %v833_v13  ;;  %v497_v41 = vor.u32 %v495_v33, %v494_v8 }
  0x63   : > { %v1130_v34 = vrot.slane %v8375_v29, 4  ;;  %772 = vst [vmem:[#allocation2 + $0x30] sm:$0xf] %v771_v46  ;;  %836 = vst.msk [vmem:[#allocation2 + $0xa0] sm:$0xf] %vm10841_vm7, %v642_v18  ;;  %v498_v62 = vrot.slane %v494_v8, 4  ;;  %1211 = vrot.lane.b32.xlu1 %v1028_v5, %s8192_s24  ;;  %1205 = vrot.lane.b32.xlu0 %v1011_v58, %s8192_s24 }
  0x64   : > { %v297_v0 = vld [vmem:[#allocation2 + $0x48] sm:$0x1]  ;;  %835 = vst [vmem:[#allocation2 + $0x9c] sm:$0xf] %v834_v38  ;;  %v505_v3 = vor.u32 %v503_v45, %v8657_v23  ;;  %v647_v63 = vrot.slane %v645_v52, 7  ;;  %v653_v43 = vshrl.u32 %v416_v60, 16 }
  0x65   : > { %v399_v15 = vld [vmem:[%s8400_s27 + $0x28] sm:$0xf]  ;;  %v324_v7 = vld [vmem:[#allocation2 + $0xb4] sm:$0x1]  ;;  %v1113_v35 = vrot.slane %v8365_v12, 4  ;;  %v648_v11 = vshll.u32 %v8635_v24, 16 }
  0x66   : > { %v656_v51 = vshll.u32 %v416_v60, 16  ;;  %v322_v20 = vsel %vm8235_vm2, 0, %v321_v32  ;;  %v417_v59 = vld [vmem:[%s8400_s27 + $0x70] sm:$0xf]  ;;  %v506_v10 = vsel %vm8280_vm5, %v498_v62, %v505_v3  ;;  %v651_v25 = vrot.slane %v647_v63, 4 }
  0x67   : > { %v8680_v24 = vrot.slane %v653_v43, 7  ;;  %323 = vst [vmem:[#allocation2 + $0xa8] sm:$0x1] %v322_v20  ;;  %v400_v22 = vld [vmem:[%s8400_s27 + $0x2c] sm:$0xf]  ;;  %v1147_v36 = vrot.slane %v8394_v53, 4  ;;  %v650_v14 = vor.u32 %v648_v11, %v647_v63  ;;  %1223 = vrot.lane.b32.xlu1 %v1062_v44, %s8192_s24  ;;  %1217 = vrot.lane.b32.xlu0 %v1045_v47, %s8192_s24 }
  0x68   : > { %780 = vst.msk [vmem:[#allocation2 + $0x40] sm:$0xf] %vm10841_vm7, %v506_v10  ;;  %v298_v57 = vsel %vm8235_vm2, 0, %v297_v0  ;;  %v509_v5 = vshrl.u32 %v399_v15, 16  ;;  %v325_v30 = vsel %vm8235_vm2, 0, %v324_v7  ;;  %v512_v33 = vshll.u32 %v399_v15, 16 }
  0x69   : > { %v658_v58 = vor.u32 %v656_v51, %v8680_v24  ;;  %299 = vst [vmem:[#allocation2 + $0x48] sm:$0x1] %v298_v57  ;;  %326 = vst [vmem:[#allocation2 + $0xb4] sm:$0x1] %v325_v30  ;;  %v662_v45 = vshrl.u32 %v417_v59, 16  ;;  %v665_v27 = vshll.u32 %v417_v59, 16 }
  0x6a   : > { %v418_v28 = vld [vmem:[%s8400_s27 + $0x74] sm:$0xf]  ;;  %v10873_v50 = vmov 0  ;;  %v777_v8 = vld [vmem:[#allocation2 + $0x3c] sm:$0xf]  ;;  %v511_v60 = vrot.slane %v509_v5, 7 }
  0x6b   : > { %v10874_v50 = vsel %vm8693_vm11, 4294967295, %v10873_v50  ;;  %v517_v46 = vshrl.u32 %v400_v22, 16  ;;  %v338_v13 = vld [vmem:[#allocation2 + $0x14] sm:$0x1]  ;;  %v778_v18 = vsel %vm8458_vm8, %v497_v41, %v777_v8  ;;  %v659_v52 = vsel %vm8280_vm5, %v651_v25, %v658_v58  ;;  %v401_v47 = vld [vmem:[%s8400_s27 + $0x30] sm:$0xf]  ;;  %1235 = vrot.lane.b32.xlu1 %v1096_v26, %s8192_s24  ;;  %1229 = vrot.lane.b32.xlu0 %v1079_v19, %s8192_s24 }
  0x6c   : > { %10875 = vst [vmem:[#allocation7_spill] sm:$0xff] %v10874_v50  ;;  %v664_v32 = vrot.slane %v662_v45, 7  ;;  %v520_v38 = vshll.u32 %v400_v22, 16  ;;  %v300_v62 = vld [vmem:[#allocation2 + $0x54] sm:$0x1]  ;;  %v439_v0 = vrot.slane %v8465_v4, 4  ;;  %v514_v3 = vor.u32 %v512_v33, %v511_v60 }
  0x6d   : > { %779 = vst [vmem:[#allocation2 + $0x3c] sm:$0xf] %v778_v18  ;;  %843 = vst.msk [vmem:[#allocation2 + $0xac] sm:$0xf] %vm10841_vm7, %v659_v52  ;;  %v515_v56 = vrot.slane %v511_v60, 4  ;;  %v8709_v44 = vrot.slane %v517_v46, 7 }
  0x6e   : > { %v670_v31 = vshrl.u32 %v418_v28, 16  ;;  %v667_v63 = vor.u32 %v665_v27, %v664_v32  ;;  %v673_v43 = vshll.u32 %v418_v28, 16  ;;  %v339_v15 = vsel %vm8693_vm11, 0, %v338_v13  ;;  %v891_v7 = vld [vmem:[%s8254_s23 + $0x78] sm:$0xf] }
  0x6f   : > { %v341_v11 = vld [vmem:[#allocation2 + $0x20] sm:$0x1]  ;;  %v840_v51 = vld [vmem:[#allocation2 + $0xa8] sm:$0xf]  ;;  %v522_v20 = vor.u32 %v520_v38, %v8709_v44  ;;  %v668_v59 = vrot.slane %v664_v32, 4  ;;  %v301_v22 = vsel %vm8235_vm2, 0, %v300_v62  ;;  %1247 = vrot.lane.b32.xlu1 %v1130_v34, %s8192_s24  ;;  %1241 = vrot.lane.b32.xlu0 %v1113_v35, %s8192_s24 }
  0x70   : > { %v8716_v41 = vrot.slane %v670_v31, 7  ;;  %340 = vst [vmem:[#allocation2 + $0x14] sm:$0x1] %v339_v15  ;;  %v402_v10 = vld [vmem:[%s8400_s27 + $0x34] sm:$0xf]  ;;  %v841_v25 = vsel %vm8458_vm8, %v650_v14, %v840_v51  ;;  %v526_v57 = vshrl.u32 %v401_v47, 16 }
  0x71   : > { %v892_v5 = vld [vmem:[%s8254_s23 + $0x7c] sm:$0xf]  ;;  %v347_v30 = vld [vmem:[#allocation2 + $0x38] sm:$0x1]  ;;  %842 = vst [vmem:[#allocation2 + $0xa8] sm:$0xf] %v841_v25  ;;  %v523_v40 = vsel %vm8280_vm5, %v515_v56, %v522_v20 }
  0x72   : > { %v784_v58 = vld [vmem:[#allocation2 + $0x48] sm:$0xf]  ;;  %v847_v33 = vld [vmem:[#allocation2 + $0xb4] sm:$0xf]  ;;  %v675_v26 = vor.u32 %v673_v43, %v8716_v41  ;;  %vm751_vm12 = vcmask 24576   ;;  %v529_v17 = vshll.u32 %v401_v47, 16 }
  0x73   : > { %302 = vst [vmem:[#allocation2 + $0x54] sm:$0x1] %v301_v22  ;;  %v785_v19 = vsel %vm8458_vm8, %v514_v3, %v784_v58  ;;  %v848_v45 = vsel %vm8458_vm8, %v667_v63, %v847_v33  ;;  %787 = vst.msk [vmem:[#allocation2 + $0x4c] sm:$0xf] %vm10841_vm7, %v523_v40  ;;  %v528_v27 = vrot.slane %v526_v57, 7  ;;  %v1149_v28 = vshrl.u32 %v891_v7, 16  ;;  %1253 = vrot.lane.b32.xlu0 %v1147_v36, %s8192_s24 }
  0x74   : > { %v344_v8 = vld [vmem:[#allocation2 + $0x2c] sm:$0x1]  ;;  %v353_v14 = vld [vmem:[#allocation2 + $0x50] sm:$0x1]  ;;  %786 = vst [vmem:[#allocation2 + $0x48] sm:$0xf] %v785_v19  ;;  %v676_v60 = vsel %vm8280_vm5, %v668_v59, %v675_v26  ;;  %vm8751_vm13 = vmand %vm751_vm12, %vm277_vm0 }
  0x75   : > { %849 = vst [vmem:[#allocation2 + $0xb4] sm:$0xf] %v848_v45  ;;  %v1152_v46 = vshll.u32 %v891_v7, 16  ;;  %v342_v13 = vsel %vm8693_vm11, 0, %v341_v11  ;;  %v534_v18 = vshrl.u32 %v402_v10, 16  ;;  %v10876_v52 = vmov 0 }
  0x76   : > { %850 = vst.msk [vmem:[#allocation2 + $0xb8] sm:$0xf] %vm10841_vm7, %v676_v60  ;;  %v10877_v52 = vsel %vm8751_vm13, 4294967295, %v10876_v52  ;;  %v531_v32 = vor.u32 %v529_v17, %v528_v27  ;;  %v1151_v38 = vrot.slane %v1149_v28, 7  ;;  %343 = vst [vmem:[#allocation2 + $0x20] sm:$0x1] %v342_v13 }
  0x77   : > { %10878 = vst [vmem:[#allocation8_spill] sm:$0xff] %v10877_v52  ;;  %v532_v62 = vrot.slane %v528_v27, 4  ;;  %v537_v56 = vshll.u32 %v402_v10, 16  ;;  %v350_v31 = vld [vmem:[#allocation2 + $0x44] sm:$0x1]  ;;  %v8755_v29 = vrot.slane %v534_v18, 7 }
  0x78   : > { %v1157_v34 = vshrl.u32 %v892_v5, 16  ;;  %v1160_v47 = vshll.u32 %v892_v5, 16  ;;  %v348_v12 = vsel %vm8693_vm11, 0, %v347_v30  ;;  %v359_v35 = vld [vmem:[#allocation2 + $0x68] sm:$0x1]  ;;  %v1154_v63 = vor.u32 %v1152_v46, %v1151_v38 }
  0x79   : > { %v753_v3 = vld [vmem:[#allocation2 + $0x14] sm:$0x1]  ;;  %349 = vst [vmem:[#allocation2 + $0x38] sm:$0x1] %v348_v12  ;;  %v345_v43 = vsel %vm8693_vm11, 0, %v344_v8  ;;  %v354_v15 = vsel %vm8693_vm11, 0, %v353_v14  ;;  %v539_v11 = vor.u32 %v537_v56, %v8755_v29 }
  0x7a   : > { %v754_v7 = vsel %vm8751_vm13, %v439_v0, %v753_v3  ;;  %v1155_v51 = vrot.slane %v1151_v38, 4  ;;  %v1159_v20 = vrot.slane %v1157_v34, 7  ;;  %346 = vst [vmem:[#allocation2 + $0x2c] sm:$0x1] %v345_v43  ;;  %355 = vst [vmem:[#allocation2 + $0x50] sm:$0x1] %v354_v15  ;;  %1255 = vrot.lane.b32.xlu1 %v1154_v63, %s8192_s24 }
  0x7b   : > { %v356_v59 = vld [vmem:[#allocation2 + $0x5c] sm:$0x1]  ;;  %v335_v10 = vld [vmem:[#allocation2 + $0x8] sm:$0x1]  ;;  %v456_v25 = vrot.slane %v8561_v61, 4  ;;  %v490_v22 = vrot.slane %v8619_v21, 4  ;;  %v540_v53 = vsel %vm8280_vm5, %v532_v62, %v539_v11 }
  0x7c   : > { %755 = vst [vmem:[#allocation2 + $0x14] sm:$0x1] %v754_v7  ;;  %v791_v4 = vld [vmem:[#allocation2 + $0x54] sm:$0xf]  ;;  %v351_v0 = vsel %vm8693_vm11, 0, %v350_v31  ;;  %v360_v57 = vsel %vm8693_vm11, 0, %v359_v35  ;;  %v1162_v36 = vor.u32 %v1160_v47, %v1159_v20 }
  0x7d   : > { %v792_v5 = vsel %vm8458_vm8, %v531_v32, %v791_v4  ;;  %v1164_v61 = vrot.slane %v1159_v20, 4  ;;  %352 = vst [vmem:[#allocation2 + $0x44] sm:$0x1] %v351_v0  ;;  %361 = vst [vmem:[#allocation2 + $0x68] sm:$0x1] %v360_v57  ;;  %v357_v21 = vsel %vm8693_vm11, 0, %v356_v59 }
  0x7e   : > { %793 = vst [vmem:[#allocation2 + $0x54] sm:$0xf] %v792_v5  ;;  %794 = vst.msk [vmem:[#allocation2 + $0x58] sm:$0xf] %vm10841_vm7, %v540_v53  ;;  %v336_v30 = vsel %vm8693_vm11, 0, %v335_v10  ;;  %v473_v40 = vrot.slane %v8571_v49, 4  ;;  %v1163_v19 = vsel %vm8280_vm5, %v1155_v51, %v1162_v36 }
  0x7f   : > { %v365_v58 = vld [vmem:[#allocation2 + $0x80] sm:$0x1]  ;;  %v362_v33 = vld [vmem:[#allocation2 + $0x74] sm:$0x1]  ;;  %v524_v26 = vrot.slane %v8709_v44, 4  ;;  %1257 = vrot.lane.b32.xlu0 %v1163_v19, %s8192_s24  ;;  %1259 = vrot.lane.b32.xlu1 %v1164_v61, %s8192_s24  ;;  %v558_v27 = vrot.slane %v8508_v48, 4 }
  0x80   : > { %v760_v17 = vld [vmem:[#allocation2 + $0x20] sm:$0x1]  ;;  %358 = vst [vmem:[#allocation2 + $0x5c] sm:$0x1] %v357_v21  ;;  %337 = vst [vmem:[#allocation2 + $0x8] sm:$0x1] %v336_v30 }
  0x81   : > { %v761_v45 = vsel %vm8751_vm13, %v456_v25, %v760_v17  ;;  %v507_v28 = vrot.slane %v8657_v23, 4  ;;  %v774_v49 = vld [vmem:[#allocation2 + $0x38] sm:$0x1]  ;;  %v366_v44 = vsel %vm8693_vm11, 0, %v365_v58  ;;  %v363_v8 = vsel %vm8693_vm11, 0, %v362_v33 }
  0x82   : > { %762 = vst [vmem:[#allocation2 + $0x20] sm:$0x1] %v761_v45  ;;  %v775_v14 = vsel %vm8751_vm13, %v490_v22, %v774_v49  ;;  %v767_v60 = vld [vmem:[#allocation2 + $0x2c] sm:$0x1]  ;;  %v788_v46 = vld [vmem:[#allocation2 + $0x50] sm:$0x1] }
  0x83   : > { %367 = vst [vmem:[#allocation2 + $0x80] sm:$0x1] %v366_v44  ;;  %364 = vst [vmem:[#allocation2 + $0x74] sm:$0x1] %v363_v8  ;;  %v541_v13 = vrot.slane %v8755_v29, 4  ;;  %v768_v48 = vsel %vm8751_vm13, %v473_v40, %v767_v60  ;;  %v789_v23 = vsel %vm8751_vm13, %v524_v26, %v788_v46  ;;  %v575_v56 = vrot.slane %v8462_v55, 4 }
  0x84   : > { %776 = vst [vmem:[#allocation2 + $0x38] sm:$0x1] %v775_v14  ;;  %769 = vst [vmem:[#allocation2 + $0x2c] sm:$0x1] %v768_v48  ;;  %v781_v18 = vld [vmem:[#allocation2 + $0x44] sm:$0x1] }
  0x85   : > { %790 = vst [vmem:[#allocation2 + $0x50] sm:$0x1] %v789_v23  ;;  %v802_v32 = vld [vmem:[#allocation2 + $0x68] sm:$0x1]  ;;  %v782_v38 = vsel %vm8751_vm13, %v507_v28, %v781_v18  ;;  %v592_v31 = vrot.slane %v8499_v2, 4  ;;  %v626_v10 = vrot.slane %v8598_v42, 4 }
  0x86   : > { %v803_v62 = vsel %vm8751_vm13, %v558_v27, %v802_v32  ;;  %783 = vst [vmem:[#allocation2 + $0x44] sm:$0x1] %v782_v38  ;;  %v371_v34 = vld [vmem:[#allocation2 + $0x98] sm:$0x1]  ;;  %v368_v12 = vld [vmem:[#allocation2 + $0x8c] sm:$0x1] }
  0x87   : > { %804 = vst [vmem:[#allocation2 + $0x68] sm:$0x1] %v803_v62  ;;  %v795_v29 = vld [vmem:[#allocation2 + $0x5c] sm:$0x1]  ;;  %v377_v35 = vld [vmem:[#allocation2 + $0xb0] sm:$0x1] }
  0x88   : > { %v796_v47 = vsel %vm8751_vm13, %v541_v13, %v795_v29  ;;  %v374_v3 = vld [vmem:[#allocation2 + $0xa4] sm:$0x1]  ;;  %v380_v63 = vld [vmem:[#allocation2 + $0xbc] sm:$0x1]  ;;  %v372_v7 = vsel %vm8693_vm11, 0, %v371_v34  ;;  %v369_v11 = vsel %vm8693_vm11, 0, %v368_v12 }
  0x89   : > { %797 = vst [vmem:[#allocation2 + $0x5c] sm:$0x1] %v796_v47  ;;  %373 = vst [vmem:[#allocation2 + $0x98] sm:$0x1] %v372_v7  ;;  %v378_v51 = vsel %vm8693_vm11, 0, %v377_v35  ;;  %v375_v20 = vsel %vm8693_vm11, 0, %v374_v3 }
  0x8a   : > { %v816_v43 = vld [vmem:[#allocation2 + $0x80] sm:$0x1]  ;;  %v809_v15 = vld [vmem:[#allocation2 + $0x74] sm:$0x1]  ;;  %370 = vst [vmem:[#allocation2 + $0x8c] sm:$0x1] %v369_v11 }
  0x8b   : > { %v817_v55 = vsel %vm8751_vm13, %v592_v31, %v816_v43  ;;  %v810_v2 = vsel %vm8751_vm13, %v575_v56, %v809_v15  ;;  %379 = vst [vmem:[#allocation2 + $0xb0] sm:$0x1] %v378_v51  ;;  %376 = vst [vmem:[#allocation2 + $0xa4] sm:$0x1] %v375_v20  ;;  %v381_v59 = vsel %vm8693_vm11, 0, %v380_v63  ;;  %vm1309_vm14 = vcmask 60448  }
  0x8c   : > { %818 = vst [vmem:[#allocation2 + $0x80] sm:$0x1] %v817_v55  ;;  %811 = vst [vmem:[#allocation2 + $0x74] sm:$0x1] %v810_v2  ;;  %v609_v25 = vrot.slane %v8563_v16, 4  ;;  %v643_v22 = vrot.slane %v8629_v9, 4 }
  0x8d   : > { %382 = vst [vmem:[#allocation2 + $0xbc] sm:$0x1] %v381_v59  ;;  %v660_v4 = vrot.slane %v8680_v24, 4  ;;  %v677_v0 = vrot.slane %v8716_v41, 4  ;;  %vm8837_vm15 = vmand %vm1309_vm14, %vm333_vm6  ;;  %v10879_v5 = vmov 0  ;;  %v1214_v26 = vpop.permute.xlu1 %1213  ;;  %v1208_v17 = vpop.permute.xlu0 %1207  ;;  %v8875_v3 = vsel %vm1588_vm9, %v8504_v6, 0 }
  0x8e   : > { %v10880_v5 = vsel %vm8837_vm15, 4294967295, %v10879_v5  ;;  %v1785_v53 = vld [vmem:[#allocation2] sm:$0xf]  ;;  %v1786_v61 = vld [vmem:[#allocation2 + $0x4] sm:$0xf]  ;;  %v2888_v63 = vsel %vm1588_vm9, %v8516_v37, 0 }
  0x8f   : > { %10881 = vst [vmem:[#allocation9_spill] sm:$0xff] %v10880_v5  ;;  %v1370_v41 = vld [vmem:[#allocation2 + $0x6c] sm:$0xf]  ;;  %v1363_v21 = vld [vmem:[#allocation2 + $0x60] sm:$0xf]  ;;  %v1837_v19 = vshrl.u32 %v1785_v53, 16 }
  0x90   : > { %v830_v57 = vld [vmem:[#allocation2 + $0x98] sm:$0x1]  ;;  %v1840_v45 = vshll.u32 %v1785_v53, 16  ;;  %v1846_v27 = vshll.u32 %v1786_v61, 16  ;;  %v1850_v28 = vshrl.u32 %v1786_v61, 16  ;;  %v1371_v49 = vsel %vm8837_vm15, %v1214_v26, %v1370_v41 }
  0x91   : > { %v831_v42 = vsel %vm8751_vm13, %v626_v10, %v830_v57  ;;  %v823_v36 = vld [vmem:[#allocation2 + $0x8c] sm:$0x1]  ;;  %v1364_v44 = vsel %vm8837_vm15, %v1208_v17, %v1363_v21  ;;  %1372 = vst [vmem:[#allocation2 + $0x6c] sm:$0xf] %v1371_v49  ;;  %v1216_v14 = vpop.permute.xlu1 %1215  ;;  %v1166_v60 = vpop.permute.xlu0 %1165  ;;  %v1839_v46 = vrot.slane %v1837_v19, 4  ;;  %vm2674_vm4 = vcmask 1042432  }
  0x92   : > { %832 = vst [vmem:[#allocation2 + $0x98] sm:$0x1] %v831_v42  ;;  %v824_v16 = vsel %vm8751_vm13, %v609_v25, %v823_v36  ;;  %v844_v9 = vld [vmem:[#allocation2 + $0xb0] sm:$0x1]  ;;  %v837_v24 = vld [vmem:[#allocation2 + $0xa4] sm:$0x1] }
  0x93   : > { %825 = vst [vmem:[#allocation2 + $0x8c] sm:$0x1] %v824_v16  ;;  %v845_v30 = vsel %vm8751_vm13, %v660_v4, %v844_v9  ;;  %v838_v58 = vsel %vm8751_vm13, %v643_v22, %v837_v24  ;;  %1365 = vst [vmem:[#allocation2 + $0x60] sm:$0xf] %v1364_v44  ;;  %v1311_v8 = vld [vmem:[#allocation2 + $0xc] sm:$0xf] }
  0x94   : > { %v851_v33 = vld [vmem:[#allocation2 + $0xbc] sm:$0x1]  ;;  %846 = vst [vmem:[#allocation2 + $0xb0] sm:$0x1] %v845_v30  ;;  %839 = vst [vmem:[#allocation2 + $0xa4] sm:$0x1] %v838_v58  ;;  %v1312_v18 = vsel %vm8837_vm15, %v1166_v60, %v1311_v8 }
  0x95   : > { %v852_v40 = vsel %vm8751_vm13, %v677_v0, %v851_v33  ;;  %v1842_v13 = vrot.slane %v1840_v45, 5  ;;  %v8855_v48 = vrot.slane %v1846_v27, 5  ;;  %v1852_v23 = vrot.slane %v1850_v28, 4  ;;  %1373 = vst.msk [vmem:[#allocation2 + $0x70] sm:$0xf] %vm1309_vm14, %v1216_v14  ;;  %v1168_v38 = vpop.permute.xlu1 %1167  ;;  %v1220_v62 = vpop.permute.xlu0 %1219 }
  0x96   : > { %853 = vst [vmem:[#allocation2 + $0xbc] sm:$0x1] %v852_v40  ;;  %1313 = vst [vmem:[#allocation2 + $0xc] sm:$0xf] %v1312_v18  ;;  %v1377_v32 = vld [vmem:[#allocation2 + $0x78] sm:$0xf] }
  0x97   : > { %v1843_v56 = vor.u32 %v1842_v13, %v1839_v46  ;;  %v1853_v31 = vor.u32 %v1852_v23, %v8855_v48  ;;  %v8864_v29 = vld [vmem:[%s10837_s2 + $0xc] sm:$0xf]  ;;  %v8866_v34 = vld [vmem:[#allocation2] sm:$0xe]  ;;  %v8868_v47 = vld [vmem:[#allocation2 + $0x4] sm:$0xf]  ;;  %v1378_v12 = vsel %vm8837_vm15, %v1220_v62, %v1377_v32 }
  0x98   : > { %1315 = vst.msk [vmem:[#allocation2 + $0x10] sm:$0xf] %vm1309_vm14, %v1168_v38  ;;  %1379 = vst [vmem:[#allocation2 + $0x78] sm:$0xf] %v1378_v12  ;;  %v1787_v43 = vld [vmem:[#allocation2 + $0x8] sm:$0x1] }
  0x99   : > { %v7293_v15 = vld [vmem:[%s10837_s2 + $0x10] sm:$0xf]  ;;  %vm1833_vm1 = vsmask.f32 3328  ;;  %vm1834_vm3 = vsmask.f32 7440  ;;  %v1222_v51 = vpop.permute.xlu1 %1221  ;;  %v1210_v20 = vpop.permute.xlu0 %1209 }
  0x9a   : > { %v1809_v35 = vld [vmem:[#allocation2 + $0x60] sm:$0xf]  ;;  %v8884_v7 = vsel %vm1588_vm9, %v8864_v29, 0  ;;  %v2679_v55 = vrot.slane %v8868_v47, 5  ;;  %v1812_v6 = vld [vmem:[#allocation2 + $0x6c] sm:$0xf]  ;;  %vm8929_vm12 = vmor %vm1833_vm1, %vm1834_vm3 }
  0x9b   : > { %v2029_v2 = vshrl.u32 %v1809_v35, 16  ;;  %v2032_v11 = vshll.u32 %v1809_v35, 16  ;;  %v1321_v59 = vld [vmem:[#allocation2 + $0x18] sm:$0xf]  ;;  %v1384_v37 = vld [vmem:[#allocation2 + $0x84] sm:$0xf] }
  0x9c   : > { %v8887_v10 = vrot.slane %v1843_v56, 4  ;;  %v8889_v25 = vrot.slane %v1853_v31, 4  ;;  %vm2675_vm6 = vcmask 1046532   ;;  %v7211_v22 = vrot.slane %v8866_v34, 9  ;;  %1380 = vst.msk [vmem:[#allocation2 + $0x7c] sm:$0xf] %vm1309_vm14, %v1222_v51 }
  0x9d   : > { %1366 = vst.msk [vmem:[#allocation2 + $0x64] sm:$0xf] %vm1309_vm14, %v1210_v20  ;;  %v1856_v4 = vshll.u32 %v1787_v43, 16  ;;  %v1788_v0 = vld [vmem:[#allocation2 + $0xc] sm:$0xf]  ;;  %v8895_v57 = vsel %vm1588_vm9, %v7293_v15, 0  ;;  %v1172_v58 = vpop.permute.xlu1 %1171  ;;  %v1226_v33 = vpop.permute.xlu0 %1225  ;;  %vm8940_vm7 = vmor %vm2674_vm4, %vm2675_vm6 }
  0x9e   : > { %v1861_v53 = vshrl.u32 %v1788_v0, 16  ;;  %v1864_v42 = vshll.u32 %v1788_v0, 16  ;;  %v1813_v36 = vld [vmem:[#allocation2 + $0x70] sm:$0xf]  ;;  %v2053_v61 = vshrl.u32 %v1812_v6, 16  ;;  %v2056_v16 = vshll.u32 %v1812_v6, 16 }
  0x9f   : > { %v8897_v9 = vld [vmem:[#allocation2 + $0x8] sm:$0x1]  ;;  %v8901_v24 = vrot.slane %v2679_v55, 4  ;;  %v2031_v41 = vrot.slane %v2029_v2, 4  ;;  %v2034_v21 = vrot.slane %v2032_v11, 5  ;;  %v2062_v30 = vshll.u32 %v1813_v36, 16 }
  0xa0   : > { %v8136_v40 = vld [vmem:[#allocation2 + $0xc] sm:$0xff]   ;;  %v1863_v17 = vrot.slane %v1861_v53, 4  ;;  %v1322_v19 = vsel %vm8837_vm15, %v1172_v58, %v1321_v59  ;;  %v1385_v45 = vsel %vm8837_vm15, %v1226_v33, %v1384_v37  ;;  %v1866_v27 = vrot.slane %v1864_v42, 5  ;;  %v8907_v28 = vld [vmem:[#allocation2 + $0x60] sm:$0xe] }
  0xa1   : > { %v1789_v26 = vld [vmem:[#allocation2 + $0x10] sm:$0xf]  ;;  %v2066_v49 = vshrl.u32 %v1813_v36, 16  ;;  %1323 = vst [vmem:[#allocation2 + $0x18] sm:$0xf] %v1322_v19  ;;  %7810 = vmatmul.mubr.msk.bf16.vlgmr.msra.gmra.mxu0 %vm1539_vm10, %v8136_v40  ;;  %v2682_v8 = vrot.slane %v8897_v9, 5  ;;  %v2035_v38 = vor.u32 %v2034_v21, %v2031_v41  ;;  %v1174_v62 = vpop.permute.xlu1 %1173  ;;  %v1228_v56 = vpop.permute.xlu0 %1227  ;;  %v8960_v33 = vsel %vm8940_vm7, %v7211_v22, %v2679_v55 }
  0xa2   : > { %1386 = vst [vmem:[#allocation2 + $0x84] sm:$0xf] %v1385_v45  ;;  %v1874_v44 = vshrl.u32 %v1789_v26, 16  ;;  %v2055_v14 = vrot.slane %v2053_v61, 4  ;;  %v2058_v60 = vrot.slane %v2056_v16, 5  ;;  %7876 = vmatpush3.bf16.msra.mxu0 %v2888_v63  ;;  %v8913_v13 = vrot.slane %v1856_v4, 5 }
  0xa3   : > { %v8911_v46 = vld [vmem:[#allocation2 + $0x6c] sm:$0xe]  ;;  %v1870_v23 = vshll.u32 %v1789_v26, 16  ;;  %v8917_v32 = vld [vmem:[#allocation2 + $0x10] sm:$0xf]  ;;  %v1867_v35 = vor.u32 %v1866_v27, %v1863_v17  ;;  %8120 = vmatprep.subr.msk.bf16.mxu0 %vm1588_vm9, %v7293_v15  ;;  %v7219_v43 = vrot.slane %v8907_v28, 9  ;;  %v8980_v55 = vsel %vm8940_vm7, %v8901_v24, %v2682_v8 }
  0xa4   : > { %v8915_v18 = vld [vmem:[#allocation2 + $0xc] sm:$0xe]  ;;  %v8137_v31 = vld [vmem:[#allocation2 + $0x60] sm:$0xff]   ;;  %1324 = vst.msk [vmem:[#allocation2 + $0x1c] sm:$0xf] %vm1309_vm14, %v1174_v62  ;;  %v8923_v11 = vrot.slane %v2062_v30, 5  ;;  %v2059_v0 = vor.u32 %v2058_v60, %v2055_v14  ;;  %v1849_v30 = vsel %vm8929_vm12, %v8887_v10, %v8855_v48  ;;  %v1859_v34 = vsel %vm8929_vm12, %v8889_v25, %v8913_v13 }
  0xa5   : > { %v1328_v12 = vld [vmem:[#allocation2 + $0x24] sm:$0xf]  ;;  %1387 = vst.msk [vmem:[#allocation2 + $0x88] sm:$0xf] %vm1309_vm14, %v1228_v56  ;;  %v8138_v63 = vld [vmem:[#allocation2 + $0x6c] sm:$0xff]   ;;  %v2068_v6 = vrot.slane %v2066_v49, 4  ;;  %7825 = vmatprep.mubr.msk.bf16.mxu1 %vm1539_vm10, %v8137_v31  ;;  %v1180_v41 = vpop.permute.xlu1 %1179  ;;  %v1178_v21 = vpop.permute.xlu0 %1177  ;;  %v8994_v62 = vcombine.low %v1849_v30, %v1859_v34 }
  0xa6   : > { %v1810_v2 = vld [vmem:[#allocation2 + $0x64] sm:$0xf]  ;;  %10882 = vst [vmem:[#allocation10_spill] sm:$0xff] %v8923_v11  ;;  %v8139_v20 = vld [vmem:[#allocation2 + $0x78] sm:$0xff]   ;;  %v1876_v59 = vrot.slane %v1874_v44, 4  ;;  %v7212_v37 = vrot.slane %v8915_v18, 9  ;;  %7826 = vmatmul.mubr.msk.bf16.vlgmr.msra.gmra.mxu1 %vm1539_vm10, %v8138_v63  ;;  %v1329_v48 = vsel %vm8837_vm15, %v1178_v21, %v1328_v12 }
  0xa7   : > { %v2686_v4 = vrot.slane %v8917_v32, 5  ;;  %v1815_v53 = vld [vmem:[#allocation2 + $0x78] sm:$0xf]  ;;  %v8936_v42 = vrot.slane %v1870_v23, 5  ;;  %v8944_v61 = vrot.slane %v2035_v38, 4  ;;  %v2038_v16 = vshll.u32 %v1810_v2, 16  ;;  %7829 = vmatprep.mubr.msk.bf16.mxu1 %vm1539_vm10, %v8139_v20  ;;  %7842 = vmatpush3.bf16.msra.mxu1 %v8875_v3 }
  0xa8   : > { %v2042_v9 = vshrl.u32 %v1810_v2, 16  ;;  %v8952_v58 = vrot.slane %v1867_v35, 4  ;;  %v8966_v3 = vld [vmem:[#allocation2 + $0x64] sm:$0xf]  ;;  %1331 = vst.msk [vmem:[#allocation2 + $0x28] sm:$0xf] %vm1309_vm14, %v1180_v41  ;;  %8119 = vmatprep.subr.msk.bf16.mxu1 %vm1588_vm9, %v8864_v29  ;;  %v2069_v10 = vor.u32 %v2068_v6, %v8923_v11 }
  0xa9   : > { %10887 = vst [vmem:[#allocation11_spill] sm:$0xff] %v8944_v61  ;;  %v8964_v40 = vrot.slane %v2686_v4, 4  ;;  %v1791_v47 = vld [vmem:[#allocation2 + $0x18] sm:$0xf]  ;;  %1330 = vst [vmem:[#allocation2 + $0x24] sm:$0xf] %v1329_v48  ;;  %v1877_v26 = vor.u32 %v1876_v59, %v8936_v42  ;;  %v1234_v44 = vpop.permute.xlu1 %1233  ;;  %v1232_v14 = vpop.permute.xlu0 %1231 }
  0xaa   : > { %v1391_v22 = vld [vmem:[#allocation2 + $0x90] sm:$0xf]  ;;  %v1885_v17 = vshrl.u32 %v1791_v47, 16  ;;  %v1888_v19 = vshll.u32 %v1791_v47, 16  ;;  %v8984_v45 = vrot.slane %v2059_v0, 4  ;;  %v8986_v25 = vrot.slane %v2038_v16, 5 }
  0xab   : > { %v8988_v27 = vrot.slane %v2042_v9, 4  ;;  %v2077_v29 = vshrl.u32 %v1815_v53, 16  ;;  %v2080_v49 = vshll.u32 %v1815_v53, 16  ;;  %v1335_v24 = vld [vmem:[#allocation2 + $0x30] sm:$0xf]  ;;  %v8140_v60 = vld [vmem:[#allocation2 + $0x18] sm:$0xff]   ;;  %v1392_v23 = vsel %vm8837_vm15, %v1232_v14, %v1391_v22 }
  0xac   : > { %10888 = vst [vmem:[#allocation12_spill] sm:$0xff] %v8984_v45  ;;  %10889 = vst [vmem:[#allocation13_spill] sm:$0xff] %v8986_v25  ;;  %v1398_v8 = vld [vmem:[#allocation2 + $0x9c] sm:$0xf]  ;;  %v2735_v13 = vrot.slane %v8966_v3, 5  ;;  %v8141_v38 = vld [vmem:[#allocation2 + $0x84] sm:$0xff]   ;;  %7813 = vmatprep.mubr.msk.bf16.mxu0 %vm1539_vm10, %v8140_v60 }
  0xad   : > { %1394 = vst.msk [vmem:[#allocation2 + $0x94] sm:$0xf] %vm1309_vm14, %v1234_v44  ;;  %v1792_v56 = vld [vmem:[#allocation2 + $0x1c] sm:$0xf]  ;;  %v8998_v12 = vld [vmem:[#allocation2 + $0x18] sm:$0xe]  ;;  %v2045_v53 = vor.u32 %v8988_v27, %v8986_v25  ;;  %v1184_v21 = vpop.permute.xlu1 %1183  ;;  %v1238_v30 = vpop.permute.xlu0 %1237 }
  0xae   : > { %v9000_v35 = vrot.slane %v2069_v10, 4  ;;  %1393 = vst [vmem:[#allocation2 + $0x90] sm:$0xf] %v1392_v23  ;;  %v1887_v63 = vrot.slane %v1885_v17, 4  ;;  %v1890_v2 = vrot.slane %v1888_v19, 5  ;;  %v1894_v6 = vshll.u32 %v1792_v56, 16  ;;  %7830 = vmatmul.mubr.msk.bf16.gmra.mxu1 %vm1539_vm10, %v8141_v38 }
  0xaf   : > { %v1898_v20 = vshrl.u32 %v1792_v56, 16  ;;  %v9003_v59 = vld [vmem:[#allocation2 + $0x1c] sm:$0xf]  ;;  %v9006_v0 = vrot.slane %v1877_v26, 4  ;;  %v2079_v9 = vrot.slane %v2077_v29, 4  ;;  %v2082_v41 = vrot.slane %v2080_v49, 5 }
  0xb0   : > { %10890 = vst [vmem:[#allocation14_spill] sm:$0xff] %v9000_v35  ;;  %v1816_v16 = vld [vmem:[#allocation2 + $0x7c] sm:$0xf]  ;;  %v9010_v48 = vrot.slane %v1894_v6, 5  ;;  %v7213_v47 = vrot.slane %v8998_v12, 9  ;;  %v9015_v10 = vrot.slane %v2735_v13, 4  ;;  %v1336_v22 = vsel %vm8837_vm15, %v1184_v21, %v1335_v24 }
  0xb1   : > { %v1900_v34 = vrot.slane %v1898_v20, 4  ;;  %v1399_v26 = vsel %vm8837_vm15, %v1238_v30, %v1398_v8  ;;  %v8142_v17 = vld [vmem:[#allocation2 + $0x24] sm:$0xff]   ;;  %v9027_v19 = vsel %vm8940_vm7, %v7212_v37, %v2686_v4  ;;  %v2693_v27 = vrot.slane %v9003_v59, 5  ;;  %1337 = vst [vmem:[#allocation2 + $0x30] sm:$0xf] %v1336_v22 }
  0xb2   : > { %10891 = vst [vmem:[#allocation15_spill] sm:$0xff] %v9015_v10  ;;  %v1794_v29 = vld [vmem:[#allocation2 + $0x24] sm:$0xf]  ;;  %1400 = vst [vmem:[#allocation2 + $0x9c] sm:$0xf] %v1399_v26  ;;  %v1891_v49 = vor.u32 %v1890_v2, %v1887_v63  ;;  %v2090_v60 = vshrl.u32 %v1816_v16, 16  ;;  %7814 = vmatmul.mubr.msk.bf16.gmra.mxu0 %vm1539_vm10, %v8142_v17  ;;  %v2083_v4 = vor.u32 %v2082_v41, %v2079_v9  ;;  %v1186_v63 = vpop.permute.xlu1 %1185  ;;  %v1240_v2 = vpop.permute.xlu0 %1239 }
  0xb3   : > { %v1795_v44 = vld [vmem:[#allocation2 + $0x28] sm:$0xf]  ;;  %v1909_v14 = vshrl.u32 %v1794_v29, 16  ;;  %v1912_v24 = vshll.u32 %v1794_v29, 16  ;;  %v1901_v32 = vor.u32 %v1900_v34, %v9010_v48  ;;  %v9032_v23 = vld [vmem:[#allocation2 + $0x24] sm:$0xe] }
  0xb4   : > { %v1918_v8 = vshll.u32 %v1795_v44, 16  ;;  %v1922_v18 = vshrl.u32 %v1795_v44, 16  ;;  %v9034_v37 = vld [vmem:[#allocation2 + $0x28] sm:$0xf]  ;;  %v9036_v38 = vld [vmem:[#allocation2 + $0x70] sm:$0xf] }
  0xb5   : > { %v9038_v56 = vld [vmem:[#allocation2 + $0x78] sm:$0xe]  ;;  %v1342_v6 = vld [vmem:[#allocation2 + $0x3c] sm:$0xf]  ;;  %v1911_v20 = vrot.slane %v1909_v14, 4  ;;  %v1914_v21 = vrot.slane %v1912_v24, 5 }
  0xb6   : > { %v9040_v30 = vrot.slane %v2045_v53, 4  ;;  %v2086_v22 = vshll.u32 %v1816_v16, 16  ;;  %1338 = vst.msk [vmem:[#allocation2 + $0x34] sm:$0xf] %vm1309_vm14, %v1186_v63  ;;  %1401 = vst.msk [vmem:[#allocation2 + $0xa0] sm:$0xf] %vm1309_vm14, %v1240_v2 }
  0xb7   : > { %v8143_v34 = vld [vmem:[#allocation2 + $0x90] sm:$0xff]   ;;  %v9050_v41 = vrot.slane %v2693_v27, 4  ;;  %v9052_v26 = vrot.slane %v1918_v8, 5  ;;  %v1924_v17 = vrot.slane %v1922_v18, 4  ;;  %v9054_v53 = vrot.slane %v1891_v49, 4  ;;  %v1192_v49 = vpop.permute.xlu1 %1191  ;;  %v1190_v18 = vpop.permute.xlu0 %1189 }
  0xb8   : > { %10892 = vst [vmem:[#allocation16_spill] sm:$0xff] %v9040_v30  ;;  %v1915_v16 = vor.u32 %v1914_v21, %v1911_v20  ;;  %v10842_v44 = vrot.slane %v9034_v37, 5  ;;  %v9058_v14 = vld [vmem:[#allocation2 + $0x7c] sm:$0xf]  ;;  %7833 = vmatprep.mubr.msk.bf16.mxu1 %vm1539_vm10, %v8143_v34  ;;  %v9061_v24 = vrot.slane %v1901_v32, 4  ;;  %v9064_v2 = vrot.slane %v2083_v4, 4 }
  0xb9   : > { %v1925_v63 = vor.u32 %v1924_v17, %v9052_v26  ;;  %v2092_v8 = vrot.slane %v2090_v60, 4  ;;  %v9066_v31 = vld [vmem:[#allocation2 + $0x84] sm:$0xf]  ;;  %v1405_v20 = vld [vmem:[#allocation2 + $0xa8] sm:$0xf]  ;;  %v9072_v9 = vrot.slane %v2086_v22, 5  ;;  %v1343_v60 = vsel %vm8837_vm15, %v1190_v18, %v1342_v6 }
  0xba   : > { %10893 = vst [vmem:[#allocation17_spill] sm:$0xff] %v9064_v2  ;;  %v9070_v21 = vrot.slane %v10842_v44, 4  ;;  %v2742_v34 = vrot.slane %v9036_v38, 5  ;;  %1345 = vst.msk [vmem:[#allocation2 + $0x40] sm:$0xf] %vm1309_vm14, %v1192_v49  ;;  %v9079_v4 = vrot.slane %v1915_v16, 4  ;;  %v9096_v6 = vsel %vm8940_vm7, %v7219_v43, %v2735_v13 }
  0xbb   : > { %10894 = vst [vmem:[#allocation18_spill] sm:$0xff] %v9072_v9  ;;  %v10843_v51 = vrot.slane %v9058_v14, 5  ;;  %1344 = vst [vmem:[#allocation2 + $0x3c] sm:$0xf] %v1343_v60  ;;  %v9086_v22 = vrot.slane %v1925_v63, 4  ;;  %v2093_v16 = vor.u32 %v2092_v8, %v9072_v9  ;;  %v2101_v49 = vshrl.u32 %v9066_v31, 16  ;;  %v1246_v28 = vpop.permute.xlu1 %1245  ;;  %v1244_v32 = vpop.permute.xlu0 %1243 }
  0xbc   : > { %v1797_v38 = vld [vmem:[#allocation2 + $0x30] sm:$0xf]  ;;  %10895 = vst [vmem:[#allocation19_spill] sm:$0xff] %v9096_v6  ;;  %vm1316_vm1 = vcmask 57376   ;;  %v9100_v63 = vrot.slane %v2742_v34, 4  ;;  %v1406_v8 = vsel %vm8837_vm15, %v1244_v32, %v1405_v20  ;;  %v2104_v54 = vshll.u32 %v9066_v31, 16 }
  0xbd   : > { %v9088_v29 = vld [vmem:[#allocation2 + $0x30] sm:$0xe]  ;;  %v1933_v18 = vshrl.u32 %v1797_v38, 16  ;;  %v1936_v60 = vshll.u32 %v1797_v38, 16  ;;  %v9104_v17 = vrot.slane %v10843_v51, 4  ;;  %v8144_v44 = vld [vmem:[#allocation2 + $0x9c] sm:$0xff]   ;;  %v9118_v38 = vsel %vm8940_vm7, %v7213_v47, %v2693_v27  ;;  %vm9193_vm3 = vmand %vm1316_vm1, %vm277_vm0 }
  0xbe   : > { %10896 = vst [vmem:[#allocation20_spill] sm:$0xff] %v9100_v63  ;;  %v9106_v3 = vld [vmem:[#allocation2 + $0x88] sm:$0xf]  ;;  %v1412_v13 = vld [vmem:[#allocation2 + $0xb4] sm:$0xf]  ;;  %7834 = vmatmul.mubr.msk.bf16.gmra.mxu1 %vm1539_vm10, %v8144_v44  ;;  %v9132_v1 = vrot.slane %v2093_v16, 4 }
  0xbf   : > { %10897 = vst [vmem:[#allocation21_spill] sm:$0xff] %v9104_v17  ;;  %v1349_v43 = vld [vmem:[#allocation2 + $0x48] sm:$0xf]  ;;  %1408 = vst.msk [vmem:[#allocation2 + $0xac] sm:$0xf] %vm1309_vm14, %v1246_v28  ;;  %v8145_v50 = vld [vmem:[#allocation2 + $0x30] sm:$0xff]   ;;  %v1250_v44 = vpop.permute.xlu0 %1249 }
  0xc0   : > { %v1798_v59 = vld [vmem:[#allocation2 + $0x34] sm:$0xf]  ;;  %v1935_v39 = vrot.slane %v1933_v18, 4  ;;  %v1938_v12 = vrot.slane %v1936_v60, 5  ;;  %1407 = vst [vmem:[#allocation2 + $0xa8] sm:$0xf] %v1406_v8  ;;  %7817 = vmatprep.mubr.msk.bf16.mxu0 %vm1539_vm10, %v8145_v50  ;;  %v1196_v60 = vpop.permute.xlu1 %1195 }
  0xc1   : > { %v1942_v47 = vshll.u32 %v1798_v59, 16  ;;  %v1946_v27 = vshrl.u32 %v1798_v59, 16  ;;  %v9130_v51 = vld [vmem:[#allocation2 + $0x34] sm:$0xf]  ;;  %10898 = vst [vmem:[#allocation22_spill] sm:$0xff] %v9132_v1  ;;  %v2103_v52 = vrot.slane %v2101_v49, 4 }
  0xc2   : > { %v1939_v28 = vor.u32 %v1938_v12, %v1935_v39  ;;  %v2110_v32 = vshll.u32 %v9106_v3, 16  ;;  %v2114_v18 = vshrl.u32 %v9106_v3, 16  ;;  %v9138_v31 = vld [vmem:[#allocation2 + $0x90] sm:$0xf]  ;;  %v10899_v16 = vrot.slane %v9034_v37, 5 }
  0xc3   : > { %v9140_v8 = vrot.slane %v1942_v47, 5  ;;  %v1948_v59 = vrot.slane %v1946_v27, 4  ;;  %v10900_v49 = vrot.slane %v9032_v23, 9  ;;  %v1801_v50 = vld [vmem:[#allocation2 + $0x40] sm:$0xf]  ;;  %v1350_v12 = vsel %vm8837_vm15, %v1196_v60, %v1349_v43 }
  0xc4   : > { %v1413_v47 = vsel %vm8837_vm15, %v1250_v44, %v1412_v13  ;;  %v8146_v27 = vld [vmem:[#allocation2 + $0x3c] sm:$0xff]   ;;  %v10901_v23 = vrot.slane %v8911_v46, 9  ;;  %1351 = vst [vmem:[#allocation2 + $0x48] sm:$0xf] %v1350_v12  ;;  %v2125_v43 = vshrl.u32 %v9138_v31, 16  ;;  %v9167_v13 = vrot.slane %v1939_v28, 4  ;;  %v1198_v12 = vpop.permute.xlu1 %1197 }
  0xc5   : > { %v9148_v39 = vsel %vm8940_vm7, %v10900_v49, %v10899_v16  ;;  %v1800_v37 = vld [vmem:[#allocation2 + $0x3c] sm:$0xf]  ;;  %v2106_v49 = vrot.slane %v2104_v54, 5  ;;  %1414 = vst [vmem:[#allocation2 + $0xb4] sm:$0xf] %v1413_v47  ;;  %v1949_v20 = vor.u32 %v1948_v59, %v9140_v8  ;;  %7818 = vmatmul.mubr.msk.bf16.gmra.mxu0 %vm1539_vm10, %v8146_v27  ;;  %v10903_v60 = vrot.slane %v9130_v51, 5  ;;  %v1252_v47 = vpop.permute.xlu0 %1251 }
  0xc6   : > { %v9162_v16 = vsel %vm8940_vm7, %v10901_v23, %v2742_v34  ;;  %v1957_v3 = vshrl.u32 %v1800_v37, 16  ;;  %v1960_v9 = vshll.u32 %v1800_v37, 16  ;;  %v1966_v44 = vshll.u32 %v1801_v50, 16  ;;  %v2593_v23 = vld [vmem:[#allocation2 + $0x3c] sm:$0xe] }
  0xc7   : > { %10902 = vst [vmem:[#allocation23_spill] sm:$0xff] %v9162_v16  ;;  %v9171_v46 = vrot.slane %v10903_v60, 4  ;;  %v1970_v34 = vshrl.u32 %v1801_v50, 16  ;;  %v1822_v54 = vld [vmem:[#allocation2 + $0x94] sm:$0xf]  ;;  %v10904_v11 = vrot.slane %v9058_v14, 5  ;;  %v2107_v59 = vor.u32 %v2106_v49, %v2103_v52 }
  0xc8   : > { %v1318_v2 = vld [vmem:[#allocation2 + $0x14] sm:$0x1]  ;;  %v1959_v37 = vrot.slane %v1957_v3, 4  ;;  %v1962_v27 = vrot.slane %v1960_v9, 5  ;;  %v2594_v28 = vld [vmem:[#allocation2 + $0x40] sm:$0xf]  ;;  %v1170_v49 = vpop.permute.xlu1 %1169 }
  0xc9   : > { %v10905_v60 = vrot.slane %v9038_v56, 9  ;;  %1352 = vst.msk [vmem:[#allocation2 + $0x4c] sm:$0xf] %vm1309_vm14, %v1198_v12  ;;  %1415 = vst.msk [vmem:[#allocation2 + $0xb8] sm:$0xf] %vm1309_vm14, %v1252_v47  ;;  %v8147_v45 = vld [vmem:[#allocation2 + $0xa8] sm:$0xff]   ;;  %v1202_v47 = vpop.permute.xlu0 %1201 }
  0xca   : > { %v9187_v17 = vrot.slane %v1966_v44, 5  ;;  %v1972_v16 = vrot.slane %v1970_v34, 4  ;;  %v9189_v3 = vrot.slane %v2110_v32, 5  ;;  %v1356_v56 = vld [vmem:[#allocation2 + $0x54] sm:$0xf]  ;;  %v1963_v14 = vor.u32 %v1962_v27, %v1959_v37  ;;  %7837 = vmatprep.mubr.msk.bf16.mxu1 %vm1539_vm10, %v8147_v45 }
  0xcb   : > { %v9183_v50 = vsel %vm8940_vm7, %v10905_v60, %v10904_v11  ;;  %v9197_v11 = vrot.slane %v1949_v20, 4  ;;  %v7216_v12 = vrot.slane %v2593_v23, 9  ;;  %v2116_v60 = vrot.slane %v2114_v18, 4  ;;  %v1803_v37 = vld [vmem:[#allocation2 + $0x48] sm:$0xf] }
  0xcc   : > { %10906 = vst [vmem:[#allocation24_spill] sm:$0xff] %v9183_v50  ;;  %10907 = vst [vmem:[#allocation25_spill] sm:$0xff] %v9189_v3  ;;  %v1973_v44 = vor.u32 %v1972_v16, %v9187_v17  ;;  %v2714_v34 = vrot.slane %v2594_v28, 5  ;;  %v9201_v52 = vrot.slane %v2107_v59, 4  ;;  %v2128_v32 = vshll.u32 %v9138_v31, 16 }
  0xcd   : > { %v1325_v50 = vld [vmem:[#allocation2 + $0x20] sm:$0x1]  ;;  %v2117_v1 = vor.u32 %v2116_v60, %v9189_v3  ;;  %v2127_v35 = vrot.slane %v2125_v43, 4  ;;  %v2134_v20 = vshll.u32 %v1822_v54, 16  ;;  %v2138_v6 = vshrl.u32 %v1822_v54, 16 }
  0xce   : > { %v1319_v18 = vsel %vm9193_vm3, %v1170_v49, %v1318_v2  ;;  %v1357_v45 = vsel %vm8837_vm15, %v1202_v47, %v1356_v56  ;;  %v9209_v16 = vrot.slane %v1963_v14, 4  ;;  %v9211_v23 = vrot.slane %v2714_v34, 4  ;;  %v2596_v27 = vld [vmem:[#allocation2 + $0x48] sm:$0xe]  ;;  %v9227_v56 = vld [vmem:[#allocation2 + $0x84] sm:$0xe] }
  0xcf   : > { %1320 = vst [vmem:[#allocation2 + $0x14] sm:$0x1] %v1319_v18  ;;  %1358 = vst [vmem:[#allocation2 + $0x54] sm:$0xf] %v1357_v45  ;;  %v10910_v43 = vrot.slane %v9130_v51, 5  ;;  %v10911_v54 = vrot.slane %v9088_v29, 9  ;;  %v1176_v18 = vpop.permute.xlu1 %1175  ;;  %v1204_v45 = vpop.permute.xlu0 %1203 }
  0xd0   : > { %v9225_v59 = vrot.slane %v1973_v44, 4  ;;  %v2130_v28 = vrot.slane %v2128_v32, 5  ;;  %v9229_v14 = vld [vmem:[#allocation2 + $0x88] sm:$0xf]  ;;  %v1981_v60 = vshrl.u32 %v1803_v37, 16  ;;  %v1984_v49 = vshll.u32 %v1803_v37, 16 }
  0xd1   : > { %v9223_v2 = vsel %vm8940_vm7, %v10911_v54, %v10910_v43  ;;  %v9231_v47 = vrot.slane %v2117_v1, 4  ;;  %v9233_v51 = vrot.slane %v2134_v20, 5  ;;  %v9235_v29 = vld [vmem:[#allocation2 + $0x90] sm:$0xe]  ;;  %v8148_v43 = vld [vmem:[#allocation2 + $0xb4] sm:$0xff]   ;;  %v9239_v32 = vsel %vm8940_vm7, %v7216_v12, %v2714_v34  ;;  %v8149_v5 = vld [vmem:[#allocation2 + $0x48] sm:$0xff]  }
  0xd2   : > { %v1339_v44 = vld [vmem:[#allocation2 + $0x38] sm:$0x1]  ;;  %v1332_v54 = vld [vmem:[#allocation2 + $0x2c] sm:$0x1]  ;;  %v2131_v1 = vor.u32 %v2130_v28, %v2127_v35  ;;  %v2140_v31 = vrot.slane %v2138_v6, 4  ;;  %v1326_v20 = vsel %vm9193_vm3, %v1176_v18, %v1325_v50  ;;  %v1983_v63 = vrot.slane %v1981_v60, 4  ;;  %7838 = vmatmul.mubr.msk.bf16.gmra.mxu1 %vm1539_vm10, %v8148_v43  ;;  %7821 = vmatprep.mubr.msk.bf16.mxu0 %vm1539_vm10, %v8149_v5 }
  0xd3   : > { %10912 = vst [vmem:[#allocation26_spill] sm:$0xff] %v9231_v47  ;;  %10913 = vst [vmem:[#allocation27_spill] sm:$0xff] %v9233_v51  ;;  %v1804_v47 = vld [vmem:[#allocation2 + $0x4c] sm:$0xf]  ;;  %v1986_v25 = vrot.slane %v1984_v49, 5  ;;  %v7217_v61 = vrot.slane %v2596_v27, 9  ;;  %7843 = vmatprep.mubr.msk.bf16.mxu1 %vm1539_vm10, %v8994_v62  ;;  %v1188_v60 = vpop.permute.xlu1 %1187  ;;  %v1182_v49 = vpop.permute.xlu0 %1181 }
  0xd4   : > { %1359 = vst.msk [vmem:[#allocation2 + $0x58] sm:$0xf] %vm1309_vm14, %v1204_v45  ;;  %1327 = vst [vmem:[#allocation2 + $0x20] sm:$0x1] %v1326_v20  ;;  %v1990_v12 = vshll.u32 %v1804_v47, 16  ;;  %v1994_v34 = vshrl.u32 %v1804_v47, 16  ;;  %v2141_v35 = vor.u32 %v2140_v31, %v9233_v51  ;;  %v1340_v62 = vsel %vm9193_vm3, %v1188_v60, %v1339_v44 }
  0xd5   : > { %v2597_v10 = vld [vmem:[#allocation2 + $0x4c] sm:$0xf]  ;;  %v9249_v30 = vrot.slane %v2131_v1, 4  ;;  %v1987_v6 = vor.u32 %v1986_v25, %v1983_v63  ;;  %v7222_v28 = vrot.slane %v9227_v56, 9  ;;  %v2756_v27 = vrot.slane %v9229_v14, 5 }
  0xd6   : > { %v2721_v50 = vrot.slane %v2597_v10, 5  ;;  %v1353_v18 = vld [vmem:[#allocation2 + $0x50] sm:$0x1]  ;;  %v1346_v47 = vld [vmem:[#allocation2 + $0x44] sm:$0x1]  ;;  %v9257_v45 = vrot.slane %v1990_v12, 5  ;;  %v1333_v25 = vsel %vm9193_vm3, %v1182_v49, %v1332_v54 }
  0xd7   : > { %10914 = vst [vmem:[#allocation28_spill] sm:$0xff] %v9249_v30  ;;  %v1996_v43 = vrot.slane %v1994_v34, 4  ;;  %v9259_v1 = vrot.slane %v2141_v35, 4  ;;  %v1790_v10 = vld [vmem:[#allocation2 + $0x14] sm:$0x1]  ;;  %v9274_v44 = vrot.slane %v1987_v6, 4  ;;  %v1200_v56 = vpop.permute.xlu1 %1199 }
  0xd8   : > { %v2583_v63 = vld [vmem:[#allocation2 + $0x14] sm:$0x1]  ;;  %1341 = vst [vmem:[#allocation2 + $0x38] sm:$0x1] %v1340_v62  ;;  %1334 = vst [vmem:[#allocation2 + $0x2c] sm:$0x1] %v1333_v25  ;;  %v9279_v34 = vsel %vm8940_vm7, %v7217_v61, %v2721_v50  ;;  %v1194_v62 = vpop.permute.xlu0 %1193 }
  0xd9   : > { %v1880_v14 = vshll.u32 %v1790_v10, 16  ;;  %v2689_v20 = vrot.slane %v2583_v63, 5  ;;  %v1997_v54 = vor.u32 %v1996_v43, %v9257_v45  ;;  %v1806_v12 = vld [vmem:[#allocation2 + $0x54] sm:$0xf]  ;;  %v9281_v35 = vrot.slane %v2721_v50, 4 }
  0xda   : > { %v2005_v60 = vshrl.u32 %v1806_v12, 16  ;;  %v2008_v49 = vshll.u32 %v1806_v12, 16  ;;  %v9283_v37 = vld [vmem:[#allocation2 + $0x54] sm:$0xe]  ;;  %v1367_v10 = vld [vmem:[#allocation2 + $0x68] sm:$0x1]  ;;  %v1354_v50 = vsel %vm9193_vm3, %v1200_v56, %v1353_v18  ;;  %v1347_v12 = vsel %vm9193_vm3, %v1194_v62, %v1346_v47 }
  0xdb   : > { %v8150_v25 = vld [vmem:[#allocation2 + $0x54] sm:$0xff]   ;;  %v1360_v63 = vld [vmem:[#allocation2 + $0x5c] sm:$0x1]  ;;  %v1882_v6 = vrot.slane %v1880_v14, 5  ;;  %v9288_v43 = vsel %vm8940_vm7, %v8964_v40, %v2689_v20  ;;  %v9290_v5 = vrot.slane %v1997_v54, 4  ;;  %v9292_v61 = vrot.slane %v2756_v27, 4 }
  0xdc   : > { %v1793_v31 = vld [vmem:[#allocation2 + $0x20] sm:$0x1]  ;;  %v1807_v30 = vld [vmem:[#allocation2 + $0x58] sm:$0xf]  ;;  %v9304_v40 = vsel %vm8940_vm7, %v7222_v28, %v2756_v27  ;;  %1355 = vst [vmem:[#allocation2 + $0x50] sm:$0x1] %v1354_v50  ;;  %7822 = vmatmul.mubr.msk.bf16.gmra.mxu0 %vm1539_vm10, %v8150_v25  ;;  %v10915_v62 = vsel %vm8929_vm12, %v8952_v58, %v8936_v42  ;;  %v10916_v27 = vcombine.low %v8960_v33, %v8980_v55 }
  0xdd   : > { %v2586_v51 = vld [vmem:[#allocation2 + $0x20] sm:$0x1]  ;;  %1348 = vst [vmem:[#allocation2 + $0x44] sm:$0x1] %v1347_v12  ;;  %v1883_v18 = vsel %vm8929_vm12, %v9006_v0, %v1882_v6  ;;  %v1904_v47 = vshll.u32 %v1793_v31, 16  ;;  %v2007_v20 = vrot.slane %v2005_v60, 4  ;;  %v7229_v25 = vcombine.low %v9027_v19, %v9288_v43  ;;  %v1206_v60 = vpop.permute.xlu0 %1205 }
  0xde   : > { %v2696_v56 = vrot.slane %v2586_v51, 5  ;;  %v9310_v54 = vld [vmem:[#allocation2 + $0x58] sm:$0xf]  ;;  %v7180_v28 = vcombine.low %v10915_v62, %v1883_v18  ;;  %7877 = vmatprep.mubr.msk.bf16.mxu0 %vm1539_vm10, %v10916_v27  ;;  %v2010_v0 = vrot.slane %v2008_v49, 5  ;;  %v2014_v31 = vshll.u32 %v1807_v30, 16  ;;  %v1212_v51 = vpop.permute.xlu1 %1211 }
  0xdf   : > { %v1381_v6 = vld [vmem:[#allocation2 + $0x80] sm:$0x1]  ;;  %v1374_v50 = vld [vmem:[#allocation2 + $0x74] sm:$0x1]  ;;  %v1906_v12 = vrot.slane %v1904_v47, 5  ;;  %v2018_v14 = vshrl.u32 %v1807_v30, 16  ;;  %v1368_v58 = vsel %vm9193_vm3, %v1212_v51, %v1367_v10  ;;  %v1361_v33 = vsel %vm9193_vm3, %v1206_v60, %v1360_v63 }
  0xe0   : > { %v7218_v3 = vrot.slane %v9283_v37, 9  ;;  %v2728_v42 = vrot.slane %v9310_v54, 5  ;;  %7844 = vmatmul.mubr.msk.bf16.vlgmr.msra.gmra.mxu1 %vm1539_vm10, %v7180_v28  ;;  %v2697_v55 = vsel %vm8940_vm7, %v9050_v41, %v2696_v56  ;;  %v1796_v19 = vld [vmem:[#allocation2 + $0x2c] sm:$0x1]  ;;  %v1799_v49 = vld [vmem:[#allocation2 + $0x38] sm:$0x1]  ;;  %v2011_v30 = vor.u32 %v2010_v0, %v2007_v20 }
  0xe1   : > { %v2589_v43 = vld [vmem:[#allocation2 + $0x2c] sm:$0x1]  ;;  %1369 = vst [vmem:[#allocation2 + $0x68] sm:$0x1] %v1368_v58  ;;  %1362 = vst [vmem:[#allocation2 + $0x5c] sm:$0x1] %v1361_v33  ;;  %v1907_v18 = vsel %vm8929_vm12, %v9061_v24, %v1906_v12  ;;  %7910 = vmatpush3.bf16.msra.mxu1 %v8884_v7  ;;  %v10917_v41 = vsel %vm8929_vm12, %v9054_v53, %v9010_v48  ;;  %v1218_v51 = vpop.permute.xlu0 %1217 }
  0xe2   : > { %v1928_v10 = vshll.u32 %v1796_v19, 16  ;;  %v1952_v63 = vshll.u32 %v1799_v49, 16  ;;  %v2703_v47 = vrot.slane %v2589_v43, 5  ;;  %v2592_v62 = vld [vmem:[#allocation2 + $0x38] sm:$0x1]  ;;  %v7181_v56 = vcombine.low %v10917_v41, %v1907_v18  ;;  %v1224_v0 = vpop.permute.xlu1 %1223 }
  0xe3   : > { %v2710_v28 = vrot.slane %v2592_v62, 5  ;;  %v9342_v20 = vrot.slane %v2011_v30, 4  ;;  %v9344_v27 = vrot.slane %v2014_v31, 5  ;;  %v1395_v24 = vld [vmem:[#allocation2 + $0x98] sm:$0x1]  ;;  %v2020_v58 = vrot.slane %v2018_v14, 4 }
  0xe4   : > { %v1930_v60 = vrot.slane %v1928_v10, 5  ;;  %v1954_v7 = vrot.slane %v1952_v63, 5  ;;  %v9349_v12 = vsel %vm8940_vm7, %v9070_v21, %v2703_v47  ;;  %v1382_v48 = vsel %vm9193_vm3, %v1224_v0, %v1381_v6  ;;  %7847 = vmatprep.mubr.msk.bf16.mxu1 %vm1539_vm10, %v7181_v56  ;;  %v1802_v19 = vld [vmem:[#allocation2 + $0x44] sm:$0x1]  ;;  %v1805_v49 = vld [vmem:[#allocation2 + $0x50] sm:$0x1]  ;;  %7878 = vmatmul.mubr.msk.bf16.vlgmr.msra.gmra.mxu0 %vm1539_vm10, %v7229_v25 }
  0xe5   : > { %v1375_v53 = vsel %vm9193_vm3, %v1218_v51, %v1374_v50  ;;  %v7230_v31 = vcombine.low %v9118_v38, %v2697_v55  ;;  %v9360_v33 = vsel %vm8940_vm7, %v9171_v46, %v2710_v28  ;;  %v2595_v21 = vld [vmem:[#allocation2 + $0x44] sm:$0x1]  ;;  %1383 = vst [vmem:[#allocation2 + $0x80] sm:$0x1] %v1382_v48  ;;  %v1388_v14 = vld [vmem:[#allocation2 + $0x8c] sm:$0x1]  ;;  %v7231_v46 = vcombine.low %v9148_v39, %v9349_v12  ;;  %v1230_v10 = vpop.permute.xlu0 %1229 }
  0xe6   : > { %1376 = vst [vmem:[#allocation2 + $0x74] sm:$0x1] %v1375_v53  ;;  %v1931_v6 = vsel %vm8929_vm12, %v9086_v22, %v1930_v60  ;;  %v1955_v38 = vsel %vm8929_vm12, %v9197_v11, %v1954_v7  ;;  %v1976_v50 = vshll.u32 %v1802_v19, 16  ;;  %v2598_v55 = vld [vmem:[#allocation2 + $0x50] sm:$0x1]  ;;  %7944 = vmatpush3.bf16.msra.mxu0 %v8895_v57  ;;  %v10918_v25 = vsel %vm8929_vm12, %v9079_v4, %v9052_v26  ;;  %v1236_v18 = vpop.permute.xlu1 %1235 }
  0xe7   : > { %7881 = vmatprep.mubr.msk.bf16.mxu0 %vm1539_vm10, %v7230_v31  ;;  %v7182_v43 = vcombine.low %v10918_v25, %v1931_v6  ;;  %v10919_v22 = vsel %vm8929_vm12, %v9167_v13, %v9140_v8  ;;  %v2000_v30 = vshll.u32 %v1805_v49, 16  ;;  %v2717_v39 = vrot.slane %v2595_v21, 5  ;;  %v1409_v63 = vld [vmem:[#allocation2 + $0xb0] sm:$0x1]  ;;  %v1402_v28 = vld [vmem:[#allocation2 + $0xa4] sm:$0x1] }
  0xe8   : > { %v7183_v11 = vcombine.low %v10919_v22, %v1955_v38  ;;  %v7232_v57 = vcombine.low %v9223_v2, %v9360_v33  ;;  %v1978_v47 = vrot.slane %v1976_v50, 5  ;;  %v2724_v62 = vrot.slane %v2598_v55, 5  ;;  %v1808_v56 = vld [vmem:[#allocation2 + $0x5c] sm:$0x1]  ;;  %v1811_v2 = vld [vmem:[#allocation2 + $0x68] sm:$0x1] }
  0xe9   : > { %v2021_v41 = vor.u32 %v2020_v58, %v9344_v27  ;;  %v1396_v26 = vsel %vm9193_vm3, %v1236_v18, %v1395_v24  ;;  %v1389_v4 = vsel %vm9193_vm3, %v1230_v10, %v1388_v14  ;;  %7848 = vmatmul.mubr.msk.bf16.gmra.mxu1 %vm1539_vm10, %v7182_v43  ;;  %v2002_v8 = vrot.slane %v2000_v30, 5  ;;  %v2601_v60 = vld [vmem:[#allocation2 + $0x5c] sm:$0x1]  ;;  %v2604_v7 = vld [vmem:[#allocation2 + $0x68] sm:$0x1] }
  0xea   : > { %v9394_v13 = vsel %vm8940_vm7, %v9211_v23, %v2717_v39  ;;  %1397 = vst [vmem:[#allocation2 + $0x98] sm:$0x1] %v1396_v26  ;;  %1390 = vst [vmem:[#allocation2 + $0x8c] sm:$0x1] %v1389_v4  ;;  %7851 = vmatprep.mubr.msk.bf16.mxu1 %vm1539_vm10, %v7183_v11  ;;  %v1979_v0 = vsel %vm8929_vm12, %v9225_v59, %v1978_v47  ;;  %v9405_v24 = vsel %vm8940_vm7, %v9281_v35, %v2724_v62  ;;  %v9422_v53 = vld [vmem:[%s10837_s2 + $0x14] sm:$0xf] }
  0xeb   : > { %v7233_v51 = vcombine.low %v9239_v32, %v9394_v13  ;;  %v2017_v23 = vsel %vm8929_vm12, %v9342_v20, %v9344_v27  ;;  %v10920_v59 = vsel %vm8929_vm12, %v9209_v16, %v9187_v17  ;;  %v2003_v58 = vsel %vm8929_vm12, %v9290_v5, %v2002_v8  ;;  %v1248_v20 = vpop.permute.xlu1 %1247  ;;  %v1242_v27 = vpop.permute.xlu0 %1241  ;;  %v1416_v31 = vld [vmem:[#allocation2 + $0xbc] sm:$0x1]  ;;  %v9433_v49 = vld [vmem:[#allocation2 + $0x94] sm:$0xf]  ;;  %8121 = vmatprep.subr.msk.bf16.mxu1 %vm1588_vm9, %v9422_v53  ;;  %v9440_v21 = vld [vmem:[%s10837_s2 + $0x18] sm:$0xf] }
  0xec   : > { %v7184_v12 = vcombine.low %v10920_v59, %v1979_v0  ;;  %v2022_v48 = vrot.slane %v2021_v41, 4  ;;  %v2024_v35 = vshll.u32 %v1808_v56, 16  ;;  %v10921_v17 = vsel %vm8929_vm12, %v9274_v44, %v9257_v45  ;;  %v1817_v50 = vld [vmem:[#allocation2 + $0x80] sm:$0x1]  ;;  %8122 = vmatprep.subr.msk.bf16.mxu0 %vm1588_vm9, %v9440_v21  ;;  %7882 = vmatmul.mubr.msk.bf16.gmra.mxu0 %vm1539_vm10, %v7231_v46  ;;  %v10923_v41 = vld [vmem:[#allocation15_spill] sm:$0xff] }
  0xed   : > { %v7185_v16 = vcombine.low %v10921_v17, %v2003_v58  ;;  %v7234_v33 = vcombine.low %v9279_v34, %v9405_v24  ;;  %v2048_v5 = vshll.u32 %v1811_v2, 16  ;;  %v2730_v19 = vrot.slane %v2728_v42, 4  ;;  %v1814_v38 = vld [vmem:[#allocation2 + $0x74] sm:$0x1]  ;;  %7885 = vmatprep.mubr.msk.bf16.mxu0 %vm1539_vm10, %v7232_v57  ;;  %v2610_v10 = vld [vmem:[#allocation2 + $0x80] sm:$0x1] }
  0xee   : > { %v1410_v45 = vsel %vm9193_vm3, %v1248_v20, %v1409_v63  ;;  %v1403_v44 = vsel %vm9193_vm3, %v1242_v27, %v1402_v28  ;;  %v2026_v14 = vrot.slane %v2024_v35, 5  ;;  %v2731_v6 = vrot.slane %v2601_v60, 5  ;;  %v2607_v11 = vld [vmem:[#allocation2 + $0x74] sm:$0x1]  ;;  %v10922_v57 = vld [vmem:[#allocation16_spill] sm:$0xff]  ;;  %v10925_v26 = vld [vmem:[#allocation13_spill] sm:$0xff] }
  0xef   : > { %1411 = vst [vmem:[#allocation2 + $0xb0] sm:$0x1] %v1410_v45  ;;  %1404 = vst [vmem:[#allocation2 + $0xa4] sm:$0x1] %v1403_v44  ;;  %v2050_v55 = vrot.slane %v2048_v5, 5  ;;  %v2738_v25 = vrot.slane %v2604_v7, 5  ;;  %v9458_v39 = vsel %vm8940_vm7, %v7218_v3, %v2728_v42  ;;  %v1254_v63 = vpop.permute.xlu0 %1253 }
  0xf0   : > { %v2072_v43 = vshll.u32 %v1814_v38, 16  ;;  %v2096_v22 = vshll.u32 %v1817_v50, 16  ;;  %v2027_v30 = vsel %vm8929_vm12, %v2022_v48, %v2026_v14  ;;  %v9462_v46 = vsel %vm8940_vm7, %v2730_v19, %v2731_v6  ;;  %v10924_v42 = vld [vmem:[#allocation11_spill] sm:$0xff]  ;;  %v10927_v60 = vld [vmem:[#allocation20_spill] sm:$0xff]  ;;  %v10929_v20 = vld [vmem:[#allocation14_spill] sm:$0xff] }
  0xf1   : > { %v2745_v18 = vrot.slane %v2607_v11, 5  ;;  %v7186_v47 = vcombine.low %v2017_v23, %v2027_v30  ;;  %v2051_v62 = vsel %vm8929_vm12, %v10922_v57, %v2050_v55  ;;  %v9470_v37 = vsel %vm8940_vm7, %v10923_v41, %v2738_v25  ;;  %7852 = vmatmul.mubr.msk.bf16.gmra.mxu1 %vm1539_vm10, %v7184_v12  ;;  %v1820_v28 = vld [vmem:[#allocation2 + $0x8c] sm:$0x1]  ;;  %v1823_v0 = vld [vmem:[#allocation2 + $0x98] sm:$0x1]  ;;  %v10928_v48 = vld [vmem:[#allocation19_spill] sm:$0xff] }
  0xf2   : > { %v2763_v3 = vrot.slane %v9433_v49, 5  ;;  %v1417_v54 = vsel %vm9193_vm3, %v1254_v63, %v1416_v31  ;;  %v10926_v4 = vsel %vm8929_vm12, %v10924_v42, %v10925_v26  ;;  %v7235_v56 = vcombine.low %v9458_v39, %v9462_v46  ;;  %7855 = vmatprep.mubr.msk.bf16.mxu1 %vm1539_vm10, %v7185_v16  ;;  %v2613_v58 = vld [vmem:[#allocation2 + $0x8c] sm:$0x1]  ;;  %v2616_v5 = vld [vmem:[#allocation2 + $0x98] sm:$0x1]  ;;  %v10931_v45 = vld [vmem:[#allocation23_spill] sm:$0xff] }
  0xf3   : > { %v7187_v8 = vcombine.low %v10926_v4, %v2051_v62  ;;  %v2074_v2 = vrot.slane %v2072_v43, 5  ;;  %1418 = vst [vmem:[#allocation2 + $0xbc] sm:$0x1] %v1417_v54  ;;  %v2098_v23 = vrot.slane %v2096_v22, 5  ;;  %v9487_v7 = vsel %vm8940_vm7, %v10927_v60, %v2745_v18  ;;  %v1824_v16 = vld [vmem:[#allocation2 + $0x9c] sm:$0xf] }
  0xf4   : > { %v2752_v59 = vrot.slane %v2610_v10, 5  ;;  %v2120_v12 = vshll.u32 %v1820_v28, 16  ;;  %v7236_v35 = vcombine.low %v10928_v48, %v9470_v37  ;;  %v2144_v31 = vshll.u32 %v1823_v0, 16  ;;  %v10930_v19 = vld [vmem:[#allocation22_spill] sm:$0xff]  ;;  %v10932_v14 = vld [vmem:[#allocation21_spill] sm:$0xff]  ;;  %v10933_v50 = vld [vmem:[#allocation12_spill] sm:$0xff]  ;;  %7886 = vmatmul.mubr.msk.bf16.gmra.mxu0 %vm1539_vm10, %v7233_v51 }
  0xf5   : > { %v2075_v27 = vsel %vm8929_vm12, %v10929_v20, %v2074_v2  ;;  %v2759_v17 = vrot.slane %v2613_v58, 5  ;;  %v2099_v49 = vsel %vm8929_vm12, %v10930_v19, %v2098_v23  ;;  %v7237_v44 = vcombine.low %v10931_v45, %v9487_v7  ;;  %v10934_v55 = vld [vmem:[#allocation10_spill] sm:$0xff]  ;;  %v10936_v22 = vld [vmem:[#allocation17_spill] sm:$0xff]  ;;  %v10939_v41 = vld [vmem:[#allocation24_spill] sm:$0xff]  ;;  %7889 = vmatprep.mubr.msk.bf16.mxu0 %vm1539_vm10, %v7234_v33 }
  0xf6   : > { %v9502_v6 = vsel %vm8940_vm7, %v10932_v14, %v2752_v59  ;;  %v2122_v38 = vrot.slane %v2120_v12, 5  ;;  %v10935_v25 = vsel %vm8929_vm12, %v10933_v50, %v10934_v55  ;;  %v10937_v11 = vld [vmem:[#allocation18_spill] sm:$0xff]  ;;  %v2146_v10 = vrot.slane %v2144_v31, 5  ;;  %v1825_v57 = vld [vmem:[#allocation2 + $0xa0] sm:$0xf] }
  0xf7   : > { %v9509_v43 = vcombine.low %v10935_v25, %v2075_v27  ;;  %v10938_v30 = vsel %vm8929_vm12, %v10936_v22, %v10937_v11  ;;  %v9521_v63 = vsel %vm8940_vm7, %v9292_v61, %v2759_v17  ;;  %v1827_v62 = vld [vmem:[#allocation2 + $0xa8] sm:$0xf]  ;;  %v7238_v54 = vcombine.low %v10939_v41, %v9502_v6  ;;  %v1826_v61 = vld [vmem:[#allocation2 + $0xa4] sm:$0x1]  ;;  %v1828_v28 = vld [vmem:[#allocation2 + $0xac] sm:$0xf] }
  0xf8   : > { %v9516_v18 = vcombine.low %v10938_v30, %v2099_v49  ;;  %v10940_v42 = vld [vmem:[#allocation26_spill] sm:$0xff]  ;;  %v7239_v4 = vcombine.low %v9304_v40, %v9521_v63  ;;  %v2765_v2 = vrot.slane %v2763_v3, 4  ;;  %v2147_v32 = vsel %vm8929_vm12, %v9259_v1, %v2146_v10  ;;  %v10942_v60 = vld [vmem:[#allocation25_spill] sm:$0xff]  ;;  %v2617_v58 = vld [vmem:[#allocation2 + $0x9c] sm:$0xe] }
  0xf9   : > { %v2123_v26 = vsel %vm8929_vm12, %v10940_v42, %v2122_v38  ;;  %v10941_v13 = vrot.slane %v9235_v29, 9  ;;  %v2766_v0 = vrot.slane %v2616_v5, 5  ;;  %v2149_v23 = vshrl.u32 %v1824_v16, 16  ;;  %7856 = vmatmul.mubr.msk.bf16.gmra.mxu1 %vm1539_vm10, %v7186_v47  ;;  %v10944_v29 = vld [vmem:[#allocation28_spill] sm:$0xff]  ;;  %v10945_v1 = vld [vmem:[#allocation27_spill] sm:$0xff] }
  0xfa   : > { %v10943_v59 = vsel %vm8929_vm12, %v9201_v52, %v10942_v60  ;;  %v2152_v24 = vshll.u32 %v1824_v16, 16  ;;  %v2158_v33 = vshll.u32 %v1825_v57, 16  ;;  %v2162_v12 = vshrl.u32 %v1825_v57, 16  ;;  %v1829_v17 = vld [vmem:[#allocation2 + $0xb0] sm:$0x1]  ;;  %7859 = vmatprep.mubr.msk.bf16.mxu1 %vm1539_vm10, %v7187_v8 }
  0xfb   : > { %v9545_v51 = vsel %vm8940_vm7, %v10941_v13, %v2763_v3  ;;  %v9552_v34 = vcombine.low %v10943_v59, %v2123_v26  ;;  %v10946_v3 = vsel %vm8929_vm12, %v10944_v29, %v10945_v1  ;;  %v2151_v27 = vrot.slane %v2149_v23, 4  ;;  %v2618_v49 = vld [vmem:[#allocation2 + $0xa0] sm:$0xf]  ;;  %v2619_v10 = vld [vmem:[#allocation2 + $0xa4] sm:$0x1] }
  0xfc   : > { %v9560_v20 = vcombine.low %v10946_v3, %v2147_v32  ;;  %v2168_v31 = vshll.u32 %v1826_v61, 16  ;;  %v2173_v5 = vshrl.u32 %v1827_v62, 16  ;;  %v9565_v52 = vsel %vm8940_vm7, %v2765_v2, %v2766_v0  ;;  %v2620_v57 = vld [vmem:[#allocation2 + $0xa8] sm:$0xe]  ;;  %v2621_v42 = vld [vmem:[#allocation2 + $0xac] sm:$0xf]  ;;  %7890 = vmatmul.mubr.msk.bf16.gmra.mxu0 %vm1539_vm10, %v7235_v56 }
  0xfd   : > { %v2154_v16 = vrot.slane %v2152_v24, 5  ;;  %v2160_v19 = vrot.slane %v2158_v33, 5  ;;  %v2164_v47 = vrot.slane %v2162_v12, 4  ;;  %v2176_v50 = vshll.u32 %v1827_v62, 16  ;;  %v1830_v32 = vld [vmem:[#allocation2 + $0xb4] sm:$0xf]  ;;  %7893 = vmatprep.mubr.msk.bf16.mxu0 %vm1539_vm10, %v7236_v35 }
  0xfe   : > { %v2170_v14 = vrot.slane %v2168_v31, 5  ;;  %v2175_v38 = vrot.slane %v2173_v5, 4  ;;  %v2182_v55 = vshll.u32 %v1828_v28, 16  ;;  %v2186_v11 = vshrl.u32 %v1828_v28, 16  ;;  %v2622_v60 = vld [vmem:[#allocation2 + $0xb0] sm:$0x1] }
  0xff   : > { %v2155_v25 = vor.u32 %v2154_v16, %v2151_v27  ;;  %v2165_v22 = vor.u32 %v2164_v47, %v2160_v19  ;;  %v2192_v30 = vshll.u32 %v1829_v17, 16  ;;  %v2178_v8 = vrot.slane %v2176_v50, 5  ;;  %v1831_v37 = vld [vmem:[#allocation2 + $0xb8] sm:$0xf]  ;;  %v2623_v1 = vld [vmem:[#allocation2 + $0xb4] sm:$0xe] }
 0x100   : > { %v2184_v26 = vrot.slane %v2182_v55, 5  ;;  %v7224_v61 = vrot.slane %v2617_v58, 9  ;;  %v2770_v2 = vrot.slane %v2618_v49, 5  ;;  %v2188_v0 = vrot.slane %v2186_v11, 4  ;;  %v1832_v17 = vld [vmem:[#allocation2 + $0xbc] sm:$0x1] }
 0x101   : > { %v2156_v13 = vrot.slane %v2155_v25, 4  ;;  %v2166_v62 = vrot.slane %v2165_v22, 4  ;;  %v2194_v23 = vrot.slane %v2192_v30, 5  ;;  %v7240_v28 = vcombine.low %v9545_v51, %v9565_v52  ;;  %7860 = vmatmul.mubr.msk.bf16.gmra.mxu1 %vm1539_vm10, %v9509_v43  ;;  %v2624_v16 = vld [vmem:[#allocation2 + $0xb8] sm:$0xf] }
 0x102   : > { %v2179_v59 = vor.u32 %v2178_v8, %v2175_v38  ;;  %v2772_v24 = vrot.slane %v2770_v2, 4  ;;  %v2773_v33 = vrot.slane %v2619_v10, 5  ;;  %v2189_v56 = vor.u32 %v2188_v0, %v2184_v26  ;;  %7863 = vmatprep.mubr.msk.bf16.mxu1 %vm1539_vm10, %v9516_v18  ;;  %v3570_v38 = vld [vmem:[#allocation2 + $0x10] sm:$0xf]  ;;  %v2625_v22 = vld [vmem:[#allocation2 + $0xbc] sm:$0x1] }
 0x103   : > { %v2161_v39 = vsel %vm8929_vm12, %v2156_v13, %v2160_v19  ;;  %v2171_v46 = vsel %vm8929_vm12, %v2166_v62, %v2170_v14  ;;  %v9583_v12 = vsel %vm8940_vm7, %v7224_v61, %v2770_v2  ;;  %v7225_v58 = vrot.slane %v2620_v57, 9  ;;  %v3569_v14 = vld [vmem:[#allocation2 + $0xc] sm:$0xf]  ;;  %v3571_v7 = vld [vmem:[#allocation2 + $0x14] sm:$0x1] }
 0x104   : > { %v2180_v48 = vrot.slane %v2179_v59, 4  ;;  %v9589_v35 = vsel %vm8940_vm7, %v2772_v24, %v2773_v33  ;;  %v2777_v29 = vrot.slane %v2621_v42, 5  ;;  %v9593_v3 = vcombine.low %v2161_v39, %v2171_v46  ;;  %7894 = vmatmul.mubr.msk.bf16.gmra.mxu0 %vm1539_vm10, %v7237_v44  ;;  %v3572_v41 = vld [vmem:[#allocation2 + $0x18] sm:$0xf]  ;;  %v3577_v63 = vld [vmem:[#allocation2 + $0x2c] sm:$0x1] }
 0x105   : > { %v2190_v27 = vrot.slane %v2189_v56, 4  ;;  %v2780_v31 = vrot.slane %v2622_v60, 5  ;;  %v2197_v5 = vshrl.u32 %v1830_v32, 16  ;;  %v7241_v19 = vcombine.low %v9583_v12, %v9589_v35  ;;  %7897 = vmatprep.mubr.msk.bf16.mxu0 %vm1539_vm10, %v7238_v54  ;;  %v3573_v56 = vld [vmem:[#allocation2 + $0x1c] sm:$0xf] }
 0x106   : > { %v2185_v43 = vsel %vm8929_vm12, %v2180_v48, %v2184_v26  ;;  %v2779_v47 = vrot.slane %v2777_v29, 4  ;;  %v2200_v49 = vshll.u32 %v1830_v32, 16  ;;  %v2206_v55 = vshll.u32 %v1831_v37, 16 }
 0x107   : > { %v2195_v18 = vsel %vm8929_vm12, %v2190_v27, %v2194_v23  ;;  %v2199_v50 = vrot.slane %v2197_v5, 4  ;;  %v2210_v25 = vshrl.u32 %v1831_v37, 16  ;;  %v9605_v30 = vsel %vm8940_vm7, %v7225_v58, %v2777_v29  ;;  %v3574_v29 = vld [vmem:[#allocation2 + $0x20] sm:$0x1] }
 0x108   : > { %v9601_v11 = vcombine.low %v2185_v43, %v2195_v18  ;;  %v2202_v10 = vrot.slane %v2200_v49, 5  ;;  %v2216_v57 = vshll.u32 %v1832_v17, 16  ;;  %v9613_v42 = vsel %vm8940_vm7, %v2779_v47, %v2780_v31  ;;  %v3575_v17 = vld [vmem:[#allocation2 + $0x24] sm:$0xf] }
 0x109   : > { %v2208_v8 = vrot.slane %v2206_v55, 5  ;;  %v2212_v26 = vrot.slane %v2210_v25, 4  ;;  %v7226_v61 = vrot.slane %v2623_v1, 9  ;;  %v2784_v13 = vrot.slane %v2624_v16, 5  ;;  %7864 = vmatmul.mubr.msk.bf16.gmra.mxu1 %vm1539_vm10, %v9552_v34 }
 0x10a   : > { %v2203_v2 = vor.u32 %v2202_v10, %v2199_v50  ;;  %v2218_v32 = vrot.slane %v2216_v57, 5  ;;  %v2787_v62 = vrot.slane %v2625_v22, 5  ;;  %v3618_v45 = vshrl.u32 %v3569_v14, 16  ;;  %7867 = vmatprep.mubr.msk.bf16.mxu1 %vm1539_vm10, %v9560_v20  ;;  %v3576_v22 = vld [vmem:[#allocation2 + $0x28] sm:$0xf] }
 0x10b   : > { %v2213_v0 = vor.u32 %v2212_v26, %v2208_v8  ;;  %v3621_v44 = vshll.u32 %v3569_v14, 16  ;;  %v3627_v23 = vshll.u32 %v3570_v38, 16  ;;  %v7242_v60 = vcombine.low %v9605_v30, %v9613_v42  ;;  %v3578_v26 = vld [vmem:[#allocation2 + $0x30] sm:$0xf] }
 0x10c   : > { %v2204_v59 = vrot.slane %v2203_v2, 4  ;;  %v2786_v24 = vrot.slane %v2784_v13, 4  ;;  %v3631_v6 = vshrl.u32 %v3570_v38, 16  ;;  %v9627_v33 = vsel %vm8940_vm7, %v7226_v61, %v2784_v13  ;;  %7898 = vmatmul.mubr.msk.bf16.gmra.mxu0 %vm1539_vm10, %v7239_v4 }
 0x10d   : > { %v2214_v54 = vrot.slane %v2213_v0, 4  ;;  %v3620_v39 = vrot.slane %v3618_v45, 4  ;;  %v3623_v46 = vrot.slane %v3621_v44, 5  ;;  %v3629_v37 = vrot.slane %v3627_v23, 5  ;;  %7901 = vmatprep.mubr.msk.bf16.mxu0 %vm1539_vm10, %v7240_v28 }
 0x10e   : > { %v9631_v34 = vsel %vm8940_vm7, %v2786_v24, %v2787_v62  ;;  %v3633_v48 = vrot.slane %v3631_v6, 4  ;;  %v3637_v58 = vshll.u32 %v3571_v7, 16  ;;  %v2209_v1 = vsel %vm8929_vm12, %v2204_v59, %v2208_v8  ;;  %v3579_v7 = vld [vmem:[#allocation2 + $0x34] sm:$0xf] }
 0x10f   : > { %v2219_v20 = vsel %vm8929_vm12, %v2214_v54, %v2218_v32  ;;  %v3624_v27 = vor.u32 %v3623_v46, %v3620_v39  ;;  %v9639_v31 = vsel %vm1588_vm9, %v9422_v53, 0  ;;  %v7243_v5 = vcombine.low %v9627_v33, %v9631_v34  ;;  %v3580_v54 = vld [vmem:[#allocation2 + $0x38] sm:$0x1]  ;;  %v8151_v46 = vld [vmem:[#allocation2 + $0xc] sm:$0xff]  }
 0x110   : > { %v3634_v16 = vor.u32 %v3633_v48, %v3629_v37  ;;  %v3639_v43 = vrot.slane %v3637_v58, 5  ;;  %v3642_v47 = vshrl.u32 %v3572_v41, 16  ;;  %v3645_v14 = vshll.u32 %v3572_v41, 16 }
 0x111   : > { %v3625_v49 = vrot.slane %v3624_v27, 4  ;;  %v3651_v38 = vshll.u32 %v3573_v56, 16  ;;  %v3655_v18 = vshrl.u32 %v3573_v56, 16  ;;  %v7194_v53 = vcombine.low %v2209_v1, %v2219_v20  ;;  %7868 = vmatmul.mubr.msk.bf16.gmra.mxu1 %vm1539_vm10, %v9593_v3 }
 0x112   : > { %v3635_v50 = vrot.slane %v3634_v16, 4  ;;  %v3644_v55 = vrot.slane %v3642_v47, 4  ;;  %v3661_v25 = vshll.u32 %v3574_v29, 16  ;;  %v3647_v10 = vrot.slane %v3645_v14, 5  ;;  %7871 = vmatprep.mubr.msk.bf16.mxu1 %vm1539_vm10, %v9601_v11  ;;  %v3581_v11 = vld [vmem:[#allocation2 + $0x3c] sm:$0xf] }
 0x113   : > { %v3653_v57 = vrot.slane %v3651_v38, 5  ;;  %v3657_v8 = vrot.slane %v3655_v18, 4  ;;  %v9653_v40 = vsel %vm1588_vm9, %v9440_v21, 0  ;;  %v3630_v4 = vsel %vm8929_vm12, %v3625_v49, %v3629_v37 }
 0x114   : > { %v3640_v51 = vsel %vm8929_vm12, %v3635_v50, %v3639_v43  ;;  %v3666_v52 = vshrl.u32 %v3575_v17, 16  ;;  %v3669_v28 = vshll.u32 %v3575_v17, 16  ;;  %v3648_v61 = vor.u32 %v3647_v10, %v3644_v55  ;;  %7902 = vmatmul.mubr.msk.bf16.gmra.mxu0 %vm1539_vm10, %v7241_v19  ;;  %v3582_v19 = vld [vmem:[#allocation2 + $0x40] sm:$0xf]  ;;  %v3584_v50 = vld [vmem:[#allocation2 + $0x48] sm:$0xf] }
 0x115   : > { %v3658_v2 = vor.u32 %v3657_v8, %v3653_v57  ;;  %v3663_v21 = vrot.slane %v3661_v25, 5  ;;  %v3675_v32 = vshll.u32 %v3576_v22, 16  ;;  %v3679_v0 = vshrl.u32 %v3576_v22, 16  ;;  %7905 = vmatprep.mubr.msk.bf16.mxu0 %vm1539_vm10, %v7242_v60  ;;  %v3583_v60 = vld [vmem:[#allocation2 + $0x44] sm:$0x1] }
 0x116   : > { %v3668_v13 = vrot.slane %v3666_v52, 4  ;;  %v3671_v62 = vrot.slane %v3669_v28, 5  ;;  %v3685_v3 = vshll.u32 %v3577_v63, 16  ;;  %v3649_v45 = vrot.slane %v3648_v61, 4  ;;  %v3585_v10 = vld [vmem:[#allocation2 + $0x4c] sm:$0xf] }
 0x117   : > { %v3659_v44 = vrot.slane %v3658_v2, 4  ;;  %v9663_v23 = vrot.slane %v3675_v32, 5  ;;  %v3690_v59 = vshrl.u32 %v3578_v26, 16  ;;  %v7294_v24 = vcombine.low %v3630_v4, %v3640_v51  ;;  %v3586_v51 = vld [vmem:[#allocation2 + $0x50] sm:$0x1] }
 0x118   : > { %v3672_v6 = vor.u32 %v3671_v62, %v3668_v13  ;;  %v3681_v41 = vrot.slane %v3679_v0, 4  ;;  %v3693_v39 = vshll.u32 %v3578_v26, 16  ;;  %v3687_v37 = vrot.slane %v3685_v3, 5  ;;  %v3587_v2 = vld [vmem:[#allocation2 + $0x54] sm:$0xf]  ;;  %v8152_v3 = vld [vmem:[#allocation2 + $0x18] sm:$0xff]  }
 0x119   : > { %v3664_v56 = vsel %vm8929_vm12, %v3659_v44, %v3663_v21  ;;  %v3692_v48 = vrot.slane %v3690_v59, 4  ;;  %v3699_v58 = vshll.u32 %v3579_v7, 16  ;;  %v3654_v29 = vsel %vm8929_vm12, %v3649_v45, %v3653_v57  ;;  %7872 = vmatmul.mubr.msk.bf16.gmra.mxu1 %vm1539_vm10, %v7194_v53  ;;  %v3588_v0 = vld [vmem:[#allocation2 + $0x58] sm:$0xf]  ;;  %v8153_v59 = vld [vmem:[#allocation2 + $0x24] sm:$0xff]  }
 0x11a   : > { %v3673_v1 = vrot.slane %v3672_v6, 4  ;;  %v3682_v12 = vor.u32 %v3681_v41, %v9663_v23  ;;  %v3695_v35 = vrot.slane %v3693_v39, 5  ;;  %v3703_v27 = vshrl.u32 %v3579_v7, 16  ;;  %7911 = vmatprep.mubr.msk.bf16.mxu1 %vm1539_vm10, %v8151_v46 }
 0x11b   : > { %v3701_v20 = vrot.slane %v3699_v58, 5  ;;  %v3709_v17 = vshll.u32 %v3580_v54, 16  ;;  %v3714_v16 = vshrl.u32 %v3581_v11, 16  ;;  %v9679_v43 = vcombine.low %v3654_v29, %v3664_v56  ;;  %v3589_v56 = vld [vmem:[#allocation2 + $0x5c] sm:$0x1] }
 0x11c   : > { %v3678_v30 = vsel %vm8929_vm12, %v3673_v1, %v9663_v23  ;;  %v3696_v42 = vor.u32 %v3695_v35, %v3692_v48  ;;  %v3717_v47 = vshll.u32 %v3581_v11, 16  ;;  %v3683_v49 = vrot.slane %v3682_v12, 4  ;;  %7906 = vmatmul.mubr.msk.bf16.gmra.mxu0 %vm1539_vm10, %v7243_v5  ;;  %v3590_v35 = vld [vmem:[#allocation2 + $0x60] sm:$0xf] }
 0x11d   : > { %v3705_v14 = vrot.slane %v3703_v27, 4  ;;  %v3716_v38 = vrot.slane %v3714_v16, 4  ;;  %v3723_v18 = vshll.u32 %v3582_v19, 16  ;;  %v3711_v25 = vrot.slane %v3709_v17, 5  ;;  %7945 = vmatprep.mubr.msk.bf16.mxu0 %vm1539_vm10, %v7294_v24  ;;  %v3591_v16 = vld [vmem:[#allocation2 + $0x64] sm:$0xf] }
 0x11e   : > { %v3697_v55 = vrot.slane %v3696_v42, 4  ;;  %v3719_v22 = vrot.slane %v3717_v47, 5  ;;  %v3727_v53 = vshrl.u32 %v3582_v19, 16  ;;  %v3688_v57 = vsel %vm8929_vm12, %v3683_v49, %v3687_v37 }
 0x11f   : > { %v3706_v8 = vor.u32 %v3705_v14, %v3701_v20  ;;  %v3725_v63 = vrot.slane %v3723_v18, 5  ;;  %v3733_v4 = vshll.u32 %v3583_v60, 16  ;;  %v3738_v61 = vshrl.u32 %v3584_v50, 16 }
 0x120   : > { %v3702_v52 = vsel %vm8929_vm12, %v3697_v55, %v3701_v20  ;;  %v3720_v28 = vor.u32 %v3719_v22, %v3716_v38  ;;  %v3729_v26 = vrot.slane %v3727_v53, 4  ;;  %v3741_v13 = vshll.u32 %v3584_v50, 16  ;;  %v3592_v38 = vld [vmem:[#allocation2 + $0x68] sm:$0x1]  ;;  %v3593_v55 = vld [vmem:[#allocation2 + $0x6c] sm:$0xf] }
 0x121   : > { %v3707_v21 = vrot.slane %v3706_v8, 4  ;;  %v3735_v32 = vrot.slane %v3733_v4, 5  ;;  %v3747_v62 = vshll.u32 %v3585_v10, 16  ;;  %v3740_v44 = vrot.slane %v3738_v61, 4  ;;  %7912 = vmatmul.mubr.msk.bf16.vlgmr.msra.gmra.mxu1 %vm1539_vm10, %v8152_v3 }
 0x122   : > { %v3721_v7 = vrot.slane %v3720_v28, 4  ;;  %v3730_v45 = vor.u32 %v3729_v26, %v3725_v63  ;;  %v3751_v23 = vshrl.u32 %v3585_v10, 16  ;;  %v3743_v41 = vrot.slane %v3741_v13, 5  ;;  %7915 = vmatprep.mubr.msk.bf16.mxu1 %vm1539_vm10, %v8153_v59  ;;  %7978 = vmatpush3.bf16.msra.mxu1 %v9639_v31  ;;  %v8154_v31 = vld [vmem:[#allocation2 + $0x30] sm:$0xff]  }
 0x123   : > { %v3712_v6 = vsel %vm8929_vm12, %v3707_v21, %v3711_v25  ;;  %v3749_v33 = vrot.slane %v3747_v62, 5  ;;  %v3757_v34 = vshll.u32 %v3586_v51, 16  ;;  %v7296_v5 = vcombine.low %v3678_v30, %v3688_v57  ;;  %v8155_v57 = vld [vmem:[#allocation2 + $0x3c] sm:$0xff]   ;;  %v3594_v51 = vld [vmem:[#allocation2 + $0x70] sm:$0xf] }
 0x124   : > { %v9697_v54 = vcombine.low %v3702_v52, %v3712_v6  ;;  %v3731_v39 = vrot.slane %v3730_v45, 4  ;;  %v3753_v11 = vrot.slane %v3751_v23, 4  ;;  %v3744_v24 = vor.u32 %v3743_v41, %v3740_v44  ;;  %7946 = vmatmul.mubr.msk.bf16.vlgmr.msra.gmra.mxu0 %vm1539_vm10, %v9679_v43  ;;  %v3595_v21 = vld [vmem:[#allocation2 + $0x74] sm:$0x1]  ;;  %v327_v62 = vld [vmem:[#allocation2 + $0xc0] sm:$0x1] }
 0x125   : > { %v3759_v46 = vrot.slane %v3757_v34, 5  ;;  %v3762_v37 = vshrl.u32 %v3587_v2, 16  ;;  %v3765_v48 = vshll.u32 %v3587_v2, 16  ;;  %v3771_v1 = vshll.u32 %v3588_v0, 16  ;;  %8012 = vmatpush3.bf16.msra.mxu0 %v9653_v40  ;;  %7949 = vmatprep.mubr.msk.bf16.mxu0 %vm1539_vm10, %v7296_v5  ;;  %v419_v44 = vld [vmem:[%s8400_s27 + $0x78] sm:$0xf] }
 0x126   : > { %v3736_v58 = vsel %vm8929_vm12, %v3731_v39, %v3735_v32  ;;  %v3754_v29 = vor.u32 %v3753_v11, %v3749_v33  ;;  %v3775_v12 = vshrl.u32 %v3588_v0, 16  ;;  %v3726_v19 = vsel %vm8929_vm12, %v3721_v7, %v3725_v63  ;;  %v420_v23 = vld [vmem:[%s8400_s27 + $0x7c] sm:$0xf]  ;;  %v3596_v34 = vld [vmem:[#allocation2 + $0x78] sm:$0xf]  ;;  %v8156_v5 = vld [vmem:[#allocation2 + $0x48] sm:$0xff]  }
 0x127   : > { %v3745_v20 = vrot.slane %v3744_v24, 4  ;;  %v3764_v27 = vrot.slane %v3762_v37, 4  ;;  %v3767_v17 = vrot.slane %v3765_v48, 5  ;;  %v9705_v42 = vrot.slane %v3771_v1, 5  ;;  %v8157_v37 = vld [vmem:[#allocation2 + $0x54] sm:$0xff]  }
 0x128   : > { %v3755_v30 = vrot.slane %v3754_v29, 4  ;;  %v3777_v60 = vrot.slane %v3775_v12, 4  ;;  %v3781_v47 = vshll.u32 %v3589_v56, 16  ;;  %v7298_v49 = vcombine.low %v3726_v19, %v3736_v58  ;;  %v9735_v56 = vld [vmem:[%s10837_s2 + $0x1c] sm:$0xf] }
 0x129   : > { %v3768_v14 = vor.u32 %v3767_v17, %v3764_v27  ;;  %v3786_v18 = vshrl.u32 %v3590_v35, 16  ;;  %v3789_v50 = vshll.u32 %v3590_v35, 16  ;;  %v3795_v10 = vshll.u32 %v3591_v16, 16  ;;  %7916 = vmatmul.mubr.msk.bf16.gmra.mxu1 %vm1539_vm10, %v8154_v31  ;;  %8123 = vmatprep.subr.msk.bf16.mxu1 %vm1588_vm9, %v9735_v56  ;;  %v9748_v35 = vld [vmem:[%s10837_s2 + $0x20] sm:$0xf] }
 0x12a   : > { %v3760_v25 = vsel %vm8929_vm12, %v3755_v30, %v3759_v46  ;;  %v3778_v22 = vor.u32 %v3777_v60, %v9705_v42  ;;  %v9714_v53 = vrot.slane %v3781_v47, 5  ;;  %v3750_v43 = vsel %vm8929_vm12, %v3745_v20, %v3749_v33  ;;  %7919 = vmatprep.mubr.msk.bf16.mxu1 %vm1539_vm10, %v8155_v57  ;;  %v3597_v17 = vld [vmem:[#allocation2 + $0x7c] sm:$0xf]  ;;  %8124 = vmatprep.subr.msk.bf16.mxu0 %vm1588_vm9, %v9748_v35 }
 0x12b   : > { %v3769_v8 = vrot.slane %v3768_v14, 4  ;;  %v3788_v63 = vrot.slane %v3786_v18, 4  ;;  %v3791_v4 = vrot.slane %v3789_v50, 5  ;;  %v3797_v52 = vrot.slane %v3795_v10, 5  ;;  %v3599_v18 = vld [vmem:[#allocation2 + $0x84] sm:$0xf] }
 0x12c   : > { %v3779_v40 = vrot.slane %v3778_v22, 4  ;;  %v3799_v28 = vshrl.u32 %v3591_v16, 16  ;;  %v3805_v26 = vshll.u32 %v3592_v38, 16  ;;  %v9720_v61 = vcombine.low %v3750_v43, %v3760_v25  ;;  %7950 = vmatmul.mubr.msk.bf16.gmra.mxu0 %vm1539_vm10, %v9697_v54  ;;  %v3598_v16 = vld [vmem:[#allocation2 + $0x80] sm:$0x1] }
 0x12d   : > { %v3792_v2 = vor.u32 %v3791_v4, %v3788_v63  ;;  %v3810_v32 = vshrl.u32 %v3593_v55, 16  ;;  %v3813_v13 = vshll.u32 %v3593_v55, 16  ;;  %v3774_v0 = vsel %vm8929_vm12, %v3769_v8, %v9705_v42  ;;  %7953 = vmatprep.mubr.msk.bf16.mxu0 %vm1539_vm10, %v7298_v49  ;;  %v3600_v8 = vld [vmem:[#allocation2 + $0x88] sm:$0xf] }
 0x12e   : > { %v3784_v3 = vsel %vm8929_vm12, %v3779_v40, %v9714_v53  ;;  %v3801_v7 = vrot.slane %v3799_v28, 4  ;;  %v3819_v45 = vshll.u32 %v3594_v51, 16  ;;  %v3807_v6 = vrot.slane %v3805_v26, 5  ;;  %v3601_v40 = vld [vmem:[#allocation2 + $0x8c] sm:$0x1]  ;;  %v8158_v28 = vld [vmem:[#allocation2 + $0x60] sm:$0xff]  }
 0x12f   : > { %v3793_v59 = vrot.slane %v3792_v2, 4  ;;  %v3812_v41 = vrot.slane %v3810_v32, 4  ;;  %v3815_v33 = vrot.slane %v3813_v13, 5  ;;  %v3823_v24 = vshrl.u32 %v3594_v51, 16  ;;  %v383_v13 = vld [vmem:[#allocation2 + $0xc8] sm:$0x1] }
 0x130   : > { %v3802_v39 = vor.u32 %v3801_v7, %v3797_v52  ;;  %v9730_v11 = vrot.slane %v3819_v45, 5  ;;  %v3829_v46 = vshll.u32 %v3595_v21, 16  ;;  %v328_v1 = vsel %vm8235_vm2, 0, %v327_v62  ;;  %v3602_v62 = vld [vmem:[#allocation2 + $0x90] sm:$0xf] }
 0x131   : > { %v3798_v48 = vsel %vm8929_vm12, %v3793_v59, %v3797_v52  ;;  %v3816_v58 = vor.u32 %v3815_v33, %v3812_v41  ;;  %v679_v12 = vshrl.u32 %v419_v44, 16  ;;  %v3825_v19 = vrot.slane %v3823_v24, 4  ;;  %329 = vst [vmem:[#allocation2 + $0xc0] sm:$0x1] %v328_v1  ;;  %7920 = vmatmul.mubr.msk.bf16.gmra.mxu1 %vm1539_vm10, %v8156_v5  ;;  %v3603_v59 = vld [vmem:[#allocation2 + $0x94] sm:$0xf] }
 0x132   : > { %v3803_v54 = vrot.slane %v3802_v39, 4  ;;  %v3831_v20 = vrot.slane %v3829_v46, 5  ;;  %v682_v27 = vshll.u32 %v419_v44, 16  ;;  %v687_v42 = vshrl.u32 %v420_v23, 16  ;;  %7923 = vmatprep.mubr.msk.bf16.mxu1 %vm1539_vm10, %v8157_v37 }
 0x133   : > { %v3817_v31 = vrot.slane %v3816_v58, 4  ;;  %v681_v30 = vrot.slane %v679_v12, 7  ;;  %v690_v60 = vshll.u32 %v420_v23, 16  ;;  %v3826_v49 = vor.u32 %v3825_v19, %v9730_v11 }
 0x134   : > { %v3808_v47 = vsel %vm8929_vm12, %v3803_v54, %v3807_v6  ;;  %v3834_v14 = vshrl.u32 %v3596_v34, 16  ;;  %v3837_v38 = vshll.u32 %v3596_v34, 16  ;;  %v7300_v50 = vcombine.low %v3774_v0, %v3784_v3  ;;  %7954 = vmatmul.mubr.msk.bf16.gmra.mxu0 %vm1539_vm10, %v9720_v61  ;;  %v1258_v3 = vpop.permute.xlu0 %1257 }
 0x135   : > { %v9758_v55 = vcombine.low %v3798_v48, %v3808_v47  ;;  %v684_v25 = vor.u32 %v682_v27, %v681_v30  ;;  %v685_v22 = vrot.slane %v681_v30, 4  ;;  %v3827_v53 = vrot.slane %v3826_v49, 4  ;;  %v3605_v47 = vld [vmem:[#allocation2 + $0x9c] sm:$0xf] }
 0x136   : > { %v9760_v10 = vrot.slane %v687_v42, 7  ;;  %v3836_v57 = vrot.slane %v3834_v14, 4  ;;  %v3839_v43 = vrot.slane %v3837_v38, 5  ;;  %v3843_v63 = vshll.u32 %v3597_v17, 16  ;;  %7957 = vmatprep.mubr.msk.bf16.mxu0 %vm1539_vm10, %v7300_v50  ;;  %v3606_v50 = vld [vmem:[#allocation2 + $0xa0] sm:$0xf] }
 0x137   : > { %v3847_v4 = vshrl.u32 %v3597_v17, 16  ;;  %v3853_v51 = vshll.u32 %v3598_v16, 16  ;;  %v3858_v52 = vshrl.u32 %v3599_v18, 16  ;;  %v3822_v26 = vsel %vm8929_vm12, %v3817_v31, %v9730_v11  ;;  %v8159_v11 = vld [vmem:[#allocation2 + $0x6c] sm:$0xff]   ;;  %v3604_v16 = vld [vmem:[#allocation2 + $0x98] sm:$0x1] }
 0x138   : > { %v3832_v2 = vsel %vm8929_vm12, %v3827_v53, %v3831_v20  ;;  %v692_v21 = vor.u32 %v690_v60, %v9760_v10  ;;  %v3840_v32 = vor.u32 %v3839_v43, %v3836_v57  ;;  %v854_v0 = vld [vmem:[#allocation2 + $0xc0] sm:$0xf]  ;;  %v694_v7 = vrot.slane %v9760_v10, 4 }
 0x139   : > { %v3845_v45 = vrot.slane %v3843_v63, 5  ;;  %v3849_v44 = vrot.slane %v3847_v4, 4  ;;  %v3855_v23 = vrot.slane %v3853_v51, 5  ;;  %v855_v41 = vsel %vm8458_vm8, %v684_v25, %v854_v0  ;;  %7924 = vmatmul.mubr.msk.bf16.gmra.mxu1 %vm1539_vm10, %v8158_v28  ;;  %v1256_v25 = vpop.permute.xlu1 %1255  ;;  %v3607_v51 = vld [vmem:[#allocation2 + $0xa4] sm:$0x1]  ;;  %v8160_v28 = vld [vmem:[#allocation2 + $0x78] sm:$0xff]  }
 0x13a   : > { %v693_v34 = vsel %vm8280_vm5, %v685_v22, %v692_v21  ;;  %v3841_v5 = vrot.slane %v3840_v32, 4  ;;  %v3860_v39 = vrot.slane %v3858_v52, 4  ;;  %856 = vst [vmem:[#allocation2 + $0xc0] sm:$0xf] %v855_v41  ;;  %vm10950_vm0 = vcmask 27648   ;;  %7927 = vmatprep.mubr.msk.bf16.mxu1 %vm1539_vm10, %v8159_v11  ;;  %v8161_v0 = vld [vmem:[#allocation2 + $0x84] sm:$0xff]  }
 0x13b   : > { %857 = vst.msk [vmem:[#allocation2 + $0xc4] sm:$0xf] %vm10950_vm0, %v693_v34  ;;  %v3850_v61 = vor.u32 %v3849_v44, %v3845_v45  ;;  %v3861_v24 = vshll.u32 %v3599_v18, 16  ;;  %v3867_v46 = vshll.u32 %v3600_v8, 16  ;;  %v3871_v37 = vshrl.u32 %v3600_v8, 16 }
 0x13c   : > { %v7302_v48 = vcombine.low %v3822_v26, %v3832_v2  ;;  %1422 = vst.msk [vmem:[#allocation2 + $0xc4] sm:$0xf] %vm1309_vm14, %v1258_v3  ;;  %v3877_v58 = vshll.u32 %v3601_v40, 16  ;;  %v384_v12 = vsel %vm8693_vm11, 0, %v383_v13  ;;  %v3882_v54 = vshrl.u32 %v3602_v62, 16  ;;  %7958 = vmatmul.mubr.msk.bf16.gmra.mxu0 %vm1539_vm10, %v9758_v55 }
 0x13d   : > { %v3851_v19 = vrot.slane %v3850_v61, 4  ;;  %v3863_v20 = vrot.slane %v3861_v24, 5  ;;  %v9782_v27 = vrot.slane %v3867_v46, 5  ;;  %v3873_v17 = vrot.slane %v3871_v37, 4  ;;  %385 = vst [vmem:[#allocation2 + $0xc8] sm:$0x1] %v384_v12 }
 0x13e   : > { %v3846_v31 = vsel %vm8929_vm12, %v3841_v5, %v3845_v45  ;;  %v3884_v30 = vrot.slane %v3882_v54, 4  ;;  %v3885_v42 = vshll.u32 %v3602_v62, 16  ;;  %v3891_v60 = vshll.u32 %v3603_v59, 16  ;;  %v3608_v52 = vld [vmem:[#allocation2 + $0xa8] sm:$0xf]  ;;  %7961 = vmatprep.mubr.msk.bf16.mxu0 %vm1539_vm10, %v7302_v48 }
 0x13f   : > { %v3856_v49 = vsel %vm8929_vm12, %v3851_v19, %v3855_v23  ;;  %v3864_v14 = vor.u32 %v3863_v20, %v3860_v39  ;;  %v3874_v38 = vor.u32 %v3873_v17, %v9782_v27  ;;  %v3895_v18 = vshrl.u32 %v3603_v59, 16  ;;  %v3609_v62 = vld [vmem:[#allocation2 + $0xac] sm:$0xf] }
 0x140   : > { %v3879_v22 = vrot.slane %v3877_v58, 5  ;;  %v3887_v53 = vrot.slane %v3885_v42, 5  ;;  %v3893_v57 = vrot.slane %v3891_v60, 5  ;;  %v3901_v43 = vshll.u32 %v3604_v16, 16  ;;  %v3610_v58 = vld [vmem:[#allocation2 + $0xb0] sm:$0x1] }
 0x141   : > { %v7303_v8 = vcombine.low %v3846_v31, %v3856_v49  ;;  %v3865_v63 = vrot.slane %v3864_v14, 4  ;;  %v3897_v4 = vrot.slane %v3895_v18, 4  ;;  %v3906_v40 = vshrl.u32 %v3605_v47, 16  ;;  %v1419_v26 = vld [vmem:[#allocation2 + $0xc0] sm:$0xf]  ;;  %7928 = vmatmul.mubr.msk.bf16.gmra.mxu1 %vm1539_vm10, %v8160_v28  ;;  %v8162_v42 = vld [vmem:[#allocation2 + $0x90] sm:$0xff]  }
 0x142   : > { %v3875_v2 = vrot.slane %v3874_v38, 4  ;;  %v3888_v21 = vor.u32 %v3887_v53, %v3884_v30  ;;  %v3909_v32 = vshll.u32 %v3605_v47, 16  ;;  %v3915_v13 = vshll.u32 %v3606_v50, 16  ;;  %7931 = vmatprep.mubr.msk.bf16.mxu1 %vm1539_vm10, %v8161_v0  ;;  %v3612_v30 = vld [vmem:[#allocation2 + $0xb8] sm:$0xf]  ;;  %v1260_v53 = vpop.permute.xlu1 %1259 }
 0x143   : > { %v1420_v45 = vsel %vm8837_vm15, %v1256_v25, %v1419_v26  ;;  %v3870_v55 = vsel %vm8929_vm12, %v3865_v63, %v9782_v27  ;;  %v3898_v44 = vor.u32 %v3897_v4, %v3893_v57  ;;  %v3903_v23 = vrot.slane %v3901_v43, 5  ;;  %v3611_v27 = vld [vmem:[#allocation2 + $0xb4] sm:$0xf]  ;;  %v4359_v3 = vld [vmem:[#allocation2 + $0xc] sm:$0xe] }
 0x144   : > { %1421 = vst [vmem:[#allocation2 + $0xc0] sm:$0xf] %v1420_v45  ;;  %v3880_v59 = vsel %vm8929_vm12, %v3875_v2, %v3879_v22  ;;  %v858_v6 = vld [vmem:[#allocation2 + $0xc8] sm:$0x1]  ;;  %v3889_v41 = vrot.slane %v3888_v21, 4  ;;  %v3908_v33 = vrot.slane %v3906_v40, 4  ;;  %7962 = vmatmul.mubr.msk.bf16.gmra.mxu0 %vm1539_vm10, %v7303_v8 }
 0x145   : > { %v3911_v34 = vrot.slane %v3909_v32, 5  ;;  %v859_v39 = vsel %vm8751_vm13, %v694_v7, %v858_v6  ;;  %v3899_v11 = vrot.slane %v3898_v44, 4  ;;  %v3917_v61 = vrot.slane %v3915_v13, 5  ;;  %v4360_v40 = vld [vmem:[#allocation2 + $0x10] sm:$0xf] }
 0x146   : > { %v3919_v24 = vshrl.u32 %v3606_v50, 16  ;;  %860 = vst [vmem:[#allocation2 + $0xc8] sm:$0x1] %v859_v39  ;;  %v3894_v46 = vsel %vm8929_vm12, %v3889_v41, %v3893_v57  ;;  %v3925_v48 = vshll.u32 %v3607_v51, 16  ;;  %v3930_v12 = vshrl.u32 %v3608_v52, 16  ;;  %v8163_v57 = vld [vmem:[#allocation2 + $0x9c] sm:$0xff]  }
 0x147   : > { %v3912_v37 = vor.u32 %v3911_v34, %v3908_v33  ;;  %v3904_v54 = vsel %vm8929_vm12, %v3899_v11, %v3903_v23  ;;  %v3933_v20 = vshll.u32 %v3608_v52, 16  ;;  %v3939_v10 = vshll.u32 %v3609_v62, 16  ;;  %v3613_v50 = vld [vmem:[#allocation2 + $0xbc] sm:$0x1]  ;;  %v4361_v2 = vld [vmem:[#allocation2 + $0x14] sm:$0x1] }
 0x148   : > { %v3921_v19 = vrot.slane %v3919_v24, 4  ;;  %v7304_v17 = vcombine.low %v3870_v55, %v3880_v59  ;;  %v7305_v7 = vcombine.low %v3894_v46, %v3904_v54  ;;  %v3927_v16 = vrot.slane %v3925_v48, 5  ;;  %v3615_v5 = vld [vmem:[#allocation2 + $0xc4] sm:$0xf]  ;;  %v4362_v39 = vld [vmem:[#allocation2 + $0x18] sm:$0xe] }
 0x149   : > { %v3932_v31 = vrot.slane %v3930_v12, 4  ;;  %v3935_v47 = vrot.slane %v3933_v20, 5  ;;  %v3941_v49 = vrot.slane %v3939_v10, 5  ;;  %v3943_v14 = vshrl.u32 %v3609_v62, 16  ;;  %7932 = vmatmul.mubr.msk.bf16.gmra.mxu1 %vm1539_vm10, %v8162_v42  ;;  %v4363_v12 = vld [vmem:[#allocation2 + $0x1c] sm:$0xf] }
 0x14a   : > { %v3922_v60 = vor.u32 %v3921_v19, %v3917_v61  ;;  %7965 = vmatprep.mubr.msk.bf16.mxu0 %vm1539_vm10, %v7304_v17  ;;  %v3913_v38 = vrot.slane %v3912_v37, 4  ;;  %v3949_v18 = vshll.u32 %v3610_v58, 16  ;;  %v3954_v25 = vshrl.u32 %v3611_v27, 16  ;;  %7935 = vmatprep.mubr.msk.bf16.mxu1 %vm1539_vm10, %v8163_v57  ;;  %v8164_v54 = vld [vmem:[#allocation2 + $0xa8] sm:$0xff]   ;;  %v8165_v19 = vld [vmem:[#allocation2 + $0xb4] sm:$0xff]  }
 0x14b   : > { %v3957_v22 = vshll.u32 %v3611_v27, 16  ;;  %v3936_v63 = vor.u32 %v3935_v47, %v3932_v31  ;;  %v3945_v4 = vrot.slane %v3943_v14, 4  ;;  %v3963_v51 = vshll.u32 %v3612_v30, 16  ;;  %v3614_v45 = vld [vmem:[#allocation2 + $0xc0] sm:$0xf] }
 0x14c   : > { %v3923_v43 = vrot.slane %v3922_v60, 4  ;;  %v3951_v8 = vrot.slane %v3949_v18, 5  ;;  %v3956_v52 = vrot.slane %v3954_v25, 4  ;;  %v3967_v26 = vshrl.u32 %v3612_v30, 16  ;;  %7966 = vmatmul.mubr.msk.bf16.gmra.mxu0 %vm1539_vm10, %v7305_v7  ;;  %v4365_v60 = vld [vmem:[#allocation2 + $0x24] sm:$0xe] }
 0x14d   : > { %v3959_v28 = vrot.slane %v3957_v22, 5  ;;  %v1423_v21 = vld [vmem:[#allocation2 + $0xc8] sm:$0x1]  ;;  %v3937_v13 = vrot.slane %v3936_v63, 4  ;;  %v3946_v62 = vor.u32 %v3945_v4, %v3941_v49  ;;  %v3965_v0 = vrot.slane %v3963_v51, 5 }
 0x14e   : > { %v3928_v32 = vsel %vm8929_vm12, %v3923_v43, %v3927_v16  ;;  %v1424_v55 = vsel %vm9193_vm3, %v1260_v53, %v1423_v21  ;;  %v3918_v44 = vsel %vm8929_vm12, %v3913_v38, %v3917_v61  ;;  %v3969_v59 = vrot.slane %v3967_v26, 4  ;;  %v4364_v16 = vld [vmem:[#allocation2 + $0x20] sm:$0x1]  ;;  %v4366_v18 = vld [vmem:[#allocation2 + $0x28] sm:$0xf] }
 0x14f   : > { %v3960_v23 = vor.u32 %v3959_v28, %v3956_v52  ;;  %1425 = vst [vmem:[#allocation2 + $0xc8] sm:$0x1] %v1424_v55  ;;  %v7306_v6 = vcombine.low %v3918_v44, %v3928_v32  ;;  %v3942_v41 = vsel %vm8929_vm12, %v3937_v13, %v3941_v49  ;;  %v3947_v33 = vrot.slane %v3946_v62, 4  ;;  %v4367_v57 = vld [vmem:[#allocation2 + $0x2c] sm:$0x1] }
 0x150   : > { %v3973_v34 = vshll.u32 %v3613_v50, 16  ;;  %v3970_v24 = vor.u32 %v3969_v59, %v3965_v0  ;;  %v4457_v46 = vrot.slane %v4360_v40, 5  ;;  %v4460_v37 = vrot.slane %v4361_v2, 5  ;;  %v4369_v52 = vld [vmem:[#allocation2 + $0x34] sm:$0xf] }
 0x151   : > { %v3961_v11 = vrot.slane %v3960_v23, 4  ;;  %v3952_v9 = vsel %vm8929_vm12, %v3947_v33, %v3951_v8  ;;  %v3978_v48 = vshrl.u32 %v3614_v45, 16  ;;  %v3981_v58 = vshll.u32 %v3614_v45, 16  ;;  %7969 = vmatprep.mubr.msk.bf16.mxu0 %vm1539_vm10, %v7306_v6  ;;  %7936 = vmatmul.mubr.msk.bf16.gmra.mxu1 %vm1539_vm10, %v8164_v54  ;;  %v4368_v8 = vld [vmem:[#allocation2 + $0x30] sm:$0xe] }
 0x152   : > { %v3975_v61 = vrot.slane %v3973_v34, 5  ;;  %v7307_v20 = vcombine.low %v3942_v41, %v3952_v9  ;;  %v3971_v27 = vrot.slane %v3970_v24, 4  ;;  %v7326_v17 = vrot.slane %v4359_v3, 9  ;;  %7939 = vmatprep.mubr.msk.bf16.mxu1 %vm1539_vm10, %v8165_v19  ;;  %v4370_v28 = vld [vmem:[#allocation2 + $0x38] sm:$0x1] }
 0x153   : > { %v3966_v10 = vsel %vm8929_vm12, %v3961_v11, %v3965_v0  ;;  %v4459_v31 = vrot.slane %v4457_v46, 4  ;;  %v3980_v7 = vrot.slane %v3978_v48, 4  ;;  %v3983_v30 = vrot.slane %v3981_v58, 5  ;;  %v4371_v26 = vld [vmem:[#allocation2 + $0x3c] sm:$0xe] }
 0x154   : > { %v3987_v42 = vshll.u32 %v3615_v5, 16  ;;  %v3976_v47 = vsel %vm8929_vm12, %v3971_v27, %v3975_v61  ;;  %v3991_v49 = vshrl.u32 %v3615_v5, 16  ;;  %v7327_v14 = vrot.slane %v4362_v39, 9  ;;  %v4372_v62 = vld [vmem:[#allocation2 + $0x40] sm:$0xf]  ;;  %7970 = vmatmul.mubr.msk.bf16.gmra.mxu0 %vm1539_vm10, %v7307_v20 }
 0x155   : > { %v4464_v38 = vrot.slane %v4363_v12, 5  ;;  %v4458_v50 = vsel %vm8940_vm7, %v7326_v17, %v4457_v46  ;;  %v4461_v25 = vsel %vm8940_vm7, %v4459_v31, %v4460_v37  ;;  %v3984_v22 = vor.u32 %v3983_v30, %v3980_v7  ;;  %v4373_v44 = vld [vmem:[#allocation2 + $0x44] sm:$0x1]  ;;  %v4374_v33 = vld [vmem:[#allocation2 + $0x48] sm:$0xe] }
 0x156   : > { %v3989_v53 = vrot.slane %v3987_v42, 5  ;;  %v7308_v43 = vcombine.low %v3966_v10, %v3976_v47  ;;  %v7343_v63 = vcombine.low %v4458_v50, %v4461_v25  ;;  %v3616_v4 = vld [vmem:[#allocation2 + $0xc8] sm:$0x1]  ;;  %v3993_v51 = vrot.slane %v3991_v49, 4  ;;  %v4375_v34 = vld [vmem:[#allocation2 + $0x4c] sm:$0xf] }
 0x157   : > { %v4466_v40 = vrot.slane %v4464_v38, 4  ;;  %v3985_v2 = vrot.slane %v3984_v22, 4  ;;  %v3997_v21 = vshll.u32 %v3616_v4, 16  ;;  %v4467_v32 = vrot.slane %v4364_v16, 5  ;;  %v8166_v5 = vld [vmem:[#allocation2 + $0xc0] sm:$0xff]   ;;  %v8167_v42 = vld [vmem:[#allocation2 + $0x18] sm:$0xff]  }
 0x158   : > { %v7328_v13 = vrot.slane %v4365_v60, 9  ;;  %v3994_v0 = vor.u32 %v3993_v51, %v3989_v53  ;;  %v9837_v3 = vsel %vm8940_vm7, %v7327_v14, %v4464_v38  ;;  %v4471_v45 = vrot.slane %v4366_v18, 5  ;;  %7973 = vmatprep.mubr.msk.bf16.mxu0 %vm1539_vm10, %v7308_v43  ;;  %v4376_v37 = vld [vmem:[#allocation2 + $0x50] sm:$0x1]  ;;  %v4377_v58 = vld [vmem:[#allocation2 + $0x54] sm:$0xe] }
 0x159   : > { %v4474_v55 = vrot.slane %v4367_v57, 5  ;;  %v3990_v23 = vsel %vm8929_vm12, %v3985_v2, %v3989_v53  ;;  %v3999_v59 = vrot.slane %v3997_v21, 5  ;;  %v9844_v6 = vsel %vm8940_vm7, %v4466_v40, %v4467_v32  ;;  %v4378_v12 = vld [vmem:[#allocation2 + $0x58] sm:$0xf]  ;;  %7940 = vmatmul.mubr.msk.bf16.gmra.mxu1 %vm1539_vm10, %v8166_v5  ;;  %v4379_v27 = vld [vmem:[#allocation2 + $0x5c] sm:$0x1] }
 0x15a   : > { %v9848_v41 = vsel %vm1588_vm9, %v9735_v56, 0  ;;  %v3995_v39 = vrot.slane %v3994_v0, 4  ;;  %v9853_v11 = vsel %vm8940_vm7, %v7328_v13, %v4471_v45  ;;  %v4473_v24 = vrot.slane %v4471_v45, 4  ;;  %7979 = vmatprep.mubr.msk.bf16.mxu1 %vm1539_vm10, %v7343_v63  ;;  %v4380_v7 = vld [vmem:[#allocation2 + $0x60] sm:$0xe] }
 0x15b   : > { %v9857_v46 = vsel %vm1588_vm9, %v9748_v35, 0  ;;  %v7329_v9 = vrot.slane %v4368_v8, 9  ;;  %v4478_v61 = vrot.slane %v4369_v52, 5  ;;  %v4481_v56 = vrot.slane %v4370_v28, 5  ;;  %v4381_v30 = vld [vmem:[#allocation2 + $0x64] sm:$0xf] }
 0x15c   : > { %v7330_v48 = vrot.slane %v4371_v26, 9  ;;  %v4000_v54 = vsel %vm8929_vm12, %v3995_v39, %v3999_v59  ;;  %v4475_v19 = vsel %vm8940_vm7, %v4473_v24, %v4474_v55  ;;  %v4485_v20 = vrot.slane %v4372_v62, 5  ;;  %v4382_v22 = vld [vmem:[#allocation2 + $0x68] sm:$0x1]  ;;  %v4383_v53 = vld [vmem:[#allocation2 + $0x6c] sm:$0xe] }
 0x15d   : > { %v4488_v10 = vrot.slane %v4373_v44, 5  ;;  %v7309_v35 = vcombine.low %v3990_v23, %v4000_v54  ;;  %v7344_v17 = vcombine.low %v9837_v3, %v9844_v6  ;;  %v7345_v16 = vcombine.low %v9853_v11, %v4475_v19  ;;  %v4384_v51 = vld [vmem:[#allocation2 + $0x70] sm:$0xf]  ;;  %v4385_v40 = vld [vmem:[#allocation2 + $0x74] sm:$0x1] }
 0x15e   : > { %v4480_v31 = vrot.slane %v4478_v61, 4  ;;  %v9870_v60 = vsel %vm8940_vm7, %v7329_v9, %v4478_v61  ;;  %v4487_v47 = vrot.slane %v4485_v20, 4  ;;  %v7331_v49 = vrot.slane %v4374_v33, 9  ;;  %v4386_v2 = vld [vmem:[#allocation2 + $0x78] sm:$0xe]  ;;  %v8169_v54 = vld [vmem:[#allocation2 + $0x30] sm:$0xff]  }
 0x15f   : > { %v4492_v14 = vrot.slane %v4375_v34, 5  ;;  %v9878_v18 = vsel %vm8940_vm7, %v7330_v48, %v4485_v20  ;;  %v4495_v50 = vrot.slane %v4376_v37, 5  ;;  %v4499_v25 = vrot.slane %v4378_v12, 5  ;;  %7974 = vmatmul.mubr.msk.bf16.gmra.mxu0 %vm1539_vm10, %v7309_v35  ;;  %v4387_v21 = vld [vmem:[#allocation2 + $0x7c] sm:$0xf]  ;;  %v8168_v37 = vld [vmem:[#allocation2 + $0x24] sm:$0xff]  }
 0x160   : > { %v9874_v38 = vsel %vm8940_vm7, %v4480_v31, %v4481_v56  ;;  %v9884_v43 = vsel %vm8940_vm7, %v4487_v47, %v4488_v10  ;;  %v7332_v4 = vrot.slane %v4377_v58, 9  ;;  %v4502_v26 = vrot.slane %v4379_v27, 5  ;;  %v4388_v32 = vld [vmem:[#allocation2 + $0x80] sm:$0x1]  ;;  %8013 = vmatprep.mubr.msk.bf16.mxu0 %vm1539_vm10, %v8167_v42  ;;  %v4389_v45 = vld [vmem:[#allocation2 + $0x84] sm:$0xe] }
 0x161   : > { %v7346_v57 = vcombine.low %v9870_v60, %v9874_v38  ;;  %v4494_v63 = vrot.slane %v4492_v14, 4  ;;  %v7347_v8 = vcombine.low %v9878_v18, %v9884_v43  ;;  %v9891_v52 = vsel %vm8940_vm7, %v7331_v49, %v4492_v14  ;;  %v4390_v55 = vld [vmem:[#allocation2 + $0x88] sm:$0xf]  ;;  %v4391_v33 = vld [vmem:[#allocation2 + $0x8c] sm:$0x1]  ;;  %7980 = vmatmul.mubr.msk.bf16.vlgmr.msra.gmra.mxu1 %vm1539_vm10, %v7344_v17 }
 0x162   : > { %v4501_v28 = vrot.slane %v4499_v25, 4  ;;  %v7333_v62 = vrot.slane %v4380_v7, 9  ;;  %v4506_v0 = vrot.slane %v4381_v30, 5  ;;  %v4509_v3 = vrot.slane %v4382_v22, 5  ;;  %v4392_v24 = vld [vmem:[#allocation2 + $0x90] sm:$0xe]  ;;  %7983 = vmatprep.mubr.msk.bf16.mxu1 %vm1539_vm10, %v7345_v16  ;;  %8046 = vmatpush3.bf16.msra.mxu1 %v9848_v41 }
 0x163   : > { %v9896_v13 = vsel %vm8940_vm7, %v4494_v63, %v4495_v50  ;;  %v9900_v44 = vsel %vm8940_vm7, %v7332_v4, %v4499_v25  ;;  %v7334_v59 = vrot.slane %v4383_v53, 9  ;;  %v4513_v6 = vrot.slane %v4384_v51, 5  ;;  %v4393_v58 = vld [vmem:[#allocation2 + $0x94] sm:$0xf]  ;;  %v4394_v12 = vld [vmem:[#allocation2 + $0x98] sm:$0x1] }
 0x164   : > { %v9904_v23 = vsel %vm8940_vm7, %v4501_v28, %v4502_v26  ;;  %v7348_v34 = vcombine.low %v9891_v52, %v9896_v13  ;;  %v4508_v39 = vrot.slane %v4506_v0, 4  ;;  %v4516_v11 = vrot.slane %v4385_v40, 5  ;;  %v4395_v27 = vld [vmem:[#allocation2 + $0x9c] sm:$0xe]  ;;  %v4396_v7 = vld [vmem:[#allocation2 + $0xa0] sm:$0xf] }
 0x165   : > { %v7349_v5 = vcombine.low %v9900_v44, %v9904_v23  ;;  %v9915_v9 = vsel %vm8940_vm7, %v7333_v62, %v4506_v0  ;;  %v9919_v61 = vsel %vm8940_vm7, %v7334_v59, %v4513_v6  ;;  %v4515_v56 = vrot.slane %v4513_v6, 4  ;;  %v4397_v30 = vld [vmem:[#allocation2 + $0xa4] sm:$0x1]  ;;  %v4398_v50 = vld [vmem:[#allocation2 + $0xa8] sm:$0xe] }
 0x166   : > { %v4520_v48 = vrot.slane %v4387_v21, 5  ;;  %v9923_v19 = vsel %vm8940_vm7, %v4508_v39, %v4509_v3  ;;  %v7335_v20 = vrot.slane %v4386_v2, 9  ;;  %v4523_v41 = vrot.slane %v4388_v32, 5  ;;  %v4399_v25 = vld [vmem:[#allocation2 + $0xac] sm:$0xf] }
 0x167   : > { %v4527_v10 = vrot.slane %v4390_v55, 5  ;;  %v7350_v35 = vcombine.low %v9915_v9, %v9923_v19  ;;  %v9929_v17 = vsel %vm8940_vm7, %v4515_v56, %v4516_v11  ;;  %v7336_v31 = vrot.slane %v4389_v45, 9  ;;  %8014 = vmatmul.mubr.msk.bf16.vlgmr.msra.gmra.mxu0 %vm1539_vm10, %v8168_v37  ;;  %v4400_v51 = vld [vmem:[#allocation2 + $0xb0] sm:$0x1]  ;;  %v4401_v21 = vld [vmem:[#allocation2 + $0xb4] sm:$0xe] }
 0x168   : > { %v4522_v16 = vrot.slane %v4520_v48, 4  ;;  %v7351_v42 = vcombine.low %v9919_v61, %v9929_v17  ;;  %v9935_v47 = vsel %vm8940_vm7, %v7335_v20, %v4520_v48  ;;  %v4530_v14 = vrot.slane %v4391_v33, 5  ;;  %8080 = vmatpush3.bf16.msra.mxu0 %v9857_v46  ;;  %8017 = vmatprep.mubr.msk.bf16.mxu0 %vm1539_vm10, %v8169_v54  ;;  %v4402_v32 = vld [vmem:[#allocation2 + $0xb8] sm:$0xf]  ;;  %v4403_v45 = vld [vmem:[#allocation2 + $0xbc] sm:$0x1] }
 0x169   : > { %v4529_v49 = vrot.slane %v4527_v10, 4  ;;  %v7337_v53 = vrot.slane %v4392_v24, 9  ;;  %v4534_v63 = vrot.slane %v4393_v58, 5  ;;  %v4537_v4 = vrot.slane %v4394_v12, 5  ;;  %7984 = vmatmul.mubr.msk.bf16.gmra.mxu1 %vm1539_vm10, %v7346_v57  ;;  %v4404_v39 = vld [vmem:[#allocation2 + $0xc0] sm:$0xe] }
 0x16a   : > { %v9940_v22 = vsel %vm8940_vm7, %v4522_v16, %v4523_v41  ;;  %v9948_v28 = vsel %vm8940_vm7, %v7336_v31, %v4527_v10  ;;  %v4541_v2 = vrot.slane %v4396_v7, 5  ;;  %v7338_v0 = vrot.slane %v4395_v27, 9  ;;  %7987 = vmatprep.mubr.msk.bf16.mxu1 %vm1539_vm10, %v7347_v8  ;;  %v4405_v24 = vld [vmem:[#allocation2 + $0xc4] sm:$0xf]  ;;  %v4406_v37 = vld [vmem:[#allocation2 + $0xc8] sm:$0x1] }
 0x16b   : > { %v7352_v40 = vcombine.low %v9935_v47, %v9940_v22  ;;  %v9952_v26 = vsel %vm8940_vm7, %v4529_v49, %v4530_v14  ;;  %v4536_v46 = vrot.slane %v4534_v63, 4  ;;  %v4544_v3 = vrot.slane %v4397_v30, 5  ;;  %v5348_v48 = vld [vmem:[#allocation2 + $0x18] sm:$0xf]  ;;  %v8170_v58 = vld [vmem:[#allocation2 + $0x3c] sm:$0xff]   ;;  %v8171_v27 = vld [vmem:[#allocation2 + $0x48] sm:$0xff]  }
 0x16c   : > { %v7353_v62 = vcombine.low %v9948_v28, %v9952_v26  ;;  %v9962_v55 = vsel %vm8940_vm7, %v7337_v53, %v4534_v63  ;;  %v4543_v59 = vrot.slane %v4541_v2, 4  ;;  %v7339_v6 = vrot.slane %v4398_v50, 9  ;;  %v5349_v10 = vld [vmem:[#allocation2 + $0x1c] sm:$0xf]  ;;  %v5350_v49 = vld [vmem:[#allocation2 + $0x20] sm:$0x1] }
 0x16d   : > { %v4548_v33 = vrot.slane %v4399_v25, 5  ;;  %v9970_v11 = vsel %vm8940_vm7, %v4536_v46, %v4537_v4  ;;  %v9974_v60 = vsel %vm8940_vm7, %v7338_v0, %v4541_v2  ;;  %v4551_v38 = vrot.slane %v4400_v51, 5  ;;  %v330_v63 = vld [vmem:[#allocation2 + $0xcc] sm:$0x1]  ;;  %v6138_v4 = vld [vmem:[#allocation2 + $0x18] sm:$0xe]  ;;  %v10001_v51 = vpop.f32.mrf.mxu1 }
 0x16e   : > { %v4555_v57 = vrot.slane %v4402_v32, 5  ;;  %v7354_v56 = vcombine.low %v9962_v55, %v9970_v11  ;;  %v9980_v18 = vsel %vm8940_vm7, %v4543_v59, %v4544_v3  ;;  %v7340_v8 = vrot.slane %v4401_v21, 9  ;;  %v6139_v0 = vld [vmem:[#allocation2 + $0x1c] sm:$0xf]  ;;  %v6140_v3 = vld [vmem:[#allocation2 + $0x20] sm:$0x1] }
 0x16f   : > { %v4550_v43 = vrot.slane %v4548_v33, 4  ;;  %v7355_v12 = vcombine.low %v9974_v60, %v9980_v18  ;;  %v9986_v54 = vsel %vm8940_vm7, %v7339_v6, %v4548_v33  ;;  %v4558_v41 = vrot.slane %v4403_v45, 5  ;;  %8018 = vmatmul.mubr.msk.bf16.gmra.mxu0 %vm1539_vm10, %v8170_v58  ;;  %v6143_v9 = vld [vmem:[#allocation2 + $0x2c] sm:$0x1]  ;;  %v5364_v11 = vld [vmem:[#allocation2 + $0x58] sm:$0xf] }
 0x170   : > { %v4557_v20 = vrot.slane %v4555_v57, 4  ;;  %v7341_v31 = vrot.slane %v4404_v39, 9  ;;  %v4562_v7 = vrot.slane %v4405_v24, 5  ;;  %v4565_v30 = vrot.slane %v4406_v37, 5  ;;  %8021 = vmatprep.mubr.msk.bf16.mxu0 %vm1539_vm10, %v8171_v27  ;;  %v5351_v39 = vld [vmem:[#allocation2 + $0x24] sm:$0xf] }
 0x171   : > { %v9990_v16 = vsel %vm8940_vm7, %v4550_v43, %v4551_v38  ;;  %v9995_v14 = vsel %vm8940_vm7, %v7340_v8, %v4555_v57  ;;  %v5397_v25 = vshrl.u32 %v5348_v48, 16  ;;  %v5400_v53 = vshll.u32 %v5348_v48, 16  ;;  %7988 = vmatmul.mubr.msk.bf16.gmra.mxu1 %vm1539_vm10, %v7348_v34  ;;  %v10012_v38 = vpop.f32.mrf.mxu1  ;;  %v5352_v8 = vld [vmem:[#allocation2 + $0x28] sm:$0xf]  ;;  %v8174_v19 = vld [vmem:[#allocation2 + $0x6c] sm:$0xff]  }
 0x172   : > { %v9999_v50 = vsel %vm8940_vm7, %v4557_v20, %v4558_v41  ;;  %v4564_v32 = vrot.slane %v4562_v7, 4  ;;  %v5406_v46 = vshll.u32 %v5349_v10, 16  ;;  %v5410_v6 = vshrl.u32 %v5349_v10, 16  ;;  %7991 = vmatprep.mubr.msk.bf16.mxu1 %vm1539_vm10, %v7349_v5  ;;  %v5353_v10 = vld [vmem:[#allocation2 + $0x2c] sm:$0x1] }
 0x173   : > { %v5399_v45 = vrot.slane %v5397_v25, 4  ;;  %v5402_v59 = vrot.slane %v5400_v53, 5  ;;  %v5416_v33 = vshll.u32 %v5350_v49, 16  ;;  %v10016_v57 = vsel %vm8940_vm7, %v7341_v31, %v4562_v7  ;;  %v10032_v58 = vpop.f32.mrf.mxu1  ;;  %v10034_v31 = vpop.f32.mrf.mxu0  ;;  %v8172_v7 = vld [vmem:[#allocation2 + $0x54] sm:$0xff]   ;;  %v5354_v49 = vld [vmem:[#allocation2 + $0x30] sm:$0xf] }
 0x174   : > { %v10020_v24 = vsel %vm8940_vm7, %v4564_v32, %v4565_v30  ;;  %v10022_v37 = vrot.slane %v5406_v46, 5  ;;  %v331_v43 = vsel %vm8235_vm2, 0, %v330_v63  ;;  %v5412_v13 = vrot.slane %v5410_v6, 4  ;;  %v8173_v25 = vld [vmem:[#allocation2 + $0x60] sm:$0xff]   ;;  %v5365_v60 = vld [vmem:[#allocation2 + $0x5c] sm:$0x1] }
 0x175   : > { %v5403_v52 = vor.u32 %v5402_v59, %v5399_v45  ;;  %v10030_v34 = vrot.slane %v5416_v33, 5  ;;  %332 = vst [vmem:[#allocation2 + $0xcc] sm:$0x1] %v331_v43  ;;  %v7441_v48 = vrot.slane %v6138_v4, 9  ;;  %v6236_v20 = vrot.slane %v6139_v0, 5  ;;  %v10039_v46 = vpop.f32.mrf.mxu1 }
 0x176   : > { %v6239_v41 = vrot.slane %v6140_v3, 5  ;;  %v5421_v27 = vshrl.u32 %v5351_v39, 16  ;;  %v5424_v29 = vshll.u32 %v5351_v39, 16  ;;  %v5413_v44 = vor.u32 %v5412_v13, %v10022_v37  ;;  %10954 = vst [vmem:[#allocation16_spill] sm:$0xff] %v10039_v46  ;;  %v5355_v43 = vld [vmem:[#allocation2 + $0x34] sm:$0xf]  ;;  %v10051_v13 = vpop.f32.mrf.mxu0 }
 0x177   : > { %v5404_v30 = vrot.slane %v5403_v52, 4  ;;  %v5430_v23 = vshll.u32 %v5352_v8, 16  ;;  %v5434_v5 = vshrl.u32 %v5352_v8, 16  ;;  %v6238_v63 = vrot.slane %v6236_v20, 4  ;;  %8022 = vmatmul.mubr.msk.bf16.gmra.mxu0 %vm1539_vm10, %v8172_v7  ;;  %v5356_v8 = vld [vmem:[#allocation2 + $0x38] sm:$0x1] }
 0x178   : > { %v5423_v4 = vrot.slane %v5421_v27, 4  ;;  %v5426_v32 = vrot.slane %v5424_v29, 5  ;;  %v5414_v0 = vrot.slane %v5413_v44, 4  ;;  %v10044_v3 = vsel %vm8940_vm7, %v7441_v48, %v6236_v20  ;;  %8025 = vmatprep.mubr.msk.bf16.mxu0 %vm1539_vm10, %v8173_v25  ;;  %v6141_v7 = vld [vmem:[#allocation2 + $0x24] sm:$0xe] }
 0x179   : > { %v5432_v45 = vrot.slane %v5430_v23, 5  ;;  %v5436_v59 = vrot.slane %v5434_v5, 4  ;;  %v10049_v6 = vsel %vm8940_vm7, %v6238_v63, %v6239_v41  ;;  %v5440_v39 = vshll.u32 %v5353_v10, 16  ;;  %v6142_v41 = vld [vmem:[#allocation2 + $0x28] sm:$0xf]  ;;  %7992 = vmatmul.mubr.msk.bf16.gmra.mxu1 %vm1539_vm10, %v7350_v35 }
 0x17a   : > { %v5427_v33 = vor.u32 %v5426_v32, %v5423_v4  ;;  %v5445_v52 = vshrl.u32 %v5354_v49, 16  ;;  %v5409_v48 = vsel %vm8929_vm12, %v5404_v30, %v10022_v37  ;;  %v5419_v20 = vsel %vm8929_vm12, %v5414_v0, %v10030_v34  ;;  %v10065_v37 = vpop.f32.mrf.mxu1  ;;  %7995 = vmatprep.mubr.msk.bf16.mxu1 %vm1539_vm10, %v7351_v42  ;;  %v6144_v0 = vld [vmem:[#allocation2 + $0x30] sm:$0xe]  ;;  %v6149_v53 = vld [vmem:[#allocation2 + $0x44] sm:$0x1] }
 0x17b   : > { %v5437_v27 = vor.u32 %v5436_v59, %v5432_v45  ;;  %v5448_v29 = vshll.u32 %v5354_v49, 16  ;;  %v5442_v23 = vrot.slane %v5440_v39, 5  ;;  %10955 = vst [vmem:[#allocation15_spill] sm:$0xff] %v10065_v37  ;;  %v5454_v49 = vshll.u32 %v5355_v43, 16  ;;  %v10073_v59 = vpop.f32.mrf.mxu0  ;;  %v6145_v39 = vld [vmem:[#allocation2 + $0x34] sm:$0xf] }
 0x17c   : > { %v5428_v44 = vrot.slane %v5427_v33, 4  ;;  %v5447_v5 = vrot.slane %v5445_v52, 4  ;;  %v5458_v25 = vshrl.u32 %v5355_v43, 16  ;;  %v5464_v63 = vshll.u32 %v5356_v8, 16  ;;  %v5357_v52 = vld [vmem:[#allocation2 + $0x3c] sm:$0xf] }
 0x17d   : > { %v5438_v34 = vrot.slane %v5437_v27, 4  ;;  %v5450_v30 = vrot.slane %v5448_v29, 5  ;;  %v7442_v4 = vrot.slane %v6141_v7, 9  ;;  %v6243_v32 = vrot.slane %v6142_v41, 5  ;;  %v8175_v43 = vld [vmem:[#allocation2 + $0x78] sm:$0xff]  }
 0x17e   : > { %v5433_v35 = vsel %vm8929_vm12, %v5428_v44, %v5432_v45  ;;  %v5456_v42 = vrot.slane %v5454_v49, 5  ;;  %v5460_v33 = vrot.slane %v5458_v25, 4  ;;  %v10077_v27 = vcombine.low %v5409_v48, %v5419_v20  ;;  %v6146_v7 = vld [vmem:[#allocation2 + $0x38] sm:$0x1]  ;;  %v5358_v41 = vld [vmem:[#allocation2 + $0x40] sm:$0xf]  ;;  %v10085_v44 = vpop.f32.mrf.mxu1 }
 0x17f   : > { %v5443_v61 = vsel %vm8929_vm12, %v5438_v34, %v5442_v23  ;;  %v5451_v17 = vor.u32 %v5450_v30, %v5447_v5  ;;  %v5466_v45 = vrot.slane %v5464_v63, 5  ;;  %v10083_v8 = vsel %vm8940_vm7, %v7442_v4, %v6243_v32  ;;  %10956 = vst [vmem:[#allocation11_spill] sm:$0xff] %v10085_v44  ;;  %8026 = vmatmul.mubr.msk.bf16.gmra.mxu0 %vm1539_vm10, %v8174_v19  ;;  %v5359_v49 = vld [vmem:[#allocation2 + $0x44] sm:$0x1]  ;;  %v10089_v63 = vpop.f32.mrf.mxu0  ;;  %v5369_v37 = vld [vmem:[#allocation2 + $0x6c] sm:$0xf] }
 0x180   : > { %v10079_v29 = vcombine.low %v5433_v35, %v5443_v61  ;;  %v5461_v5 = vor.u32 %v5460_v33, %v5456_v42  ;;  %v6245_v34 = vrot.slane %v6243_v32, 4  ;;  %v6246_v30 = vrot.slane %v6143_v9, 5  ;;  %8029 = vmatprep.mubr.msk.bf16.mxu0 %vm1539_vm10, %v8175_v43  ;;  %v5361_v43 = vld [vmem:[#allocation2 + $0x4c] sm:$0xf] }
 0x181   : > { %v5452_v23 = vrot.slane %v5451_v17, 4  ;;  %v7443_v48 = vrot.slane %v6144_v0, 9  ;;  %v6250_v20 = vrot.slane %v6145_v39, 5  ;;  %v5469_v25 = vshrl.u32 %v5357_v52, 16  ;;  %v5360_v17 = vld [vmem:[#allocation2 + $0x48] sm:$0xf]  ;;  %7996 = vmatmul.mubr.msk.bf16.gmra.mxu1 %vm1539_vm10, %v7352_v40  ;;  %v10103_v39 = vpop.f32.mrf.mxu0 }
 0x182   : > { %v5472_v35 = vshll.u32 %v5357_v52, 16  ;;  %v5462_v4 = vrot.slane %v5461_v5, 4  ;;  %v10093_v61 = vsel %vm8940_vm7, %v6245_v34, %v6246_v30  ;;  %v6253_v10 = vrot.slane %v6146_v7, 5  ;;  %v10105_v52 = vpop.f32.mrf.mxu1  ;;  %7999 = vmatprep.mubr.msk.bf16.mxu1 %vm1539_vm10, %v7353_v62  ;;  %v8176_v7 = vld [vmem:[#allocation2 + $0x84] sm:$0xff]  }
 0x183   : > { %v5478_v19 = vshll.u32 %v5358_v41, 16  ;;  %v5457_v9 = vsel %vm8929_vm12, %v5452_v23, %v5456_v42  ;;  %v6252_v0 = vrot.slane %v6250_v20, 4  ;;  %v5471_v33 = vrot.slane %v5469_v25, 4  ;;  %10957 = vst [vmem:[#allocation13_spill] sm:$0xff] %v10105_v52  ;;  %v8177_v23 = vld [vmem:[#allocation2 + $0x90] sm:$0xff]   ;;  %v10123_v21 = vpop.f32.mrf.mxu0 }
 0x184   : > { %v5467_v47 = vsel %vm8929_vm12, %v5462_v4, %v5466_v45  ;;  %v5474_v22 = vrot.slane %v5472_v35, 5  ;;  %v5482_v42 = vshrl.u32 %v5358_v41, 16  ;;  %v10117_v34 = vsel %vm8940_vm7, %v7443_v48, %v6250_v20  ;;  %v5362_v25 = vld [vmem:[#allocation2 + $0x50] sm:$0x1]  ;;  %v6147_v41 = vld [vmem:[#allocation2 + $0x3c] sm:$0xe]  ;;  %v10125_v48 = vpop.f32.mrf.mxu1 }
 0x185   : > { %v5480_v40 = vrot.slane %v5478_v19, 5  ;;  %v10113_v5 = vcombine.low %v5457_v9, %v5467_v47  ;;  %v5488_v30 = vshll.u32 %v5359_v49, 16  ;;  %v5493_v28 = vshrl.u32 %v5360_v17, 16  ;;  %v6148_v4 = vld [vmem:[#allocation2 + $0x40] sm:$0xf]  ;;  %10958 = vst [vmem:[#allocation20_spill] sm:$0xff] %v10125_v48 }
 0x186   : > { %v10121_v26 = vsel %vm8940_vm7, %v6252_v0, %v6253_v10  ;;  %v5475_v62 = vor.u32 %v5474_v22, %v5471_v33  ;;  %v5484_v45 = vrot.slane %v5482_v42, 4  ;;  %v5496_v35 = vshll.u32 %v5360_v17, 16  ;;  %v6150_v33 = vld [vmem:[#allocation2 + $0x48] sm:$0xe] }
 0x187   : > { %v5490_v19 = vrot.slane %v5488_v30, 5  ;;  %v5495_v32 = vrot.slane %v5493_v28, 4  ;;  %v5502_v9 = vshll.u32 %v5361_v43, 16  ;;  %v5506_v47 = vshrl.u32 %v5361_v43, 16  ;;  %8030 = vmatmul.mubr.msk.bf16.gmra.mxu0 %vm1539_vm10, %v8176_v7  ;;  %v6151_v28 = vld [vmem:[#allocation2 + $0x4c] sm:$0xf]  ;;  %v10129_v43 = vpop.f32.mrf.mxu1 }
 0x188   : > { %v5476_v20 = vrot.slane %v5475_v62, 4  ;;  %v5485_v49 = vor.u32 %v5484_v45, %v5480_v40  ;;  %v5498_v10 = vrot.slane %v5496_v35, 5  ;;  %v5512_v0 = vshll.u32 %v5362_v25, 16  ;;  %8033 = vmatprep.mubr.msk.bf16.mxu0 %vm1539_vm10, %v8177_v23  ;;  %10959 = vst [vmem:[#allocation19_spill] sm:$0xff] %v10129_v43  ;;  %v6152_v35 = vld [vmem:[#allocation2 + $0x50] sm:$0x1] }
 0x189   : > { %v5504_v17 = vrot.slane %v5502_v9, 5  ;;  %v5508_v22 = vrot.slane %v5506_v47, 4  ;;  %v7444_v42 = vrot.slane %v6147_v41, 9  ;;  %v6257_v30 = vrot.slane %v6148_v4, 5  ;;  %8000 = vmatmul.mubr.msk.bf16.gmra.mxu1 %vm1539_vm10, %v7354_v56  ;;  %v5363_v9 = vld [vmem:[#allocation2 + $0x54] sm:$0xf]  ;;  %v10139_v47 = vpop.f32.mrf.mxu0  ;;  %v10155_v18 = vpop.f32.mrf.mxu1 }
 0x18a   : > { %v5481_v7 = vsel %vm8929_vm12, %v5476_v20, %v5480_v40  ;;  %v5486_v62 = vrot.slane %v5485_v49, 4  ;;  %v5499_v45 = vor.u32 %v5498_v10, %v5495_v32  ;;  %v5514_v25 = vrot.slane %v5512_v0, 5  ;;  %8003 = vmatprep.mubr.msk.bf16.mxu1 %vm1539_vm10, %v7355_v12  ;;  %10960 = vst [vmem:[#allocation14_spill] sm:$0xff] %v10155_v18  ;;  %v8178_v12 = vld [vmem:[#allocation2 + $0x9c] sm:$0xff]   ;;  %v6157_v43 = vld [vmem:[#allocation2 + $0x64] sm:$0xf] }
 0x18b   : > { %v5509_v23 = vor.u32 %v5508_v22, %v5504_v17  ;;  %v6259_v41 = vrot.slane %v6257_v30, 4  ;;  %v6260_v4 = vrot.slane %v6149_v53, 5  ;;  %v7445_v20 = vrot.slane %v6150_v33, 9  ;;  %v10179_v18 = vpop.f32.mrf.mxu1 }
 0x18c   : > { %v5491_v32 = vsel %vm8929_vm12, %v5486_v62, %v5490_v19  ;;  %v5500_v40 = vrot.slane %v5499_v45, 4  ;;  %v6264_v55 = vrot.slane %v6151_v28, 5  ;;  %v10149_v49 = vsel %vm8940_vm7, %v7444_v42, %v6257_v30  ;;  %v5366_v42 = vld [vmem:[#allocation2 + $0x60] sm:$0xf]  ;;  %v8179_v30 = vld [vmem:[#allocation2 + $0xa8] sm:$0xff]   ;;  %10961 = vst [vmem:[#allocation22_spill] sm:$0xff] %v10179_v18 }
 0x18d   : > { %v5510_v56 = vrot.slane %v5509_v23, 4  ;;  %v10153_v53 = vsel %vm8940_vm7, %v6259_v41, %v6260_v4  ;;  %v6267_v10 = vrot.slane %v6152_v35, 5  ;;  %v10157_v0 = vcombine.low %v5481_v7, %v5491_v32  ;;  %v5367_v23 = vld [vmem:[#allocation2 + $0x64] sm:$0xf]  ;;  %v10165_v41 = vpop.f32.mrf.mxu0 }
 0x18e   : > { %v5505_v19 = vsel %vm8929_vm12, %v5500_v40, %v5504_v17  ;;  %v6266_v22 = vrot.slane %v6264_v55, 4  ;;  %v5517_v62 = vshrl.u32 %v5363_v9, 16  ;;  %v5520_v45 = vshll.u32 %v5363_v9, 16  ;;  %v5368_v40 = vld [vmem:[#allocation2 + $0x68] sm:$0x1] }
 0x18f   : > { %v5515_v28 = vsel %vm8929_vm12, %v5510_v56, %v5514_v25  ;;  %v5526_v35 = vshll.u32 %v5364_v11, 16  ;;  %8034 = vmatmul.mubr.msk.bf16.gmra.mxu0 %vm1539_vm10, %v8178_v12  ;;  %v10170_v17 = vsel %vm8940_vm7, %v7445_v20, %v6264_v55  ;;  %v5530_v4 = vshrl.u32 %v5364_v11, 16  ;;  %v6153_v25 = vld [vmem:[#allocation2 + $0x54] sm:$0xe]  ;;  %v6154_v12 = vld [vmem:[#allocation2 + $0x58] sm:$0xf]  ;;  %v10181_v20 = vpop.f32.mrf.mxu0 }
 0x190   : > { %v10174_v7 = vsel %vm8940_vm7, %v6266_v22, %v6267_v10  ;;  %v5536_v32 = vshll.u32 %v5365_v60, 16  ;;  %8037 = vmatprep.mubr.msk.bf16.mxu0 %vm1539_vm10, %v8179_v30  ;;  %v10177_v9 = vcombine.low %v5505_v19, %v5515_v28  ;;  %v5519_v56 = vrot.slane %v5517_v62, 4  ;;  %v6155_v22 = vld [vmem:[#allocation2 + $0x5c] sm:$0x1] }
 0x191   : > { %v5522_v33 = vrot.slane %v5520_v45, 5  ;;  %v5528_v2 = vrot.slane %v5526_v35, 5  ;;  %v5532_v10 = vrot.slane %v5530_v4, 4  ;;  %v5541_v11 = vshrl.u32 %v5366_v42, 16  ;;  %v6156_v35 = vld [vmem:[#allocation2 + $0x60] sm:$0xe] }
 0x192   : > { %v5544_v60 = vshll.u32 %v5366_v42, 16  ;;  %v10962_v30 = vcombine.low %v9986_v54, %v9990_v16  ;;  %v5550_v28 = vshll.u32 %v5367_v23, 16  ;;  %v5554_v62 = vshrl.u32 %v5367_v23, 16  ;;  %v8180_v23 = vld [vmem:[#allocation2 + $0xb4] sm:$0xff]  }
 0x193   : > { %v5523_v19 = vor.u32 %v5522_v33, %v5519_v56  ;;  %v5560_v45 = vshll.u32 %v5368_v40, 16  ;;  %v10963_v18 = vcombine.low %v9995_v14, %v9999_v50  ;;  %v5533_v55 = vor.u32 %v5532_v10, %v5528_v2  ;;  %v10195_v33 = vpop.f32.mrf.mxu0  ;;  %v6158_v50 = vld [vmem:[#allocation2 + $0x68] sm:$0x1] }
 0x194   : > { %8004 = vmatmul.mubr.msk.bf16.gmra.mxu1 %vm1539_vm10, %v10962_v30  ;;  %v5538_v4 = vrot.slane %v5536_v32, 5  ;;  %v5543_v1 = vrot.slane %v5541_v11, 4  ;;  %v5546_v42 = vrot.slane %v5544_v60, 5  ;;  %v5552_v52 = vrot.slane %v5550_v28, 5  ;;  %v10193_v30 = vpop.f32.mrf.mxu1 }
 0x195   : > { %8007 = vmatprep.mubr.msk.bf16.mxu1 %vm1539_vm10, %v10963_v18  ;;  %v5524_v48 = vrot.slane %v5523_v19, 4  ;;  %v5556_v54 = vrot.slane %v5554_v62, 4  ;;  %v7446_v16 = vrot.slane %v6153_v25, 9  ;;  %10964 = vst [vmem:[#allocation23_spill] sm:$0xff] %v10193_v30  ;;  %v5534_v40 = vrot.slane %v5533_v55, 4  ;;  %v8181_v18 = vld [vmem:[#allocation2 + $0xc0] sm:$0xff]  }
 0x196   : > { %v5547_v56 = vor.u32 %v5546_v42, %v5543_v1  ;;  %v6271_v44 = vrot.slane %v6154_v12, 5  ;;  %v6274_v14 = vrot.slane %v6155_v22, 5  ;;  %v5562_v32 = vrot.slane %v5560_v45, 5  ;;  %v10197_v19 = vpop.f32.mrf.mxu1  ;;  %v5370_v22 = vld [vmem:[#allocation2 + $0x70] sm:$0xf] }
 0x197   : > { %v5557_v10 = vor.u32 %v5556_v54, %v5552_v52  ;;  %v7447_v11 = vrot.slane %v6156_v35, 9  ;;  %v6278_v60 = vrot.slane %v6157_v43, 5  ;;  %10965 = vst [vmem:[#allocation21_spill] sm:$0xff] %v10197_v19  ;;  %8038 = vmatmul.mubr.msk.bf16.gmra.mxu0 %vm1539_vm10, %v8180_v23  ;;  %v5529_v25 = vsel %vm8929_vm12, %v5524_v48, %v5528_v2  ;;  %v10215_v2 = vpop.f32.mrf.mxu0  ;;  %v5371_v54 = vld [vmem:[#allocation2 + $0x74] sm:$0x1] }
 0x198   : > { %v5539_v55 = vsel %vm8929_vm12, %v5534_v40, %v5538_v4  ;;  %v5548_v1 = vrot.slane %v5547_v56, 4  ;;  %v6273_v12 = vrot.slane %v6271_v44, 4  ;;  %8041 = vmatprep.mubr.msk.bf16.mxu0 %vm1539_vm10, %v8181_v18  ;;  %v10209_v43 = vsel %vm8940_vm7, %v7446_v16, %v6271_v44  ;;  %v10217_v48 = vpop.f32.mrf.mxu1  ;;  %v6160_v19 = vld [vmem:[#allocation2 + $0x70] sm:$0xf] }
 0x199   : > { %v10205_v28 = vcombine.low %v5529_v25, %v5539_v55  ;;  %v5558_v62 = vrot.slane %v5557_v10, 4  ;;  %v10213_v45 = vsel %vm8940_vm7, %v7447_v11, %v6278_v60  ;;  %10966 = vst [vmem:[#allocation12_spill] sm:$0xff] %v10217_v48  ;;  %v6280_v4 = vrot.slane %v6278_v60, 4  ;;  %v5372_v10 = vld [vmem:[#allocation2 + $0x78] sm:$0xf] }
 0x19a   : > { %v10221_v35 = vsel %vm8940_vm7, %v6273_v12, %v6274_v14  ;;  %v6281_v42 = vrot.slane %v6158_v50, 5  ;;  %v5565_v23 = vshrl.u32 %v5369_v37, 16  ;;  %v10967_v44 = vcombine.low %v10016_v57, %v10020_v24  ;;  %v5373_v14 = vld [vmem:[#allocation2 + $0x7c] sm:$0xf]  ;;  %v8182_v50 = vld [vmem:[#allocation2 + $0xcc] sm:$0xff]   ;;  %v10239_v25 = vpop.f32.mrf.mxu1  ;;  %v10243_v12 = vpop.f32.mrf.mxu0 }
 0x19b   : > { %v5553_v16 = vsel %vm8929_vm12, %v5548_v1, %v5552_v52  ;;  %v5563_v40 = vsel %vm8929_vm12, %v5558_v62, %v5562_v32  ;;  %v5568_v56 = vshll.u32 %v5369_v37, 16  ;;  %v5574_v18 = vshll.u32 %v5370_v22, 16  ;;  %v5374_v60 = vld [vmem:[#allocation2 + $0x80] sm:$0x1]  ;;  %10968 = vst [vmem:[#allocation10_spill] sm:$0xff] %v10239_v25 }
 0x19c   : > { %8008 = vmatmul.mubr.msk.bf16.gmra.mxu1 %vm1539_vm10, %v10967_v44  ;;  %v10237_v57 = vsel %vm8940_vm7, %v6280_v4, %v6281_v42  ;;  %v5567_v24 = vrot.slane %v5565_v23, 4  ;;  %v5578_v52 = vshrl.u32 %v5370_v22, 16  ;;  %v10241_v37 = vcombine.low %v5553_v16, %v5563_v40  ;;  %v6159_v48 = vld [vmem:[#allocation2 + $0x6c] sm:$0xe]  ;;  %v6161_v25 = vld [vmem:[#allocation2 + $0x74] sm:$0x1]  ;;  %v10247_v16 = vpop.f32.mrf.mxu0 }
 0x19d   : > { %8047 = vmatprep.mubr.msk.bf16.mxu1 %vm1539_vm10, %v10077_v27  ;;  %v5570_v32 = vrot.slane %v5568_v56, 5  ;;  %v5576_v55 = vrot.slane %v5574_v18, 5  ;;  %v5584_v1 = vshll.u32 %v5371_v54, 16  ;;  %v5589_v62 = vshrl.u32 %v5372_v10, 16  ;;  %v6163_v4 = vld [vmem:[#allocation2 + $0x7c] sm:$0xf] }
 0x19e   : > { %v5580_v27 = vrot.slane %v5578_v52, 4  ;;  %v5592_v44 = vshll.u32 %v5372_v10, 16  ;;  %v5598_v11 = vshll.u32 %v5373_v14, 16  ;;  %v5602_v22 = vshrl.u32 %v5373_v14, 16  ;;  %v6162_v52 = vld [vmem:[#allocation2 + $0x78] sm:$0xe]  ;;  %v10250_v10 = vpop.f32.mrf.mxu1  ;;  %v10256_v46 = vpop.f32.mrf.mxu0 }
 0x19f   : > { %v5571_v42 = vor.u32 %v5570_v32, %v5567_v24  ;;  %v5608_v23 = vshll.u32 %v5374_v60, 16  ;;  %8042 = vmatmul.mubr.msk.bf16.gmra.mxu0 %vm1539_vm10, %v8182_v50  ;;  %v5586_v40 = vrot.slane %v5584_v1, 5  ;;  %v5591_v56 = vrot.slane %v5589_v62, 4 }
 0x1a0   : > { %v5581_v54 = vor.u32 %v5580_v27, %v5576_v55  ;;  %v5594_v18 = vrot.slane %v5592_v44, 5  ;;  %v10969_v30 = vcombine.low %v10044_v3, %v10049_v6  ;;  %v5600_v24 = vrot.slane %v5598_v11, 5  ;;  %v7845_v44 = vpop.f32.mrf.mxu1 }
 0x1a1   : > { %v5572_v14 = vrot.slane %v5571_v42, 4  ;;  %v5604_v60 = vrot.slane %v5602_v22, 4  ;;  %v7448_v32 = vrot.slane %v6159_v48, 9  ;;  %v5610_v1 = vrot.slane %v5608_v23, 5  ;;  %v6164_v42 = vld [vmem:[#allocation2 + $0x80] sm:$0x1]  ;;  %v10265_v22 = vpop.f32.mrf.mxu0 }
 0x1a2   : > { %8081 = vmatprep.mubr.msk.bf16.mxu0 %vm1539_vm10, %v10969_v30  ;;  %v5582_v50 = vrot.slane %v5581_v54, 4  ;;  %v5595_v27 = vor.u32 %v5594_v18, %v5591_v56  ;;  %v6285_v62 = vrot.slane %v6160_v19, 5  ;;  %v6288_v30 = vrot.slane %v6161_v25, 5  ;;  %v2355_v56 = vpop.f32.mrf.mxu1 }
 0x1a3   : > { %v5577_v3 = vsel %vm8929_vm12, %v5572_v14, %v5576_v55  ;;  %v5605_v6 = vor.u32 %v5604_v60, %v5600_v24  ;;  %v7449_v11 = vrot.slane %v6162_v52, 9  ;;  %v2516_v48 = vadd.f32 %v7845_v44, %v10034_v31  ;;  %v5377_v44 = vld [vmem:[#allocation2 + $0x8c] sm:$0x1] }
 0x1a4   : > { %8048 = vmatmul.mubr.msk.bf16.vlgmr.msra.gmra.mxu1 %vm1539_vm10, %v10079_v29  ;;  %v5587_v19 = vsel %vm8929_vm12, %v5582_v50, %v5586_v40  ;;  %v5596_v23 = vrot.slane %v5595_v27, 4  ;;  %v6292_v54 = vrot.slane %v6163_v4, 5  ;;  %v5375_v29 = vld [vmem:[#allocation2 + $0x84] sm:$0xf]  ;;  %v10273_v25 = vsel %vm8940_vm7, %v7448_v32, %v6285_v62  ;;  %v7846_v4 = vpop.f32.mrf.mxu1  ;;  %v5376_v32 = vld [vmem:[#allocation2 + $0x88] sm:$0xf] }
 0x1a5   : > { %8051 = vmatprep.mubr.msk.bf16.mxu1 %vm1539_vm10, %v10113_v5  ;;  %v10269_v18 = vcombine.low %v5577_v3, %v5587_v19  ;;  %v5606_v55 = vrot.slane %v5605_v6, 4  ;;  %v6287_v31 = vrot.slane %v6285_v62, 4  ;;  %v2514_v52 = vadd.f32 %v2355_v56, %v10051_v13  ;;  %v10276_v5 = vpop.f32.mrf.mxu0  ;;  %v5378_v19 = vld [vmem:[#allocation2 + $0x90] sm:$0xf] }
 0x1a6   : > { %v5601_v14 = vsel %vm8929_vm12, %v5596_v23, %v5600_v24  ;;  %v6294_v40 = vrot.slane %v6292_v54, 4  ;;  %v6295_v60 = vrot.slane %v6164_v42, 5  ;;  %v5613_v62 = vshrl.u32 %v5375_v29, 16  ;;  %v2358_v23 = vpop.f32.mrf.mxu1 }
 0x1a7   : > { %v5611_v50 = vsel %vm8929_vm12, %v5606_v55, %v5610_v1  ;;  %v10284_v27 = vsel %vm8940_vm7, %v6287_v31, %v6288_v30  ;;  %v5616_v3 = vshll.u32 %v5375_v29, 16  ;;  %v2517_v13 = vadd.f32 %v7846_v4, %v10073_v59  ;;  %v7879_v6 = vpop.f32.mrf.mxu0 }
 0x1a8   : > { %v10970_v24 = vcombine.low %v10083_v8, %v10093_v61  ;;  %v10291_v42 = vcombine.low %v5601_v14, %v5611_v50  ;;  %v7465_v1 = vcombine.low %v10273_v25, %v10284_v27  ;;  %v10297_v30 = vsel %vm8940_vm7, %v7449_v11, %v6292_v54 }
 0x1a9   : > { %v10299_v29 = vadd.f32 %v7879_v6, %v2516_v48  ;;  %v10971_v59 = vcombine.low %v10117_v34, %v10121_v26  ;;  %v10307_v8 = vsel %vm8940_vm7, %v6294_v40, %v6295_v60  ;;  %v5615_v61 = vrot.slane %v5613_v62, 4  ;;  %v2924_v31 = vpop.f32.mrf.mxu0  ;;  %v7849_v4 = vpop.f32.mrf.mxu1  ;;  %v5379_v26 = vld [vmem:[#allocation2 + $0x94] sm:$0xf] }
 0x1aa   : > { %8082 = vmatmul.mubr.msk.bf16.vlgmr.msra.gmra.mxu0 %vm1539_vm10, %v10970_v24  ;;  %v5618_v56 = vrot.slane %v5616_v3, 5  ;;  %v2515_v55 = vadd.f32 %v2358_v23, %v10089_v63  ;;  %v5622_v11 = vshll.u32 %v5376_v32, 16  ;;  %v5626_v54 = vshrl.u32 %v5376_v32, 16 }
 0x1ab   : > { %8085 = vmatprep.mubr.msk.bf16.mxu0 %vm1539_vm10, %v10971_v59  ;;  %v5632_v14 = vshll.u32 %v5377_v44, 16  ;;  %v10310_v48 = vadd.f32 %v2924_v31, %v2514_v52  ;;  %v5637_v50 = vshrl.u32 %v5378_v19, 16  ;;  %v5640_v6 = vshll.u32 %v5378_v19, 16  ;;  %v7880_v63 = vpop.f32.mrf.mxu0  ;;  %v5380_v44 = vld [vmem:[#allocation2 + $0x98] sm:$0x1]  ;;  %v2371_v3 = vpop.f32.mrf.mxu1 }
 0x1ac   : > { %8052 = vmatmul.mubr.msk.bf16.gmra.mxu1 %vm1539_vm10, %v10157_v0  ;;  %v5619_v34 = vor.u32 %v5618_v56, %v5615_v61  ;;  %v2520_v40 = vadd.f32 %v7849_v4, %v10103_v39  ;;  %v5624_v60 = vrot.slane %v5622_v11, 5  ;;  %v5628_v62 = vrot.slane %v5626_v54, 4 }
 0x1ad   : > { %8055 = vmatprep.mubr.msk.bf16.mxu1 %vm1539_vm10, %v10177_v9  ;;  %v5634_v32 = vrot.slane %v5632_v14, 5  ;;  %v10317_v52 = vadd.f32 %v7880_v63, %v2517_v13  ;;  %v5639_v23 = vrot.slane %v5637_v50, 4  ;;  %v5642_v0 = vrot.slane %v5640_v6, 5  ;;  %v2927_v61 = vpop.f32.mrf.mxu0  ;;  %v7850_v31 = vpop.f32.mrf.mxu1  ;;  %v6165_v14 = vld [vmem:[#allocation2 + $0x84] sm:$0xe] }
 0x1ae   : > { %v5620_v24 = vrot.slane %v5619_v34, 4  ;;  %v2518_v59 = vadd.f32 %v2371_v3, %v10123_v21  ;;  %v5629_v19 = vor.u32 %v5628_v62, %v5624_v60  ;;  %v5646_v56 = vshll.u32 %v5379_v26, 16  ;;  %v6166_v13 = vld [vmem:[#allocation2 + $0x88] sm:$0xf] }
 0x1af   : > { %v5650_v39 = vshrl.u32 %v5379_v26, 16  ;;  %v10320_v4 = vadd.f32 %v2927_v61, %v2515_v55  ;;  %v7466_v9 = vcombine.low %v10297_v30, %v10307_v8  ;;  %v5643_v11 = vor.u32 %v5642_v0, %v5639_v23  ;;  %v7883_v50 = vpop.f32.mrf.mxu0  ;;  %v6167_v55 = vld [vmem:[#allocation2 + $0x8c] sm:$0x1]  ;;  %v2374_v62 = vpop.f32.mrf.mxu1 }
 0x1b0   : > { %v5656_v54 = vshll.u32 %v5380_v44, 16  ;;  %v2521_v34 = vadd.f32 %v7850_v31, %v10139_v47  ;;  %v10972_v21 = vcombine.low %v10149_v49, %v10153_v53  ;;  %v5630_v6 = vrot.slane %v5629_v19, 4 }
 0x1b1   : > { %v5648_v26 = vrot.slane %v5646_v56, 5  ;;  %v5652_v63 = vrot.slane %v5650_v39, 4  ;;  %v10329_v3 = vadd.f32 %v7883_v50, %v2520_v40  ;;  %v10973_v44 = vcombine.low %v10170_v17, %v10174_v7  ;;  %v2940_v53 = vpop.f32.mrf.mxu0  ;;  %v6168_v40 = vld [vmem:[#allocation2 + $0x90] sm:$0xe]  ;;  %v6169_v39 = vld [vmem:[#allocation2 + $0x94] sm:$0xf]  ;;  %v7853_v31 = vpop.f32.mrf.mxu1 }
 0x1b2   : > { %8086 = vmatmul.mubr.msk.bf16.gmra.mxu0 %vm1539_vm10, %v10972_v21  ;;  %v5625_v47 = vsel %vm8929_vm12, %v5620_v24, %v5624_v60  ;;  %v5644_v23 = vrot.slane %v5643_v11, 4  ;;  %v5658_v0 = vrot.slane %v5656_v54, 5  ;;  %v2519_v49 = vadd.f32 %v2374_v62, %v10165_v41  ;;  %v5381_v24 = vld [vmem:[#allocation2 + $0x9c] sm:$0xf]  ;;  %v5382_v62 = vld [vmem:[#allocation2 + $0xa0] sm:$0xf] }
 0x1b3   : > { %8089 = vmatprep.mubr.msk.bf16.mxu0 %vm1539_vm10, %v10973_v44  ;;  %v5635_v61 = vsel %vm8929_vm12, %v5630_v6, %v5634_v32  ;;  %v5653_v19 = vor.u32 %v5652_v63, %v5648_v26  ;;  %v6299_v56 = vrot.slane %v6166_v13, 5  ;;  %v10340_v50 = vadd.f32 %v2940_v53, %v2518_v59  ;;  %v7884_v32 = vpop.f32.mrf.mxu0  ;;  %v6170_v13 = vld [vmem:[#allocation2 + $0x98] sm:$0x1]  ;;  %v2387_v21 = vpop.f32.mrf.mxu1  ;;  %v5383_v44 = vld [vmem:[#allocation2 + $0xa4] sm:$0x1] }
 0x1b4   : > { %8056 = vmatmul.mubr.msk.bf16.gmra.mxu1 %vm1539_vm10, %v10205_v28  ;;  %v10344_v17 = vcombine.low %v5625_v47, %v5635_v61  ;;  %v7450_v7 = vrot.slane %v6165_v14, 9  ;;  %v6302_v60 = vrot.slane %v6167_v55, 5  ;;  %v2524_v41 = vadd.f32 %v7853_v31, %v10181_v20 }
 0x1b5   : > { %8059 = vmatprep.mubr.msk.bf16.mxu1 %vm1539_vm10, %v10241_v37  ;;  %v5649_v11 = vsel %vm8929_vm12, %v5644_v23, %v5648_v26  ;;  %v5654_v54 = vrot.slane %v5653_v19, 4  ;;  %v6301_v59 = vrot.slane %v6299_v56, 4  ;;  %v10351_v6 = vadd.f32 %v7884_v32, %v2521_v34  ;;  %v2943_v55 = vpop.f32.mrf.mxu0  ;;  %v7854_v47 = vpop.f32.mrf.mxu1  ;;  %v5384_v19 = vld [vmem:[#allocation2 + $0xa8] sm:$0xf] }
 0x1b6   : > { %v10355_v28 = vsel %vm8940_vm7, %v7450_v7, %v6299_v56  ;;  %v7451_v14 = vrot.slane %v6168_v40, 9  ;;  %v6306_v63 = vrot.slane %v6169_v39, 5  ;;  %v2522_v20 = vadd.f32 %v2387_v21, %v10195_v33 }
 0x1b7   : > { %v5659_v37 = vsel %vm8929_vm12, %v5654_v54, %v5658_v0  ;;  %v10362_v26 = vsel %vm8940_vm7, %v6301_v59, %v6302_v60  ;;  %v5661_v34 = vshrl.u32 %v5381_v24, 16  ;;  %v10364_v23 = vadd.f32 %v2943_v55, %v2519_v49  ;;  %v7887_v0 = vpop.f32.mrf.mxu0  ;;  %v2390_v49 = vpop.f32.mrf.mxu1 }
 0x1b8   : > { %v10366_v53 = vcombine.low %v5649_v11, %v5659_v37  ;;  %v7467_v61 = vcombine.low %v10355_v28, %v10362_v26  ;;  %v6309_v33 = vrot.slane %v6170_v13, 5  ;;  %v2525_v56 = vadd.f32 %v7854_v47, %v10215_v2  ;;  %v5386_v37 = vld [vmem:[#allocation2 + $0xb0] sm:$0x1] }
 0x1b9   : > { %v10974_v40 = vcombine.low %v10209_v43, %v10221_v35  ;;  %v6308_v39 = vrot.slane %v6306_v63, 4  ;;  %v5663_v31 = vrot.slane %v5661_v34, 4  ;;  %v5664_v7 = vshll.u32 %v5381_v24, 16  ;;  %v2956_v13 = vpop.f32.mrf.mxu0  ;;  %v5385_v24 = vld [vmem:[#allocation2 + $0xac] sm:$0xf] }
 0x1ba   : > { %v10375_v60 = vadd.f32 %v7887_v0, %v2524_v41  ;;  %v10975_v32 = vcombine.low %v10213_v45, %v10237_v57  ;;  %v5670_v11 = vshll.u32 %v5382_v62, 16  ;;  %v5674_v54 = vshrl.u32 %v5382_v62, 16  ;;  %v7857_v41 = vpop.f32.mrf.mxu1 }
 0x1bb   : > { %8090 = vmatmul.mubr.msk.bf16.gmra.mxu0 %vm1539_vm10, %v10974_v40  ;;  %v5680_v2 = vshll.u32 %v5383_v44, 16  ;;  %v2523_v59 = vadd.f32 %v2390_v49, %v10243_v12  ;;  %v10384_v43 = vsel %vm8940_vm7, %v7451_v14, %v6306_v63  ;;  %v5666_v35 = vrot.slane %v5664_v7, 5  ;;  %v7888_v14 = vpop.f32.mrf.mxu0 }
 0x1bc   : > { %8093 = vmatprep.mubr.msk.bf16.mxu0 %vm1539_vm10, %v10975_v32  ;;  %v5685_v21 = vshrl.u32 %v5384_v19, 16  ;;  %v10386_v55 = vadd.f32 %v2956_v13, %v2522_v20  ;;  %8060 = vmatmul.mubr.msk.bf16.gmra.mxu1 %vm1539_vm10, %v10269_v18  ;;  %v10392_v45 = vsel %vm8940_vm7, %v6308_v39, %v6309_v33  ;;  %v5672_v57 = vrot.slane %v5670_v11, 5  ;;  %v2403_v34 = vpop.f32.mrf.mxu1  ;;  %v6172_v13 = vld [vmem:[#allocation2 + $0xa0] sm:$0xf] }
 0x1bd   : > { %v5676_v12 = vrot.slane %v5674_v54, 4  ;;  %v2528_v62 = vadd.f32 %v7857_v41, %v10247_v16  ;;  %8063 = vmatprep.mubr.msk.bf16.mxu1 %vm1539_vm10, %v10291_v42  ;;  %v5667_v63 = vor.u32 %v5666_v35, %v5663_v31  ;;  %v5682_v44 = vrot.slane %v5680_v2, 5  ;;  %v2959_v39 = vpop.f32.mrf.mxu0  ;;  %v6171_v16 = vld [vmem:[#allocation2 + $0x9c] sm:$0xe] }
 0x1be   : > { %v5687_v20 = vrot.slane %v5685_v21, 4  ;;  %v10397_v47 = vadd.f32 %v7888_v14, %v2525_v56  ;;  %v5688_v0 = vshll.u32 %v5384_v19, 16  ;;  %v5694_v40 = vshll.u32 %v5385_v24, 16  ;;  %v7858_v11 = vpop.f32.mrf.mxu1  ;;  %v6175_v14 = vld [vmem:[#allocation2 + $0xac] sm:$0xf] }
 0x1bf   : > { %v5677_v18 = vor.u32 %v5676_v12, %v5672_v57  ;;  %v2526_v33 = vadd.f32 %v2403_v34, %v10256_v46  ;;  %v5668_v7 = vrot.slane %v5667_v63, 4  ;;  %v5698_v49 = vshrl.u32 %v5385_v24, 16  ;;  %v7891_v35 = vpop.f32.mrf.mxu0  ;;  %v6173_v24 = vld [vmem:[#allocation2 + $0xa4] sm:$0x1] }
 0x1c0   : > { %v5704_v32 = vshll.u32 %v5386_v37, 16  ;;  %v10400_v54 = vadd.f32 %v2959_v39, %v2523_v59  ;;  %v5690_v31 = vrot.slane %v5688_v0, 5  ;;  %v5696_v2 = vrot.slane %v5694_v40, 5  ;;  %v2406_v21 = vpop.f32.mrf.mxu1 }
 0x1c1   : > { %v5678_v42 = vrot.slane %v5677_v18, 4  ;;  %v2529_v56 = vadd.f32 %v7858_v11, %v10265_v22  ;;  %v7468_v46 = vcombine.low %v10384_v43, %v10392_v45  ;;  %v5673_v19 = vsel %vm8929_vm12, %v5668_v7, %v5672_v57  ;;  %v2972_v45 = vpop.f32.mrf.mxu0  ;;  %v5388_v11 = vld [vmem:[#allocation2 + $0xb8] sm:$0xf] }
 0x1c2   : > { %v5700_v59 = vrot.slane %v5698_v49, 4  ;;  %v10411_v41 = vadd.f32 %v7891_v35, %v2528_v62  ;;  %v5691_v25 = vor.u32 %v5690_v31, %v5687_v20  ;;  %v5706_v27 = vrot.slane %v5704_v32, 5  ;;  %v7861_v62 = vpop.f32.mrf.mxu1  ;;  %v5387_v20 = vld [vmem:[#allocation2 + $0xb4] sm:$0xf] }
 0x1c3   : > { %8094 = vmatmul.mubr.msk.bf16.gmra.mxu0 %vm1539_vm10, %v7465_v1  ;;  %v5683_v22 = vsel %vm8929_vm12, %v5678_v42, %v5682_v44  ;;  %v6174_v1 = vld [vmem:[#allocation2 + $0xa8] sm:$0xe]  ;;  %v2527_v43 = vadd.f32 %v2406_v21, %v10276_v5  ;;  %v7452_v12 = vrot.slane %v6171_v16, 9  ;;  %v6313_v37 = vrot.slane %v6172_v13, 5  ;;  %v6176_v44 = vld [vmem:[#allocation2 + $0xb0] sm:$0x1]  ;;  %v7892_v5 = vpop.f32.mrf.mxu0 }
 0x1c4   : > { %8097 = vmatprep.mubr.msk.bf16.mxu0 %vm1539_vm10, %v7466_v9  ;;  %v5701_v57 = vor.u32 %v5700_v59, %v5696_v2  ;;  %v10420_v63 = vadd.f32 %v2972_v45, %v2526_v33  ;;  %8064 = vmatmul.mubr.msk.bf16.gmra.mxu1 %vm1539_vm10, %v10344_v17  ;;  %v7420_v30 = vcombine.low %v5673_v19, %v5683_v22  ;;  %v5692_v8 = vrot.slane %v5691_v25, 4  ;;  %v2419_v39 = vpop.f32.mrf.mxu1  ;;  %v5389_v42 = vld [vmem:[#allocation2 + $0xbc] sm:$0x1]  ;;  %v5390_v59 = vld [vmem:[#allocation2 + $0xc0] sm:$0xf] }
 0x1c5   : > { %v6316_v9 = vrot.slane %v6173_v24, 5  ;;  %v2532_v34 = vadd.f32 %v7861_v62, %v10001_v51  ;;  %8067 = vmatprep.mubr.msk.bf16.mxu1 %vm1539_vm10, %v10366_v53  ;;  %v6315_v0 = vrot.slane %v6313_v37, 4  ;;  %v7453_v40 = vrot.slane %v6174_v1, 9  ;;  %v2975_v32 = vpop.f32.mrf.mxu0  ;;  %v10976_v62 = vld [vmem:[#allocation16_spill] sm:$0xff] }
 0x1c6   : > { %v5702_v18 = vrot.slane %v5701_v57, 4  ;;  %v10427_v33 = vadd.f32 %v7892_v5, %v2529_v56  ;;  %v5697_v17 = vsel %vm8929_vm12, %v5692_v8, %v5696_v2  ;;  %v10433_v7 = vsel %vm8940_vm7, %v7452_v12, %v6313_v37  ;;  %v7862_v2 = vpop.f32.mrf.mxu1 }
 0x1c7   : > { %v6320_v49 = vrot.slane %v6175_v14, 5  ;;  %v10439_v53 = vsel %vm8940_vm7, %v6315_v0, %v6316_v9  ;;  %v6323_v16 = vrot.slane %v6176_v44, 5  ;;  %v5709_v31 = vshrl.u32 %v5387_v20, 16  ;;  %v7895_v24 = vpop.f32.mrf.mxu0 }
 0x1c8   : > { %v5707_v51 = vsel %vm8929_vm12, %v5702_v18, %v5706_v27  ;;  %v2530_v13 = vadd.f32 %v2419_v39, %v10012_v38  ;;  %v10442_v56 = vadd.f32 %v2975_v32, %v2527_v43  ;;  %v7469_v19 = vcombine.low %v10433_v7, %v10439_v53  ;;  %v2422_v27 = vpop.f32.mrf.mxu1 }
 0x1c9   : > { %v7421_v35 = vcombine.low %v5697_v17, %v5707_v51  ;;  %v6321_v21 = vsel %vm8940_vm7, %v7453_v40, %v6320_v49  ;;  %v6322_v22 = vrot.slane %v6320_v49, 4  ;;  %v5711_v25 = vrot.slane %v5709_v31, 4  ;;  %v2988_v37 = vpop.f32.mrf.mxu0  ;;  %v10977_v51 = vld [vmem:[#allocation15_spill] sm:$0xff] }
 0x1ca   : > { %v5712_v38 = vshll.u32 %v5387_v20, 16  ;;  %v10452_v1 = vadd.f32 %v7895_v24, %v2532_v34  ;;  %v5718_v43 = vshll.u32 %v5388_v11, 16  ;;  %v5722_v45 = vshrl.u32 %v5388_v11, 16  ;;  %v7865_v9 = vpop.f32.mrf.mxu1  ;;  %v5392_v34 = vld [vmem:[#allocation2 + $0xc8] sm:$0x1] }
 0x1cb   : > { %8098 = vmatmul.mubr.msk.bf16.gmra.mxu0 %vm1539_vm10, %v7467_v61  ;;  %v5728_v57 = vshll.u32 %v5389_v42, 16  ;;  %v2533_v12 = vadd.f32 %v7862_v2, %v10032_v58  ;;  %v6324_v28 = vsel %vm8940_vm7, %v6322_v22, %v6323_v16  ;;  %v5391_v61 = vld [vmem:[#allocation2 + $0xc4] sm:$0xf]  ;;  %v5733_v14 = vshrl.u32 %v5390_v59, 16  ;;  %v7896_v58 = vpop.f32.mrf.mxu0  ;;  %v6177_v31 = vld [vmem:[#allocation2 + $0xb4] sm:$0xe] }
 0x1cc   : > { %8101 = vmatprep.mubr.msk.bf16.mxu0 %vm1539_vm10, %v7468_v46  ;;  %v5714_v26 = vrot.slane %v5712_v38, 5  ;;  %v2531_v8 = vadd.f32 %v2422_v27, %v10976_v62  ;;  %v10459_v44 = vadd.f32 %v2988_v37, %v2530_v13  ;;  %8068 = vmatmul.mubr.msk.bf16.gmra.mxu1 %vm1539_vm10, %v7420_v30  ;;  %v5720_v46 = vrot.slane %v5718_v43, 5  ;;  %v2435_v39 = vpop.f32.mrf.mxu1  ;;  %v6178_v22 = vld [vmem:[#allocation2 + $0xb8] sm:$0xf]  ;;  %v10979_v27 = vld [vmem:[#allocation13_spill] sm:$0xff] }
 0x1cd   : > { %v5724_v20 = vrot.slane %v5722_v45, 4  ;;  %8071 = vmatprep.mubr.msk.bf16.mxu1 %vm1539_vm10, %v7421_v35  ;;  %v7470_v5 = vcombine.low %v6321_v21, %v6324_v28  ;;  %v5730_v0 = vrot.slane %v5728_v57, 5  ;;  %v5735_v40 = vrot.slane %v5733_v14, 4  ;;  %v2991_v16 = vpop.f32.mrf.mxu0  ;;  %v6180_v62 = vld [vmem:[#allocation2 + $0xc0] sm:$0xe] }
 0x1ce   : > { %v5715_v18 = vor.u32 %v5714_v26, %v5711_v25  ;;  %v10463_v17 = vadd.f32 %v7896_v58, %v2533_v12  ;;  %v5736_v49 = vshll.u32 %v5390_v59, 16  ;;  %v5742_v32 = vshll.u32 %v5391_v61, 16  ;;  %v7866_v13 = vpop.f32.mrf.mxu1  ;;  %v10978_v25 = vld [vmem:[#allocation11_spill] sm:$0xff]  ;;  %v6179_v12 = vld [vmem:[#allocation2 + $0xbc] sm:$0x1] }
 0x1cf   : > { %v5725_v7 = vor.u32 %v5724_v20, %v5720_v46  ;;  %v2536_v53 = vadd.f32 %v7865_v9, %v10977_v51  ;;  %v5746_v11 = vshrl.u32 %v5391_v61, 16  ;;  %v5752_v42 = vshll.u32 %v5392_v34, 16  ;;  %v7899_v59 = vpop.f32.mrf.mxu0  ;;  %v6181_v58 = vld [vmem:[#allocation2 + $0xc4] sm:$0xf]  ;;  %v386_v51 = vld [vmem:[#allocation2 + $0xd4] sm:$0x1] }
 0x1d0   : > { %v5716_v30 = vrot.slane %v5715_v18, 4  ;;  %v10466_v2 = vadd.f32 %v2991_v16, %v2531_v8  ;;  %v5738_v24 = vrot.slane %v5736_v49, 5  ;;  %v5744_v21 = vrot.slane %v5742_v32, 5  ;;  %v2438_v37 = vpop.f32.mrf.mxu1 }
 0x1d1   : > { %v5726_v35 = vrot.slane %v5725_v7, 4  ;;  %v2534_v38 = vadd.f32 %v2435_v39, %v10978_v25  ;;  %v2537_v43 = vadd.f32 %v7866_v13, %v10979_v27  ;;  %v5748_v57 = vrot.slane %v5746_v11, 4  ;;  %v3004_v8 = vpop.f32.mrf.mxu0 }
 0x1d2   : > { %v5721_v45 = vsel %vm8929_vm12, %v5716_v30, %v5720_v46  ;;  %v10473_v28 = vadd.f32 %v7899_v59, %v2536_v53  ;;  %v5739_v61 = vor.u32 %v5738_v24, %v5735_v40  ;;  %v5754_v14 = vrot.slane %v5752_v42, 5  ;;  %v10980_v46 = vld [vmem:[#allocation20_spill] sm:$0xff]  ;;  %v7869_v39 = vpop.f32.mrf.mxu1  ;;  %v10981_v53 = vld [vmem:[#allocation19_spill] sm:$0xff] }
 0x1d3   : > { %8102 = vmatmul.mubr.msk.bf16.gmra.mxu0 %vm1539_vm10, %v7469_v19  ;;  %v5731_v26 = vsel %vm8929_vm12, %v5726_v35, %v5730_v0  ;;  %v5749_v20 = vor.u32 %v5748_v57, %v5744_v21  ;;  %v7454_v19 = vrot.slane %v6177_v31, 9  ;;  %v6327_v34 = vrot.slane %v6178_v22, 5  ;;  %v7900_v16 = vpop.f32.mrf.mxu0  ;;  %v5393_v22 = vld [vmem:[#allocation2 + $0xcc] sm:$0xf] }
 0x1d4   : > { %8105 = vmatprep.mubr.msk.bf16.mxu0 %vm1539_vm10, %v7470_v5  ;;  %v7422_v9 = vcombine.low %v5721_v45, %v5731_v26  ;;  %v2535_v18 = vadd.f32 %v2438_v37, %v10980_v46  ;;  %v10479_v7 = vadd.f32 %v3004_v8, %v2534_v38  ;;  %v5740_v49 = vrot.slane %v5739_v61, 4  ;;  %v6182_v5 = vld [vmem:[#allocation2 + $0xc8] sm:$0x1]  ;;  %v2451_v31 = vpop.f32.mrf.mxu1  ;;  %v6183_v8 = vld [vmem:[#allocation2 + $0xcc] sm:$0xe] }
 0x1d5   : > { %v6330_v32 = vrot.slane %v6179_v12, 5  ;;  %v2540_v0 = vadd.f32 %v7869_v39, %v10981_v53  ;;  %v5750_v40 = vrot.slane %v5749_v20, 4  ;;  %v6329_v30 = vrot.slane %v6327_v34, 4  ;;  %v3007_v38 = vpop.f32.mrf.mxu0 }
 0x1d6   : > { %8072 = vmatmul.mubr.msk.bf16.gmra.mxu1 %vm1539_vm10, %v7422_v9  ;;  %v7455_v11 = vrot.slane %v6180_v62, 9  ;;  %v5745_v42 = vsel %vm8929_vm12, %v5740_v49, %v5744_v21  ;;  %v10485_v13 = vadd.f32 %v7900_v16, %v2537_v43  ;;  %v6328_v35 = vsel %vm8940_vm7, %v7454_v19, %v6327_v34  ;;  %v5394_v21 = vld [vmem:[#allocation2 + $0xd0] sm:$0xf]  ;;  %v10983_v43 = vld [vmem:[#allocation14_spill] sm:$0xff]  ;;  %v7870_v26 = vpop.f32.mrf.mxu1 }
 0x1d7   : > { %v6334_v24 = vrot.slane %v6181_v58, 5  ;;  %v5755_v25 = vsel %vm8929_vm12, %v5750_v40, %v5754_v14  ;;  %v6331_v27 = vsel %vm8940_vm7, %v6329_v30, %v6330_v32  ;;  %v6337_v59 = vrot.slane %v6182_v5, 5  ;;  %v7903_v9 = vpop.f32.mrf.mxu0  ;;  %v10984_v58 = vld [vmem:[#allocation22_spill] sm:$0xff]  ;;  %v6184_v5 = vld [vmem:[#allocation2 + $0xd0] sm:$0xf] }
 0x1d8   : > { %v387_v57 = vsel %vm8693_vm11, 0, %v386_v51  ;;  %v7423_v12 = vcombine.low %v5745_v42, %v5755_v25  ;;  %v2538_v37 = vadd.f32 %v2451_v31, %v10983_v43  ;;  %v10496_v61 = vadd.f32 %v3007_v38, %v2535_v18  ;;  %v2454_v39 = vpop.f32.mrf.mxu1  ;;  %v10985_v38 = vld [vmem:[#allocation23_spill] sm:$0xff] }
 0x1d9   : > { %v7471_v62 = vcombine.low %v6328_v35, %v6331_v27  ;;  %388 = vst [vmem:[#allocation2 + $0xd4] sm:$0x1] %v387_v57  ;;  %v6335_v14 = vsel %vm8940_vm7, %v7455_v11, %v6334_v24  ;;  %v6336_v20 = vrot.slane %v6334_v24, 4  ;;  %v5757_v19 = vshrl.u32 %v5393_v22, 16  ;;  %v3020_v53 = vpop.f32.mrf.mxu0 }
 0x1da   : > { %v5760_v34 = vshll.u32 %v5393_v22, 16  ;;  %8075 = vmatprep.mubr.msk.bf16.mxu1 %vm1539_vm10, %v7423_v12  ;;  %v2541_v46 = vadd.f32 %v7870_v26, %v10984_v58  ;;  %v10502_v49 = vadd.f32 %v7903_v9, %v2540_v0  ;;  %v5766_v18 = vshll.u32 %v5394_v21, 16  ;;  %v7873_v42 = vpop.f32.mrf.mxu1 }
 0x1db   : > { %8106 = vmatmul.mubr.msk.bf16.gmra.mxu0 %vm1539_vm10, %v7471_v62  ;;  %v5770_v32 = vshrl.u32 %v5394_v21, 16  ;;  %v6338_v51 = vsel %vm8940_vm7, %v6336_v20, %v6337_v59  ;;  %v5759_v40 = vrot.slane %v5757_v19, 4  ;;  %v7456_v30 = vrot.slane %v6183_v8, 9  ;;  %v7904_v22 = vpop.f32.mrf.mxu0  ;;  %v10986_v21 = vld [vmem:[#allocation21_spill] sm:$0xff] }
 0x1dc   : > { %v5762_v16 = vrot.slane %v5760_v34, 5  ;;  %v7472_v11 = vcombine.low %v6335_v14, %v6338_v51  ;;  %v10507_v31 = vadd.f32 %v3020_v53, %v2538_v37  ;;  %v5768_v35 = vrot.slane %v5766_v18, 5  ;;  %v2467_v57 = vpop.f32.mrf.mxu1 }
 0x1dd   : > { %v5772_v24 = vrot.slane %v5770_v32, 4  ;;  %v6341_v25 = vrot.slane %v6184_v5, 5  ;;  %v2539_v27 = vadd.f32 %v2454_v39, %v10985_v38  ;;  %v10511_v59 = vadd.f32 %v7904_v22, %v2541_v46  ;;  %v3023_v62 = vpop.f32.mrf.mxu0  ;;  %v10987_v39 = vld [vmem:[#allocation12_spill] sm:$0xff] }
 0x1de   : > { %v5763_v0 = vor.u32 %v5762_v16, %v5759_v40  ;;  %8109 = vmatprep.mubr.msk.bf16.mxu0 %vm1539_vm10, %v7472_v11  ;;  %v2544_v12 = vadd.f32 %v7873_v42, %v10986_v21  ;;  %v7874_v19 = vpop.f32.mrf.mxu1  ;;  %v2542_v18 = vadd.f32 %v2467_v57, %v10987_v39 }
 0x1df   : > { %v5773_v45 = vor.u32 %v5772_v24, %v5768_v35  ;;  %v6342_v8 = vsel %vm8940_vm7, %v7456_v30, %v6341_v25  ;;  %v6343_v9 = vrot.slane %v6341_v25, 4  ;;  %v10516_v34 = vadd.f32 %v3023_v62, %v2539_v27  ;;  %v7907_v46 = vpop.f32.mrf.mxu0  ;;  %v10988_v24 = vld [vmem:[#allocation10_spill] sm:$0xff] }
 0x1e0   : > { %v5395_v43 = vld [vmem:[#allocation2 + $0xd4] sm:$0x1]  ;;  %v5764_v26 = vrot.slane %v5763_v0, 4  ;;  %v2470_v51 = vpop.f32.mrf.mxu1  ;;  %v10521_v53 = vadd.f32 %v7907_v46, %v2544_v12  ;;  %v2545_v0 = vadd.f32 %v7874_v19, %v10988_v24 }
 0x1e1   : > { %v6185_v37 = vld [vmem:[#allocation2 + $0xd4] sm:$0x1]  ;;  %v5774_v14 = vrot.slane %v5773_v45, 4  ;;  %v5776_v20 = vshll.u32 %v5395_v43, 16  ;;  %v2543_v16 = vadd.f32 %v2470_v51, %v10250_v10  ;;  %v3036_v11 = vpop.f32.mrf.mxu0 }
 0x1e2   : > { %v6344_v58 = vrot.slane %v6185_v37, 5  ;;  %v5769_v32 = vsel %vm8929_vm12, %v5764_v26, %v5768_v35  ;;  %v10529_v22 = vadd.f32 %v3036_v11, %v2542_v18  ;;  %v7913_v25 = vpop.f32.mrf.mxu1 }
 0x1e3   : > { %v5778_v5 = vrot.slane %v5776_v20, 5  ;;  %v3507_v38 = vadd.f32 %v7913_v25, %v10299_v29  ;;  %v7908_v27 = vpop.f32.mrf.mxu0 }
 0x1e4   : > { %v6345_v40 = vsel %vm8940_vm7, %v6343_v9, %v6344_v58  ;;  %v10533_v36 = vadd.f32 %v7908_v27, %v2545_v0  ;;  %v3346_v45 = vpop.f32.mrf.mxu1 }
 0x1e5   : > { %v7473_v30 = vcombine.low %v6342_v8, %v6345_v40  ;;  %v5779_v42 = vsel %vm8929_vm12, %v5774_v14, %v5778_v5  ;;  %v3505_v10 = vadd.f32 %v3346_v45, %v10310_v48  ;;  %v3039_v15 = vpop.f32.mrf.mxu0 }
 0x1e6   : > { %v7424_v35 = vcombine.low %v5769_v32, %v5779_v42  ;;  %v10537_v57 = vadd.f32 %v3039_v15, %v2543_v16  ;;  %v7914_v21 = vpop.f32.mrf.mxu1 }
 0x1e7   : > { %8110 = vmatmul.mubr.msk.bf16.gmra.mxu0 %vm1539_vm10, %v7473_v30  ;;  %v3508_v12 = vadd.f32 %v7914_v21, %v10317_v52  ;;  %v7947_v43 = vpop.f32.mrf.mxu0 }
 0x1e8   : > { %8076 = vmatmul.mubr.msk.bf16.gmra.mxu1 %vm1539_vm10, %v7424_v35  ;;  %v3349_v26 = vpop.f32.mrf.mxu1  ;;  %v10540_v62 = vadd.f32 %v7947_v43, %v3507_v38 }
 0x1e9   : > { %v3506_v29 = vadd.f32 %v3349_v26, %v10320_v4  ;;  %v4136_v37 = vpop.f32.mrf.mxu0 }
 0x1ea   : > { %v7917_v8 = vpop.f32.mrf.mxu1  ;;  %v10543_v9 = vadd.f32 %v4136_v37, %v3505_v10 }
 0x1eb   : > { %v3511_v14 = vadd.f32 %v7917_v8, %v10329_v3  ;;  %v7948_v20 = vpop.f32.mrf.mxu0 }
 0x1ec   : > { %v3362_v48 = vpop.f32.mrf.mxu1  ;;  %v10546_v19 = vadd.f32 %v7948_v20, %v3508_v12 }
 0x1ed   : > { %v3509_v58 = vadd.f32 %v3362_v48, %v10340_v50  ;;  %v4139_v39 = vpop.f32.mrf.mxu0 }
 0x1ee   : > { %v7918_v52 = vpop.f32.mrf.mxu1  ;;  %v10549_v18 = vadd.f32 %v4139_v39, %v3506_v29 }
 0x1ef   : > { %v3512_v46 = vadd.f32 %v7918_v52, %v10351_v6  ;;  %v7951_v32 = vpop.f32.mrf.mxu0 }
 0x1f0   : > { %v3365_v4 = vpop.f32.mrf.mxu1  ;;  %v10552_v5 = vadd.f32 %v7951_v32, %v3511_v14 }
 0x1f1   : > { %v3510_v51 = vadd.f32 %v3365_v4, %v10364_v23  ;;  %v4152_v40 = vpop.f32.mrf.mxu0 }
 0x1f2   : > { %v7921_v3 = vpop.f32.mrf.mxu1  ;;  %v10555_v16 = vadd.f32 %v4152_v40, %v3509_v58 }
 0x1f3   : > { %v3515_v30 = vadd.f32 %v7921_v3, %v10375_v60  ;;  %v7952_v11 = vpop.f32.mrf.mxu0 }
 0x1f4   : > { %v3378_v50 = vpop.f32.mrf.mxu1  ;;  %v10558_v42 = vadd.f32 %v7952_v11, %v3512_v46 }
 0x1f5   : > { %v3513_v24 = vadd.f32 %v3378_v50, %v10386_v55  ;;  %v4155_v0 = vpop.f32.mrf.mxu0 }
 0x1f6   : > { %v7922_v6 = vpop.f32.mrf.mxu1  ;;  %v10561_v25 = vadd.f32 %v4155_v0, %v3510_v51 }
 0x1f7   : > { %v3516_v35 = vadd.f32 %v7922_v6, %v10397_v47  ;;  %v7955_v38 = vpop.f32.mrf.mxu0 }
 0x1f8   : > { %v3381_v23 = vpop.f32.mrf.mxu1  ;;  %v10564_v27 = vadd.f32 %v7955_v38, %v3515_v30 }
 0x1f9   : > { %v3514_v45 = vadd.f32 %v3381_v23, %v10400_v54  ;;  %v4168_v10 = vpop.f32.mrf.mxu0 }
 0x1fa   : > { %v7925_v60 = vpop.f32.mrf.mxu1  ;;  %v10567_v15 = vadd.f32 %v4168_v10, %v3513_v24 }
 0x1fb   : > { %v3519_v21 = vadd.f32 %v7925_v60, %v10411_v41  ;;  %v7956_v12 = vpop.f32.mrf.mxu0 }
 0x1fc   : > { %v3394_v55 = vpop.f32.mrf.mxu1  ;;  %v10570_v43 = vadd.f32 %v7956_v12, %v3516_v35 }
 0x1fd   : > { %v3517_v26 = vadd.f32 %v3394_v55, %v10420_v63  ;;  %v4171_v29 = vpop.f32.mrf.mxu0 }
 0x1fe   : > { %v7926_v47 = vpop.f32.mrf.mxu1  ;;  %v10573_v37 = vadd.f32 %v4171_v29, %v3514_v45 }
 0x1ff   : > { %v3520_v8 = vadd.f32 %v7926_v47, %v10427_v33  ;;  %v7959_v14 = vpop.f32.mrf.mxu0 }
 0x200   : > { %v3397_v54 = vpop.f32.mrf.mxu1  ;;  %v10576_v20 = vadd.f32 %v7959_v14, %v3519_v21 }
 0x201   : > { %v3518_v48 = vadd.f32 %v3397_v54, %v10442_v56  ;;  %v4184_v58 = vpop.f32.mrf.mxu0 }
 0x202   : > { %v7929_v41 = vpop.f32.mrf.mxu1  ;;  %v10579_v39 = vadd.f32 %v4184_v58, %v3517_v26 }
 0x203   : > { %v3523_v52 = vadd.f32 %v7929_v41, %v10452_v1  ;;  %v7960_v46 = vpop.f32.mrf.mxu0 }
 0x204   : > { %v3410_v63 = vpop.f32.mrf.mxu1  ;;  %v10582_v32 = vadd.f32 %v7960_v46, %v3520_v8 }
 0x205   : > { %v3521_v4 = vadd.f32 %v3410_v63, %v10459_v44  ;;  %v4187_v51 = vpop.f32.mrf.mxu0 }
 0x206   : > { %v7930_v33 = vpop.f32.mrf.mxu1  ;;  %v10585_v40 = vadd.f32 %v4187_v51, %v3518_v48 }
 0x207   : > { %v3524_v3 = vadd.f32 %v7930_v33, %v10463_v17  ;;  %v7963_v30 = vpop.f32.mrf.mxu0 }
 0x208   : > { %v3413_v56 = vpop.f32.mrf.mxu1  ;;  %v10588_v11 = vadd.f32 %v7963_v30, %v3523_v52 }
 0x209   : > { %v3522_v50 = vadd.f32 %v3413_v56, %v10466_v2  ;;  %v4200_v24 = vpop.f32.mrf.mxu0 }
 0x20a   : > { %v7933_v1 = vpop.f32.mrf.mxu1  ;;  %v10591_v0 = vadd.f32 %v4200_v24, %v3521_v4 }
 0x20b   : > { %v3527_v6 = vadd.f32 %v7933_v1, %v10473_v28  ;;  %v7964_v35 = vpop.f32.mrf.mxu0 }
 0x20c   : > { %v3426_v44 = vpop.f32.mrf.mxu1  ;;  %v10594_v38 = vadd.f32 %v7964_v35, %v3524_v3 }
 0x20d   : > { %v3525_v23 = vadd.f32 %v3426_v44, %v10479_v7  ;;  %v4203_v45 = vpop.f32.mrf.mxu0 }
 0x20e   : > { %v7934_v17 = vpop.f32.mrf.mxu1  ;;  %v10597_v10 = vadd.f32 %v4203_v45, %v3522_v50 }
 0x20f   : > { %v3528_v60 = vadd.f32 %v7934_v17, %v10485_v13  ;;  %v7967_v21 = vpop.f32.mrf.mxu0 }
 0x210   : > { %v3429_v2 = vpop.f32.mrf.mxu1  ;;  %v10600_v12 = vadd.f32 %v7967_v21, %v3527_v6 }
 0x211   : > { %v3526_v55 = vadd.f32 %v3429_v2, %v10496_v61  ;;  %v4216_v26 = vpop.f32.mrf.mxu0 }
 0x212   : > { %v7937_v28 = vpop.f32.mrf.mxu1  ;;  %v10603_v29 = vadd.f32 %v4216_v26, %v3525_v23 }
 0x213   : > { %v3531_v47 = vadd.f32 %v7937_v28, %v10502_v49  ;;  %v7968_v8 = vpop.f32.mrf.mxu0 }
 0x214   : > { %v3442_v7 = vpop.f32.mrf.mxu1  ;;  %v10606_v14 = vadd.f32 %v7968_v8, %v3528_v60 }
 0x215   : > { %v3529_v54 = vadd.f32 %v3442_v7, %v10507_v31  ;;  %v4219_v48 = vpop.f32.mrf.mxu0 }
 0x216   : > { %v7938_v13 = vpop.f32.mrf.mxu1  ;;  %v10609_v58 = vadd.f32 %v4219_v48, %v3526_v55 }
 0x217   : > { %v3532_v41 = vadd.f32 %v7938_v13, %v10511_v59  ;;  %v7971_v52 = vpop.f32.mrf.mxu0 }
 0x218   : > { %10989 = vst [vmem:[#allocation17_spill] sm:$0xff] %v10609_v58  ;;  %v3445_v61 = vpop.f32.mrf.mxu1  ;;  %v10612_v46 = vadd.f32 %v7971_v52, %v3531_v47 }
 0x219   : > { %v3530_v63 = vadd.f32 %v3445_v61, %v10516_v34  ;;  %v4232_v4 = vpop.f32.mrf.mxu0 }
 0x21a   : > { %v7941_v49 = vpop.f32.mrf.mxu1  ;;  %v10615_v51 = vadd.f32 %v4232_v4, %v3529_v54 }
 0x21b   : > { %v3535_v33 = vadd.f32 %v7941_v49, %v10521_v53  ;;  %v7972_v3 = vpop.f32.mrf.mxu0 }
 0x21c   : > { %v3458_v31 = vpop.f32.mrf.mxu1  ;;  %v10618_v30 = vadd.f32 %v7972_v3, %v3532_v41 }
 0x21d   : > { %v3533_v56 = vadd.f32 %v3458_v31, %v10529_v22  ;;  %v4235_v50 = vpop.f32.mrf.mxu0 }
 0x21e   : > { %10990 = vst [vmem:[#allocation18_spill] sm:$0xff] %v10618_v30  ;;  %v7942_v59 = vpop.f32.mrf.mxu1  ;;  %v10621_v24 = vadd.f32 %v4235_v50, %v3530_v63 }
 0x21f   : > { %v3536_v1 = vadd.f32 %v7942_v59, %v10533_v36  ;;  %v7975_v6 = vpop.f32.mrf.mxu0 }
 0x220   : > { %10991 = vst [vmem:[#allocation24_spill] sm:$0xff] %v10621_v24  ;;  %v3461_v34 = vpop.f32.mrf.mxu1  ;;  %v10624_v35 = vadd.f32 %v7975_v6, %v3535_v33 }
 0x221   : > { %v3534_v44 = vadd.f32 %v3461_v34, %v10537_v57  ;;  %v4248_v23 = vpop.f32.mrf.mxu0 }
 0x222   : > { %v10627_v53 = vadd.f32 %v4248_v23, %v3533_v56  ;;  %v7981_v45 = vpop.f32.mrf.mxu1 }
 0x223   : > { %v4863_v17 = vadd.f32 %v7981_v45, %v10540_v62  ;;  %v7976_v60 = vpop.f32.mrf.mxu0 }
 0x224   : > { %v10630_v22 = vadd.f32 %v7976_v60, %v3536_v1  ;;  %v4702_v21 = vpop.f32.mrf.mxu1 }
 0x225   : > { %v4861_v2 = vadd.f32 %v4702_v21, %v10543_v9  ;;  %v4251_v55 = vpop.f32.mrf.mxu0 }
 0x226   : > { %v10633_v36 = vadd.f32 %v4251_v55, %v3534_v44  ;;  %v10635_v26 = vpop.f32.mrf.mxu1 }
 0x227   : > { %v8015_v28 = vpop.f32.mrf.mxu0 }
 0x228   : > { %v10637_v47 = vpop.f32.mrf.mxu1  ;;  %v10639_v57 = vadd.f32 %v8015_v28, %v4863_v17 }
 0x229   : > { %v5125_v8 = vpop.f32.mrf.mxu0 }
 0x22a   : > { %v7985_v7 = vpop.f32.mrf.mxu1  ;;  %v10641_v54 = vadd.f32 %v5125_v8, %v4861_v2 }
 0x22b   : > { %v4867_v62 = vadd.f32 %v7985_v7, %v10552_v5  ;;  %v10644_v48 = vpop.f32.mrf.mxu0 }
 0x22c   : > { %v4718_v13 = vpop.f32.mrf.mxu1 }
 0x22d   : > { %v4865_v9 = vadd.f32 %v4718_v13, %v10555_v16  ;;  %v10647_v41 = vpop.f32.mrf.mxu0 }
 0x22e   : > { %v10649_v52 = vpop.f32.mrf.mxu1 }
 0x22f   : > { %v8019_v61 = vpop.f32.mrf.mxu0 }
 0x230   : > { %v10651_v63 = vpop.f32.mrf.mxu1  ;;  %v10653_v4 = vadd.f32 %v8019_v61, %v4867_v62 }
 0x231   : > { %v5141_v49 = vpop.f32.mrf.mxu0 }
 0x232   : > { %v7989_v33 = vpop.f32.mrf.mxu1  ;;  %v10655_v3 = vadd.f32 %v5141_v49, %v4865_v9 }
 0x233   : > { %v4871_v5 = vadd.f32 %v7989_v33, %v10564_v27  ;;  %v10658_v31 = vpop.f32.mrf.mxu0 }
 0x234   : > { %v4734_v56 = vpop.f32.mrf.mxu1 }
 0x235   : > { %v4869_v16 = vadd.f32 %v4734_v56, %v10567_v15  ;;  %v10661_v50 = vpop.f32.mrf.mxu0 }
 0x236   : > { %v10663_v59 = vpop.f32.mrf.mxu1 }
 0x237   : > { %v8023_v1 = vpop.f32.mrf.mxu0 }
 0x238   : > { %v10665_v6 = vpop.f32.mrf.mxu1  ;;  %v10667_v34 = vadd.f32 %v8023_v1, %v4871_v5 }
 0x239   : > { %v5157_v44 = vpop.f32.mrf.mxu0 }
 0x23a   : > { %v7993_v23 = vpop.f32.mrf.mxu1  ;;  %v10669_v45 = vadd.f32 %v5157_v44, %v4869_v16 }
 0x23b   : > { %v4875_v27 = vadd.f32 %v7993_v23, %v10576_v20  ;;  %v10672_v17 = vpop.f32.mrf.mxu0 }
 0x23c   : > { %v4750_v60 = vpop.f32.mrf.mxu1 }
 0x23d   : > { %v4873_v15 = vadd.f32 %v4750_v60, %v10579_v39  ;;  %v10675_v21 = vpop.f32.mrf.mxu0 }
 0x23e   : > { %v10677_v2 = vpop.f32.mrf.mxu1 }
 0x23f   : > { %v8027_v55 = vpop.f32.mrf.mxu0 }
 0x240   : > { %v10679_v28 = vpop.f32.mrf.mxu1  ;;  %v10681_v8 = vadd.f32 %v8027_v55, %v4875_v27 }
 0x241   : > { %v5173_v7 = vpop.f32.mrf.mxu0 }
 0x242   : > { %v7997_v62 = vpop.f32.mrf.mxu1  ;;  %v10683_v13 = vadd.f32 %v5173_v7, %v4873_v15 }
 0x243   : > { %v4879_v20 = vadd.f32 %v7997_v62, %v10588_v11  ;;  %v10686_v9 = vpop.f32.mrf.mxu0 }
 0x244   : > { %v4766_v61 = vpop.f32.mrf.mxu1 }
 0x245   : > { %v4877_v39 = vadd.f32 %v4766_v61, %v10591_v0  ;;  %v10689_v49 = vpop.f32.mrf.mxu0 }
 0x246   : > { %v10691_v33 = vpop.f32.mrf.mxu1 }
 0x247   : > { %v8031_v5 = vpop.f32.mrf.mxu0 }
 0x248   : > { %v10693_v56 = vpop.f32.mrf.mxu1  ;;  %v10695_v16 = vadd.f32 %v8031_v5, %v4879_v20 }
 0x249   : > { %v5189_v1 = vpop.f32.mrf.mxu0 }
 0x24a   : > { %v8001_v44 = vpop.f32.mrf.mxu1  ;;  %v10697_v23 = vadd.f32 %v5189_v1, %v4877_v39 }
 0x24b   : > { %v4883_v11 = vadd.f32 %v8001_v44, %v10600_v12  ;;  %v10700_v27 = vpop.f32.mrf.mxu0 }
 0x24c   : > { %v4782_v60 = vpop.f32.mrf.mxu1 }
 0x24d   : > { %v4881_v0 = vadd.f32 %v4782_v60, %v10603_v29  ;;  %v10703_v15 = vpop.f32.mrf.mxu0 }
 0x24e   : > { %v10705_v55 = vpop.f32.mrf.mxu1 }
 0x24f   : > { %v8035_v7 = vpop.f32.mrf.mxu0 }
 0x250   : > { %v10707_v62 = vpop.f32.mrf.mxu1  ;;  %v10709_v20 = vadd.f32 %v8035_v7, %v4883_v11 }
 0x251   : > { %v5205_v61 = vpop.f32.mrf.mxu0 }
 0x252   : > { %10992 = vst [vmem:[#allocation26_spill] sm:$0xff] %v10709_v20  ;;  %v10711_v39 = vadd.f32 %v5205_v61, %v4881_v0 }
 0x253   : > { %v10714_v1 = vpop.f32.mrf.mxu0 }
 0x254   : > { %v8005_v5 = vpop.f32.mrf.mxu1  ;;  %10993 = vst [vmem:[#allocation25_spill] sm:$0xff] %v10711_v39 }
 0x255   : > { %v4887_v12 = vadd.f32 %v8005_v5, %v10612_v46  ;;  %v10717_v60 = vpop.f32.mrf.mxu0 }
 0x256   : > { %v4798_v44 = vpop.f32.mrf.mxu1  ;;  %10994 = vst [vmem:[#allocation28_spill] sm:$0xff] %v10717_v60 }
 0x257   : > { %v4885_v29 = vadd.f32 %v4798_v44, %v10615_v51  ;;  %v8039_v30 = vpop.f32.mrf.mxu0 }
 0x258   : > { %v10719_v24 = vpop.f32.mrf.mxu1  ;;  %v10723_v11 = vadd.f32 %v8039_v30, %v4887_v12 }
 0x259   : > { %10995 = vst [vmem:[#allocation27_spill] sm:$0xff] %v10719_v24  ;;  %v5221_v7 = vpop.f32.mrf.mxu0 }
 0x25a   : > { %v10721_v58 = vpop.f32.mrf.mxu1  ;;  %10997 = vst [vmem:[#allocation6_spill] sm:$0xff] %v10723_v11  ;;  %v10725_v0 = vadd.f32 %v5221_v7, %v4885_v29 }
 0x25b   : > { %10996 = vst [vmem:[#allocation4_spill] sm:$0xff] %v10721_v58  ;;  %v10728_v61 = vpop.f32.mrf.mxu0 }
 0x25c   : > { %v8009_v20 = vpop.f32.mrf.mxu1  ;;  %10998 = vst [vmem:[#allocation5_spill] sm:$0xff] %v10725_v0 }
 0x25d   : > { %v4891_v46 = vadd.f32 %v8009_v20, %v10624_v35  ;;  %v10731_v44 = vpop.f32.mrf.mxu0 }
 0x25e   : > { %v4814_v5 = vpop.f32.mrf.mxu1  ;;  %10999 = vst [vmem:[#allocation9_spill] sm:$0xff] %v10731_v44 }
 0x25f   : > { %v4889_v51 = vadd.f32 %v4814_v5, %v10627_v53  ;;  %v8043_v39 = vpop.f32.mrf.mxu0  ;;  %v4864_v5 = vadd.f32 %v10635_v26, %v10546_v19 }
 0x260   : > { %v8010_v60 = vpop.f32.mrf.mxu1  ;;  %v10734_v30 = vadd.f32 %v8043_v39, %v4891_v46  ;;  %v4862_v39 = vadd.f32 %v10637_v47, %v10549_v18  ;;  %v4868_v18 = vadd.f32 %v10649_v52, %v10558_v42 }
 0x261   : > { %v4892_v24 = vadd.f32 %v8010_v60, %v10630_v22  ;;  %v5237_v29 = vpop.f32.mrf.mxu0 }
 0x262   : > { %v4817_v58 = vpop.f32.mrf.mxu1  ;;  %11000 = vst [vmem:[#allocation8_spill] sm:$0xff] %v10734_v30  ;;  %v10737_v7 = vadd.f32 %v5237_v29, %v4889_v51  ;;  %v5285_v51 = vadd.f32 %v10647_v41, %v4862_v39  ;;  %v5291_v41 = vadd.f32 %v10658_v31, %v4868_v18  ;;  %v4866_v39 = vadd.f32 %v10651_v63, %v10561_v25 }
 0x263   : > { %v4890_v12 = vadd.f32 %v4817_v58, %v10633_v36  ;;  %v8044_v20 = vpop.f32.mrf.mxu0  ;;  %v5287_v58 = vadd.f32 %v10644_v48, %v4864_v5  ;;  %v4872_v63 = vadd.f32 %v10663_v59, %v10570_v43 }
 0x264   : > { %v8049_v35 = vpop.f32.mrf.mxu1  ;;  %v10739_v11 = vadd.f32 %v8044_v20, %v4892_v24 }
 0x265   : > { %v5240_v53 = vpop.f32.mrf.mxu0  ;;  %v6076_v29 = vadd.f32 %v8049_v35, %v10639_v57 }
 0x266   : > { %11001 = vst [vmem:[#allocation16_spill] sm:$0xff] %v10739_v11  ;;  %v5915_v0 = vpop.f32.mrf.mxu1  ;;  %v10743_v44 = vadd.f32 %v5240_v53, %v4890_v12 }
 0x267   : > { %v6074_v46 = vadd.f32 %v5915_v0, %v10641_v54 }
 0x268   : > { %11002 = vst [vmem:[#allocation15_spill] sm:$0xff] %v10743_v44  ;;  %v8050_v22 = vpop.f32.mrf.mxu1 }
 0x269   : > { %v6077_v20 = vadd.f32 %v8050_v22, %v5287_v58 }
 0x26a   : > { %v8083_v60 = vpop.f32.mrf.mxu0  ;;  %v5918_v36 = vpop.f32.mrf.mxu1 }
 0x26b   : > { %v6075_v53 = vadd.f32 %v5918_v36, %v5285_v51  ;;  %v6642_v44 = vadd.f32 %v8083_v60, %v6076_v29 }
 0x26c   : > { %v6481_v24 = vpop.f32.mrf.mxu0  ;;  %v8053_v19 = vpop.f32.mrf.mxu1 }
 0x26d   : > { %v6640_v26 = vadd.f32 %v6481_v24, %v6074_v46  ;;  %v6935_v58 = vmul.f32 %v6642_v44, %v6642_v44  ;;  %v6080_v36 = vadd.f32 %v8053_v19, %v10653_v4 }
 0x26e   : > { %v8084_v12 = vpop.f32.mrf.mxu0  ;;  %v5931_v11 = vpop.f32.mrf.mxu1 }
 0x26f   : > { %v6643_v30 = vadd.f32 %v8084_v12, %v6077_v20  ;;  %v6933_v0 = vmul.f32 %v6640_v26, %v6640_v26  ;;  %v6078_v5 = vadd.f32 %v5931_v11, %v10655_v3  ;;  %v5289_v3 = vadd.f32 %v10661_v50, %v4866_v39 }
 0x270   : > { %v6484_v47 = vpop.f32.mrf.mxu0  ;;  %v8054_v57 = vpop.f32.mrf.mxu1 }
 0x271   : > { %v7567_v54 = vpack.c.bf16 %v6643_v30, %v6642_v44  ;;  %v6641_v48 = vadd.f32 %v6484_v47, %v6075_v53  ;;  %v6081_v24 = vadd.f32 %v8054_v57, %v5291_v41  ;;  %v6936_v11 = vmul.f32 %v6643_v30, %v6643_v30 }
 0x272   : > { %v8087_v35 = vpop.f32.mrf.mxu0  ;;  %v5934_v60 = vpop.f32.mrf.mxu1 }
 0x273   : > { %7639 = vst [vmem:[%s10757_s26 + $0x8] sm:$0xff] %v7567_v54   ;;  %v7562_v22 = vpack.c.bf16 %v6641_v48, %v6640_v26  ;;  %v6896_v42 = vadd.f32 %v6641_v48, %v6640_v26  ;;  %v6934_v52 = vmul.f32 %v6641_v48, %v6641_v48  ;;  %v6646_v53 = vadd.f32 %v8087_v35, %v6080_v36 }
 0x274   : > { %v6497_v46 = vpop.f32.mrf.mxu0  ;;  %v8057_v29 = vpop.f32.mrf.mxu1  ;;  %v6079_v4 = vadd.f32 %v5934_v60, %v5289_v3  ;;  %v4870_v35 = vadd.f32 %v10665_v6, %v10573_v37 }
 0x275   : > { %7563 = vst [vmem:[%s10757_s26] sm:$0xff] %v7562_v22   ;;  %v6897_v51 = vadd.f32 %v6896_v42, %v6642_v44  ;;  %v6965_v31 = vadd.f32 %v6934_v52, %v6933_v0  ;;  %v6644_v20 = vadd.f32 %v6497_v46, %v6078_v5 }
 0x276   : > { %v8088_v12 = vpop.f32.mrf.mxu0  ;;  %v5947_v47 = vpop.f32.mrf.mxu1  ;;  %v5293_v39 = vadd.f32 %v10675_v21, %v4870_v35 }
 0x277   : > { %v6966_v26 = vadd.f32 %v6965_v31, %v6935_v58  ;;  %v6898_v18 = vadd.f32 %v6897_v51, %v6643_v30  ;;  %v6647_v25 = vadd.f32 %v8088_v12, %v6081_v24  ;;  %v6937_v44 = vmul.f32 %v6644_v20, %v6644_v20 }
 0x278   : > { %v6500_v19 = vpop.f32.mrf.mxu0  ;;  %v8058_v41 = vpop.f32.mrf.mxu1  ;;  %v5295_v30 = vadd.f32 %v10672_v17, %v4872_v63  ;;  %v6082_v43 = vadd.f32 %v5947_v47, %v10669_v45  ;;  %v6084_v58 = vadd.f32 %v8057_v29, %v10667_v34  ;;  %v6939_v24 = vmul.f32 %v6646_v53, %v6646_v53 }
 0x279   : > { %v6899_v54 = vadd.f32 %v6898_v18, %v6644_v20  ;;  %v6967_v57 = vadd.f32 %v6966_v26, %v6936_v11  ;;  %v7577_v48 = vpack.c.bf16 %v6647_v25, %v6646_v53  ;;  %v6645_v0 = vadd.f32 %v6500_v19, %v6079_v4 }
 0x27a   : > { %v5950_v22 = vpop.f32.mrf.mxu1  ;;  %v6085_v36 = vadd.f32 %v8058_v41, %v5295_v30  ;;  %v4876_v34 = vadd.f32 %v10677_v2, %v10582_v32 }
 0x27b   : > { %v8091_v50 = vpop.f32.mrf.mxu0  ;;  %v6968_v5 = vadd.f32 %v6967_v57, %v6937_v44  ;;  %7641 = vst [vmem:[%s10757_s26 + $0x18] sm:$0xff] %v7577_v48   ;;  %v7572_v59 = vpack.c.bf16 %v6645_v0, %v6644_v20  ;;  %v6900_v42 = vadd.f32 %v6899_v54, %v6645_v0  ;;  %v6938_v52 = vmul.f32 %v6645_v0, %v6645_v0 }
 0x27c   : > { %v8061_v46 = vpop.f32.mrf.mxu1  ;;  %v6083_v31 = vadd.f32 %v5950_v22, %v5293_v39  ;;  %v6650_v3 = vadd.f32 %v8091_v50, %v6084_v58  ;;  %v6940_v20 = vmul.f32 %v6647_v25, %v6647_v25  ;;  %v4874_v54 = vadd.f32 %v10679_v28, %v10585_v40 }
 0x27d   : > { %v6513_v60 = vpop.f32.mrf.mxu0  ;;  %7640 = vst [vmem:[%s10757_s26 + $0x10] sm:$0xff] %v7572_v59   ;;  %v6901_v37 = vadd.f32 %v6900_v42, %v6646_v53  ;;  %v6969_v6 = vadd.f32 %v6968_v5, %v6938_v52  ;;  %v5299_v44 = vadd.f32 %v10686_v9, %v4876_v34  ;;  %v6088_v35 = vadd.f32 %v8061_v46, %v10681_v8 }
 0x27e   : > { %v6648_v17 = vadd.f32 %v6513_v60, %v6082_v43  ;;  %v5963_v11 = vpop.f32.mrf.mxu1  ;;  %v5297_v50 = vadd.f32 %v10689_v49, %v4874_v54  ;;  %v6943_v22 = vmul.f32 %v6650_v3, %v6650_v3  ;;  %v4880_v8 = vadd.f32 %v10691_v33, %v10594_v38 }
 0x27f   : > { %v8092_v51 = vpop.f32.mrf.mxu0  ;;  %v6970_v12 = vadd.f32 %v6969_v6, %v6939_v24  ;;  %v6902_v26 = vadd.f32 %v6901_v37, %v6647_v25  ;;  %v6086_v32 = vadd.f32 %v5963_v11, %v10683_v13 }
 0x280   : > { %v6651_v45 = vadd.f32 %v8092_v51, %v6085_v36  ;;  %v8062_v29 = vpop.f32.mrf.mxu1  ;;  %v6941_v53 = vmul.f32 %v6648_v17, %v6648_v17 }
 0x281   : > { %v6516_v18 = vpop.f32.mrf.mxu0  ;;  %v6903_v63 = vadd.f32 %v6902_v26, %v6648_v17  ;;  %v6971_v4 = vadd.f32 %v6970_v12, %v6940_v20  ;;  %v6089_v30 = vadd.f32 %v8062_v29, %v5299_v44 }
 0x282   : > { %v7587_v21 = vpack.c.bf16 %v6651_v45, %v6650_v3  ;;  %v6649_v47 = vadd.f32 %v6516_v18, %v6083_v31  ;;  %v5966_v48 = vpop.f32.mrf.mxu1  ;;  %v6944_v13 = vmul.f32 %v6651_v45, %v6651_v45  ;;  %v4878_v31 = vadd.f32 %v10693_v56, %v10597_v10 }
 0x283   : > { %v8095_v19 = vpop.f32.mrf.mxu0  ;;  %v6972_v41 = vadd.f32 %v6971_v4, %v6941_v53  ;;  %v6087_v59 = vadd.f32 %v5966_v48, %v5297_v50 }
 0x284   : > { %7643 = vst [vmem:[%s10757_s26 + $0x28] sm:$0xff] %v7587_v21   ;;  %v7582_v57 = vpack.c.bf16 %v6649_v47, %v6648_v17  ;;  %v6942_v25 = vmul.f32 %v6649_v47, %v6649_v47  ;;  %v6904_v2 = vadd.f32 %v6903_v63, %v6649_v47  ;;  %v8065_v5 = vpop.f32.mrf.mxu1  ;;  %v6654_v42 = vadd.f32 %v8095_v19, %v6088_v35  ;;  %v11003_v35 = vld [vmem:[#allocation17_spill] sm:$0xff] }
 0x285   : > { %v6529_v0 = vpop.f32.mrf.mxu0  ;;  %v5301_v18 = vadd.f32 %v10703_v15, %v4878_v31  ;;  %v6092_v34 = vadd.f32 %v8065_v5, %v10695_v16  ;;  %v4884_v16 = vadd.f32 %v10705_v55, %v10606_v14 }
 0x286   : > { %7642 = vst [vmem:[%s10757_s26 + $0x20] sm:$0xff] %v7582_v57   ;;  %v6905_v40 = vadd.f32 %v6904_v2, %v6650_v3  ;;  %v6973_v28 = vadd.f32 %v6972_v41, %v6942_v25  ;;  %v6652_v9 = vadd.f32 %v6529_v0, %v6086_v32  ;;  %v5979_v52 = vpop.f32.mrf.mxu1  ;;  %v5303_v3 = vadd.f32 %v10700_v27, %v4880_v8 }
 0x287   : > { %v8096_v43 = vpop.f32.mrf.mxu0  ;;  %v6090_v38 = vadd.f32 %v5979_v52, %v10697_v23  ;;  %v6947_v47 = vmul.f32 %v6654_v42, %v6654_v42  ;;  %v5307_v5 = vadd.f32 %v10714_v1, %v4884_v16 }
 0x288   : > { %v6655_v60 = vadd.f32 %v8096_v43, %v6089_v30  ;;  %v6974_v39 = vadd.f32 %v6973_v28, %v6943_v22  ;;  %v6906_v58 = vadd.f32 %v6905_v40, %v6651_v45  ;;  %v8066_v46 = vpop.f32.mrf.mxu1  ;;  %v6945_v6 = vmul.f32 %v6652_v9, %v6652_v9  ;;  %v11004_v43 = vld [vmem:[#allocation25_spill] sm:$0xff] }
 0x289   : > { %v6532_v36 = vpop.f32.mrf.mxu0  ;;  %v6093_v21 = vadd.f32 %v8066_v46, %v5303_v3  ;;  %v4882_v30 = vadd.f32 %v10707_v62, %v11003_v35 }
 0x28a   : > { %v7597_v49 = vpack.c.bf16 %v6655_v60, %v6654_v42  ;;  %v6653_v24 = vadd.f32 %v6532_v36, %v6087_v59  ;;  %v6907_v37 = vadd.f32 %v6906_v58, %v6652_v9  ;;  %v6975_v17 = vadd.f32 %v6974_v39, %v6944_v13  ;;  %v5982_v20 = vpop.f32.mrf.mxu1 }
 0x28b   : > { %v8099_v51 = vpop.f32.mrf.mxu0  ;;  %v6091_v53 = vadd.f32 %v5982_v20, %v5301_v18  ;;  %v6948_v23 = vmul.f32 %v6655_v60, %v6655_v60  ;;  %v11007_v20 = vld [vmem:[#allocation18_spill] sm:$0xff] }
 0x28c   : > { %7645 = vst [vmem:[%s10757_s26 + $0x38] sm:$0xff] %v7597_v49   ;;  %v7592_v11 = vpack.c.bf16 %v6653_v24, %v6652_v9  ;;  %v6946_v45 = vmul.f32 %v6653_v24, %v6653_v24  ;;  %v6976_v12 = vadd.f32 %v6975_v17, %v6945_v6  ;;  %v6908_v33 = vadd.f32 %v6907_v37, %v6653_v24  ;;  %v8069_v29 = vpop.f32.mrf.mxu1 }
 0x28d   : > { %v6545_v26 = vpop.f32.mrf.mxu0  ;;  %v6658_v4 = vadd.f32 %v8099_v51, %v6092_v34 }
 0x28e   : > { %7644 = vst [vmem:[%s10757_s26 + $0x30] sm:$0xff] %v7592_v11   ;;  %v6909_v10 = vadd.f32 %v6908_v33, %v6654_v42  ;;  %v6977_v56 = vadd.f32 %v6976_v12, %v6946_v45  ;;  %v6656_v27 = vadd.f32 %v6545_v26, %v6090_v38  ;;  %v5995_v19 = vpop.f32.mrf.mxu1  ;;  %v11005_v42 = vld [vmem:[#allocation28_spill] sm:$0xff]  ;;  %v11008_v12 = vld [vmem:[#allocation27_spill] sm:$0xff] }
 0x28f   : > { %v8100_v63 = vpop.f32.mrf.mxu0  ;;  %v6094_v14 = vadd.f32 %v5995_v19, %v11004_v43  ;;  %v5305_v52 = vadd.f32 %v11005_v42, %v4882_v30  ;;  %v6951_v58 = vmul.f32 %v6658_v4, %v6658_v4  ;;  %v4888_v38 = vadd.f32 %v11008_v12, %v11007_v20  ;;  %v11011_v19 = vld [vmem:[#allocation4_spill] sm:$0xff] }
 0x290   : > { %v6659_v54 = vadd.f32 %v8100_v63, %v6093_v21  ;;  %v6978_v44 = vadd.f32 %v6977_v56, %v6947_v47  ;;  %v6910_v57 = vadd.f32 %v6909_v10, %v6655_v60  ;;  %v8070_v48 = vpop.f32.mrf.mxu1  ;;  %v6949_v2 = vmul.f32 %v6656_v27, %v6656_v27  ;;  %v11006_v60 = vld [vmem:[#allocation26_spill] sm:$0xff] }
 0x291   : > { %v6548_v25 = vpop.f32.mrf.mxu0  ;;  %v6096_v13 = vadd.f32 %v8069_v29, %v11006_v60  ;;  %v6097_v39 = vadd.f32 %v8070_v48, %v5307_v5  ;;  %v5311_v10 = vadd.f32 %v10728_v61, %v4888_v38 }
 0x292   : > { %v7607_v15 = vpack.c.bf16 %v6659_v54, %v6658_v4  ;;  %v6657_v41 = vadd.f32 %v6548_v25, %v6091_v53  ;;  %v6911_v32 = vadd.f32 %v6910_v57, %v6656_v27  ;;  %v6979_v0 = vadd.f32 %v6978_v44, %v6948_v23  ;;  %v5998_v28 = vpop.f32.mrf.mxu1  ;;  %v11012_v44 = vld [vmem:[#allocation6_spill] sm:$0xff] }
 0x293   : > { %v8103_v50 = vpop.f32.mrf.mxu0  ;;  %v6095_v46 = vadd.f32 %v5998_v28, %v5305_v52  ;;  %v6952_v6 = vmul.f32 %v6659_v54, %v6659_v54 }
 0x294   : > { %7647 = vst [vmem:[%s10757_s26 + $0x48] sm:$0xff] %v7607_v15   ;;  %v7602_v22 = vpack.c.bf16 %v6657_v41, %v6656_v27  ;;  %v6950_v40 = vmul.f32 %v6657_v41, %v6657_v41  ;;  %v6980_v9 = vadd.f32 %v6979_v0, %v6949_v2  ;;  %v6912_v55 = vadd.f32 %v6911_v32, %v6657_v41  ;;  %v11009_v27 = vld [vmem:[#allocation5_spill] sm:$0xff] }
 0x295   : > { %v6561_v59 = vpop.f32.mrf.mxu0  ;;  %v6662_v24 = vadd.f32 %v8103_v50, %v6096_v13  ;;  %v11013_v2 = vld [vmem:[#allocation9_spill] sm:$0xff] }
 0x296   : > { %7646 = vst [vmem:[%s10757_s26 + $0x40] sm:$0xff] %v7602_v22   ;;  %v6913_v36 = vadd.f32 %v6912_v55, %v6658_v4  ;;  %v6981_v62 = vadd.f32 %v6980_v9, %v6950_v40  ;;  %v8073_v8 = vpop.f32.mrf.mxu1  ;;  %v6660_v1 = vadd.f32 %v6561_v59, %v6094_v14  ;;  %v11010_v4 = vld [vmem:[#allocation24_spill] sm:$0xff] }
 0x297   : > { %v8104_v49 = vpop.f32.mrf.mxu0  ;;  %v6955_v23 = vmul.f32 %v6662_v24, %v6662_v24  ;;  %v6100_v57 = vadd.f32 %v8073_v8, %v11012_v44 }
 0x298   : > { %v6663_v37 = vadd.f32 %v8104_v49, %v6097_v39  ;;  %v6982_v17 = vadd.f32 %v6981_v62, %v6951_v58  ;;  %v6914_v51 = vadd.f32 %v6913_v36, %v6659_v54  ;;  %v6011_v31 = vpop.f32.mrf.mxu1  ;;  %v6953_v26 = vmul.f32 %v6660_v1, %v6660_v1 }
 0x299   : > { %v6564_v3 = vpop.f32.mrf.mxu0  ;;  %v6098_v63 = vadd.f32 %v6011_v31, %v11009_v27  ;;  %v4886_v54 = vadd.f32 %v11011_v19, %v11010_v4  ;;  %v11014_v31 = vld [vmem:[#allocation8_spill] sm:$0xff] }
 0x29a   : > { %v7617_v11 = vpack.c.bf16 %v6663_v37, %v6662_v24  ;;  %v6661_v45 = vadd.f32 %v6564_v3, %v6095_v46  ;;  %v6915_v33 = vadd.f32 %v6914_v51, %v6660_v1  ;;  %v6983_v18 = vadd.f32 %v6982_v17, %v6952_v6  ;;  %v8074_v34 = vpop.f32.mrf.mxu1 }
 0x29b   : > { %v8107_v47 = vpop.f32.mrf.mxu0  ;;  %v6101_v16 = vadd.f32 %v8074_v34, %v5311_v10  ;;  %v5309_v61 = vadd.f32 %v11013_v2, %v4886_v54  ;;  %v6956_v0 = vmul.f32 %v6663_v37, %v6663_v37 }
 0x29c   : > { %7649 = vst [vmem:[%s10757_s26 + $0x58] sm:$0xff] %v7617_v11   ;;  %v7612_v21 = vpack.c.bf16 %v6661_v45, %v6660_v1  ;;  %v6954_v29 = vmul.f32 %v6661_v45, %v6661_v45  ;;  %v6984_v56 = vadd.f32 %v6983_v18, %v6953_v26  ;;  %v6916_v53 = vadd.f32 %v6915_v33, %v6661_v45  ;;  %v6014_v41 = vpop.f32.mrf.mxu1  ;;  %v11015_v45 = vld [vmem:[#allocation16_spill] sm:$0xff]  ;;  %v11016_v18 = vld [vmem:[#allocation15_spill] sm:$0xff] }
 0x29d   : > { %v6577_v25 = vpop.f32.mrf.mxu0  ;;  %v6666_v30 = vadd.f32 %v8107_v47, %v6100_v57  ;;  %v6099_v40 = vadd.f32 %v6014_v41, %v5309_v61 }
 0x29e   : > { %7648 = vst [vmem:[%s10757_s26 + $0x50] sm:$0xff] %v7612_v21   ;;  %v6917_v15 = vadd.f32 %v6916_v53, %v6662_v24  ;;  %v6985_v48 = vadd.f32 %v6984_v56, %v6954_v29  ;;  %v6664_v32 = vadd.f32 %v6577_v25, %v6098_v63 }
 0x29f   : > { %v8108_v50 = vpop.f32.mrf.mxu0  ;;  %v6959_v58 = vmul.f32 %v6666_v30, %v6666_v30 }
 0x2a0   : > { %v6986_v35 = vadd.f32 %v6985_v48, %v6955_v23  ;;  %v6918_v5 = vadd.f32 %v6917_v15, %v6663_v37  ;;  %v6667_v22 = vadd.f32 %v8108_v50, %v6101_v16  ;;  %v6957_v43 = vmul.f32 %v6664_v32, %v6664_v32 }
 0x2a1   : > { %v6580_v28 = vpop.f32.mrf.mxu0 }
 0x2a2   : > { %v6919_v9 = vadd.f32 %v6918_v5, %v6664_v32  ;;  %v6987_v14 = vadd.f32 %v6986_v35, %v6956_v0  ;;  %v7627_v55 = vpack.c.bf16 %v6667_v22, %v6666_v30  ;;  %v6665_v59 = vadd.f32 %v6580_v28, %v6099_v40 }
 0x2a3   : > { %v6960_v49 = vmul.f32 %v6667_v22, %v6667_v22 }
 0x2a4   : > { %v6988_v42 = vadd.f32 %v6987_v14, %v6957_v43  ;;  %7651 = vst [vmem:[%s10757_s26 + $0x68] sm:$0xff] %v7627_v55   ;;  %v7622_v52 = vpack.c.bf16 %v6665_v59, %v6664_v32  ;;  %v6920_v60 = vadd.f32 %v6919_v9, %v6665_v59  ;;  %v6958_v13 = vmul.f32 %v6665_v59, %v6665_v59 }
 0x2a6   : > { %7650 = vst [vmem:[%s10757_s26 + $0x60] sm:$0xff] %v7622_v52   ;;  %v6921_v36 = vadd.f32 %v6920_v60, %v6666_v30  ;;  %v6989_v62 = vadd.f32 %v6988_v42, %v6958_v13 }
 0x2a7   : > { %v8111_v39 = vpop.f32.mrf.mxu0 }
 0x2a8   : > { %v8077_v8 = vpop.f32.mrf.mxu1  ;;  %v6990_v46 = vadd.f32 %v6989_v62, %v6959_v58  ;;  %v6922_v24 = vadd.f32 %v6921_v36, %v6667_v22 }
 0x2a9   : > { %v6593_v1 = vpop.f32.mrf.mxu0  ;;  %v6104_v3 = vadd.f32 %v8077_v8, %v11014_v31 }
 0x2aa   : > { %v6027_v37 = vpop.f32.mrf.mxu1  ;;  %v6991_v51 = vadd.f32 %v6990_v46, %v6960_v49 }
 0x2ab   : > { %v8112_v6 = vpop.f32.mrf.mxu0  ;;  %v6102_v17 = vadd.f32 %v6027_v37, %v10737_v7  ;;  %v6670_v33 = vadd.f32 %v8111_v39, %v6104_v3 }
 0x2ac   : > { %v8078_v11 = vpop.f32.mrf.mxu1 }
 0x2ad   : > { %v6105_v20 = vadd.f32 %v8078_v11, %v11015_v45  ;;  %v6668_v12 = vadd.f32 %v6593_v1, %v6102_v17  ;;  %v6596_v26 = vpop.f32.mrf.mxu0  ;;  %v6963_v4 = vmul.f32 %v6670_v33, %v6670_v33 }
 0x2ae   : > { %v6030_v38 = vpop.f32.mrf.mxu1 }
 0x2af   : > { %v6103_v34 = vadd.f32 %v6030_v38, %v11016_v18  ;;  %v6923_v21 = vadd.f32 %v6922_v24, %v6668_v12  ;;  %v6961_v29 = vmul.f32 %v6668_v12, %v6668_v12  ;;  %v6671_v47 = vadd.f32 %v8112_v6, %v6105_v20 }
 0x2b1   : > { %v6992_v10 = vadd.f32 %v6991_v51, %v6961_v29  ;;  %v7637_v56 = vpack.c.bf16 %v6671_v47, %v6670_v33  ;;  %v6669_v7 = vadd.f32 %v6596_v26, %v6103_v34  ;;  %v6964_v23 = vmul.f32 %v6671_v47, %v6671_v47 }
 0x2b3   : > { %7653 = vst [vmem:[%s10757_s26 + $0x78] sm:$0xff] %v7637_v56   ;;  %v7632_v27 = vpack.c.bf16 %v6669_v7, %v6668_v12  ;;  %v6924_v63 = vadd.f32 %v6923_v21, %v6669_v7  ;;  %v6962_v53 = vmul.f32 %v6669_v7, %v6669_v7 }
 0x2b5   : > { %7652 = vst [vmem:[%s10757_s26 + $0x70] sm:$0xff] %v7632_v27   ;;  %v6925_v19 = vadd.f32 %v6924_v63, %v6670_v33  ;;  %v6993_v54 = vadd.f32 %v6992_v10, %v6962_v53 }
 0x2b7   : > { %v6926_v44 = vadd.f32 %v6925_v19, %v6671_v47  ;;  %v6994_v57 = vadd.f32 %v6993_v54, %v6963_v4 }
 0x2b9   : > { %v6927_v25 = vrot.slane %v6926_v44, 4  ;;  %v6995_v16 = vadd.f32 %v6994_v57, %v6964_v23 }
 0x2bb   : > { %v6928_v15 = vadd.f32 %v6927_v25, %v6926_v44  ;;  %v6996_v48 = vrot.slane %v6995_v16, 4 }
 0x2bd   : > { %v6929_v41 = vrot.slane %v6928_v15, 2  ;;  %v6997_v32 = vadd.f32 %v6996_v48, %v6995_v16 }
 0x2bf   : > { %v6930_v2 = vadd.f32 %v6929_v41, %v6928_v15  ;;  %v6998_v61 = vrot.slane %v6997_v32, 2 }
 0x2c1   : > { %v6931_v0 = vrot.slane %v6930_v2, 1  ;;  %v6999_v50 = vadd.f32 %v6998_v61, %v6997_v32 }
 0x2c3   : > { %v6932_v35 = vadd.f32 %v6931_v0, %v6930_v2  ;;  %v7000_v30 = vrot.slane %v6999_v50, 1 }
 0x2c5   : > { %v7001_v5 = vadd.f32 %v7000_v30, %v6999_v50  ;;  %7002 = vst [vmem:[%s261_s29] sm:$0xff] %v6932_v35 }
 0x2c7   : > { %7003 = vst [vmem:[%s265_s7] sm:$0xff] %v7001_v5 }
 0x2c8 PF: > { %s16_s18 = sadd.s32 1, %s8189_s18  }
 0x2c9   : > { %p13_p4 = scmp.ge.s32.totalorder %s16_s18, 4  }
 0x2cb   :  { %15 = sbr.rel (!%p13_p4) target bundleno = 1 (0x1), region = 100 }

// kernel: up_forward.4
= control target key start
LH: loop header
LB: loop body
LE: loop exit
PB: predicated region body
PF: predicated region fallthrough
CT: control target
= control target key end

     0   :  { %s7750_s21 = smov 0   ;;  %s10104_s0 = inlined_call_operand.vmem [shape: bf16[2,256,128], index: 0, kind: input, shape index: {}]   ;;  %s10105_s1 = inlined_call_operand.vmem [shape: f32[1,4], index: 1, kind: input, shape index: {}]   ;;  %s10106_s2 = inlined_call_operand.vmem [shape: f32[1,4], index: 2, kind: input, shape index: {}]   ;;  %s10107_s3 = inlined_call_operand.vmem [shape: bf16[9,4,128], index: 3, kind: input, shape index: {}]   ;;  %s10108_s4 = inlined_call_operand.vmem [shape: f32[2,256,128], index: 4, kind: output, shape index: {0}]   ;;  %s10109_s5 = inlined_call_operand.vmem [shape: f32[2,8,128], index: 5, kind: output, shape index: {1}]   ;;  %s10110_s6 = inlined_call_operand.vmem [shape: f32[2,8,128], index: 6, kind: output, shape index: {2}]  }
   0x1 LB: > { %s6670_s22 = sadd.s32 4294967295, %s7712_s21   ;;  %p6674_p0 = scmp.ge.s32.totalorder %s7712_s21, 1  ;;  %s7712_s21 = sphi %s7750_s21, %s17_s21  }
   0x2   : > { %p217_p1 = scmp.lt.s32.totalorder %s7712_s21, 3 }
   0x4   : > { %p218_p2 = pnand %p6674_p0, %p217_p1 }
   0x6   : > { %221 = sbr.rel (%p218_p2) target bundleno = 660 (0x294), region = 36 }
   0xb   : > { %v1135_v0 = vld [vmem:[%s10107_s3] sm:$0x3]  ;;  %vm1265_vm0 = vcmask 1041408   ;;  %vm274_vm1 = vcmask 27648   ;;  %vm277_vm2 = vcmask 24576   ;;  %v7714_v2 = vmov 0  }
   0xc   : > { %7635 = vmatprep.subr.msk.bf16.mxu0 %vm1265_vm0, %v1135_v0  ;;  %7636 = vmatprep.subr.msk.bf16.mxu1 %vm1265_vm0, %v1135_v0  ;;  %v1267_v1 = vsel %vm1265_vm0, %v1135_v0, 0  ;;  %275 = vst.msk [vmem:[#allocation2] sm:$0xf] %vm274_vm1, %v7714_v2  ;;  %276 = vst.msk [vmem:[#allocation2 + $0x4] sm:$0xf] %vm274_vm1, %v7714_v2  ;;  %p255_p3 = scmp.lt.s32.totalorder %s6670_s22, 1 }
   0xd   : > { %vm284_vm3 = vsmask.f32 256  ;;  %278 = vst.msk [vmem:[#allocation2 + $0x8] sm:$0x1] %vm277_vm2, %v7714_v2  ;;  %282 = vst.msk [vmem:[#allocation2 + $0xd4] sm:$0x1] %vm277_vm2, %v7714_v2  ;;  %7328 = vmatpush3.bf16.msra.mxu0 %v1267_v1  ;;  %7634 = vmatpush3.bf16.msra.mxu1 %v1267_v1 }
   0xe   : > { %280 = vst.msk [vmem:[#allocation2 + $0xcc] sm:$0xf] %vm274_vm1, %v7714_v2  ;;  %281 = vst.msk [vmem:[#allocation2 + $0xd0] sm:$0xf] %vm274_vm1, %v7714_v2  ;;  %v289_v4 = vld [vmem:[#allocation2 + $0xc] sm:$0x1] }
   0xf   : > { %vm7772_vm4 = vmand %vm277_vm2, %vm284_vm3  ;;  %vm340_vm5 = vsmask.f32 7938  ;;  %v345_v5 = vld [vmem:[#allocation2 + $0x14] sm:$0x1]  ;;  %s10339_s22 = smov (!%p255_p3, %s6670_s22), 1  ;;  %v10114_v7 = vmov 0 }
  0x10   : > { %v290_v6 = vsel %vm7772_vm4, 0, %v289_v4  ;;  %vm7782_vm6 = vmand %vm277_vm2, %vm340_vm5  ;;  %v310_v9 = vld [vmem:[#allocation2 + $0x60] sm:$0x1]  ;;  %s7061_s25 = sshll.u32 %s10339_s22, 7  ;;  %v366_v12 = vld [vmem:[#allocation2 + $0x68] sm:$0x1] }
  0x11   : > { %v10115_v7 = vsel %vm7782_vm6, 4294967295, %v10114_v7  ;;  %291 = vst [vmem:[#allocation2 + $0xc] sm:$0x1] %v290_v6  ;;  %v346_v8 = vsel %vm7782_vm6, 0, %v345_v5  ;;  %v7792_v10 = vld [vmem:[%s10105_s1] ss:$0 sm:$0xff]  ;;  %s7799_s30 = scalar_lea.vmem %s10104_s0, %s7061_s25  ;;  %vm7851_vm9 = vmand %vm274_vm1, %vm340_vm5 }
  0x12   : > { %10116 = vst [vmem:[#allocation4_spill] sm:$0xff] %v10115_v7  ;;  %347 = vst [vmem:[#allocation2 + $0x14] sm:$0x1] %v346_v8  ;;  %v311_v11 = vsel %vm7772_vm4, 0, %v310_v9  ;;  %v367_v13 = vsel %vm7782_vm6, 0, %v366_v12  ;;  %v7096_v16 = vld [vmem:[%s7799_s30] sm:$0xff]  }
  0x13   : > { %312 = vst [vmem:[#allocation2 + $0x60] sm:$0x1] %v311_v11  ;;  %v7806_v14 = vld [vmem:[%s10107_s3 + $0x2] sm:$0x3]  ;;  %v313_v15 = vld [vmem:[#allocation2 + $0x6c] sm:$0x1]  ;;  %v7097_v21 = vunpack.c.l.bf16 %v7096_v16  ;;  %v7098_v22 = vunpack.c.h.bf16 %v7096_v16 }
  0x14   : > { %368 = vst [vmem:[#allocation2 + $0x68] sm:$0x1] %v367_v13  ;;  %v7165_v17 = vld [vmem:[%s7799_s30 + $0x38] sm:$0xff]   ;;  %7637 = vmatprep.subr.msk.bf16.mxu1 %vm1265_vm0, %v7806_v14  ;;  %v314_v18 = vsel %vm7772_vm4, 0, %v313_v15  ;;  %v7166_v19 = vld [vmem:[%s7799_s30 + $0x40] sm:$0xff]   ;;  %vm1216_vm7 = vcmask 31744  }
  0x15   : > { %v286_v20 = vld [vmem:[#allocation2] sm:$0x1]  ;;  %v7125_v23 = vunpack.c.l.bf16 %v7165_v17  ;;  %v7126_v24 = vunpack.c.h.bf16 %v7165_v17  ;;  %315 = vst [vmem:[#allocation2 + $0x6c] sm:$0x1] %v314_v18  ;;  %v7818_v25 = vld [vmem:[%s10107_s3 + $0x4] sm:$0x3]  ;;  %v7129_v28 = vunpack.c.l.bf16 %v7166_v19  ;;  %v7130_v29 = vunpack.c.h.bf16 %v7166_v19 }
  0x16   : > { %v287_v26 = vsel %vm7772_vm4, 0, %v286_v20  ;;  %v7825_v27 = vld [vmem:[%s10106_s2] ss:$0 sm:$0xff]  ;;  %7638 = vmatprep.subr.msk.bf16.mxu0 %vm1265_vm0, %v7818_v25  ;;  %v292_v30 = vld [vmem:[#allocation2 + $0x18] sm:$0x1]  ;;  %v7159_v31 = vld [vmem:[%s7799_s30 + $0x8] sm:$0xff]   ;;  %v467_v32 = vmul.f32 %v7097_v21, %v7792_v10  ;;  %v468_v33 = vmul.f32 %v7098_v22, %v7792_v10 }
  0x17   : > { %288 = vst [vmem:[#allocation2] sm:$0x1] %v287_v26  ;;  %vm666_vm8 = vsmask.f32 4368  ;;  %v481_v34 = vmul.f32 %v7125_v23, %v7792_v10  ;;  %v482_v35 = vmul.f32 %v7126_v24, %v7792_v10  ;;  %v483_v36 = vmul.f32 %v7129_v28, %v7792_v10  ;;  %s7062_s11 = sshll.u32 %s10339_s22, 8  ;;  %s6679_s15 = sshll.u32 %s10339_s22, 3 }
  0x18   : > { %v484_v37 = vmul.f32 %v7130_v29, %v7792_v10  ;;  %v293_v38 = vsel %vm7772_vm4, 0, %v292_v30  ;;  %v7101_v39 = vunpack.c.l.bf16 %v7159_v31  ;;  %v506_v40 = vadd.f32 %v7825_v27, %v467_v32  ;;  %v991_v16 = vld [vmem:[#allocation2 + $0xc] sm:$0xf]  ;;  %vm7857_vm10 = vmor %vm284_vm3, %vm666_vm8  ;;  %s9977_s14 = scalar_lea.vmem %s10108_s4, %s7062_s11  ;;  %s268_s18 = scalar_lea.vmem %s10109_s5, %s6679_s15 }
  0x19   : > { %v507_v41 = vadd.f32 %v7825_v27, %v468_v33  ;;  %v520_v42 = vadd.f32 %v7825_v27, %v481_v34  ;;  %v521_v43 = vadd.f32 %v7825_v27, %v482_v35  ;;  %294 = vst [vmem:[#allocation2 + $0x18] sm:$0x1] %v293_v38  ;;  %v522_v44 = vadd.f32 %v7825_v27, %v483_v36  ;;  %v995_v20 = vld [vmem:[#allocation2 + $0x14] sm:$0x1]  ;;  %s272_s23 = scalar_lea.vmem %s10110_s6, %s6679_s15 }
  0x1a   : > { %v523_v45 = vadd.f32 %v7825_v27, %v484_v37  ;;  %v7102_v46 = vunpack.c.h.bf16 %v7159_v31  ;;  %v469_v47 = vmul.f32 %v7101_v39, %v7792_v10  ;;  %v538_v48 = vmax.f32 %v506_v40, 0.0  ;;  %v1040_v31 = vld [vmem:[#allocation2 + $0x60] sm:$0xf] }
  0x1b   : > { %v539_v49 = vmax.f32 %v507_v41, 0.0  ;;  %v552_v50 = vmax.f32 %v520_v42, 0.0  ;;  %v553_v51 = vmax.f32 %v521_v43, 0.0  ;;  %v554_v52 = vmax.f32 %v522_v44, 0.0  ;;  %v1044_v32 = vld [vmem:[#allocation2 + $0x68] sm:$0x1] }
  0x1c   : > { %v555_v53 = vmax.f32 %v523_v45, 0.0  ;;  %v470_v54 = vmul.f32 %v7102_v46, %v7792_v10  ;;  %v508_v55 = vadd.f32 %v7825_v27, %v469_v47  ;;  %v7063_v56 = vpack.c.bf16 %v538_v48, %v538_v48  ;;  %v295_v41 = vld [vmem:[#allocation2 + $0x24] sm:$0x1]  ;;  %v7160_v42 = vld [vmem:[%s7799_s30 + $0x10] sm:$0xff]   ;;  %v1047_v47 = vld [vmem:[#allocation2 + $0x6c] sm:$0xf] }
  0x1d   : > { %v7064_v57 = vpack.c.bf16 %v539_v49, %v539_v49  ;;  %v7077_v58 = vpack.c.bf16 %v552_v50, %v552_v50  ;;  %v7078_v59 = vpack.c.bf16 %v553_v51, %v553_v51  ;;  %v7079_v61 = vpack.c.bf16 %v554_v52, %v554_v52  ;;  %v316_v52 = vld [vmem:[#allocation2 + $0x78] sm:$0x1] }
  0x1e   : > { %v7654_v60 = vld [vmem:[#allocation2] sm:$0xff]   ;;  %v7080_v62 = vpack.c.bf16 %v555_v53, %v555_v53  ;;  %v509_v63 = vadd.f32 %v7825_v27, %v470_v54  ;;  %v540_v0 = vmax.f32 %v508_v55, 0.0  ;;  %v669_v1 = vshrl.u32 %v7063_v56, 16 }
  0x1f   : > { %v672_v2 = vshll.u32 %v7063_v56, 16  ;;  %v677_v4 = vshrl.u32 %v7064_v57, 16  ;;  %v680_v5 = vshll.u32 %v7064_v57, 16  ;;  %7329 = vmatprep.mubr.msk.bf16.mxu0 %vm1216_vm7, %v7654_v60  ;;  %v788_v6 = vshrl.u32 %v7077_v58, 16  ;;  %v7167_v57 = vld [vmem:[%s7799_s30 + $0x48] sm:$0xff]  }
  0x20   : > { %v791_v8 = vshll.u32 %v7077_v58, 16  ;;  %v796_v9 = vshrl.u32 %v7078_v59, 16  ;;  %v799_v11 = vshll.u32 %v7078_v59, 16  ;;  %v671_v12 = vrot.slane %v669_v1, 7 }
  0x21   : > { %v679_v13 = vrot.slane %v677_v4, 7  ;;  %v805_v17 = vshrl.u32 %v7079_v61, 16  ;;  %v808_v18 = vshll.u32 %v7079_v61, 16  ;;  %v790_v21 = vrot.slane %v788_v6, 7 }
  0x22   : > { %v798_v22 = vrot.slane %v796_v9, 7  ;;  %v813_v23 = vshrl.u32 %v7080_v62, 16  ;;  %v816_v24 = vshll.u32 %v7080_v62, 16  ;;  %v674_v26 = vor.u32 %v672_v2, %v671_v12  ;;  %v319_v62 = vld [vmem:[#allocation2 + $0x84] sm:$0x1]  ;;  %v7168_v2 = vld [vmem:[%s7799_s30 + $0x50] sm:$0xff]  }
  0x23   : > { %v675_v28 = vrot.slane %v671_v12, 4  ;;  %v682_v29 = vor.u32 %v680_v5, %v679_v13  ;;  %v684_v30 = vrot.slane %v679_v13, 4  ;;  %v793_v33 = vor.u32 %v791_v8, %v790_v21  ;;  %v998_v8 = vld [vmem:[#allocation2 + $0x18] sm:$0xf] }
  0x24   : > { %v794_v34 = vrot.slane %v790_v21, 4  ;;  %v801_v35 = vor.u32 %v799_v11, %v798_v22  ;;  %v803_v36 = vrot.slane %v798_v22, 4  ;;  %v992_v38 = vsel %vm7851_vm9, %v674_v26, %v991_v16 }
  0x25   : > { %v683_v37 = vsel %vm7857_vm10, %v675_v28, %v682_v29  ;;  %v996_v39 = vsel %vm7772_vm4, %v684_v30, %v995_v20  ;;  %v807_v40 = vrot.slane %v805_v17, 7  ;;  %993 = vst [vmem:[#allocation2 + $0xc] sm:$0xf] %v992_v38  ;;  %v1041_v44 = vsel %vm7851_vm9, %v793_v33, %v1040_v31  ;;  %v7900_v17 = vld [vmem:[%s10107_s3 + $0x8] sm:$0x3] }
  0x26   : > { %994 = vst.msk [vmem:[#allocation2 + $0x10] sm:$0xf] %vm274_vm1, %v683_v37  ;;  %997 = vst [vmem:[#allocation2 + $0x14] sm:$0x1] %v996_v39  ;;  %v802_v43 = vsel %vm7857_vm10, %v794_v34, %v801_v35  ;;  %v1045_v45 = vsel %vm7772_vm4, %v803_v36, %v1044_v32  ;;  %v7875_v46 = vrot.slane %v813_v23, 7  ;;  %v541_v50 = vmax.f32 %v509_v63, 0.0 }
  0x27   : > { %1042 = vst [vmem:[#allocation2 + $0x60] sm:$0xf] %v1041_v44  ;;  %1043 = vst.msk [vmem:[#allocation2 + $0x64] sm:$0xf] %vm274_vm1, %v802_v43  ;;  %v810_v48 = vor.u32 %v808_v18, %v807_v40  ;;  %v811_v49 = vrot.slane %v807_v40, 4  ;;  %v7065_v51 = vpack.c.bf16 %v540_v0, %v540_v0  ;;  %v2565_v54 = vsel %vm1265_vm0, %v7818_v25, 0 }
  0x28   : > { %1046 = vst [vmem:[#allocation2 + $0x68] sm:$0x1] %v1045_v45  ;;  %v818_v53 = vor.u32 %v816_v24, %v7875_v46  ;;  %v296_v55 = vsel %vm7772_vm4, 0, %v295_v41  ;;  %v7105_v56 = vunpack.c.l.bf16 %v7160_v42  ;;  %v7066_v59 = vpack.c.bf16 %v541_v50, %v541_v50 }
  0x29   : > { %v1048_v58 = vsel %vm7851_vm9, %v810_v48, %v1047_v47  ;;  %v686_v60 = vshrl.u32 %v7065_v51, 16  ;;  %v689_v61 = vshll.u32 %v7065_v51, 16  ;;  %297 = vst [vmem:[#allocation2 + $0x24] sm:$0x1] %v296_v55  ;;  %v7106_v0 = vunpack.c.h.bf16 %v7160_v42 }
  0x2a   : > { %v819_v63 = vsel %vm7857_vm10, %v811_v49, %v818_v53  ;;  %1049 = vst [vmem:[#allocation2 + $0x6c] sm:$0xf] %v1048_v58  ;;  %v471_v25 = vmul.f32 %v7105_v56, %v7792_v10  ;;  %v317_v1 = vsel %vm7772_vm4, 0, %v316_v52  ;;  %v694_v5 = vshrl.u32 %v7066_v59, 16  ;;  %v7928_v52 = vld [vmem:[%s10107_s3 + $0x6] sm:$0x3] }
  0x2b   : > { %1050 = vst.msk [vmem:[#allocation2 + $0x70] sm:$0xf] %vm274_vm1, %v819_v63  ;;  %v688_v4 = vrot.slane %v686_v60, 7  ;;  %v697_v6 = vshll.u32 %v7066_v59, 16  ;;  %318 = vst [vmem:[#allocation2 + $0x78] sm:$0x1] %v317_v1  ;;  %v7133_v9 = vunpack.c.l.bf16 %v7167_v57  ;;  %v472_v11 = vmul.f32 %v7106_v0, %v7792_v10 }
  0x2c   : > { %v510_v12 = vadd.f32 %v7825_v27, %v471_v25  ;;  %v7134_v13 = vunpack.c.h.bf16 %v7167_v57  ;;  %v320_v16 = vsel %vm7772_vm4, 0, %v319_v62  ;;  %v7137_v23 = vunpack.c.l.bf16 %v7168_v2  ;;  %v7161_v60 = vld [vmem:[%s7799_s30 + $0x18] sm:$0xff]  }
  0x2d   : > { %v7655_v18 = vld [vmem:[#allocation2 + $0xc] sm:$0xff]   ;;  %v691_v20 = vor.u32 %v689_v61, %v688_v4  ;;  %v692_v21 = vrot.slane %v688_v4, 4  ;;  %v485_v22 = vmul.f32 %v7133_v9, %v7792_v10  ;;  %321 = vst [vmem:[#allocation2 + $0x84] sm:$0x1] %v320_v16  ;;  %v7903_v26 = vrot.slane %v694_v5, 7 }
  0x2e   : > { %v7656_v24 = vld [vmem:[#allocation2 + $0x60] sm:$0xff]   ;;  %v511_v28 = vadd.f32 %v7825_v27, %v472_v11  ;;  %v486_v29 = vmul.f32 %v7134_v13, %v7792_v10  ;;  %v7138_v30 = vunpack.c.h.bf16 %v7168_v2  ;;  %7330 = vmatmul.mubr.msk.bf16.vlgmr.msra.gmra.mxu0 %vm1216_vm7, %v7655_v18  ;;  %v542_v32 = vmax.f32 %v510_v12, 0.0  ;;  %v298_v12 = vld [vmem:[#allocation2 + $0x30] sm:$0x1] }
  0x2f   : > { %v999_v31 = vsel %vm7851_vm9, %v691_v20, %v998_v8  ;;  %v524_v33 = vadd.f32 %v7825_v27, %v485_v22  ;;  %v487_v34 = vmul.f32 %v7137_v23, %v7792_v10  ;;  %7345 = vmatprep.mubr.msk.bf16.mxu1 %vm1216_vm7, %v7656_v24  ;;  %7396 = vmatpush3.bf16.msra.mxu0 %v2565_v54  ;;  %v1996_v43 = vsel %vm1265_vm0, %v7806_v14, 0  ;;  %v301_v22 = vld [vmem:[#allocation2 + $0x3c] sm:$0x1]  ;;  %v7162_v23 = vld [vmem:[%s7799_s30 + $0x20] sm:$0xff]  }
  0x30   : > { %v699_v35 = vor.u32 %v697_v6, %v7903_v26  ;;  %1000 = vst [vmem:[#allocation2 + $0x18] sm:$0xf] %v999_v31  ;;  %v543_v36 = vmax.f32 %v511_v28, 0.0  ;;  %v525_v37 = vadd.f32 %v7825_v27, %v486_v29  ;;  %v7067_v38 = vpack.c.bf16 %v542_v32, %v542_v32  ;;  %7640 = vmatprep.subr.msk.bf16.mxu0 %vm1265_vm0, %v7900_v17  ;;  %v1005_v62 = vld [vmem:[#allocation2 + $0x24] sm:$0xf] }
  0x31   : > { %v556_v39 = vmax.f32 %v524_v33, 0.0  ;;  %v488_v40 = vmul.f32 %v7138_v30, %v7792_v10  ;;  %v526_v41 = vadd.f32 %v7825_v27, %v487_v34  ;;  %v7109_v13 = vunpack.c.l.bf16 %v7161_v60  ;;  %v322_v31 = vld [vmem:[#allocation2 + $0x90] sm:$0x1] }
  0x32   : > { %v7657_v42 = vld [vmem:[#allocation2 + $0x6c] sm:$0xff]   ;;  %v700_v44 = vsel %vm7857_vm10, %v692_v21, %v699_v35  ;;  %v7068_v45 = vpack.c.bf16 %v543_v36, %v543_v36  ;;  %v557_v47 = vmax.f32 %v525_v37, 0.0  ;;  %v703_v48 = vshrl.u32 %v7067_v38, 16  ;;  %v1054_v9 = vld [vmem:[#allocation2 + $0x78] sm:$0xf] }
  0x33   : > { %1001 = vst.msk [vmem:[#allocation2 + $0x1c] sm:$0xf] %vm274_vm1, %v700_v44  ;;  %v706_v49 = vshll.u32 %v7067_v38, 16  ;;  %v7081_v50 = vpack.c.bf16 %v556_v39, %v556_v39  ;;  %v527_v51 = vadd.f32 %v7825_v27, %v488_v40  ;;  %7346 = vmatmul.mubr.msk.bf16.vlgmr.msra.gmra.mxu1 %vm1216_vm7, %v7657_v42  ;;  %v558_v55 = vmax.f32 %v526_v41, 0.0 }
  0x34   : > { %v711_v14 = vshrl.u32 %v7068_v45, 16  ;;  %v714_v53 = vshll.u32 %v7068_v45, 16  ;;  %v7082_v54 = vpack.c.bf16 %v557_v47, %v557_v47  ;;  %7362 = vmatpush3.bf16.msra.mxu1 %v1996_v43  ;;  %v705_v56 = vrot.slane %v703_v48, 7  ;;  %v1061_v35 = vld [vmem:[#allocation2 + $0x84] sm:$0xf]  ;;  %v7169_v45 = vld [vmem:[%s7799_s30 + $0x58] sm:$0xff]  }
  0x35   : > { %v822_v57 = vshrl.u32 %v7081_v50, 16  ;;  %v825_v58 = vshll.u32 %v7081_v50, 16  ;;  %v559_v59 = vmax.f32 %v527_v51, 0.0  ;;  %v7083_v25 = vpack.c.bf16 %v558_v55, %v558_v55  ;;  %7639 = vmatprep.subr.msk.bf16.mxu1 %vm1265_vm0, %v7928_v52  ;;  %v325_v51 = vld [vmem:[#allocation2 + $0x9c] sm:$0x1] }
  0x36   : > { %v7932_v61 = vrot.slane %v711_v14, 7  ;;  %v830_v63 = vshrl.u32 %v7082_v54, 16  ;;  %v833_v0 = vshll.u32 %v7082_v54, 16  ;;  %v708_v1 = vor.u32 %v706_v49, %v705_v56 }
  0x37   : > { %v709_v2 = vrot.slane %v705_v56, 4  ;;  %v824_v4 = vrot.slane %v822_v57, 7  ;;  %v7084_v5 = vpack.c.bf16 %v559_v59, %v559_v59  ;;  %v839_v11 = vshrl.u32 %v7083_v25, 16  ;;  %v7971_v59 = vld [vmem:[%s7799_s30 + $0x60] sm:$0xff]  }
  0x38   : > { %v716_v6 = vor.u32 %v714_v53, %v7932_v61  ;;  %v7937_v8 = vrot.slane %v830_v63, 7  ;;  %v1006_v16 = vsel %vm7851_vm9, %v708_v1, %v1005_v62  ;;  %v842_v21 = vshll.u32 %v7083_v25, 16 }
  0x39   : > { %v827_v18 = vor.u32 %v825_v58, %v824_v4  ;;  %v828_v20 = vrot.slane %v824_v4, 4  ;;  %1007 = vst [vmem:[#allocation2 + $0x24] sm:$0xf] %v1006_v16  ;;  %v841_v30 = vrot.slane %v839_v11, 7  ;;  %v847_v33 = vshrl.u32 %v7084_v5, 16 }
  0x3a   : > { %v7658_v24 = vld [vmem:[#allocation2 + $0x18] sm:$0xff]   ;;  %v717_v28 = vsel %vm7857_vm10, %v709_v2, %v716_v6  ;;  %v835_v29 = vor.u32 %v833_v0, %v7937_v8  ;;  %v850_v34 = vshll.u32 %v7084_v5, 16  ;;  %v299_v36 = vsel %vm7772_vm4, 0, %v298_v12 }
  0x3b   : > { %1008 = vst.msk [vmem:[#allocation2 + $0x28] sm:$0xf] %vm274_vm1, %v717_v28  ;;  %v1055_v32 = vsel %vm7851_vm9, %v827_v18, %v1054_v9  ;;  %7333 = vmatprep.mubr.msk.bf16.mxu0 %vm1216_vm7, %v7658_v24  ;;  %v844_v38 = vor.u32 %v842_v21, %v841_v30  ;;  %v845_v39 = vrot.slane %v841_v30, 4  ;;  %300 = vst [vmem:[#allocation2 + $0x30] sm:$0x1] %v299_v36  ;;  %v7110_v40 = vunpack.c.h.bf16 %v7161_v60 }
  0x3c   : > { %v836_v37 = vsel %vm7857_vm10, %v828_v20, %v835_v29  ;;  %1056 = vst [vmem:[#allocation2 + $0x78] sm:$0xf] %v1055_v32  ;;  %v7954_v41 = vrot.slane %v847_v33, 7  ;;  %v473_v42 = vmul.f32 %v7109_v13, %v7792_v10  ;;  %v302_v43 = vsel %vm7772_vm4, 0, %v301_v22 }
  0x3d   : > { %1057 = vst.msk [vmem:[#allocation2 + $0x7c] sm:$0xf] %vm274_vm1, %v836_v37  ;;  %v7113_v44 = vunpack.c.l.bf16 %v7162_v23  ;;  %v1062_v47 = vsel %vm7851_vm9, %v844_v38, %v1061_v35  ;;  %v474_v48 = vmul.f32 %v7110_v40, %v7792_v10  ;;  %303 = vst [vmem:[#allocation2 + $0x3c] sm:$0x1] %v302_v43  ;;  %v7114_v49 = vunpack.c.h.bf16 %v7162_v23 }
  0x3e   : > { %v323_v50 = vsel %vm7772_vm4, 0, %v322_v31  ;;  %v852_v14 = vor.u32 %v850_v34, %v7954_v41  ;;  %1063 = vst [vmem:[#allocation2 + $0x84] sm:$0xf] %v1062_v47  ;;  %v512_v53 = vadd.f32 %v7825_v27, %v473_v42  ;;  %v7141_v57 = vunpack.c.l.bf16 %v7169_v45 }
  0x3f   : > { %v475_v54 = vmul.f32 %v7113_v44, %v7792_v10  ;;  %324 = vst [vmem:[#allocation2 + $0x90] sm:$0x1] %v323_v50  ;;  %v513_v55 = vadd.f32 %v7825_v27, %v474_v48  ;;  %v476_v56 = vmul.f32 %v7114_v49, %v7792_v10  ;;  %v7142_v58 = vunpack.c.h.bf16 %v7169_v45 }
  0x40   : > { %v853_v60 = vsel %vm7857_vm10, %v845_v39, %v852_v14  ;;  %v544_v62 = vmax.f32 %v512_v53, 0.0  ;;  %v326_v0 = vsel %vm7772_vm4, 0, %v325_v51  ;;  %v489_v4 = vmul.f32 %v7141_v57, %v7792_v10 }
  0x41   : > { %v514_v63 = vadd.f32 %v7825_v27, %v475_v54  ;;  %1064 = vst.msk [vmem:[#allocation2 + $0x88] sm:$0xf] %vm274_vm1, %v853_v60  ;;  %v545_v1 = vmax.f32 %v513_v55, 0.0  ;;  %v515_v2 = vadd.f32 %v7825_v27, %v476_v56  ;;  %v490_v5 = vmul.f32 %v7142_v58, %v7792_v10  ;;  %327 = vst [vmem:[#allocation2 + $0x9c] sm:$0x1] %v326_v0 }
  0x42   : > { %v7659_v25 = vld [vmem:[#allocation2 + $0x24] sm:$0xff]   ;;  %v7069_v6 = vpack.c.bf16 %v544_v62, %v544_v62  ;;  %v7145_v11 = vunpack.c.l.bf16 %v7971_v59  ;;  %v528_v18 = vadd.f32 %v7825_v27, %v489_v4  ;;  %v7146_v24 = vunpack.c.h.bf16 %v7971_v59  ;;  %v1012_v37 = vld [vmem:[#allocation2 + $0x30] sm:$0xf]  ;;  %v307_v4 = vld [vmem:[#allocation2 + $0x54] sm:$0x1] }
  0x43   : > { %v546_v9 = vmax.f32 %v514_v63, 0.0  ;;  %7334 = vmatmul.mubr.msk.bf16.gmra.mxu0 %vm1216_vm7, %v7659_v25  ;;  %v7070_v13 = vpack.c.bf16 %v545_v1, %v545_v1  ;;  %v547_v16 = vmax.f32 %v515_v2, 0.0  ;;  %v529_v20 = vadd.f32 %v7825_v27, %v490_v5  ;;  %v304_v60 = vld [vmem:[#allocation2 + $0x48] sm:$0x1] }
  0x44   : > { %v7660_v12 = vld [vmem:[#allocation2 + $0x78] sm:$0xff]   ;;  %v720_v21 = vshrl.u32 %v7069_v6, 16  ;;  %v723_v22 = vshll.u32 %v7069_v6, 16  ;;  %v560_v31 = vmax.f32 %v528_v18, 0.0  ;;  %v491_v14 = vmul.f32 %v7145_v11, %v7792_v10  ;;  %v7163_v62 = vld [vmem:[%s7799_s30 + $0x28] sm:$0xff]  }
  0x45   : > { %v7071_v23 = vpack.c.bf16 %v546_v9, %v546_v9  ;;  %7349 = vmatprep.mubr.msk.bf16.mxu1 %vm1216_vm7, %v7660_v12  ;;  %v728_v28 = vshrl.u32 %v7070_v13, 16  ;;  %v731_v29 = vshll.u32 %v7070_v13, 16  ;;  %v7072_v30 = vpack.c.bf16 %v547_v16, %v547_v16  ;;  %v1019_v50 = vld [vmem:[#allocation2 + $0x3c] sm:$0xf]  ;;  %v7164_v12 = vld [vmem:[%s7799_s30 + $0x30] sm:$0xff]  }
  0x46   : > { %v722_v32 = vrot.slane %v720_v21, 7  ;;  %v561_v35 = vmax.f32 %v529_v20, 0.0  ;;  %v7085_v40 = vpack.c.bf16 %v560_v31, %v560_v31  ;;  %v1068_v1 = vld [vmem:[#allocation2 + $0x90] sm:$0xf]  ;;  %v492_v2 = vmul.f32 %v7146_v24, %v7792_v10  ;;  %v328_v21 = vld [vmem:[#allocation2 + $0xa8] sm:$0x1] }
  0x47   : > { %v737_v33 = vshrl.u32 %v7071_v23, 16  ;;  %v740_v34 = vshll.u32 %v7071_v23, 16  ;;  %v7988_v36 = vrot.slane %v728_v28, 7  ;;  %v745_v38 = vshrl.u32 %v7072_v30, 16 }
  0x48   : > { %v748_v39 = vshll.u32 %v7072_v30, 16  ;;  %v7661_v42 = vld [vmem:[#allocation2 + $0x84] sm:$0xff]   ;;  %v725_v43 = vor.u32 %v723_v22, %v722_v32  ;;  %v726_v44 = vrot.slane %v722_v32, 4  ;;  %v7086_v47 = vpack.c.bf16 %v561_v35, %v561_v35 }
  0x49   : > { %v739_v45 = vrot.slane %v737_v33, 7  ;;  %v733_v48 = vor.u32 %v731_v29, %v7988_v36  ;;  %v7991_v49 = vrot.slane %v745_v38, 7  ;;  %v856_v51 = vshrl.u32 %v7085_v40, 16  ;;  %7350 = vmatmul.mubr.msk.bf16.gmra.mxu1 %vm1216_vm7, %v7661_v42  ;;  %v7171_v42 = vld [vmem:[%s7799_s30 + $0x68] sm:$0xff]  }
  0x4a   : > { %v1013_v53 = vsel %vm7851_vm9, %v725_v43, %v1012_v37  ;;  %v859_v56 = vshll.u32 %v7085_v40, 16  ;;  %v864_v0 = vshrl.u32 %v7086_v47, 16  ;;  %v867_v25 = vshll.u32 %v7086_v47, 16 }
  0x4b   : > { %v742_v54 = vor.u32 %v740_v34, %v739_v45  ;;  %v743_v55 = vrot.slane %v739_v45, 4  ;;  %v734_v57 = vsel %vm7857_vm10, %v726_v44, %v733_v48  ;;  %1014 = vst [vmem:[#allocation2 + $0x30] sm:$0xf] %v1013_v53  ;;  %v750_v58 = vor.u32 %v748_v39, %v7991_v49 }
  0x4c   : > { %v858_v59 = vrot.slane %v856_v51, 7  ;;  %1015 = vst.msk [vmem:[#allocation2 + $0x34] sm:$0xf] %vm274_vm1, %v734_v57  ;;  %v530_v11 = vadd.f32 %v7825_v27, %v491_v14  ;;  %v8010_v13 = vrot.slane %v864_v0, 7  ;;  %v531_v16 = vadd.f32 %v7825_v27, %v492_v2 }
  0x4d   : > { %v1020_v63 = vsel %vm7851_vm9, %v742_v54, %v1019_v50  ;;  %v751_v5 = vsel %vm7857_vm10, %v743_v55, %v750_v58  ;;  %v305_v18 = vsel %vm7772_vm4, 0, %v304_v60  ;;  %v7117_v20 = vunpack.c.l.bf16 %v7163_v62  ;;  %v1075_v60 = vld [vmem:[#allocation2 + $0x9c] sm:$0xf] }
  0x4e   : > { %1021 = vst [vmem:[#allocation2 + $0x3c] sm:$0xf] %v1020_v63  ;;  %v861_v6 = vor.u32 %v859_v56, %v858_v59  ;;  %v862_v9 = vrot.slane %v858_v59, 4  ;;  %1022 = vst.msk [vmem:[#allocation2 + $0x40] sm:$0xf] %vm274_vm1, %v751_v5  ;;  %v562_v23 = vmax.f32 %v530_v11, 0.0  ;;  %v7118_v24 = vunpack.c.h.bf16 %v7163_v62 }
  0x4f   : > { %306 = vst [vmem:[#allocation2 + $0x48] sm:$0x1] %v305_v18  ;;  %v308_v28 = vsel %vm7772_vm4, 0, %v307_v4  ;;  %v869_v29 = vor.u32 %v867_v25, %v8010_v13  ;;  %v563_v30 = vmax.f32 %v531_v16, 0.0  ;;  %v477_v31 = vmul.f32 %v7117_v20, %v7792_v10 }
  0x50   : > { %v1069_v22 = vsel %vm7851_vm9, %v861_v6, %v1068_v1  ;;  %309 = vst [vmem:[#allocation2 + $0x54] sm:$0x1] %v308_v28  ;;  %v7087_v32 = vpack.c.bf16 %v562_v23, %v562_v23  ;;  %v478_v33 = vmul.f32 %v7118_v24, %v7792_v10  ;;  %v7121_v34 = vunpack.c.l.bf16 %v7164_v12 }
  0x51   : > { %1070 = vst [vmem:[#allocation2 + $0x90] sm:$0xf] %v1069_v22  ;;  %v7122_v35 = vunpack.c.h.bf16 %v7164_v12  ;;  %v870_v37 = vsel %vm7857_vm10, %v862_v9, %v869_v29  ;;  %v7088_v38 = vpack.c.bf16 %v563_v30, %v563_v30  ;;  %v516_v39 = vadd.f32 %v7825_v27, %v477_v31  ;;  %v331_v12 = vld [vmem:[#allocation2 + $0xb4] sm:$0x1] }
  0x52   : > { %v329_v40 = vsel %vm7772_vm4, 0, %v328_v21  ;;  %1071 = vst.msk [vmem:[#allocation2 + $0x94] sm:$0xf] %vm274_vm1, %v870_v37  ;;  %v873_v44 = vshrl.u32 %v7087_v32, 16  ;;  %v876_v45 = vshll.u32 %v7087_v32, 16  ;;  %v517_v47 = vadd.f32 %v7825_v27, %v478_v33 }
  0x53   : > { %v7662_v43 = vld [vmem:[#allocation2 + $0x30] sm:$0xff]   ;;  %v479_v48 = vmul.f32 %v7121_v34, %v7792_v10  ;;  %330 = vst [vmem:[#allocation2 + $0xa8] sm:$0x1] %v329_v40  ;;  %v881_v50 = vshrl.u32 %v7088_v38, 16  ;;  %v884_v51 = vshll.u32 %v7088_v38, 16  ;;  %v548_v14 = vmax.f32 %v516_v39, 0.0 }
  0x54   : > { %v480_v53 = vmul.f32 %v7122_v35, %v7792_v10  ;;  %7337 = vmatprep.mubr.msk.bf16.mxu0 %vm1216_vm7, %v7662_v43  ;;  %v875_v55 = vrot.slane %v873_v44, 7  ;;  %v549_v56 = vmax.f32 %v517_v47, 0.0  ;;  %v7149_v58 = vunpack.c.l.bf16 %v7171_v42  ;;  %v7172_v40 = vld [vmem:[%s7799_s30 + $0x70] sm:$0xff]  }
  0x55   : > { %v7663_v54 = vld [vmem:[#allocation2 + $0x3c] sm:$0xff]   ;;  %v518_v57 = vadd.f32 %v7825_v27, %v479_v48  ;;  %v8034_v59 = vrot.slane %v881_v50, 7  ;;  %v7073_v62 = vpack.c.bf16 %v548_v14, %v548_v14  ;;  %v7150_v0 = vunpack.c.h.bf16 %v7171_v42 }
  0x56   : > { %v519_v63 = vadd.f32 %v7825_v27, %v480_v53  ;;  %7338 = vmatmul.mubr.msk.bf16.gmra.mxu0 %vm1216_vm7, %v7663_v54  ;;  %v878_v25 = vor.u32 %v876_v45, %v875_v55  ;;  %v879_v1 = vrot.slane %v875_v55, 4  ;;  %v7074_v2 = vpack.c.bf16 %v549_v56, %v549_v56  ;;  %v1026_v31 = vld [vmem:[#allocation2 + $0x48] sm:$0xf] }
  0x57   : > { %v550_v4 = vmax.f32 %v518_v57, 0.0  ;;  %v820_v5 = vrot.slane %v7875_v46, 4  ;;  %v886_v6 = vor.u32 %v884_v51, %v8034_v59  ;;  %v754_v9 = vshrl.u32 %v7073_v62, 16  ;;  %v1033_v54 = vld [vmem:[#allocation2 + $0x54] sm:$0xf] }
  0x58   : > { %v757_v11 = vshll.u32 %v7073_v62, 16  ;;  %v1076_v16 = vsel %vm7851_vm9, %v878_v25, %v1075_v60  ;;  %v762_v18 = vshrl.u32 %v7074_v2, 16  ;;  %v765_v20 = vshll.u32 %v7074_v2, 16  ;;  %v342_v57 = vld [vmem:[#allocation2 + $0x8] sm:$0x1] }
  0x59   : > { %v551_v21 = vmax.f32 %v519_v63, 0.0  ;;  %v7664_v22 = vld [vmem:[#allocation2 + $0x90] sm:$0xff]   ;;  %v887_v23 = vsel %vm7857_vm10, %v879_v1, %v886_v6  ;;  %1077 = vst [vmem:[#allocation2 + $0x9c] sm:$0xf] %v1076_v16  ;;  %v756_v24 = vrot.slane %v754_v9, 7  ;;  %v7075_v28 = vpack.c.bf16 %v550_v4, %v550_v4 }
  0x5a   : > { %v493_v29 = vmul.f32 %v7149_v58, %v7792_v10  ;;  %1078 = vst.msk [vmem:[#allocation2 + $0xa0] sm:$0xf] %vm274_vm1, %v887_v23  ;;  %v8046_v30 = vrot.slane %v762_v18, 7  ;;  %v494_v33 = vmul.f32 %v7150_v0, %v7792_v10  ;;  %v332_v34 = vsel %vm7772_vm4, 0, %v331_v12  ;;  %7353 = vmatprep.mubr.msk.bf16.mxu1 %vm1216_vm7, %v7664_v22 }
  0x5b   : > { %v7076_v32 = vpack.c.bf16 %v551_v21, %v551_v21  ;;  %v759_v35 = vor.u32 %v757_v11, %v756_v24  ;;  %v760_v37 = vrot.slane %v756_v24, 4  ;;  %v771_v38 = vshrl.u32 %v7075_v28, 16  ;;  %333 = vst [vmem:[#allocation2 + $0xb4] sm:$0x1] %v332_v34 }
  0x5c   : > { %v774_v39 = vshll.u32 %v7075_v28, 16  ;;  %v701_v42 = vrot.slane %v7903_v26, 4  ;;  %v767_v43 = vor.u32 %v765_v20, %v8046_v30  ;;  %vm2351_vm11 = vcmask 1042432  }
  0x5d   : > { %v779_v44 = vshrl.u32 %v7076_v32, 16  ;;  %v782_v45 = vshll.u32 %v7076_v32, 16  ;;  %vm2352_vm12 = vcmask 1046532   ;;  %v1027_v47 = vsel %vm7851_vm9, %v759_v35, %v1026_v31 }
  0x5e   : > { %v773_v48 = vrot.slane %v771_v38, 7  ;;  %v532_v50 = vadd.f32 %v7825_v27, %v493_v29  ;;  %v533_v51 = vadd.f32 %v7825_v27, %v494_v33  ;;  %v768_v14 = vsel %vm7857_vm10, %v760_v37, %v767_v43  ;;  %1028 = vst [vmem:[#allocation2 + $0x48] sm:$0xf] %v1027_v47  ;;  %v2255_v29 = vld [vmem:[#allocation2] sm:$0xe]  ;;  %vm8087_vm13 = vmor %vm2351_vm11, %vm2352_vm12 }
  0x5f   : > { %v8061_v53 = vrot.slane %v779_v44, 7  ;;  %v7153_v55 = vunpack.c.l.bf16 %v7172_v40  ;;  %v7154_v56 = vunpack.c.h.bf16 %v7172_v40  ;;  %1029 = vst.msk [vmem:[#allocation2 + $0x4c] sm:$0xf] %vm274_vm1, %v768_v14  ;;  %v718_v0 = vrot.slane %v7932_v61, 4  ;;  %v1082_v40 = vld [vmem:[#allocation2 + $0xa8] sm:$0xf] }
  0x60   : > { %v776_v58 = vor.u32 %v774_v39, %v773_v48  ;;  %v777_v60 = vrot.slane %v773_v48, 4  ;;  %v564_v62 = vmax.f32 %v532_v50, 0.0  ;;  %v565_v63 = vmax.f32 %v533_v51, 0.0  ;;  %v1462_v14 = vld [vmem:[#allocation2] sm:$0xf] }
  0x61   : > { %v784_v25 = vor.u32 %v782_v45, %v8061_v53  ;;  %v495_v1 = vmul.f32 %v7153_v55, %v7792_v10  ;;  %v496_v2 = vmul.f32 %v7154_v56, %v7792_v10  ;;  %v7665_v4 = vld [vmem:[#allocation2 + $0x9c] sm:$0xff]   ;;  %v343_v12 = vsel %vm7782_vm6, 0, %v342_v57  ;;  %v2256_v10 = vld [vmem:[#allocation2 + $0x4] sm:$0xf] }
  0x62   : > { %v1034_v6 = vsel %vm7851_vm9, %v776_v58, %v1033_v54  ;;  %v7089_v9 = vpack.c.bf16 %v564_v62, %v564_v62  ;;  %v7090_v11 = vpack.c.bf16 %v565_v63, %v565_v63  ;;  %v837_v16 = vrot.slane %v7937_v8, 4  ;;  %344 = vst [vmem:[#allocation2 + $0x8] sm:$0x1] %v343_v12  ;;  %7354 = vmatmul.mubr.msk.bf16.gmra.mxu1 %vm1216_vm7, %v7665_v4  ;;  %v1463_v58 = vld [vmem:[#allocation2 + $0x4] sm:$0xf] }
  0x63   : > { %v785_v18 = vsel %vm7857_vm10, %v777_v60, %v784_v25  ;;  %1035 = vst [vmem:[#allocation2 + $0x54] sm:$0xf] %v1034_v6  ;;  %v534_v20 = vadd.f32 %v7825_v27, %v495_v1  ;;  %v535_v21 = vadd.f32 %v7825_v27, %v496_v2  ;;  %v854_v31 = vrot.slane %v7954_v41, 4  ;;  %v2258_v12 = vld [vmem:[#allocation2 + $0xc] sm:$0xe] }
  0x64   : > { %1036 = vst.msk [vmem:[#allocation2 + $0x58] sm:$0xf] %vm274_vm1, %v785_v18  ;;  %v890_v22 = vshrl.u32 %v7089_v9, 16  ;;  %v893_v23 = vshll.u32 %v7089_v9, 16  ;;  %v898_v24 = vshrl.u32 %v7090_v11, 16  ;;  %v901_v28 = vshll.u32 %v7090_v11, 16 }
  0x65   : > { %v735_v32 = vrot.slane %v7988_v36, 4  ;;  %v566_v33 = vmax.f32 %v534_v20, 0.0  ;;  %v567_v34 = vmax.f32 %v535_v21, 0.0  ;;  %v752_v35 = vrot.slane %v7991_v49, 4  ;;  %v2259_v18 = vld [vmem:[#allocation2 + $0x10] sm:$0xf] }
  0x66   : > { %v892_v27 = vrot.slane %v890_v22, 7  ;;  %v8082_v37 = vrot.slane %v898_v24, 7  ;;  %v2356_v38 = vrot.slane %v2256_v10, 5  ;;  %v7666_v39 = vld [vmem:[#allocation2 + $0x48] sm:$0xff]   ;;  %v6780_v45 = vrot.slane %v2255_v29, 9 }
  0x67   : > { %v7091_v43 = vpack.c.bf16 %v566_v33, %v566_v33  ;;  %v7092_v44 = vpack.c.bf16 %v567_v34, %v567_v34  ;;  %vm1510_vm14 = vsmask.f32 3328  ;;  %7341 = vmatprep.mubr.msk.bf16.mxu0 %vm1216_vm7, %v7666_v39  ;;  %v871_v60 = vrot.slane %v8010_v13, 4  ;;  %v1089_v20 = vld [vmem:[#allocation2 + $0xb4] sm:$0xf] }
  0x68   : > { %v895_v47 = vor.u32 %v893_v23, %v892_v27  ;;  %v896_v48 = vrot.slane %v892_v27, 4  ;;  %v903_v50 = vor.u32 %v901_v28, %v8082_v37  ;;  %v2358_v1 = vrot.slane %v2356_v38, 4  ;;  %v2260_v24 = vld [vmem:[#allocation2 + $0x14] sm:$0x1] }
  0x69   : > { %v907_v54 = vshrl.u32 %v7091_v43, 16  ;;  %v910_v55 = vshll.u32 %v7091_v43, 16  ;;  %v915_v56 = vshrl.u32 %v7092_v44, 16  ;;  %v918_v57 = vshll.u32 %v7092_v44, 16  ;;  %v2257_v25 = vld [vmem:[#allocation2 + $0x8] sm:$0x1] }
  0x6a   : > { %v904_v62 = vsel %vm7857_vm10, %v896_v48, %v903_v50  ;;  %v1083_v63 = vsel %vm7851_vm9, %v895_v47, %v1082_v40  ;;  %v2357_v9 = vsel %vm8087_vm13, %v6780_v45, %v2356_v38  ;;  %v2359_v11 = vrot.slane %v2257_v25, 5  ;;  %v1464_v34 = vld [vmem:[#allocation2 + $0x8] sm:$0x1]  ;;  %v1465_v43 = vld [vmem:[#allocation2 + $0xc] sm:$0xf] }
  0x6b   : > { %v7667_v2 = vld [vmem:[#allocation2 + $0x54] sm:$0xff]   ;;  %1084 = vst [vmem:[#allocation2 + $0xa8] sm:$0xf] %v1083_v63  ;;  %1085 = vst.msk [vmem:[#allocation2 + $0xac] sm:$0xf] %vm274_vm1, %v904_v62  ;;  %v909_v4 = vrot.slane %v907_v54, 7 }
  0x6c   : > { %v8098_v6 = vrot.slane %v915_v56, 7  ;;  %v1514_v21 = vshrl.u32 %v1462_v14, 16  ;;  %v1517_v10 = vshll.u32 %v1462_v14, 16  ;;  %v1523_v22 = vshll.u32 %v1463_v58, 16  ;;  %7342 = vmatmul.mubr.msk.bf16.gmra.mxu0 %vm1216_vm7, %v7667_v2  ;;  %v1466_v56 = vld [vmem:[#allocation2 + $0x10] sm:$0xf] }
  0x6d   : > { %v1527_v23 = vshrl.u32 %v1463_v58, 16  ;;  %v912_v28 = vor.u32 %v910_v55, %v909_v4  ;;  %v913_v29 = vrot.slane %v909_v4, 4  ;;  %vm1511_vm15 = vsmask.f32 7440  ;;  %v1467_v63 = vld [vmem:[#allocation2 + $0x14] sm:$0x1] }
  0x6e   : > { %v920_v33 = vor.u32 %v918_v57, %v8098_v6  ;;  %v2360_v27 = vsel %vm8087_vm13, %v2358_v1, %v2359_v11  ;;  %v1516_v38 = vrot.slane %v1514_v21, 4  ;;  %v1519_v39 = vrot.slane %v1517_v10, 5  ;;  %vm8114_vm2 = vmor %vm1510_vm14, %vm1511_vm15 }
  0x6f   : > { %v1525_v40 = vrot.slane %v1523_v22, 5  ;;  %v1090_v45 = vsel %vm7851_vm9, %v912_v28, %v1089_v20  ;;  %v6797_v47 = vcombine.low %v2357_v9, %v2360_v27  ;;  %v1529_v48 = vrot.slane %v1527_v23, 4 }
  0x70   : > { %v921_v44 = vsel %vm7857_vm10, %v913_v29, %v920_v33  ;;  %1091 = vst [vmem:[#allocation2 + $0xb4] sm:$0xf] %v1090_v45  ;;  %v1520_v50 = vor.u32 %v1519_v39, %v1516_v38  ;;  %v1533_v14 = vshll.u32 %v1464_v34, 16  ;;  %v6781_v54 = vrot.slane %v2258_v12, 9  ;;  %v348_v34 = vld [vmem:[#allocation2 + $0x20] sm:$0x1] }
  0x71   : > { %1092 = vst.msk [vmem:[#allocation2 + $0xb8] sm:$0xf] %vm274_vm1, %v921_v44  ;;  %v2363_v55 = vrot.slane %v2259_v18, 5  ;;  %7397 = vmatprep.mubr.msk.bf16.mxu0 %vm1216_vm7, %v6797_v47  ;;  %v1530_v58 = vor.u32 %v1529_v48, %v1525_v40  ;;  %v2366_v62 = vrot.slane %v2260_v24, 5  ;;  %v1538_v25 = vshrl.u32 %v1465_v43, 16 }
  0x72   : > { %v1541_v1 = vshll.u32 %v1465_v43, 16  ;;  %v7668_v2 = vld [vmem:[#allocation2 + $0xa8] sm:$0xff]   ;;  %v1521_v4 = vrot.slane %v1520_v50, 4  ;;  %v1535_v12 = vrot.slane %v1533_v14, 5  ;;  %v1547_v22 = vshll.u32 %v1466_v56, 16 }
  0x73   : > { %v2364_v9 = vsel %vm8087_vm13, %v6781_v54, %v2363_v55  ;;  %v1531_v11 = vrot.slane %v1530_v58, 4  ;;  %v2365_v18 = vrot.slane %v2363_v55, 4  ;;  %v1540_v20 = vrot.slane %v1538_v25, 4  ;;  %7357 = vmatprep.mubr.msk.bf16.mxu1 %vm1216_vm7, %v7668_v2  ;;  %v1468_v44 = vld [vmem:[#allocation2 + $0x18] sm:$0xf] }
  0x74   : > { %v1526_v21 = vsel %vm8114_vm2, %v1521_v4, %v1525_v40  ;;  %v1543_v10 = vrot.slane %v1541_v1, 5  ;;  %v1551_v23 = vshrl.u32 %v1466_v56, 16  ;;  %v888_v24 = vrot.slane %v8034_v59, 4  ;;  %v1469_v45 = vld [vmem:[#allocation2 + $0x1c] sm:$0xf] }
  0x75   : > { %v1536_v28 = vsel %vm8114_vm2, %v1531_v11, %v1535_v12  ;;  %v2367_v29 = vsel %vm8087_vm13, %v2365_v18, %v2366_v62  ;;  %v1557_v33 = vshll.u32 %v1467_v63, 16  ;;  %v1549_v43 = vrot.slane %v1547_v22, 5  ;;  %v351_v48 = vld [vmem:[#allocation2 + $0x2c] sm:$0x1]  ;;  %v8134_v56 = vld [vmem:[#allocation2 + $0x1c] sm:$0xf] }
  0x76   : > { %v6748_v27 = vcombine.low %v1526_v21, %v1536_v28  ;;  %v6798_v38 = vcombine.low %v2364_v9, %v2367_v29  ;;  %v1544_v39 = vor.u32 %v1543_v10, %v1540_v20  ;;  %v1553_v47 = vrot.slane %v1551_v23, 4  ;;  %v8138_v1 = vld [vmem:[#allocation2 + $0x28] sm:$0xf]  ;;  %v1471_v12 = vld [vmem:[#allocation2 + $0x24] sm:$0xf] }
  0x77   : > { %v769_v50 = vrot.slane %v8046_v30, 4  ;;  %v3777_v54 = vsel %vm1265_vm0, %v7900_v17, 0  ;;  %v349_v55 = vsel %vm7782_vm6, 0, %v348_v34  ;;  %v786_v58 = vrot.slane %v8061_v53, 4  ;;  %v8142_v17 = vld [vmem:[#allocation2 + $0x18] sm:$0xe] }
  0x78   : > { %v7669_v40 = vld [vmem:[#allocation2 + $0xb4] sm:$0xff]   ;;  %7398 = vmatmul.mubr.msk.bf16.vlgmr.msra.gmra.mxu0 %vm1216_vm7, %v6798_v38  ;;  %v1545_v14 = vrot.slane %v1544_v39, 4  ;;  %v1554_v62 = vor.u32 %v1553_v47, %v1549_v43  ;;  %v1559_v63 = vrot.slane %v1557_v33, 5  ;;  %350 = vst [vmem:[#allocation2 + $0x20] sm:$0x1] %v349_v55  ;;  %v1562_v25 = vshrl.u32 %v1468_v44, 16 }
  0x79   : > { %7358 = vmatmul.mubr.msk.bf16.gmra.mxu1 %vm1216_vm7, %v7669_v40  ;;  %7464 = vmatpush3.bf16.msra.mxu0 %v3777_v54  ;;  %v1565_v4 = vshll.u32 %v1468_v44, 16  ;;  %v1571_v9 = vshll.u32 %v1469_v45, 16  ;;  %v1575_v11 = vshrl.u32 %v1469_v45, 16  ;;  %v2370_v21 = vrot.slane %v8134_v56, 5  ;;  %v8147_v22 = vld [vmem:[#allocation2 + $0x24] sm:$0xe] }
  0x7a   : > { %7363 = vmatprep.mubr.msk.bf16.mxu1 %vm1216_vm7, %v6748_v27  ;;  %v1550_v18 = vsel %vm8114_vm2, %v1545_v14, %v1549_v43  ;;  %v1555_v20 = vrot.slane %v1554_v62, 4  ;;  %v1564_v10 = vrot.slane %v1562_v25, 4  ;;  %v1472_v23 = vld [vmem:[#allocation2 + $0x28] sm:$0xf]  ;;  %v352_v34 = vsel %vm7782_vm6, 0, %v351_v48 }
  0x7b   : > { %v1567_v28 = vrot.slane %v1565_v4, 5  ;;  %v8149_v29 = vrot.slane %v1571_v9, 5  ;;  %v1577_v33 = vrot.slane %v1575_v11, 4  ;;  %v354_v27 = vld [vmem:[#allocation2 + $0x38] sm:$0x1]  ;;  %v2377_v44 = vrot.slane %v8138_v1, 5 }
  0x7c   : > { %v6944_v38 = vld [vmem:[%s10107_s3 + $0xc] sm:$0x3]  ;;  %v1560_v43 = vsel %vm8114_vm2, %v1555_v20, %v1559_v63  ;;  %353 = vst [vmem:[#allocation2 + $0x2c] sm:$0x1] %v352_v34  ;;  %v1586_v45 = vshrl.u32 %v1471_v12, 16  ;;  %v2987_v48 = vsel %vm1265_vm0, %v7928_v52, 0 }
  0x7d   : > { %v8160_v40 = vld [vmem:[#allocation2 + $0x34] sm:$0xf]  ;;  %7642 = vmatprep.subr.msk.bf16.mxu0 %vm1265_vm0, %v6944_v38  ;;  %v6749_v47 = vcombine.low %v1550_v18, %v1560_v43  ;;  %v1568_v14 = vor.u32 %v1567_v28, %v1564_v10  ;;  %v1589_v54 = vshll.u32 %v1471_v12, 16  ;;  %v1474_v55 = vld [vmem:[#allocation2 + $0x30] sm:$0xf]  ;;  %v6782_v62 = vrot.slane %v8142_v17, 9 }
  0x7e   : > { %v1475_v56 = vld [vmem:[#allocation2 + $0x34] sm:$0xf]  ;;  %v8166_v25 = vrot.slane %v2370_v21, 4  ;;  %v1588_v63 = vrot.slane %v1586_v45, 4  ;;  %v1595_v4 = vshll.u32 %v1472_v23, 16  ;;  %v1578_v18 = vor.u32 %v1577_v33, %v8149_v29 }
  0x7f   : > { %v2267_v9 = vld [vmem:[#allocation2 + $0x30] sm:$0xe]  ;;  %v6911_v11 = vld [vmem:[%s10107_s3 + $0xa] sm:$0x3]  ;;  %v1002_v20 = vld [vmem:[#allocation2 + $0x20] sm:$0x1] }
  0x80   : > { %v6783_v52 = vrot.slane %v8147_v22, 9  ;;  %v1591_v10 = vrot.slane %v1589_v54, 5  ;;  %v1599_v12 = vshrl.u32 %v1472_v23, 16  ;;  %v1003_v17 = vsel %vm7772_vm4, %v701_v42, %v1002_v20  ;;  %v357_v38 = vld [vmem:[#allocation2 + $0x44] sm:$0x1] }
  0x81   : > { %7364 = vmatmul.mubr.msk.bf16.vlgmr.msra.gmra.mxu1 %vm1216_vm7, %v6749_v47  ;;  %v8178_v28 = vrot.slane %v1568_v14, 4  ;;  %v8182_v34 = vrot.slane %v2377_v44, 4  ;;  %v355_v33 = vsel %vm7782_vm6, 0, %v354_v27  ;;  %1004 = vst [vmem:[#allocation2 + $0x20] sm:$0x1] %v1003_v17  ;;  %v8186_v23 = vrot.slane %v1595_v4, 5 }
  0x82   : > { %7430 = vmatpush3.bf16.msra.mxu1 %v2987_v48  ;;  %v1592_v22 = vor.u32 %v1591_v10, %v1588_v63  ;;  %v1601_v43 = vrot.slane %v1599_v12, 4  ;;  %356 = vst [vmem:[#allocation2 + $0x38] sm:$0x1] %v355_v33  ;;  %v2384_v26 = vrot.slane %v8160_v40, 5  ;;  %v2270_v42 = vld [vmem:[#allocation2 + $0x3c] sm:$0xe]  ;;  %v2371_v27 = vsel %vm8087_vm13, %v6782_v62, %v2370_v21 }
  0x83   : > { %v1477_v45 = vld [vmem:[#allocation2 + $0x3c] sm:$0xf]  ;;  %v1610_v47 = vshrl.u32 %v1474_v55, 16  ;;  %v1613_v14 = vshll.u32 %v1474_v55, 16  ;;  %v1619_v54 = vshll.u32 %v1475_v56, 16  ;;  %v1623_v20 = vshrl.u32 %v1475_v56, 16  ;;  %7641 = vmatprep.subr.msk.bf16.mxu1 %vm1265_vm0, %v6911_v11 }
  0x84   : > { %v8189_v39 = vld [vmem:[#allocation2 + $0x40] sm:$0xf]  ;;  %v1579_v48 = vrot.slane %v1578_v18, 4  ;;  %v1009_v63 = vld [vmem:[#allocation2 + $0x2c] sm:$0x1]  ;;  %v6784_v4 = vrot.slane %v2267_v9, 9  ;;  %v1602_v12 = vor.u32 %v1601_v43, %v8186_v23  ;;  %v1574_v43 = vsel %vm8114_vm2, %v8178_v28, %v8149_v29 }
  0x85   : > { %v1478_v2 = vld [vmem:[#allocation2 + $0x40] sm:$0xf]  ;;  %v1010_v40 = vsel %vm7772_vm4, %v718_v0, %v1009_v63  ;;  %v8198_v10 = vrot.slane %v1592_v22, 4  ;;  %v1612_v55 = vrot.slane %v1610_v47, 4  ;;  %v1615_v56 = vrot.slane %v1613_v14, 5 }
  0x86   : > { %1011 = vst [vmem:[#allocation2 + $0x2c] sm:$0x1] %v1010_v40  ;;  %v8201_v17 = vrot.slane %v1619_v54, 5  ;;  %v1625_v11 = vrot.slane %v1623_v20, 4  ;;  %v358_v21 = vsel %vm7782_vm6, 0, %v357_v38  ;;  %v8205_v62 = vrot.slane %v2384_v26, 4 }
  0x87   : > { %v1616_v9 = vor.u32 %v1615_v56, %v1612_v55  ;;  %359 = vst [vmem:[#allocation2 + $0x44] sm:$0x1] %v358_v21  ;;  %v6785_v61 = vrot.slane %v2270_v42, 9  ;;  %v1634_v18 = vshrl.u32 %v1477_v45, 16  ;;  %v2391_v0 = vrot.slane %v8189_v39, 5 }
  0x88   : > { %v1637_v33 = vshll.u32 %v1477_v45, 16  ;;  %v1643_v22 = vshll.u32 %v1478_v2, 16  ;;  %v1647_v47 = vshrl.u32 %v1478_v2, 16  ;;  %v2263_v14 = vld [vmem:[#allocation2 + $0x20] sm:$0x1]  ;;  %v2378_v38 = vsel %vm8087_vm13, %v6783_v52, %v2377_v44 }
  0x89   : > { %v1470_v63 = vld [vmem:[#allocation2 + $0x20] sm:$0x1]  ;;  %v1598_v39 = vsel %vm8114_vm2, %v8198_v10, %v8186_v23  ;;  %v1016_v42 = vld [vmem:[#allocation2 + $0x38] sm:$0x1]  ;;  %v8222_v2 = vsel %vm8087_vm13, %v6784_v4, %v2384_v26  ;;  %v2373_v45 = vrot.slane %v2263_v14, 5  ;;  %v1626_v29 = vor.u32 %v1625_v11, %v8201_v17 }
  0x8a   : > { %v1581_v54 = vshll.u32 %v1470_v63, 16  ;;  %v1017_v1 = vsel %vm7772_vm4, %v735_v32, %v1016_v42  ;;  %v360_v44 = vld [vmem:[#allocation2 + $0x50] sm:$0x1]  ;;  %v1603_v52 = vrot.slane %v1602_v12, 4  ;;  %v8231_v28 = vsel %vm8087_vm13, %v6785_v61, %v2391_v0  ;;  %v8233_v26 = vld [vmem:[#allocation2 + $0x4c] sm:$0xf] }
  0x8b   : > { %1018 = vst [vmem:[#allocation2 + $0x38] sm:$0x1] %v1017_v1  ;;  %v1636_v23 = vrot.slane %v1634_v18, 4  ;;  %v1639_v20 = vrot.slane %v1637_v33, 5  ;;  %v2374_v36 = vsel %vm8087_vm13, %v8166_v25, %v2373_v45  ;;  %v8238_v40 = vrot.slane %v1616_v9, 4 }
  0x8c   : > { %v1583_v4 = vrot.slane %v1581_v54, 5  ;;  %v8240_v32 = vrot.slane %v1643_v22, 5  ;;  %v8242_v10 = vld [vmem:[#allocation2 + $0x48] sm:$0xe]  ;;  %v6799_v56 = vcombine.low %v2371_v27, %v2374_v36  ;;  %v1649_v61 = vrot.slane %v1647_v47, 4 }
  0x8d   : > { %v1480_v55 = vld [vmem:[#allocation2 + $0x48] sm:$0xf]  ;;  %v2266_v12 = vld [vmem:[#allocation2 + $0x2c] sm:$0x1]  ;;  %v1640_v21 = vor.u32 %v1639_v20, %v1636_v23  ;;  %v361_v18 = vsel %vm7782_vm6, 0, %v360_v44  ;;  %v1627_v9 = vrot.slane %v1626_v29, 4 }
  0x8e   : > { %v1473_v11 = vld [vmem:[#allocation2 + $0x2c] sm:$0x1]  ;;  %v1584_v33 = vsel %vm8114_vm2, %v1579_v48, %v1583_v4  ;;  %v2380_v25 = vrot.slane %v2266_v12, 5  ;;  %v1023_v63 = vld [vmem:[#allocation2 + $0x44] sm:$0x1]  ;;  %7401 = vmatprep.mubr.msk.bf16.mxu0 %vm1216_vm7, %v6799_v56  ;;  %v8253_v47 = vrot.slane %v2391_v0, 4  ;;  %v1650_v42 = vor.u32 %v1649_v61, %v8240_v32 }
  0x8f   : > { %v1605_v14 = vshll.u32 %v1473_v11, 16  ;;  %362 = vst [vmem:[#allocation2 + $0x50] sm:$0x1] %v361_v18  ;;  %v6750_v22 = vcombine.low %v1574_v43, %v1584_v33  ;;  %v1024_v27 = vsel %vm7772_vm4, %v752_v35, %v1023_v63  ;;  %v1481_v45 = vld [vmem:[#allocation2 + $0x4c] sm:$0xf]  ;;  %v2398_v29 = vrot.slane %v8233_v26, 5 }
  0x90   : > { %v363_v54 = vld [vmem:[#allocation2 + $0x5c] sm:$0x1]  ;;  %v2381_v48 = vsel %vm8087_vm13, %v8182_v34, %v2380_v25  ;;  %1025 = vst [vmem:[#allocation2 + $0x44] sm:$0x1] %v1024_v27  ;;  %v1658_v43 = vshrl.u32 %v1480_v55, 16  ;;  %v8261_v44 = vrot.slane %v1640_v21, 4  ;;  %v1622_v4 = vsel %vm8114_vm2, %v8238_v40, %v8201_v17 }
  0x91   : > { %v1607_v1 = vrot.slane %v1605_v14, 5  ;;  %7367 = vmatprep.mubr.msk.bf16.mxu1 %vm1216_vm7, %v6750_v22  ;;  %v6800_v49 = vcombine.low %v2378_v38, %v2381_v48  ;;  %v6786_v35 = vrot.slane %v8242_v10, 9  ;;  %v1661_v0 = vshll.u32 %v1480_v55, 16  ;;  %v8264_v23 = vld [vmem:[#allocation2 + $0x58] sm:$0xf] }
  0x92   : > { %v2269_v36 = vld [vmem:[#allocation2 + $0x38] sm:$0x1]  ;;  %v1651_v56 = vrot.slane %v1650_v42, 4  ;;  %v1660_v12 = vrot.slane %v1658_v43, 4  ;;  %v8275_v61 = vrot.slane %v2398_v29, 4  ;;  %v1671_v18 = vshrl.u32 %v1481_v45, 16 }
  0x93   : > { %v1608_v20 = vsel %vm8114_vm2, %v1603_v52, %v1607_v1  ;;  %v1476_v34 = vld [vmem:[#allocation2 + $0x38] sm:$0x1]  ;;  %7402 = vmatmul.mubr.msk.bf16.gmra.mxu0 %vm1216_vm7, %v6800_v49  ;;  %v2387_v11 = vrot.slane %v2269_v36, 5  ;;  %v1663_v55 = vrot.slane %v1661_v0, 5  ;;  %v1667_v52 = vshll.u32 %v1481_v45, 16 }
  0x94   : > { %v6751_v38 = vcombine.low %v1598_v39, %v1608_v20  ;;  %v1629_v21 = vshll.u32 %v1476_v34, 16  ;;  %v364_v33 = vsel %vm7782_vm6, 0, %v363_v54  ;;  %v2276_v25 = vld [vmem:[#allocation2 + $0x54] sm:$0xe]  ;;  %v2405_v63 = vrot.slane %v8264_v23, 5 }
  0x95   : > { %v2388_v17 = vsel %vm8087_vm13, %v8205_v62, %v2387_v11  ;;  %v1664_v14 = vor.u32 %v1663_v55, %v1660_v12  ;;  %365 = vst [vmem:[#allocation2 + $0x5c] sm:$0x1] %v364_v33  ;;  %v8289_v42 = vrot.slane %v1667_v52, 5  ;;  %v1673_v45 = vrot.slane %v1671_v18, 4  ;;  %v1483_v54 = vld [vmem:[#allocation2 + $0x54] sm:$0xf] }
  0x96   : > { %7368 = vmatmul.mubr.msk.bf16.gmra.mxu1 %vm1216_vm7, %v6751_v38  ;;  %v1631_v39 = vrot.slane %v1629_v21, 5  ;;  %v1030_v40 = vld [vmem:[#allocation2 + $0x50] sm:$0x1]  ;;  %v6801_v22 = vcombine.low %v8222_v2, %v2388_v17  ;;  %v1484_v48 = vld [vmem:[#allocation2 + $0x58] sm:$0xf]  ;;  %v1646_v2 = vsel %vm8114_vm2, %v8261_v44, %v8240_v32  ;;  %v6787_v49 = vrot.slane %v2276_v25, 9 }
  0x97   : > { %v1031_v27 = vsel %vm7772_vm4, %v769_v50, %v1030_v40  ;;  %v2272_v1 = vld [vmem:[#allocation2 + $0x44] sm:$0x1]  ;;  %v8297_v30 = vrot.slane %v1664_v14, 4  ;;  %v2279_v50 = vld [vmem:[#allocation2 + $0x60] sm:$0xe]  ;;  %v1674_v36 = vor.u32 %v1673_v45, %v8289_v42  ;;  %v8301_v12 = vrot.slane %v2405_v63, 4 }
  0x98   : > { %v1632_v62 = vsel %vm8114_vm2, %v1627_v9, %v1631_v39  ;;  %v1479_v43 = vld [vmem:[#allocation2 + $0x44] sm:$0x1]  ;;  %1032 = vst [vmem:[#allocation2 + $0x50] sm:$0x1] %v1031_v27  ;;  %7405 = vmatprep.mubr.msk.bf16.mxu0 %vm1216_vm7, %v6801_v22  ;;  %v2394_v23 = vrot.slane %v2272_v1, 5  ;;  %v1682_v38 = vshrl.u32 %v1483_v54, 16 }
  0x99   : > { %v6752_v0 = vcombine.low %v1622_v4, %v1632_v62  ;;  %v1653_v20 = vshll.u32 %v1479_v43, 16  ;;  %v2280_v9 = vld [vmem:[#allocation2 + $0x64] sm:$0xf]  ;;  %v2281_v34 = vld [vmem:[#allocation2 + $0x68] sm:$0x1]  ;;  %v1685_v11 = vshll.u32 %v1483_v54, 16  ;;  %v8325_v43 = vsel %vm8087_vm13, %v6787_v49, %v2405_v63 }
  0x9a   : > { %v1691_v21 = vshll.u32 %v1484_v48, 16  ;;  %v2395_v32 = vsel %vm8087_vm13, %v8253_v47, %v2394_v23  ;;  %v1675_v55 = vrot.slane %v1674_v36, 4  ;;  %v1695_v4 = vshrl.u32 %v1484_v48, 16  ;;  %v1486_v17 = vld [vmem:[#allocation2 + $0x60] sm:$0xf] }
  0x9b   : > { %7371 = vmatprep.mubr.msk.bf16.mxu1 %vm1216_vm7, %v6752_v0  ;;  %v1655_v44 = vrot.slane %v1653_v20, 5  ;;  %v6802_v52 = vcombine.low %v8231_v28, %v2395_v32  ;;  %v1684_v18 = vrot.slane %v1682_v38, 4  ;;  %v1687_v33 = vrot.slane %v1685_v11, 5  ;;  %v1487_v48 = vld [vmem:[#allocation2 + $0x64] sm:$0xf] }
  0x9c   : > { %v8308_v25 = vrot.slane %v1691_v21, 5  ;;  %v1037_v40 = vld [vmem:[#allocation2 + $0x5c] sm:$0x1]  ;;  %v1697_v14 = vrot.slane %v1695_v4, 4  ;;  %v6788_v22 = vrot.slane %v2279_v50, 9  ;;  %v2412_v27 = vrot.slane %v2280_v9, 5 }
  0x9d   : > { %v1656_v39 = vsel %vm8114_vm2, %v1651_v56, %v1655_v44  ;;  %7406 = vmatmul.mubr.msk.bf16.gmra.mxu0 %vm1216_vm7, %v6802_v52  ;;  %v1038_v28 = vsel %vm7772_vm4, %v786_v58, %v1037_v40  ;;  %v1688_v45 = vor.u32 %v1687_v33, %v1684_v18  ;;  %v2415_v54 = vrot.slane %v2281_v34, 5  ;;  %v369_v23 = vld [vmem:[#allocation2 + $0x74] sm:$0x1]  ;;  %v8344_v38 = vld [vmem:[#allocation2 + $0x6c] sm:$0xe] }
  0x9e   : > { %v6753_v47 = vcombine.low %v1646_v2, %v1656_v39  ;;  %v2399_v56 = vsel %vm8087_vm13, %v6786_v35, %v2398_v29  ;;  %1039 = vst [vmem:[#allocation2 + $0x5c] sm:$0x1] %v1038_v28  ;;  %v2414_v53 = vrot.slane %v2412_v27, 4  ;;  %v1706_v2 = vshrl.u32 %v1486_v17, 16  ;;  %v1488_v35 = vld [vmem:[#allocation2 + $0x68] sm:$0x1] }
  0x9f   : > { %v2275_v62 = vld [vmem:[#allocation2 + $0x50] sm:$0x1]  ;;  %v1698_v0 = vor.u32 %v1697_v14, %v8308_v25  ;;  %v1709_v26 = vshll.u32 %v1486_v17, 16  ;;  %v1670_v10 = vsel %vm8114_vm2, %v8297_v30, %v8289_v42  ;;  %v8335_v29 = vsel %vm8087_vm13, %v6788_v22, %v2412_v27  ;;  %v1489_v42 = vld [vmem:[#allocation2 + $0x6c] sm:$0xf]  ;;  %v8353_v14 = vld [vmem:[%s7799_s30 + $0x78] sm:$0xff]  }
  0xa0   : > { %v1482_v1 = vld [vmem:[#allocation2 + $0x50] sm:$0x1]  ;;  %7372 = vmatmul.mubr.msk.bf16.gmra.mxu1 %vm1216_vm7, %v6753_v47  ;;  %v2401_v58 = vrot.slane %v2275_v62, 5  ;;  %v1708_v63 = vrot.slane %v1706_v2, 4  ;;  %v1715_v49 = vshll.u32 %v1487_v48, 16  ;;  %v1689_v9 = vrot.slane %v1688_v45, 4 }
  0xa1   : > { %v1677_v50 = vshll.u32 %v1482_v1, 16  ;;  %v8342_v34 = vsel %vm8087_vm13, %v2414_v53, %v2415_v54  ;;  %v1711_v11 = vrot.slane %v1709_v26, 5  ;;  %v1719_v32 = vshrl.u32 %v1487_v48, 16  ;;  %v2283_v39 = vld [vmem:[#allocation2 + $0x70] sm:$0xf] }
  0xa2   : > { %v2402_v20 = vsel %vm8087_vm13, %v8275_v61, %v2401_v58  ;;  %v1717_v21 = vrot.slane %v1715_v49, 5  ;;  %v1699_v4 = vrot.slane %v1698_v0, 4  ;;  %v1725_v52 = vshll.u32 %v1488_v35, 16  ;;  %v372_v54 = vld [vmem:[#allocation2 + $0x80] sm:$0x1] }
  0xa3   : > { %v1679_v36 = vrot.slane %v1677_v50, 5  ;;  %v6803_v30 = vcombine.low %v2399_v56, %v2402_v20  ;;  %v370_v61 = vsel %vm7782_vm6, 0, %v369_v23  ;;  %v1712_v33 = vor.u32 %v1711_v11, %v1708_v63  ;;  %v1490_v53 = vld [vmem:[#allocation2 + $0x70] sm:$0xf]  ;;  %v2285_v0 = vld [vmem:[#allocation2 + $0x78] sm:$0xe] }
  0xa4   : > { %v1721_v17 = vrot.slane %v1719_v32, 4  ;;  %371 = vst [vmem:[#allocation2 + $0x74] sm:$0x1] %v370_v61  ;;  %v6789_v40 = vrot.slane %v8344_v38, 9  ;;  %v6805_v47 = vcombine.low %v8335_v29, %v8342_v34  ;;  %v1727_v28 = vrot.slane %v1725_v52, 5 }
  0xa5   : > { %v1680_v44 = vsel %vm8114_vm2, %v1675_v55, %v1679_v36  ;;  %7409 = vmatprep.mubr.msk.bf16.mxu0 %vm1216_vm7, %v6803_v30  ;;  %v2278_v22 = vld [vmem:[#allocation2 + $0x5c] sm:$0x1]  ;;  %v1694_v55 = vsel %vm8114_vm2, %v1689_v9, %v8308_v25  ;;  %v1730_v45 = vshrl.u32 %v1489_v42, 16  ;;  %v1713_v56 = vrot.slane %v1712_v33, 4  ;;  %v1492_v35 = vld [vmem:[#allocation2 + $0x78] sm:$0xf] }
  0xa6   : > { %v6754_v18 = vcombine.low %v1670_v10, %v1680_v44  ;;  %v1485_v27 = vld [vmem:[#allocation2 + $0x5c] sm:$0x1]  ;;  %v2408_v48 = vrot.slane %v2278_v22, 5  ;;  %v1722_v1 = vor.u32 %v1721_v17, %v1717_v21  ;;  %v2419_v2 = vrot.slane %v2283_v39, 5  ;;  %v375_v52 = vld [vmem:[#allocation2 + $0x8c] sm:$0x1] }
  0xa7   : > { %v1701_v62 = vshll.u32 %v1485_v27, 16  ;;  %v1732_v58 = vrot.slane %v1730_v45, 4  ;;  %v1733_v50 = vshll.u32 %v1489_v42, 16  ;;  %v7157_v26 = vunpack.c.l.bf16 %v8353_v14  ;;  %v2286_v9 = vld [vmem:[#allocation2 + $0x7c] sm:$0xf] }
  0xa8   : > { %7375 = vmatprep.mubr.msk.bf16.mxu1 %vm1216_vm7, %v6754_v18  ;;  %v2409_v25 = vsel %vm8087_vm13, %v8301_v12, %v2408_v48  ;;  %v1718_v10 = vsel %vm8114_vm2, %v1713_v56, %v1717_v21  ;;  %v1723_v29 = vrot.slane %v1722_v1, 4  ;;  %v1739_v20 = vshll.u32 %v1490_v53, 16  ;;  %v1493_v34 = vld [vmem:[#allocation2 + $0x7c] sm:$0xf]  ;;  %v2288_v61 = vld [vmem:[#allocation2 + $0x84] sm:$0xe] }
  0xa9   : > { %v1703_v23 = vrot.slane %v1701_v62, 5  ;;  %v6804_v63 = vcombine.low %v8325_v43, %v2409_v25  ;;  %v1735_v49 = vrot.slane %v1733_v50, 5  ;;  %v1743_v36 = vshrl.u32 %v1490_v53, 16  ;;  %v1495_v22 = vld [vmem:[#allocation2 + $0x84] sm:$0xf] }
  0xaa   : > { %v1728_v42 = vsel %vm8114_vm2, %v1723_v29, %v1727_v28  ;;  %v373_v12 = vsel %vm7782_vm6, 0, %v372_v54  ;;  %v7158_v30 = vunpack.c.h.bf16 %v8353_v14  ;;  %v8376_v44 = vrot.slane %v1739_v20, 5  ;;  %v1496_v53 = vld [vmem:[#allocation2 + $0x88] sm:$0xf]  ;;  %v378_v29 = vld [vmem:[#allocation2 + $0x98] sm:$0x1] }
  0xab   : > { %v1704_v38 = vsel %vm8114_vm2, %v1699_v4, %v1703_v23  ;;  %7410 = vmatmul.mubr.msk.bf16.gmra.mxu0 %vm1216_vm7, %v6804_v63  ;;  %v6756_v43 = vcombine.low %v1718_v10, %v1728_v42  ;;  %v1051_v21 = vld [vmem:[#allocation2 + $0x74] sm:$0x1]  ;;  %v1736_v32 = vor.u32 %v1735_v49, %v1732_v58  ;;  %374 = vst [vmem:[#allocation2 + $0x80] sm:$0x1] %v373_v12  ;;  %v2289_v4 = vld [vmem:[#allocation2 + $0x88] sm:$0xf] }
  0xac   : > { %v6755_v11 = vcombine.low %v1694_v55, %v1704_v38  ;;  %7413 = vmatprep.mubr.msk.bf16.mxu0 %vm1216_vm7, %v6805_v47  ;;  %v1052_v18 = vsel %vm7772_vm4, %v820_v5, %v1051_v21  ;;  %v1745_v33 = vrot.slane %v1743_v36, 4  ;;  %v6790_v17 = vrot.slane %v2285_v0, 9  ;;  %v2292_v63 = vld [vmem:[#allocation2 + $0x94] sm:$0xf]  ;;  %v1498_v38 = vld [vmem:[#allocation2 + $0x90] sm:$0xf] }
  0xad   : > { %v1754_v39 = vshrl.u32 %v1492_v35, 16  ;;  %1053 = vst [vmem:[#allocation2 + $0x74] sm:$0x1] %v1052_v18  ;;  %v8386_v27 = vsel %vm8087_vm13, %v6789_v40, %v2419_v2  ;;  %v1757_v55 = vshll.u32 %v1492_v35, 16  ;;  %v1763_v28 = vshll.u32 %v1493_v34, 16 }
  0xae   : > { %7376 = vmatmul.mubr.msk.bf16.gmra.mxu1 %vm1216_vm7, %v6755_v11  ;;  %v1767_v45 = vshrl.u32 %v1493_v34, 16  ;;  %v2421_v46 = vrot.slane %v2419_v2, 4  ;;  %v1746_v47 = vor.u32 %v1745_v33, %v8376_v44  ;;  %v2426_v5 = vrot.slane %v2286_v9, 5  ;;  %v2291_v35 = vld [vmem:[#allocation2 + $0x90] sm:$0xe] }
  0xaf   : > { %7379 = vmatprep.mubr.msk.bf16.mxu1 %vm1216_vm7, %v6756_v43  ;;  %v1756_v54 = vrot.slane %v1754_v39, 4  ;;  %v8390_v48 = vrot.slane %v1736_v32, 4  ;;  %v1759_v62 = vrot.slane %v1757_v55, 5  ;;  %v8392_v56 = vrot.slane %v1763_v28, 5  ;;  %v8753_v15 = vld [vmem:[#allocation2 + $0x38] sm:$0x1] }
  0xb0   : > { %v1769_v1 = vrot.slane %v1767_v45, 4  ;;  %v8396_v40 = vsel %vm8087_vm13, %v6790_v17, %v2426_v5  ;;  %v376_v58 = vsel %vm7782_vm6, 0, %v375_v52  ;;  %v6791_v50 = vrot.slane %v2288_v61, 9 }
  0xb1   : > { %v2433_v2 = vrot.slane %v2289_v4, 5  ;;  %v1760_v0 = vor.u32 %v1759_v62, %v1756_v54  ;;  %377 = vst [vmem:[#allocation2 + $0x8c] sm:$0x1] %v376_v58  ;;  %v1778_v23 = vshrl.u32 %v1495_v22, 16  ;;  %v1781_v10 = vshll.u32 %v1495_v22, 16 }
  0xb2   : > { %v1770_v25 = vor.u32 %v1769_v1, %v8392_v56  ;;  %v1747_v49 = vrot.slane %v1746_v47, 4  ;;  %v1058_v20 = vld [vmem:[#allocation2 + $0x80] sm:$0x1]  ;;  %v8401_v36 = vrot.slane %v2426_v5, 4  ;;  %v1787_v9 = vshll.u32 %v1496_v53, 16 }
  0xb3   : > { %v1791_v34 = vshrl.u32 %v1496_v53, 16  ;;  %v1059_v42 = vsel %vm7772_vm4, %v837_v16, %v1058_v20  ;;  %v8407_v12 = vrot.slane %v1760_v0, 4  ;;  %v8409_v11 = vrot.slane %v2433_v2, 4  ;;  %v1499_v5 = vld [vmem:[#allocation2 + $0x94] sm:$0xf] }
  0xb4   : > { %v1780_v43 = vrot.slane %v1778_v23, 4  ;;  %v2284_v21 = vld [vmem:[#allocation2 + $0x74] sm:$0x1]  ;;  %v1742_v52 = vsel %vm8114_vm2, %v8390_v48, %v8376_v44  ;;  %1060 = vst [vmem:[#allocation2 + $0x80] sm:$0x1] %v1059_v42  ;;  %v8417_v61 = vsel %vm8087_vm13, %v6791_v50, %v2433_v2  ;;  %v1783_v8 = vrot.slane %v1781_v10, 5 }
  0xb5   : > { %v1491_v32 = vld [vmem:[#allocation2 + $0x74] sm:$0x1]  ;;  %v8419_v4 = vrot.slane %v1787_v9, 5  ;;  %v2422_v16 = vrot.slane %v2284_v21, 5  ;;  %v8421_v33 = vrot.slane %v1770_v25, 4  ;;  %v1793_v17 = vrot.slane %v1791_v34, 4 }
  0xb6   : > { %v1749_v18 = vshll.u32 %v1491_v32, 16  ;;  %v1784_v39 = vor.u32 %v1783_v8, %v1780_v43  ;;  %v379_v22 = vsel %vm7782_vm6, 0, %v378_v29  ;;  %v6792_v55 = vrot.slane %v2291_v35, 9  ;;  %v381_v48 = vld [vmem:[#allocation2 + $0xa4] sm:$0x1] }
  0xb7   : > { %v2440_v28 = vrot.slane %v2292_v63, 5  ;;  %v2423_v44 = vsel %vm8087_vm13, %v2421_v46, %v2422_v16  ;;  %v1794_v47 = vor.u32 %v1793_v17, %v8419_v4  ;;  %380 = vst [vmem:[#allocation2 + $0x98] sm:$0x1] %v379_v22  ;;  %v1802_v54 = vshrl.u32 %v1498_v38, 16  ;;  %v2294_v50 = vld [vmem:[#allocation2 + $0x9c] sm:$0xe] }
  0xb8   : > { %v1751_v45 = vrot.slane %v1749_v18, 5  ;;  %v6806_v62 = vcombine.low %v8386_v27, %v2423_v44  ;;  %v1065_v1 = vld [vmem:[#allocation2 + $0x8c] sm:$0x1]  ;;  %v8429_v53 = vrot.slane %v1784_v39, 4  ;;  %v7702_v2 = vld [vmem:[%s10105_s1] ss:$0 sm:$0xff]  ;;  %v1766_v41 = vsel %vm8114_vm2, %v8407_v12, %v8392_v56 }
  0xb9   : > { %v8431_v58 = vrot.slane %v2440_v28, 4  ;;  %v497_v46 = vmul.f32 %v7702_v2, %v7157_v26  ;;  %v1066_v27 = vsel %vm7772_vm4, %v854_v31, %v1065_v1  ;;  %v8444_v25 = vrot.slane %v1794_v47, 4  ;;  %v2295_v10 = vld [vmem:[#allocation2 + $0xa0] sm:$0xf]  ;;  %v1501_v29 = vld [vmem:[#allocation2 + $0x9c] sm:$0xf] }
  0xba   : > { %v1752_v0 = vsel %vm8114_vm2, %v1747_v49, %v1751_v45  ;;  %v1804_v23 = vrot.slane %v1802_v54, 4  ;;  %7414 = vmatmul.mubr.msk.bf16.gmra.mxu0 %vm1216_vm7, %v6806_v62  ;;  %1067 = vst [vmem:[#allocation2 + $0x8c] sm:$0x1] %v1066_v27  ;;  %v1805_v63 = vshll.u32 %v1498_v38, 16  ;;  %v1811_v20 = vshll.u32 %v1499_v5, 16 }
  0xbb   : > { %v6757_v35 = vcombine.low %v1742_v52, %v1752_v0  ;;  %v498_v26 = vmul.f32 %v7702_v2, %v7158_v30  ;;  %v2287_v49 = vld [vmem:[#allocation2 + $0x80] sm:$0x1]  ;;  %v8455_v31 = vsel %vm8087_vm13, %v6792_v55, %v2440_v28  ;;  %v1815_v34 = vshrl.u32 %v1499_v5, 16  ;;  %v2297_v47 = vld [vmem:[#allocation2 + $0xa8] sm:$0xe] }
  0xbc   : > { %v1494_v9 = vld [vmem:[#allocation2 + $0x80] sm:$0x1]  ;;  %v382_v42 = vsel %vm7782_vm6, 0, %v381_v48  ;;  %v2429_v38 = vrot.slane %v2287_v49, 5  ;;  %v1807_v30 = vrot.slane %v1805_v63, 5  ;;  %v8460_v43 = vrot.slane %v1811_v20, 5 }
  0xbd   : > { %7380 = vmatmul.mubr.msk.bf16.gmra.mxu1 %vm1216_vm7, %v6757_v35  ;;  %v1773_v14 = vshll.u32 %v1494_v9, 16  ;;  %383 = vst [vmem:[#allocation2 + $0xa4] sm:$0x1] %v382_v42  ;;  %v1817_v21 = vrot.slane %v1815_v34, 4  ;;  %v6793_v32 = vrot.slane %v2294_v50, 9  ;;  %v2447_v52 = vrot.slane %v2295_v10, 5 }
  0xbe   : > { %v1826_v56 = vshrl.u32 %v1501_v29, 16  ;;  %v2430_v12 = vsel %vm8087_vm13, %v8401_v36, %v2429_v38  ;;  %v1072_v16 = vld [vmem:[#allocation2 + $0x98] sm:$0x1]  ;;  %v1808_v18 = vor.u32 %v1807_v30, %v1804_v23  ;;  %v1829_v17 = vshll.u32 %v1501_v29, 16  ;;  %v1502_v44 = vld [vmem:[#allocation2 + $0xa0] sm:$0xf] }
  0xbf   : > { %v1775_v8 = vrot.slane %v1773_v14, 5  ;;  %v6807_v39 = vcombine.low %v8396_v40, %v2430_v12  ;;  %v1790_v22 = vsel %vm8114_vm2, %v8429_v53, %v8419_v4  ;;  %v1073_v55 = vsel %vm7772_vm4, %v871_v60, %v1072_v16  ;;  %v384_v40 = vld [vmem:[#allocation2 + $0xb0] sm:$0x1]  ;;  %v7703_v4 = vld [vmem:[%s10106_s2] ss:$0 sm:$0xff] }
  0xc0   : > { %v1818_v28 = vor.u32 %v1817_v21, %v8460_v43  ;;  %1074 = vst [vmem:[#allocation2 + $0x98] sm:$0x1] %v1073_v55  ;;  %v1828_v45 = vrot.slane %v1826_v56, 4  ;;  %v8481_v5 = vadd.f32 %v7703_v4, %v497_v46  ;;  %v8483_v13 = vadd.f32 %v7703_v4, %v498_v26  ;;  %v1504_v53 = vld [vmem:[#allocation2 + $0xa8] sm:$0xf] }
  0xc1   : > { %v1776_v36 = vsel %vm8114_vm2, %v8421_v33, %v1775_v8  ;;  %7417 = vmatprep.mubr.msk.bf16.mxu0 %vm1216_vm7, %v6807_v39  ;;  %v2290_v54 = vld [vmem:[#allocation2 + $0x8c] sm:$0x1]  ;;  %v8486_v62 = vrot.slane %v1808_v18, 4  ;;  %v8490_v33 = vsel %vm8087_vm13, %v6793_v32, %v2447_v52  ;;  %v1831_v1 = vrot.slane %v1829_v17, 5  ;;  %v387_v30 = vld [vmem:[#allocation2 + $0xbc] sm:$0x1] }
  0xc2   : > { %v6758_v60 = vcombine.low %v1766_v41, %v1776_v36  ;;  %v1497_v48 = vld [vmem:[#allocation2 + $0x8c] sm:$0x1]  ;;  %v2436_v50 = vrot.slane %v2290_v54, 5  ;;  %v8492_v0 = vrot.slane %v2447_v52, 4  ;;  %v1835_v46 = vshll.u32 %v1502_v44, 16 }
  0xc3   : > { %v1797_v2 = vshll.u32 %v1497_v48, 16  ;;  %v8494_v27 = vld [vmem:[#allocation2 + $0xac] sm:$0xf]  ;;  %v1819_v10 = vrot.slane %v1818_v28, 4  ;;  %v1832_v35 = vor.u32 %v1831_v1, %v1828_v45  ;;  %v1839_v63 = vshrl.u32 %v1502_v44, 16 }
  0xc4   : > { %v1505_v23 = vld [vmem:[#allocation2 + $0xac] sm:$0xf]  ;;  %7383 = vmatprep.mubr.msk.bf16.mxu1 %vm1216_vm7, %v6758_v60  ;;  %v1079_v29 = vld [vmem:[#allocation2 + $0xa4] sm:$0x1]  ;;  %v385_v20 = vsel %vm7782_vm6, 0, %v384_v40  ;;  %v2437_v26 = vsel %vm8087_vm13, %v8409_v11, %v2436_v50  ;;  %v8506_v41 = vrot.slane %v1835_v46, 5  ;;  %v1814_v8 = vsel %vm8114_vm2, %v8486_v62, %v8460_v43 }
  0xc5   : > { %v1799_v49 = vrot.slane %v1797_v2, 5  ;;  %v1080_v9 = vsel %vm7772_vm4, %v888_v24, %v1079_v29  ;;  %386 = vst [vmem:[#allocation2 + $0xb0] sm:$0x1] %v385_v20  ;;  %v6808_v34 = vcombine.low %v8417_v61, %v2437_v26  ;;  %v8509_v42 = vrot.slane %v1832_v35, 4  ;;  %v2300_v21 = vld [vmem:[#allocation2 + $0xb4] sm:$0xe] }
  0xc6   : > { %1081 = vst [vmem:[#allocation2 + $0xa4] sm:$0x1] %v1080_v9  ;;  %v1841_v38 = vrot.slane %v1839_v63, 4  ;;  %v6794_v14 = vrot.slane %v2297_v47, 9  ;;  %v1850_v59 = vshrl.u32 %v1504_v53, 16  ;;  %v1853_v32 = vshll.u32 %v1504_v53, 16 }
  0xc7   : > { %v1800_v11 = vsel %vm8114_vm2, %v8444_v25, %v1799_v49  ;;  %v1859_v52 = vshll.u32 %v1505_v23, 16  ;;  %v2301_v24 = vld [vmem:[#allocation2 + $0xb8] sm:$0xf]  ;;  %7418 = vmatmul.mubr.msk.bf16.gmra.mxu0 %vm1216_vm7, %v6808_v34  ;;  %v1838_v16 = vsel %vm8114_vm2, %v8509_v42, %v8506_v41  ;;  %v2454_v25 = vrot.slane %v8494_v27, 5  ;;  %v3246_v29 = vld [vmem:[#allocation2 + $0xc] sm:$0xf] }
  0xc8   : > { %v6759_v56 = vcombine.low %v1790_v22, %v1800_v11  ;;  %v2293_v12 = vld [vmem:[#allocation2 + $0x98] sm:$0x1]  ;;  %v1842_v39 = vor.u32 %v1841_v38, %v8506_v41  ;;  %v1852_v55 = vrot.slane %v1850_v59, 4  ;;  %v1507_v22 = vld [vmem:[#allocation2 + $0xb4] sm:$0xf]  ;;  %v1855_v43 = vrot.slane %v1853_v32, 5 }
  0xc9   : > { %v1500_v61 = vld [vmem:[#allocation2 + $0x98] sm:$0x1]  ;;  %v2443_v18 = vrot.slane %v2293_v12, 5  ;;  %v8528_v28 = vsel %vm8087_vm13, %v6794_v14, %v2454_v25  ;;  %v8530_v44 = vrot.slane %v1859_v52, 5  ;;  %v1863_v36 = vshrl.u32 %v1505_v23, 16 }
  0xca   : > { %v1821_v17 = vshll.u32 %v1500_v61, 16  ;;  %7384 = vmatmul.mubr.msk.bf16.gmra.mxu1 %vm1216_vm7, %v6759_v56  ;;  %v388_v47 = vsel %vm7782_vm6, 0, %v387_v30  ;;  %v6795_v4 = vrot.slane %v2300_v21, 9  ;;  %v1856_v48 = vor.u32 %v1855_v43, %v1852_v55  ;;  %v1508_v26 = vld [vmem:[#allocation2 + $0xb8] sm:$0xf] }
  0xcb   : > { %v2444_v45 = vsel %vm8087_vm13, %v8431_v58, %v2443_v18  ;;  %v1865_v62 = vrot.slane %v1863_v36, 4  ;;  %389 = vst [vmem:[#allocation2 + $0xbc] sm:$0x1] %v388_v47  ;;  %v2461_v1 = vrot.slane %v2301_v24, 5  ;;  %v10125_v46 = vrot.slane %v8082_v37, 4 }
  0xcc   : > { %v1823_v40 = vrot.slane %v1821_v17, 5  ;;  %v6809_v60 = vcombine.low %v8455_v31, %v2444_v45  ;;  %v1086_v54 = vld [vmem:[#allocation2 + $0xb0] sm:$0x1]  ;;  %v1874_v27 = vshrl.u32 %v1507_v22, 16  ;;  %v1877_v23 = vshll.u32 %v1507_v22, 16 }
  0xcd   : > { %v2296_v50 = vld [vmem:[#allocation2 + $0xa4] sm:$0x1]  ;;  %v1087_v58 = vsel %vm7772_vm4, %v10125_v46, %v1086_v54  ;;  %v1843_v63 = vrot.slane %v1842_v39, 4  ;;  %v2456_v49 = vrot.slane %v2454_v25, 4  ;;  %v1866_v9 = vor.u32 %v1865_v62, %v8530_v44  ;;  %v3247_v37 = vld [vmem:[#allocation2 + $0x10] sm:$0xf] }
  0xce   : > { %v1824_v53 = vsel %vm8114_vm2, %v1819_v10, %v1823_v40  ;;  %v1503_v2 = vld [vmem:[#allocation2 + $0xa4] sm:$0x1]  ;;  %7421 = vmatprep.mubr.msk.bf16.mxu0 %vm1216_vm7, %v6809_v60  ;;  %v2450_v35 = vrot.slane %v2296_v50, 5  ;;  %1088 = vst [vmem:[#allocation2 + $0xb0] sm:$0x1] %v1087_v58  ;;  %v1857_v10 = vrot.slane %v1856_v48, 4  ;;  %v8552_v38 = vsel %vm8087_vm13, %v6795_v4, %v2461_v1 }
  0xcf   : > { %v6760_v31 = vcombine.low %v1814_v8, %v1824_v53  ;;  %v1845_v20 = vshll.u32 %v1503_v2, 16  ;;  %v1876_v41 = vrot.slane %v1874_v27, 4  ;;  %v1879_v14 = vrot.slane %v1877_v23, 5  ;;  %v3248_v24 = vld [vmem:[#allocation2 + $0x14] sm:$0x1] }
  0xd0   : > { %v2451_v34 = vsel %vm8087_vm13, %v8492_v0, %v2450_v35  ;;  %v8555_v21 = vrot.slane %v2461_v1, 4  ;;  %v1883_v11 = vshll.u32 %v1508_v26, 16  ;;  %v1887_v59 = vshrl.u32 %v1508_v26, 16  ;;  %v3249_v0 = vld [vmem:[#allocation2 + $0x18] sm:$0xf] }
  0xd1   : > { %7387 = vmatprep.mubr.msk.bf16.mxu1 %vm1216_vm7, %v6760_v31  ;;  %v1847_v42 = vrot.slane %v1845_v20, 5  ;;  %v6810_v30 = vcombine.low %v8490_v33, %v2451_v34  ;;  %v1880_v52 = vor.u32 %v1879_v14, %v1876_v41  ;;  %v3295_v56 = vshrl.u32 %v3246_v29, 16  ;;  %v3250_v50 = vld [vmem:[#allocation2 + $0x1c] sm:$0xf]  ;;  %v3251_v27 = vld [vmem:[#allocation2 + $0x20] sm:$0x1] }
  0xd2   : > { %v3298_v12 = vshll.u32 %v3246_v29, 16  ;;  %v1093_v8 = vld [vmem:[#allocation2 + $0xbc] sm:$0x1]  ;;  %v8560_v25 = vrot.slane %v1883_v11, 5  ;;  %v1889_v18 = vrot.slane %v1887_v59, 4  ;;  %v3304_v33 = vshll.u32 %v3247_v37, 16 }
  0xd3   : > { %v1848_v32 = vsel %vm8114_vm2, %v1843_v63, %v1847_v42  ;;  %7422 = vmatmul.mubr.msk.bf16.gmra.mxu0 %vm1216_vm7, %v6810_v30  ;;  %v1867_v17 = vrot.slane %v1866_v9, 4  ;;  %v10126_v39 = vrot.slane %v8098_v6, 4  ;;  %v3297_v22 = vrot.slane %v3295_v56, 4  ;;  %v3252_v42 = vld [vmem:[#allocation2 + $0x24] sm:$0xf] }
  0xd4   : > { %v6761_v61 = vcombine.low %v1838_v16, %v1848_v32  ;;  %v3300_v43 = vrot.slane %v3298_v12, 5  ;;  %v1862_v16 = vsel %vm8114_vm2, %v1857_v10, %v8530_v44  ;;  %v1890_v40 = vor.u32 %v1889_v18, %v8560_v25  ;;  %v7704_v32 = vld [vmem:[%s10107_s3 + $0xa] sm:$0x3] }
  0xd5   : > { %v1094_v55 = vsel %vm7772_vm4, %v10126_v39, %v1093_v8  ;;  %v2299_v36 = vld [vmem:[#allocation2 + $0xb0] sm:$0x1]  ;;  %v3306_v47 = vrot.slane %v3304_v33, 5  ;;  %v3308_v4 = vshrl.u32 %v3247_v37, 16  ;;  %v8571_v54 = vrot.slane %v1880_v52, 4 }
  0xd6   : > { %7388 = vmatmul.mubr.msk.bf16.gmra.mxu1 %vm1216_vm7, %v6761_v61  ;;  %v1506_v45 = vld [vmem:[#allocation2 + $0xb0] sm:$0x1]  ;;  %1095 = vst [vmem:[#allocation2 + $0xbc] sm:$0x1] %v1094_v55  ;;  %v2457_v60 = vrot.slane %v2299_v36, 5  ;;  %v3301_v48 = vor.u32 %v3300_v43, %v3297_v22  ;;  %v1891_v62 = vrot.slane %v1890_v40, 4 }
  0xd7   : > { %v1869_v6 = vshll.u32 %v1506_v45, 16  ;;  %v3310_v1 = vrot.slane %v3308_v4, 4  ;;  %v3314_v53 = vshll.u32 %v3248_v24, 16  ;;  %v3319_v2 = vshrl.u32 %v3249_v0, 16  ;;  %v3253_v61 = vld [vmem:[#allocation2 + $0x28] sm:$0xf] }
  0xd8   : > { %v2458_v46 = vsel %vm8087_vm13, %v2456_v49, %v2457_v60  ;;  %v3302_v44 = vrot.slane %v3301_v48, 4  ;;  %v3322_v23 = vshll.u32 %v3249_v0, 16  ;;  %v3328_v9 = vshll.u32 %v3250_v50, 16  ;;  %v7705_v33 = vld [vmem:[%s10107_s3 + $0xc] sm:$0x3] }
  0xd9   : > { %v1871_v58 = vrot.slane %v1869_v6, 5  ;;  %v6811_v29 = vcombine.low %v8528_v28, %v2458_v46  ;;  %v3311_v31 = vor.u32 %v3310_v1, %v3306_v47  ;;  %v3316_v35 = vrot.slane %v3314_v53, 5  ;;  %v3254_v39 = vld [vmem:[#allocation2 + $0x2c] sm:$0x1]  ;;  %v3255_v4 = vld [vmem:[#allocation2 + $0x30] sm:$0xf] }
  0xda   : > { %v3321_v63 = vrot.slane %v3319_v2, 4  ;;  %v3307_v26 = vsel %vm8114_vm2, %v3302_v44, %v3306_v47  ;;  %v3324_v10 = vrot.slane %v3322_v23, 5  ;;  %v3332_v37 = vshrl.u32 %v3250_v50, 16  ;;  %v3256_v60 = vld [vmem:[#allocation2 + $0x34] sm:$0xf] }
  0xdb   : > { %v1872_v20 = vsel %vm8114_vm2, %v1867_v17, %v1871_v58  ;;  %7425 = vmatprep.mubr.msk.bf16.mxu0 %vm1216_vm7, %v6811_v29  ;;  %v3312_v41 = vrot.slane %v3311_v31, 4  ;;  %v3338_v34 = vshll.u32 %v3251_v27, 16  ;;  %v1886_v30 = vsel %vm8114_vm2, %v8571_v54, %v8560_v25  ;;  %v7670_v54 = vld [vmem:[#allocation2 + $0xc] sm:$0xff]   ;;  %v3258_v50 = vld [vmem:[#allocation2 + $0x3c] sm:$0xf] }
  0xdc   : > { %v6762_v49 = vcombine.low %v1862_v16, %v1872_v20  ;;  %v3325_v11 = vor.u32 %v3324_v10, %v3321_v63  ;;  %v3330_v59 = vrot.slane %v3328_v9, 5  ;;  %v8589_v52 = vsel %vm1265_vm0, %v7704_v32, 0  ;;  %v3259_v20 = vld [vmem:[#allocation2 + $0x40] sm:$0xf] }
  0xdd   : > { %v2302_v14 = vld [vmem:[#allocation2 + $0xbc] sm:$0x1]  ;;  %v3317_v12 = vsel %vm8114_vm2, %v3312_v41, %v3316_v35  ;;  %v3334_v0 = vrot.slane %v3332_v37, 4  ;;  %v3340_v18 = vrot.slane %v3338_v34, 5  ;;  %v8598_v17 = vsel %vm1265_vm0, %v7705_v33, 0 }
  0xde   : > { %v1509_v28 = vld [vmem:[#allocation2 + $0xbc] sm:$0x1]  ;;  %7391 = vmatprep.mubr.msk.bf16.mxu1 %vm1216_vm7, %v6762_v49  ;;  %v2464_v24 = vrot.slane %v2302_v14, 5  ;;  %v6863_v8 = vcombine.low %v3307_v26, %v3317_v12  ;;  %v3326_v25 = vrot.slane %v3325_v11, 4  ;;  %v3343_v36 = vshrl.u32 %v3252_v42, 16 }
  0xdf   : > { %v1893_v56 = vshll.u32 %v1509_v28, 16  ;;  %v3335_v43 = vor.u32 %v3334_v0, %v3330_v59  ;;  %v3346_v40 = vshll.u32 %v3252_v42, 16  ;;  %v3352_v47 = vshll.u32 %v3253_v61, 16  ;;  %v3260_v41 = vld [vmem:[#allocation2 + $0x44] sm:$0x1]  ;;  %v7671_v28 = vld [vmem:[#allocation2 + $0x18] sm:$0xff]  }
  0xe0   : > { %v2465_v55 = vsel %vm8087_vm13, %v8555_v21, %v2464_v24  ;;  %v3331_v16 = vsel %vm8114_vm2, %v3326_v25, %v3330_v59  ;;  %v3345_v1 = vrot.slane %v3343_v36, 4  ;;  %v3356_v53 = vshrl.u32 %v3253_v61, 16  ;;  %v3257_v21 = vld [vmem:[#allocation2 + $0x38] sm:$0x1] }
  0xe1   : > { %v1895_v22 = vrot.slane %v1893_v56, 5  ;;  %v6812_v45 = vcombine.low %v8552_v38, %v2465_v55  ;;  %v3336_v48 = vrot.slane %v3335_v43, 4  ;;  %v3348_v38 = vrot.slane %v3346_v40, 5  ;;  %v7672_v56 = vld [vmem:[#allocation2 + $0x24] sm:$0xff]   ;;  %v3262_v55 = vld [vmem:[#allocation2 + $0x4c] sm:$0xf] }
  0xe2   : > { %v3354_v46 = vrot.slane %v3352_v47, 5  ;;  %v3362_v58 = vshll.u32 %v3254_v39, 16  ;;  %v3358_v27 = vrot.slane %v3356_v53, 4  ;;  %v3367_v23 = vshrl.u32 %v3255_v4, 16  ;;  %v3264_v40 = vld [vmem:[#allocation2 + $0x54] sm:$0xf] }
  0xe3   : > { %v1896_v6 = vsel %vm8114_vm2, %v1891_v62, %v1895_v22  ;;  %7426 = vmatmul.mubr.msk.bf16.gmra.mxu0 %vm1216_vm7, %v6812_v45  ;;  %v3341_v44 = vsel %vm8114_vm2, %v3336_v48, %v3340_v18  ;;  %v3370_v62 = vshll.u32 %v3255_v4, 16  ;;  %v3349_v31 = vor.u32 %v3348_v38, %v3345_v1  ;;  %v8621_v22 = vld [vmem:[%s10107_s3 + $0xe] sm:$0x3]  ;;  %v3263_v53 = vld [vmem:[#allocation2 + $0x50] sm:$0x1] }
  0xe4   : > { %v6763_v2 = vcombine.low %v1886_v30, %v1896_v6  ;;  %7465 = vmatprep.mubr.msk.bf16.mxu0 %vm1216_vm7, %v6863_v8  ;;  %v6864_v29 = vcombine.low %v3331_v16, %v3341_v44  ;;  %v3364_v35 = vrot.slane %v3362_v58, 5  ;;  %v3376_v63 = vshll.u32 %v3256_v60, 16  ;;  %v3261_v8 = vld [vmem:[#allocation2 + $0x48] sm:$0xf]  ;;  %v3265_v58 = vld [vmem:[#allocation2 + $0x58] sm:$0xf] }
  0xe5   : > { %v3359_v26 = vor.u32 %v3358_v27, %v3354_v46  ;;  %v3369_v10 = vrot.slane %v3367_v23, 4  ;;  %v3372_v9 = vrot.slane %v3370_v62, 5  ;;  %v3380_v49 = vshrl.u32 %v3256_v60, 16 }
  0xe6   : > { %7392 = vmatmul.mubr.msk.bf16.gmra.mxu1 %vm1216_vm7, %v6763_v2  ;;  %v3350_v37 = vrot.slane %v3349_v31, 4  ;;  %v3378_v34 = vrot.slane %v3376_v63, 5  ;;  %v3386_v42 = vshll.u32 %v3257_v21, 16  ;;  %v3391_v14 = vshrl.u32 %v3258_v50, 16  ;;  %v3267_v63 = vld [vmem:[#allocation2 + $0x60] sm:$0xf] }
  0xe7   : > { %7431 = vmatprep.mubr.msk.bf16.mxu1 %vm1216_vm7, %v7670_v54  ;;  %v3360_v30 = vrot.slane %v3359_v26, 4  ;;  %v3373_v11 = vor.u32 %v3372_v9, %v3369_v10  ;;  %v3382_v59 = vrot.slane %v3380_v49, 4  ;;  %v3394_v32 = vshll.u32 %v3258_v50, 16  ;;  %v8630_v54 = vld [vmem:[%s10107_s3 + $0x10] sm:$0x3] }
  0xe8   : > { %v3355_v24 = vsel %vm8114_vm2, %v3350_v37, %v3354_v46  ;;  %v3388_v12 = vrot.slane %v3386_v42, 5  ;;  %v3393_v0 = vrot.slane %v3391_v14, 4  ;;  %v3400_v61 = vshll.u32 %v3259_v20, 16  ;;  %v3266_v9 = vld [vmem:[#allocation2 + $0x5c] sm:$0x1] }
  0xe9   : > { %v3365_v25 = vsel %vm8114_vm2, %v3360_v30, %v3364_v35  ;;  %v3374_v18 = vrot.slane %v3373_v11, 4  ;;  %v3383_v33 = vor.u32 %v3382_v59, %v3378_v34  ;;  %v3396_v39 = vrot.slane %v3394_v32, 5  ;;  %v7674_v37 = vld [vmem:[#allocation2 + $0x3c] sm:$0xff]   ;;  %v3268_v30 = vld [vmem:[#allocation2 + $0x64] sm:$0xf] }
  0xea   : > { %v6865_v43 = vcombine.low %v3355_v24, %v3365_v25  ;;  %v3402_v36 = vrot.slane %v3400_v61, 5  ;;  %v3404_v45 = vshrl.u32 %v3259_v20, 16  ;;  %v3410_v16 = vshll.u32 %v3260_v41, 16  ;;  %v7673_v20 = vld [vmem:[#allocation2 + $0x30] sm:$0xff]  }
  0xeb   : > { %7466 = vmatmul.mubr.msk.bf16.vlgmr.msra.gmra.mxu0 %vm1216_vm7, %v6864_v29  ;;  %v3379_v47 = vsel %vm8114_vm2, %v3374_v18, %v3378_v34  ;;  %v3384_v4 = vrot.slane %v3383_v33, 4  ;;  %v3397_v60 = vor.u32 %v3396_v39, %v3393_v0  ;;  %v3415_v6 = vshrl.u32 %v3261_v8, 16  ;;  %v3269_v18 = vld [vmem:[#allocation2 + $0x68] sm:$0x1] }
  0xec   : > { %7532 = vmatpush3.bf16.msra.mxu0 %v8598_v17  ;;  %7469 = vmatprep.mubr.msk.bf16.mxu0 %vm1216_vm7, %v6865_v43  ;;  %v3406_v48 = vrot.slane %v3404_v45, 4  ;;  %v3412_v1 = vrot.slane %v3410_v16, 5  ;;  %v3418_v21 = vshll.u32 %v3261_v8, 16  ;;  %v3424_v17 = vshll.u32 %v3262_v55, 16  ;;  %v3270_v16 = vld [vmem:[#allocation2 + $0x6c] sm:$0xf] }
  0xed   : > { %v3389_v50 = vsel %vm8114_vm2, %v3384_v4, %v3388_v12  ;;  %v3398_v2 = vrot.slane %v3397_v60, 4  ;;  %v3417_v38 = vrot.slane %v3415_v6, 4  ;;  %v3428_v46 = vshrl.u32 %v3262_v55, 16  ;;  %7644 = vmatprep.subr.msk.bf16.mxu0 %vm1265_vm0, %v8630_v54  ;;  %v3271_v6 = vld [vmem:[#allocation2 + $0x70] sm:$0xf] }
  0xee   : > { %7432 = vmatmul.mubr.msk.bf16.vlgmr.msra.gmra.mxu1 %vm1216_vm7, %v7671_v28  ;;  %v6866_v44 = vcombine.low %v3379_v47, %v3389_v50  ;;  %v3407_v27 = vor.u32 %v3406_v48, %v3402_v36  ;;  %v3420_v23 = vrot.slane %v3418_v21, 5  ;;  %v3426_v62 = vrot.slane %v3424_v17, 5  ;;  %v7675_v17 = vld [vmem:[#allocation2 + $0x48] sm:$0xff]  }
  0xef   : > { %7498 = vmatpush3.bf16.msra.mxu1 %v8589_v52  ;;  %7435 = vmatprep.mubr.msk.bf16.mxu1 %vm1216_vm7, %v7672_v56  ;;  %v3403_v52 = vsel %vm8114_vm2, %v3398_v2, %v3402_v36  ;;  %v3430_v29 = vrot.slane %v3428_v46, 4  ;;  %v3434_v31 = vshll.u32 %v3263_v53, 16  ;;  %v3439_v35 = vshrl.u32 %v3264_v40, 16 }
  0xf0   : > { %7643 = vmatprep.subr.msk.bf16.mxu1 %vm1265_vm0, %v8621_v22  ;;  %v3408_v26 = vrot.slane %v3407_v27, 4  ;;  %v3421_v10 = vor.u32 %v3420_v23, %v3417_v38  ;;  %v3442_v49 = vshll.u32 %v3264_v40, 16  ;;  %v3448_v41 = vshll.u32 %v3265_v58, 16  ;;  %v3272_v38 = vld [vmem:[#allocation2 + $0x74] sm:$0x1] }
  0xf1   : > { %v3431_v34 = vor.u32 %v3430_v29, %v3426_v62  ;;  %v3436_v42 = vrot.slane %v3434_v31, 5  ;;  %v3441_v14 = vrot.slane %v3439_v35, 4  ;;  %v3452_v28 = vshrl.u32 %v3265_v58, 16  ;;  %v7676_v27 = vld [vmem:[#allocation2 + $0x54] sm:$0xff]  }
  0xf2   : > { %v3413_v11 = vsel %vm8114_vm2, %v3408_v26, %v3412_v1  ;;  %v3422_v59 = vrot.slane %v3421_v10, 4  ;;  %v3444_v32 = vrot.slane %v3442_v49, 5  ;;  %v3450_v24 = vrot.slane %v3448_v41, 5  ;;  %v3273_v29 = vld [vmem:[#allocation2 + $0x78] sm:$0xf] }
  0xf3   : > { %7470 = vmatmul.mubr.msk.bf16.gmra.mxu0 %vm1216_vm7, %v6866_v44  ;;  %v6867_v56 = vcombine.low %v3403_v52, %v3413_v11  ;;  %v3432_v12 = vrot.slane %v3431_v34, 4  ;;  %v3454_v0 = vrot.slane %v3452_v28, 4  ;;  %v3458_v61 = vshll.u32 %v3266_v9, 16  ;;  %v3274_v26 = vld [vmem:[#allocation2 + $0x7c] sm:$0xf] }
  0xf4   : > { %v3427_v8 = vsel %vm8114_vm2, %v3422_v59, %v3426_v62  ;;  %v3445_v25 = vor.u32 %v3444_v32, %v3441_v14  ;;  %v3463_v33 = vshrl.u32 %v3267_v63, 16  ;;  %v3466_v39 = vshll.u32 %v3267_v63, 16 }
  0xf5   : > { %7473 = vmatprep.mubr.msk.bf16.mxu0 %vm1216_vm7, %v6867_v56  ;;  %v3437_v55 = vsel %vm8114_vm2, %v3432_v12, %v3436_v42  ;;  %v3455_v43 = vor.u32 %v3454_v0, %v3450_v24  ;;  %v3460_v36 = vrot.slane %v3458_v61, 5  ;;  %v3472_v45 = vshll.u32 %v3268_v30, 16  ;;  %v3275_v42 = vld [vmem:[#allocation2 + $0x80] sm:$0x1]  ;;  %v3276_v61 = vld [vmem:[#allocation2 + $0x84] sm:$0xf] }
  0xf6   : > { %7436 = vmatmul.mubr.msk.bf16.gmra.mxu1 %vm1216_vm7, %v7673_v20  ;;  %v6868_v40 = vcombine.low %v3427_v8, %v3437_v55  ;;  %v3446_v47 = vrot.slane %v3445_v25, 4  ;;  %v3465_v4 = vrot.slane %v3463_v33, 4  ;;  %v3468_v60 = vrot.slane %v3466_v39, 5  ;;  %v3277_v39 = vld [vmem:[#allocation2 + $0x88] sm:$0xf] }
  0xf7   : > { %7439 = vmatprep.mubr.msk.bf16.mxu1 %vm1216_vm7, %v7674_v37  ;;  %v3456_v48 = vrot.slane %v3455_v43, 4  ;;  %v3474_v1 = vrot.slane %v3472_v45, 5  ;;  %v3476_v53 = vshrl.u32 %v3268_v30, 16  ;;  %v3482_v21 = vshll.u32 %v3269_v18, 16  ;;  %v7677_v43 = vld [vmem:[#allocation2 + $0x60] sm:$0xff]  }
  0xf8   : > { %v3451_v50 = vsel %vm8114_vm2, %v3446_v47, %v3450_v24  ;;  %v3469_v2 = vor.u32 %v3468_v60, %v3465_v4  ;;  %v3487_v46 = vshrl.u32 %v3270_v16, 16  ;;  %v3490_v58 = vshll.u32 %v3270_v16, 16  ;;  %v7678_v4 = vld [vmem:[#allocation2 + $0x6c] sm:$0xff]  }
  0xf9   : > { %v3461_v44 = vsel %vm8114_vm2, %v3456_v48, %v3460_v36  ;;  %v3478_v23 = vrot.slane %v3476_v53, 4  ;;  %v3484_v62 = vrot.slane %v3482_v21, 5  ;;  %v3496_v52 = vshll.u32 %v3271_v6, 16 }
  0xfa   : > { %v6869_v31 = vcombine.low %v3451_v50, %v3461_v44  ;;  %v3470_v35 = vrot.slane %v3469_v2, 4  ;;  %v3489_v63 = vrot.slane %v3487_v46, 4  ;;  %v3492_v20 = vrot.slane %v3490_v58, 5  ;;  %v3279_v50 = vld [vmem:[#allocation2 + $0x90] sm:$0xf] }
  0xfb   : > { %7474 = vmatmul.mubr.msk.bf16.gmra.mxu0 %vm1216_vm7, %v6868_v40  ;;  %v3479_v10 = vor.u32 %v3478_v23, %v3474_v1  ;;  %v3498_v9 = vrot.slane %v3496_v52, 5  ;;  %v3500_v49 = vshrl.u32 %v3271_v6, 16  ;;  %v3506_v41 = vshll.u32 %v3272_v38, 16  ;;  %v3278_v40 = vld [vmem:[#allocation2 + $0x8c] sm:$0x1] }
  0xfc   : > { %7477 = vmatprep.mubr.msk.bf16.mxu0 %vm1216_vm7, %v6869_v31  ;;  %v3475_v37 = vsel %vm8114_vm2, %v3470_v35, %v3474_v1  ;;  %v3493_v34 = vor.u32 %v3492_v20, %v3489_v63  ;;  %v3511_v14 = vshrl.u32 %v3273_v29, 16  ;;  %v3514_v28 = vshll.u32 %v3273_v29, 16  ;;  %v3280_v44 = vld [vmem:[#allocation2 + $0x94] sm:$0xf]  ;;  %v8674_v29 = vpop.f32.mrf.mxu0  ;;  %v3281_v20 = vld [vmem:[#allocation2 + $0x98] sm:$0x1] }
  0xfd   : > { %v3480_v30 = vrot.slane %v3479_v10, 4  ;;  %v3502_v11 = vrot.slane %v3500_v49, 4  ;;  %v3508_v59 = vrot.slane %v3506_v41, 5  ;;  %v3520_v32 = vshll.u32 %v3274_v26, 16 }
  0xfe   : > { %7440 = vmatmul.mubr.msk.bf16.gmra.mxu1 %vm1216_vm7, %v7675_v17  ;;  %v3494_v24 = vrot.slane %v3493_v34, 4  ;;  %v3513_v56 = vrot.slane %v3511_v14, 4  ;;  %v3516_v12 = vrot.slane %v3514_v28, 5  ;;  %v3524_v0 = vshrl.u32 %v3274_v26, 16 }
  0xff   : > { %7443 = vmatprep.mubr.msk.bf16.mxu1 %vm1216_vm7, %v7676_v27  ;;  %v3485_v8 = vsel %vm8114_vm2, %v3480_v30, %v3484_v62  ;;  %v3503_v25 = vor.u32 %v3502_v11, %v3498_v9  ;;  %v3522_v18 = vrot.slane %v3520_v32, 5  ;;  %v3530_v33 = vshll.u32 %v3275_v42, 16  ;;  %v3283_v30 = vld [vmem:[#allocation2 + $0xa0] sm:$0xf]  ;;  %v7679_v11 = vld [vmem:[#allocation2 + $0x78] sm:$0xff]  }
 0x100   : > { %v6870_v55 = vcombine.low %v3475_v37, %v3485_v8  ;;  %v3499_v36 = vsel %vm8114_vm2, %v3494_v24, %v3498_v9  ;;  %v3517_v45 = vor.u32 %v3516_v12, %v3513_v56  ;;  %v3526_v16 = vrot.slane %v3524_v0, 4  ;;  %v3282_v37 = vld [vmem:[#allocation2 + $0x9c] sm:$0xf]  ;;  %v8680_v12 = vpop.f32.mrf.mxu0  ;;  %v7680_v8 = vld [vmem:[#allocation2 + $0x84] sm:$0xff]  }
 0x101   : > { %v3504_v47 = vrot.slane %v3503_v25, 4  ;;  %v3532_v60 = vrot.slane %v3530_v33, 5  ;;  %v3535_v6 = vshrl.u32 %v3276_v61, 16  ;;  %v3538_v48 = vshll.u32 %v3276_v61, 16 }
 0x102   : > { %v3518_v1 = vrot.slane %v3517_v45, 4  ;;  %v3527_v53 = vor.u32 %v3526_v16, %v3522_v18  ;;  %v3544_v21 = vshll.u32 %v3277_v39, 16  ;;  %v3548_v17 = vshrl.u32 %v3277_v39, 16  ;;  %v3285_v45 = vld [vmem:[#allocation2 + $0xa8] sm:$0xf]  ;;  %v8685_v16 = vpop.f32.mrf.mxu1 }
 0x103   : > { %7478 = vmatmul.mubr.msk.bf16.gmra.mxu0 %vm1216_vm7, %v6870_v55  ;;  %v3509_v2 = vsel %vm8114_vm2, %v3504_v47, %v3508_v59  ;;  %v3537_v38 = vrot.slane %v3535_v6, 4  ;;  %v3540_v46 = vrot.slane %v3538_v48, 5  ;;  %v3554_v58 = vshll.u32 %v3278_v40, 16  ;;  %v3286_v6 = vld [vmem:[#allocation2 + $0xac] sm:$0xf] }
 0x104   : > { %v6871_v27 = vcombine.low %v3499_v36, %v3509_v2  ;;  %v3523_v23 = vsel %vm8114_vm2, %v3518_v1, %v3522_v18  ;;  %v3528_v62 = vrot.slane %v3527_v53, 4  ;;  %v3546_v52 = vrot.slane %v3544_v21, 5 }
 0x105   : > { %v3541_v31 = vor.u32 %v3540_v46, %v3537_v38  ;;  %v3550_v35 = vrot.slane %v3548_v17, 4  ;;  %v3556_v63 = vrot.slane %v3554_v58, 5  ;;  %v3559_v26 = vshrl.u32 %v3279_v50, 16  ;;  %v8690_v17 = vpop.f32.mrf.mxu0 }
 0x106   : > { %7444 = vmatmul.mubr.msk.bf16.gmra.mxu1 %vm1216_vm7, %v7677_v43  ;;  %7481 = vmatprep.mubr.msk.bf16.mxu0 %vm1216_vm7, %v6871_v27  ;;  %v3533_v10 = vsel %vm8114_vm2, %v3528_v62, %v3532_v60  ;;  %v3562_v9 = vshll.u32 %v3279_v50, 16  ;;  %v3568_v49 = vshll.u32 %v3280_v44, 16  ;;  %v3572_v41 = vshrl.u32 %v3280_v44, 16  ;;  %v3284_v43 = vld [vmem:[#allocation2 + $0xa4] sm:$0x1] }
 0x107   : > { %7447 = vmatprep.mubr.msk.bf16.mxu1 %vm1216_vm7, %v7678_v4  ;;  %v6872_v34 = vcombine.low %v3523_v23, %v3533_v10  ;;  %v3542_v42 = vrot.slane %v3541_v31, 4  ;;  %v3551_v14 = vor.u32 %v3550_v35, %v3546_v52  ;;  %v3561_v28 = vrot.slane %v3559_v26, 4  ;;  %v3287_v27 = vld [vmem:[#allocation2 + $0xb0] sm:$0x1]  ;;  %v8698_v31 = vpop.f32.mrf.mxu1  ;;  %v3289_v10 = vld [vmem:[#allocation2 + $0xb8] sm:$0xf] }
 0x108   : > { %v3564_v59 = vrot.slane %v3562_v9, 5  ;;  %v3570_v32 = vrot.slane %v3568_v49, 5  ;;  %v3574_v24 = vrot.slane %v3572_v41, 4  ;;  %v3578_v56 = vshll.u32 %v3281_v20, 16  ;;  %v7681_v9 = vld [vmem:[#allocation2 + $0x90] sm:$0xff]  }
 0x109   : > { %v3547_v0 = vsel %vm8114_vm2, %v3542_v42, %v3546_v52  ;;  %v3552_v61 = vrot.slane %v3551_v14, 4  ;;  %v3583_v25 = vshrl.u32 %v3282_v37, 16  ;;  %v3586_v18 = vshll.u32 %v3282_v37, 16  ;;  %v3288_v52 = vld [vmem:[#allocation2 + $0xb4] sm:$0xf]  ;;  %v8700_v42 = vpop.f32.mrf.mxu0 }
 0x10a   : > { %v3565_v33 = vor.u32 %v3564_v59, %v3561_v28  ;;  %v3575_v39 = vor.u32 %v3574_v24, %v3570_v32  ;;  %v3580_v55 = vrot.slane %v3578_v56, 5  ;;  %v3592_v36 = vshll.u32 %v3283_v30, 16 }
 0x10b   : > { %7482 = vmatmul.mubr.msk.bf16.gmra.mxu0 %vm1216_vm7, %v6872_v34  ;;  %v3557_v40 = vsel %vm8114_vm2, %v3552_v61, %v3556_v63  ;;  %v3585_v47 = vrot.slane %v3583_v25, 4  ;;  %v3588_v4 = vrot.slane %v3586_v18, 5  ;;  %v3596_v60 = vshrl.u32 %v3283_v30, 16  ;;  %v7682_v30 = vld [vmem:[#allocation2 + $0x9c] sm:$0xff]   ;;  %v8705_v25 = vpop.f32.mrf.mxu1 }
 0x10c   : > { %v6873_v48 = vcombine.low %v3547_v0, %v3557_v40  ;;  %v3566_v1 = vrot.slane %v3565_v33, 4  ;;  %v3576_v53 = vrot.slane %v3575_v39, 4  ;;  %v3594_v21 = vrot.slane %v3592_v36, 5  ;;  %v3290_v0 = vld [vmem:[#allocation2 + $0xbc] sm:$0x1] }
 0x10d   : > { %v3589_v50 = vor.u32 %v3588_v4, %v3585_v47  ;;  %v3598_v2 = vrot.slane %v3596_v60, 4  ;;  %v3602_v38 = vshll.u32 %v3284_v43, 16  ;;  %v3607_v46 = vshrl.u32 %v3285_v45, 16  ;;  %v390_v43 = vld [vmem:[#allocation2 + $0xc8] sm:$0x1]  ;;  %v8710_v4 = vpop.f32.mrf.mxu0 }
 0x10e   : > { %7448 = vmatmul.mubr.msk.bf16.gmra.mxu1 %vm1216_vm7, %v7679_v11  ;;  %7485 = vmatprep.mubr.msk.bf16.mxu0 %vm1216_vm7, %v6873_v48  ;;  %v3571_v58 = vsel %vm8114_vm2, %v3566_v1, %v3570_v32  ;;  %v3581_v44 = vsel %vm8114_vm2, %v3576_v53, %v3580_v55  ;;  %v3610_v23 = vshll.u32 %v3285_v45, 16  ;;  %v3616_v62 = vshll.u32 %v3286_v6, 16  ;;  %v334_v32 = vld [vmem:[#allocation2 + $0xc0] sm:$0x1] }
 0x10f   : > { %7451 = vmatprep.mubr.msk.bf16.mxu1 %vm1216_vm7, %v7680_v8  ;;  %v6874_v35 = vcombine.low %v3571_v58, %v3581_v44  ;;  %v3590_v63 = vrot.slane %v3589_v50, 4  ;;  %v3599_v20 = vor.u32 %v3598_v2, %v3594_v21  ;;  %v3604_v26 = vrot.slane %v3602_v38, 5  ;;  %v8720_v38 = vpop.f32.mrf.mxu1 }
 0x110   : > { %v3609_v49 = vrot.slane %v3607_v46, 4  ;;  %v3612_v41 = vrot.slane %v3610_v23, 5  ;;  %v3618_v37 = vrot.slane %v3616_v62, 5  ;;  %v3620_v34 = vshrl.u32 %v3286_v6, 16  ;;  %10127 = vst [vmem:[#allocation5_spill] sm:$0xff] %v8720_v38  ;;  %v7683_v62 = vld [vmem:[#allocation2 + $0xa8] sm:$0xff]  }
 0x111   : > { %v3595_v14 = vsel %vm8114_vm2, %v3590_v63, %v3594_v21  ;;  %v3600_v28 = vrot.slane %v3599_v20, 4  ;;  %v3626_v11 = vshll.u32 %v3287_v27, 16  ;;  %v3631_v59 = vshrl.u32 %v3288_v52, 16  ;;  %v5040_v38 = vld [vmem:[#allocation2 + $0x54] sm:$0xf] }
 0x112   : > { %v3613_v24 = vor.u32 %v3612_v41, %v3609_v49  ;;  %v3622_v56 = vrot.slane %v3620_v34, 4  ;;  %v3634_v61 = vshll.u32 %v3288_v52, 16  ;;  %v3640_v8 = vshll.u32 %v3289_v10, 16  ;;  %v4037_v41 = vld [vmem:[#allocation2 + $0x10] sm:$0xf] }
 0x113   : > { %7486 = vmatmul.mubr.msk.bf16.gmra.mxu0 %vm1216_vm7, %v6874_v35  ;;  %v3605_v18 = vsel %vm8114_vm2, %v3600_v28, %v3604_v26  ;;  %v3628_v33 = vrot.slane %v3626_v11, 5  ;;  %v3633_v39 = vrot.slane %v3631_v59, 4  ;;  %v3644_v55 = vshrl.u32 %v3289_v10, 16  ;;  %v8726_v35 = vpop.f32.mrf.mxu0  ;;  %v7684_v26 = vld [vmem:[#allocation2 + $0xb4] sm:$0xff]   ;;  %v4040_v28 = vld [vmem:[#allocation2 + $0x1c] sm:$0xf] }
 0x114   : > { %v6875_v36 = vcombine.low %v3595_v14, %v3605_v18  ;;  %v3614_v45 = vrot.slane %v3613_v24, 4  ;;  %v3623_v40 = vor.u32 %v3622_v56, %v3618_v37  ;;  %v3636_v47 = vrot.slane %v3634_v61, 5  ;;  %10128 = vst [vmem:[#allocation6_spill] sm:$0xff] %v8726_v35  ;;  %v4036_v59 = vld [vmem:[#allocation2 + $0xc] sm:$0xe] }
 0x115   : > { %v3642_v60 = vrot.slane %v3640_v8, 5  ;;  %v3646_v6 = vrot.slane %v3644_v55, 4  ;;  %v3650_v48 = vshll.u32 %v3290_v0, 16  ;;  %v335_v1 = vsel %vm7772_vm4, 0, %v334_v32  ;;  %v8736_v32 = vpop.f32.mrf.mxu0  ;;  %v4038_v0 = vld [vmem:[#allocation2 + $0x14] sm:$0x1] }
 0x116   : > { %7452 = vmatmul.mubr.msk.bf16.gmra.mxu1 %vm1216_vm7, %v7681_v9  ;;  %7489 = vmatprep.mubr.msk.bf16.mxu0 %vm1216_vm7, %v6875_v36  ;;  %v3619_v53 = vsel %vm8114_vm2, %v3614_v45, %v3618_v37  ;;  %v3624_v21 = vrot.slane %v3623_v40, 4  ;;  %v3637_v50 = vor.u32 %v3636_v47, %v3633_v39  ;;  %336 = vst [vmem:[#allocation2 + $0xc0] sm:$0x1] %v335_v1  ;;  %v391_v2 = vsel %vm7782_vm6, 0, %v390_v43  ;;  %v8730_v37 = vpop.f32.mrf.mxu1  ;;  %v4043_v8 = vld [vmem:[#allocation2 + $0x28] sm:$0xf] }
 0x117   : > { %7455 = vmatprep.mubr.msk.bf16.mxu1 %vm1216_vm7, %v7682_v30  ;;  %v3647_v46 = vor.u32 %v3646_v6, %v3642_v60  ;;  %v3652_v58 = vrot.slane %v3650_v48, 5  ;;  %392 = vst [vmem:[#allocation2 + $0xc8] sm:$0x1] %v391_v2  ;;  %v568_v44 = vmax.f32 %v8481_v5, 0.0  ;;  %v569_v27 = vmax.f32 %v8483_v13, 0.0  ;;  %10129 = vst [vmem:[#allocation7_spill] sm:$0xff] %v8730_v37 }
 0x118   : > { %v3629_v23 = vsel %vm8114_vm2, %v3624_v21, %v3628_v33  ;;  %v3638_v52 = vrot.slane %v3637_v50, 4  ;;  %10130 = vst [vmem:[#allocation8_spill] sm:$0xff] %v8736_v32  ;;  %v4134_v61 = vrot.slane %v4037_v41, 5  ;;  %v4141_v39 = vrot.slane %v4040_v28, 5  ;;  %v8740_v55 = vpop.f32.mrf.mxu1  ;;  %v4039_v47 = vld [vmem:[#allocation2 + $0x18] sm:$0xe] }
 0x119   : > { %v6876_v63 = vcombine.low %v3619_v53, %v3629_v23  ;;  %v3648_v20 = vrot.slane %v3647_v46, 4  ;;  %v7093_v10 = vpack.c.bf16 %v568_v44, %v568_v44  ;;  %v7094_v9 = vpack.c.bf16 %v569_v27, %v569_v27  ;;  %10131 = vst [vmem:[#allocation9_spill] sm:$0xff] %v8740_v55  ;;  %v4042_v48 = vld [vmem:[#allocation2 + $0x24] sm:$0xe]  ;;  %v8742_v53 = vpop.f32.mrf.mxu0  ;;  %v4046_v44 = vld [vmem:[#allocation2 + $0x34] sm:$0xf] }
 0x11a   : > { %v3643_v49 = vsel %vm8114_vm2, %v3638_v52, %v3642_v60  ;;  %v4041_v60 = vld [vmem:[#allocation2 + $0x20] sm:$0x1]  ;;  %v6895_v6 = vrot.slane %v4036_v59, 9  ;;  %v4148_v1 = vrot.slane %v4043_v8, 5  ;;  %10132 = vst [vmem:[#allocation10_spill] sm:$0xff] %v8742_v53  ;;  %v4136_v46 = vrot.slane %v4134_v61, 4  ;;  %v8751_v19 = vpop.f32.mrf.mxu1 }
 0x11b   : > { %7490 = vmatmul.mubr.msk.bf16.gmra.mxu0 %vm1216_vm7, %v6876_v63  ;;  %v3653_v5 = vsel %vm8114_vm2, %v3648_v20, %v3652_v58  ;;  %v924_v13 = vshrl.u32 %v7093_v10, 16  ;;  %v927_v34 = vshll.u32 %v7093_v10, 16  ;;  %v932_v14 = vshrl.u32 %v7094_v9, 16  ;;  %v4044_v58 = vld [vmem:[#allocation2 + $0x2c] sm:$0x1]  ;;  %10133 = vst [vmem:[#allocation11_spill] sm:$0xff] %v8751_v19 }
 0x11c   : > { %v6877_v30 = vcombine.low %v3643_v49, %v3653_v5  ;;  %v935_v11 = vshll.u32 %v7094_v9, 16  ;;  %v4137_v27 = vrot.slane %v4038_v0, 5  ;;  %v6896_v23 = vrot.slane %v4039_v47, 9  ;;  %v4045_v63 = vld [vmem:[#allocation2 + $0x30] sm:$0xe]  ;;  %v8755_v5 = vpop.f32.mrf.mxu0  ;;  %v7690_v55 = vld [vmem:[#allocation2 + $0x48] sm:$0xff]  }
 0x11d   : > { %v926_v24 = vrot.slane %v924_v13, 7  ;;  %v934_v56 = vrot.slane %v932_v14, 7  ;;  %v1096_v18 = vld [vmem:[#allocation2 + $0xc0] sm:$0xf]  ;;  %v4144_v52 = vrot.slane %v4041_v60, 5  ;;  %v6897_v20 = vrot.slane %v4042_v48, 9 }
 0x11e   : > { %7456 = vmatmul.mubr.msk.bf16.gmra.mxu1 %vm1216_vm7, %v7683_v62  ;;  %7493 = vmatprep.mubr.msk.bf16.mxu0 %vm1216_vm7, %v6877_v30  ;;  %v1100_v33 = vld [vmem:[#allocation2 + $0xc8] sm:$0x1]  ;;  %v4143_v62 = vrot.slane %v4141_v39, 4  ;;  %v4150_v10 = vrot.slane %v4148_v1, 4  ;;  %v4151_v9 = vrot.slane %v4044_v58, 5  ;;  %v4155_v49 = vrot.slane %v4046_v44, 5  ;;  %v8793_v60 = vpop.f32.mrf.mxu0 }
 0x11f   : > { %7459 = vmatprep.mubr.msk.bf16.mxu1 %vm1216_vm7, %v7684_v26  ;;  %v929_v43 = vor.u32 %v927_v34, %v926_v24  ;;  %v930_v36 = vrot.slane %v926_v24, 4  ;;  %v937_v45 = vor.u32 %v935_v11, %v934_v56  ;;  %v939_v40 = vrot.slane %v934_v56, 4  ;;  %v4048_v26 = vld [vmem:[#allocation2 + $0x3c] sm:$0xe]  ;;  %v4049_v41 = vld [vmem:[#allocation2 + $0x40] sm:$0xf]  ;;  %v8775_v56 = vpop.f32.mrf.mxu1 }
 0x120   : > { %10134 = vst [vmem:[#allocation12_spill] sm:$0xff] %v8755_v5  ;;  %v4135_v13 = vsel %vm8087_vm13, %v6895_v6, %v4134_v61  ;;  %v6898_v34 = vrot.slane %v4045_v63, 9  ;;  %v4050_v14 = vld [vmem:[#allocation2 + $0x44] sm:$0x1]  ;;  %v8759_v28 = vld [vmem:[#allocation2 + $0x4c] sm:$0xf]  ;;  %v4138_v30 = vsel %vm8087_vm13, %v4136_v46, %v4137_v27  ;;  %v8765_v11 = vsel %vm8087_vm13, %v6896_v23, %v4141_v39 }
 0x121   : > { %v938_v21 = vsel %vm7857_vm10, %v930_v36, %v937_v45  ;;  %v1097_v50 = vsel %vm7851_vm9, %v929_v43, %v1096_v18  ;;  %v1101_v2 = vsel %vm7772_vm4, %v939_v40, %v1100_v33  ;;  %v8769_v59 = vsel %vm8087_vm13, %v4143_v62, %v4144_v52  ;;  %10135 = vst [vmem:[#allocation13_spill] sm:$0xff] %v8775_v56  ;;  %v8782_v33 = vld [vmem:[#allocation2 + $0x58] sm:$0xf]  ;;  %v8788_v45 = vld [vmem:[#allocation2 + $0x50] sm:$0x1] }
 0x122   : > { %1098 = vst [vmem:[#allocation2 + $0xc0] sm:$0xf] %v1097_v50  ;;  %1099 = vst.msk [vmem:[#allocation2 + $0xc4] sm:$0xf] %vm274_vm1, %v938_v21  ;;  %v8773_v24 = vsel %vm1265_vm0, %v8621_v22, 0  ;;  %v8779_v0 = vsel %vm8087_vm13, %v6897_v20, %v4148_v1  ;;  %v4158_v61 = vrot.slane %v8753_v15, 5  ;;  %v8786_v39 = vsel %vm8087_vm13, %v4150_v10, %v4151_v9  ;;  %v8803_v52 = vpop.f32.mrf.mxu1 }
 0x123   : > { %1102 = vst [vmem:[#allocation2 + $0xc8] sm:$0x1] %v1101_v2  ;;  %v6899_v8 = vrot.slane %v4048_v26, 9  ;;  %v4162_v18 = vrot.slane %v4049_v41, 5  ;;  %v4157_v43 = vrot.slane %v4155_v49, 4  ;;  %v4165_v36 = vrot.slane %v4050_v14, 5  ;;  %v8808_v14 = vpop.f32.mrf.mxu0 }
 0x124   : > { %v4051_v22 = vld [vmem:[#allocation2 + $0x48] sm:$0xe]  ;;  %v4169_v40 = vrot.slane %v8759_v28, 5  ;;  %v8791_v47 = vld [vmem:[#allocation2 + $0x64] sm:$0xf]  ;;  %10136 = vst [vmem:[#allocation14_spill] sm:$0xff] %v8793_v60  ;;  %v6912_v21 = vcombine.low %v4135_v13, %v4138_v30  ;;  %v8799_v2 = vsel %vm8087_vm13, %v6898_v34, %v4155_v49 }
 0x125   : > { %v4054_v23 = vld [vmem:[#allocation2 + $0x54] sm:$0xe]  ;;  %v8801_v62 = vld [vmem:[#allocation2 + $0x70] sm:$0xf]  ;;  %10137 = vst [vmem:[#allocation15_spill] sm:$0xff] %v8803_v52  ;;  %v4164_v26 = vrot.slane %v4162_v18, 4  ;;  %v8813_v28 = vsel %vm8087_vm13, %v6899_v8, %v4162_v18  ;;  %v8831_v50 = vpop.f32.mrf.mxu0 }
 0x126   : > { %v4056_v10 = vld [vmem:[#allocation2 + $0x5c] sm:$0x1]  ;;  %v4176_v9 = vrot.slane %v8782_v33, 5  ;;  %10138 = vst [vmem:[#allocation16_spill] sm:$0xff] %v8808_v14  ;;  %v6900_v30 = vrot.slane %v4051_v22, 9  ;;  %v6901_v18 = vrot.slane %v4054_v23, 9 }
 0x127   : > { %v8826_v8 = vsel %vm8087_vm13, %v4164_v26, %v4165_v36  ;;  %v4060_v22 = vld [vmem:[#allocation2 + $0x6c] sm:$0xe]  ;;  %10140 = vst [vmem:[#allocation18_spill] sm:$0xff] %v8831_v50  ;;  %v4063_v23 = vld [vmem:[#allocation2 + $0x78] sm:$0xe] }
 0x128   : > { %v4065_v50 = vld [vmem:[#allocation2 + $0x80] sm:$0x1]  ;;  %v8925_v35 = vld [vmem:[#allocation2 + $0xb4] sm:$0xe]  ;;  %v5815_v56 = vld [vmem:[#allocation2 + $0x18] sm:$0xe] }
 0x129   : > { %v3291_v6 = vld [vmem:[#allocation2 + $0xc0] sm:$0xf]  ;;  %v3292_v48 = vld [vmem:[#allocation2 + $0xc4] sm:$0xf] }
 0x12a   : > { %v3293_v1 = vld [vmem:[#allocation2 + $0xc8] sm:$0x1]  ;;  %v3655_v46 = vshrl.u32 %v3291_v6, 16  ;;  %v3658_v58 = vshll.u32 %v3291_v6, 16  ;;  %v3664_v44 = vshll.u32 %v3292_v48, 16  ;;  %v3668_v27 = vshrl.u32 %v3292_v48, 16 }
 0x12b   : > { %v3674_v63 = vshll.u32 %v3293_v1, 16  ;;  %v7685_v20 = vld [vmem:[#allocation2 + $0xc0] sm:$0xff]   ;;  %v4172_v6 = vrot.slane %v8788_v45, 5  ;;  %v4183_v48 = vrot.slane %v8791_v47, 5  ;;  %v4190_v45 = vrot.slane %v8801_v62, 5 }
 0x12c   : > { %v3657_v49 = vrot.slane %v3655_v46, 4  ;;  %v3660_v41 = vrot.slane %v3658_v58, 5  ;;  %v3666_v13 = vrot.slane %v3664_v44, 5  ;;  %v3670_v34 = vrot.slane %v3668_v27, 4  ;;  %7460 = vmatmul.mubr.msk.bf16.gmra.mxu1 %vm1216_vm7, %v7685_v20  ;;  %v4057_v58 = vld [vmem:[#allocation2 + $0x60] sm:$0xe]  ;;  %v8818_v27 = vpop.f32.mrf.mxu1 }
 0x12d   : > { %v3676_v33 = vrot.slane %v3674_v63, 5  ;;  %7499 = vmatprep.mubr.msk.bf16.mxu1 %vm1216_vm7, %v6912_v21  ;;  %v4171_v46 = vrot.slane %v4169_v40, 4  ;;  %v4059_v44 = vld [vmem:[#allocation2 + $0x68] sm:$0x1]  ;;  %10139 = vst [vmem:[#allocation17_spill] sm:$0xff] %v8818_v27  ;;  %v8822_v20 = vsel %vm8087_vm13, %v4157_v43, %v4158_v61  ;;  %v8835_v61 = vsel %vm8087_vm13, %v6900_v30, %v4169_v40 }
 0x12e   : > { %v3661_v1 = vor.u32 %v3660_v41, %v3657_v49  ;;  %v3671_v15 = vor.u32 %v3670_v34, %v3666_v13  ;;  %v8829_v47 = vld [vmem:[#allocation2 + $0x7c] sm:$0xf]  ;;  %v4178_v49 = vrot.slane %v4176_v9, 4  ;;  %v4179_v41 = vrot.slane %v4056_v10, 5  ;;  %v4062_v34 = vld [vmem:[#allocation2 + $0x74] sm:$0x1]  ;;  %v8848_v30 = vpop.f32.mrf.mxu1 }
 0x12f   : > { %v6902_v43 = vrot.slane %v4057_v58, 9  ;;  %v4185_v36 = vrot.slane %v4183_v48, 4  ;;  %v4186_v26 = vrot.slane %v4059_v44, 5  ;;  %v8843_v10 = vsel %vm8087_vm13, %v4171_v46, %v4172_v6  ;;  %v8846_v40 = vld [vmem:[#allocation2 + $0x88] sm:$0xf]  ;;  %10141 = vst [vmem:[#allocation19_spill] sm:$0xff] %v8848_v30 }
 0x130   : > { %v3662_v21 = vrot.slane %v3661_v1, 4  ;;  %v3672_v63 = vrot.slane %v3671_v15, 4  ;;  %v7686_v15 = vld [vmem:[#allocation2 + $0x18] sm:$0xff]   ;;  %v4197_v14 = vrot.slane %v8829_v47, 5  ;;  %v6903_v44 = vrot.slane %v4060_v22, 9 }
 0x131   : > { %v4192_v60 = vrot.slane %v4190_v45, 4  ;;  %v4193_v5 = vrot.slane %v4062_v34, 5  ;;  %v8858_v46 = vsel %vm8087_vm13, %v6901_v18, %v4176_v9  ;;  %v8862_v47 = vsel %vm8087_vm13, %v4178_v49, %v4179_v41  ;;  %v4069_v22 = vld [vmem:[#allocation2 + $0x90] sm:$0xe]  ;;  %v4070_v34 = vld [vmem:[#allocation2 + $0x94] sm:$0xf] }
 0x132   : > { %v3667_v62 = vsel %vm8114_vm2, %v3662_v21, %v3666_v13  ;;  %v3677_v1 = vsel %vm8114_vm2, %v3672_v63, %v3676_v33  ;;  %v4066_v13 = vld [vmem:[#allocation2 + $0x84] sm:$0xe]  ;;  %v8852_v33 = vsel %vm1265_vm0, %v8630_v54, 0  ;;  %v8864_v21 = vld [vmem:[#allocation2 + $0x8c] sm:$0x1]  ;;  %v8866_v63 = vpop.f32.mrf.mxu0  ;;  %v10142_v54 = vcombine.low %v8765_v11, %v8769_v59 }
 0x133   : > { %v6878_v58 = vcombine.low %v3667_v62, %v3677_v1  ;;  %v8875_v9 = vsel %vm8087_vm13, %v6902_v43, %v4183_v48  ;;  %v8879_v18 = vsel %vm8087_vm13, %v4185_v36, %v4186_v26  ;;  %v6904_v49 = vrot.slane %v4063_v23, 9  ;;  %v4073_v62 = vld [vmem:[#allocation2 + $0xa0] sm:$0xf]  ;;  %v8888_v1 = vld [vmem:[#allocation2 + $0x98] sm:$0x1]  ;;  %v8890_v26 = vpop.f32.mrf.mxu1  ;;  %v7687_v23 = vld [vmem:[#allocation2 + $0x24] sm:$0xff]  }
 0x134   : > { %7500 = vmatmul.mubr.msk.bf16.vlgmr.msra.gmra.mxu1 %vm1216_vm7, %v10142_v54  ;;  %v4204_v41 = vrot.slane %v8846_v40, 5  ;;  %v4199_v48 = vrot.slane %v4197_v14, 4  ;;  %v4200_v43 = vrot.slane %v4065_v50, 5  ;;  %v4072_v36 = vld [vmem:[#allocation2 + $0x9c] sm:$0xe]  ;;  %10143 = vst [vmem:[#allocation20_spill] sm:$0xff] %v8890_v26  ;;  %v10144_v40 = vcombine.low %v8779_v0, %v8786_v39 }
 0x135   : > { %7494 = vmatmul.mubr.msk.bf16.gmra.mxu0 %vm1216_vm7, %v6878_v58  ;;  %7566 = vmatpush3.bf16.msra.mxu1 %v8773_v24  ;;  %v8898_v24 = vsel %vm8087_vm13, %v6903_v44, %v4190_v45  ;;  %v6905_v50 = vrot.slane %v4066_v13, 9  ;;  %v6906_v58 = vrot.slane %v4069_v22, 9  ;;  %v8904_v54 = vld [vmem:[#allocation2 + $0xa4] sm:$0x1]  ;;  %v8906_v59 = vld [vmem:[#allocation2 + $0xa8] sm:$0xe]  ;;  %v8918_v13 = vpop.f32.mrf.mxu0  ;;  %v8922_v6 = vsel %vm8087_vm13, %v6904_v49, %v4197_v14 }
 0x136   : > { %7533 = vmatprep.mubr.msk.bf16.mxu0 %vm1216_vm7, %v7686_v15  ;;  %7503 = vmatprep.mubr.msk.bf16.mxu1 %vm1216_vm7, %v10144_v40  ;;  %v8902_v15 = vsel %vm8087_vm13, %v4192_v60, %v4193_v5  ;;  %v8908_v11 = vld [vmem:[#allocation2 + $0xac] sm:$0xf]  ;;  %v4211_v45 = vrot.slane %v4070_v34, 5  ;;  %v4218_v44 = vrot.slane %v4073_v62, 5  ;;  %v8914_v40 = vld [vmem:[#allocation2 + $0xb0] sm:$0x1]  ;;  %v8931_v62 = vsel %vm8087_vm13, %v4199_v48, %v4200_v43 }
 0x137   : > { %v8916_v5 = vld [vmem:[#allocation2 + $0xb8] sm:$0xf]  ;;  %v337_v60 = vld [vmem:[#allocation2 + $0xcc] sm:$0x1]  ;;  %v7688_v22 = vld [vmem:[#allocation2 + $0x30] sm:$0xff]   ;;  %v4206_v53 = vrot.slane %v4204_v41, 4  ;;  %v10147_v3 = vcombine.low %v8799_v2, %v8822_v20 }
 0x138   : > { %v4207_v0 = vrot.slane %v8864_v21, 5  ;;  %v6907_v32 = vrot.slane %v4072_v36, 9  ;;  %v4214_v39 = vrot.slane %v8888_v1, 5  ;;  %v4225_v26 = vrot.slane %v8908_v11, 5  ;;  %v4080_v30 = vld [vmem:[#allocation2 + $0xbc] sm:$0x1] }
 0x139   : > { %v8935_v14 = vpop.f32.mrf.mxu1  ;;  %v4082_v49 = vld [vmem:[#allocation2 + $0xc4] sm:$0xf]  ;;  %v8939_v21 = vsel %vm8087_vm13, %v6905_v50, %v4204_v41  ;;  %v8943_v36 = vsel %vm8087_vm13, %v6906_v58, %v4211_v45  ;;  %v4232_v34 = vrot.slane %v8916_v5, 5  ;;  %v338_v48 = vsel %vm7772_vm4, 0, %v337_v60  ;;  %v8948_v43 = vld [vmem:[#allocation2 + $0x1c] sm:$0xf]  ;;  %v8954_v58 = vpop.f32.mrf.mxu0 }
 0x13a   : > { %10145 = vst [vmem:[#allocation21_spill] sm:$0xff] %v8935_v14  ;;  %v5025_v11 = vld [vmem:[#allocation2 + $0x18] sm:$0xf]  ;;  %v4213_v1 = vrot.slane %v4211_v45, 4  ;;  %v4220_v27 = vrot.slane %v4218_v44, 4  ;;  %v4221_v14 = vrot.slane %v8904_v54, 5  ;;  %v8963_v45 = vsel %vm8087_vm13, %v4206_v53, %v4207_v0 }
 0x13b   : > { %v6908_v52 = vrot.slane %v8906_v59, 9  ;;  %339 = vst [vmem:[#allocation2 + $0xcc] sm:$0x1] %v338_v48  ;;  %v4081_v41 = vld [vmem:[#allocation2 + $0xc0] sm:$0xe]  ;;  %v8952_v50 = vpop.f32.mrf.mxu1  ;;  %v8967_v59 = vsel %vm8087_vm13, %v6907_v32, %v4218_v44  ;;  %v4228_v54 = vrot.slane %v8914_v40, 5  ;;  %v10149_v32 = vcombine.low %v8813_v28, %v8826_v8 }
 0x13c   : > { %10146 = vst [vmem:[#allocation22_spill] sm:$0xff] %v8952_v50  ;;  %7504 = vmatmul.mubr.msk.bf16.gmra.mxu1 %vm1216_vm7, %v10147_v3  ;;  %v4083_v5 = vld [vmem:[#allocation2 + $0xc8] sm:$0x1]  ;;  %v4239_v60 = vrot.slane %v4082_v49, 5  ;;  %v5026_v48 = vld [vmem:[#allocation2 + $0x1c] sm:$0xf] }
 0x13d   : > { %7534 = vmatmul.mubr.msk.bf16.vlgmr.msra.gmra.mxu0 %vm1216_vm7, %v7687_v23  ;;  %v4227_v2 = vrot.slane %v4225_v26, 4  ;;  %v6909_v20 = vrot.slane %v8925_v35, 9  ;;  %v4235_v23 = vrot.slane %v4080_v30, 5  ;;  %v8973_v3 = vpop.f32.mrf.mxu1  ;;  %v5817_v53 = vld [vmem:[#allocation2 + $0x20] sm:$0x1]  ;;  %v5913_v0 = vrot.slane %v8948_v43, 5  ;;  %7507 = vmatprep.mubr.msk.bf16.mxu1 %vm1216_vm7, %v10149_v32  ;;  %v8988_v43 = vpop.f32.mrf.mxu0 }
 0x13e   : > { %7600 = vmatpush3.bf16.msra.mxu0 %v8852_v33  ;;  %7537 = vmatprep.mubr.msk.bf16.mxu0 %vm1216_vm7, %v7688_v22  ;;  %10148 = vst [vmem:[#allocation23_spill] sm:$0xff] %v8973_v3  ;;  %v4234_v44 = vrot.slane %v4232_v34, 4  ;;  %v6910_v40 = vrot.slane %v4081_v41, 9  ;;  %v5074_v49 = vshrl.u32 %v5025_v11, 16  ;;  %v5077_v33 = vshll.u32 %v5025_v11, 16  ;;  %v7689_v50 = vld [vmem:[#allocation2 + $0x3c] sm:$0xff]  }
 0x13f   : > { %v8982_v22 = vsel %vm8087_vm13, %v4213_v1, %v4214_v39  ;;  %v8986_v35 = vsel %vm8087_vm13, %v4220_v27, %v4221_v14  ;;  %v4242_v30 = vrot.slane %v4083_v5, 5  ;;  %v5083_v3 = vshll.u32 %v5026_v48, 16  ;;  %v8990_v28 = vld [vmem:[#allocation2 + $0x28] sm:$0xf]  ;;  %v8992_v32 = vpop.f32.mrf.mxu1  ;;  %v5028_v19 = vld [vmem:[#allocation2 + $0x24] sm:$0xf] }
 0x140   : > { %v4241_v8 = vrot.slane %v4239_v60, 4  ;;  %10150 = vst [vmem:[#allocation24_spill] sm:$0xff] %v8992_v32  ;;  %v7010_v41 = vrot.slane %v5815_v56, 9  ;;  %v5915_v11 = vrot.slane %v5913_v0, 4  ;;  %v5916_v7 = vrot.slane %v5817_v53, 5 }
 0x141   : > { %v8996_v39 = vsel %vm8087_vm13, %v6908_v52, %v4225_v26  ;;  %v5027_v27 = vld [vmem:[#allocation2 + $0x20] sm:$0x1]  ;;  %v5076_v14 = vrot.slane %v5074_v49, 4  ;;  %v5079_v1 = vrot.slane %v5077_v33, 5  ;;  %v5087_v5 = vshrl.u32 %v5026_v48, 16  ;;  %v9014_v49 = vpop.f32.mrf.mxu0 }
 0x142   : > { %v9000_v37 = vsel %vm8087_vm13, %v4227_v2, %v4228_v54  ;;  %v9004_v32 = vsel %vm8087_vm13, %v6909_v20, %v4232_v34  ;;  %v9008_v56 = vsel %vm8087_vm13, %v4234_v44, %v4235_v23  ;;  %v9012_v52 = vsel %vm8087_vm13, %v6910_v40, %v4239_v60  ;;  %v5818_v26 = vld [vmem:[#allocation2 + $0x24] sm:$0xe]  ;;  %v5029_v53 = vld [vmem:[#allocation2 + $0x28] sm:$0xf]  ;;  %10151 = vst [vmem:[#allocation25_spill] sm:$0xff] %v9014_v49  ;;  %v7365_v44 = vpop.f32.mrf.mxu1 }
 0x143   : > { %v9016_v48 = vrot.slane %v5083_v3, 5  ;;  %v5089_v54 = vrot.slane %v5087_v5, 4  ;;  %v5820_v2 = vld [vmem:[#allocation2 + $0x2c] sm:$0x1]  ;;  %v5920_v33 = vrot.slane %v8990_v28, 5  ;;  %v5098_v34 = vshrl.u32 %v5028_v19, 16  ;;  %v9044_v49 = vpop.f32.mrf.mxu0 }
 0x144   : > { %v10152_v20 = vcombine.low %v8835_v61, %v8843_v10  ;;  %v9026_v60 = vsel %vm8087_vm13, %v4241_v8, %v4242_v30  ;;  %v9030_v23 = vsel %vm8087_vm13, %v7010_v41, %v5913_v0  ;;  %v9034_v3 = vsel %vm8087_vm13, %v5915_v11, %v5916_v7  ;;  %10154 = vst [vmem:[#allocation26_spill] sm:$0xff] %v9044_v49 }
 0x145   : > { %7538 = vmatmul.mubr.msk.bf16.gmra.mxu0 %vm1216_vm7, %v7689_v50  ;;  %v5101_v40 = vshll.u32 %v5028_v19, 16  ;;  %v10153_v61 = vcombine.low %v8858_v46, %v8862_v47  ;;  %v5080_v10 = vor.u32 %v5079_v1, %v5076_v14  ;;  %v5100_v50 = vrot.slane %v5098_v34, 4  ;;  %v7691_v46 = vld [vmem:[#allocation2 + $0x54] sm:$0xff]   ;;  %v9075_v34 = vld [vmem:[#allocation2 + $0x30] sm:$0xe] }
 0x146   : > { %7508 = vmatmul.mubr.msk.bf16.gmra.mxu1 %vm1216_vm7, %v10152_v20  ;;  %7541 = vmatprep.mubr.msk.bf16.mxu0 %vm1216_vm7, %v7690_v55  ;;  %v5107_v30 = vshll.u32 %v5029_v53, 16  ;;  %v5111_v28 = vshrl.u32 %v5029_v53, 16  ;;  %v5093_v8 = vshll.u32 %v5027_v27, 16  ;;  %v7011_v0 = vrot.slane %v5818_v26, 9  ;;  %v5030_v20 = vld [vmem:[#allocation2 + $0x2c] sm:$0x1]  ;;  %v2032_v26 = vpop.f32.mrf.mxu1 }
 0x147   : > { %7511 = vmatprep.mubr.msk.bf16.mxu1 %vm1216_vm7, %v10153_v61  ;;  %v5923_v41 = vrot.slane %v5820_v2, 5  ;;  %v5103_v5 = vrot.slane %v5101_v40, 5  ;;  %v5090_v7 = vor.u32 %v5089_v54, %v9016_v48  ;;  %v5922_v11 = vrot.slane %v5920_v33, 4  ;;  %v7692_v53 = vld [vmem:[#allocation2 + $0x60] sm:$0xff]   ;;  %v5031_v61 = vld [vmem:[#allocation2 + $0x30] sm:$0xf] }
 0x148   : > { %v9042_v19 = vrot.slane %v5107_v30, 5  ;;  %v5113_v55 = vrot.slane %v5111_v28, 4  ;;  %v5081_v40 = vrot.slane %v5080_v10, 4  ;;  %v9063_v27 = vld [vmem:[#allocation2 + $0x34] sm:$0xf]  ;;  %v5095_v47 = vrot.slane %v5093_v8, 5  ;;  %v9073_v30 = vpop.f32.mrf.mxu0 }
 0x149   : > { %v5104_v1 = vor.u32 %v5103_v5, %v5100_v50  ;;  %v5117_v5 = vshll.u32 %v5030_v20, 16  ;;  %v5032_v54 = vld [vmem:[#allocation2 + $0x34] sm:$0xf]  ;;  %v5091_v14 = vrot.slane %v5090_v7, 4  ;;  %v9067_v2 = vsel %vm8087_vm13, %v7011_v0, %v5920_v33  ;;  %10155 = vst [vmem:[#allocation27_spill] sm:$0xff] %v9073_v30  ;;  %v7366_v0 = vpop.f32.mrf.mxu1 }
 0x14a   : > { %v5114_v50 = vor.u32 %v5113_v55, %v9042_v19  ;;  %v9071_v10 = vsel %vm8087_vm13, %v5922_v11, %v5923_v41  ;;  %v10156_v20 = vcombine.low %v8875_v9, %v8879_v18  ;;  %v9083_v8 = vadd.f32 %v7365_v44, %v8674_v29  ;;  %v9085_v7 = vld [vmem:[#allocation2 + $0x38] sm:$0x1]  ;;  %v5036_v30 = vld [vmem:[#allocation2 + $0x44] sm:$0x1] }
 0x14b   : > { %v5105_v33 = vrot.slane %v5104_v1, 4  ;;  %v5122_v41 = vshrl.u32 %v5031_v61, 16  ;;  %v5125_v11 = vshll.u32 %v5031_v61, 16  ;;  %v10158_v55 = vcombine.low %v8898_v24, %v8902_v15  ;;  %v7693_v24 = vld [vmem:[#allocation2 + $0x6c] sm:$0xff]   ;;  %v7694_v1 = vld [vmem:[#allocation2 + $0x78] sm:$0xff]  }
 0x14c   : > { %10157 = vst [vmem:[#allocation28_spill] sm:$0xff] %v9083_v8  ;;  %v5086_v9 = vsel %vm8114_vm2, %v5081_v40, %v9016_v48  ;;  %v5927_v29 = vrot.slane %v9063_v27, 5  ;;  %v5131_v18 = vshll.u32 %v5032_v54, 16  ;;  %v5135_v44 = vshrl.u32 %v5032_v54, 16  ;;  %v9106_v48 = vpop.f32.mrf.mxu0  ;;  %v5035_v40 = vld [vmem:[#allocation2 + $0x40] sm:$0xf] }
 0x14d   : > { %7542 = vmatmul.mubr.msk.bf16.gmra.mxu0 %vm1216_vm7, %v7691_v46  ;;  %v5034_v46 = vld [vmem:[#allocation2 + $0x3c] sm:$0xf]  ;;  %v5115_v61 = vrot.slane %v5114_v50, 4  ;;  %v5096_v15 = vsel %vm8114_vm2, %v5091_v14, %v5095_v47  ;;  %10161 = vst [vmem:[#allocation31_spill] sm:$0xff] %v9106_v48  ;;  %v7012_v27 = vrot.slane %v9075_v34, 9  ;;  %v5930_v54 = vrot.slane %v9085_v7, 5 }
 0x14e   : > { %7512 = vmatmul.mubr.msk.bf16.gmra.mxu1 %vm1216_vm7, %v10156_v20  ;;  %7545 = vmatprep.mubr.msk.bf16.mxu0 %vm1216_vm7, %v7692_v53  ;;  %v5119_v20 = vrot.slane %v5117_v5, 5  ;;  %v9099_v53 = vadd.f32 %v2032_v26, %v8680_v12  ;;  %v5110_v12 = vsel %vm8114_vm2, %v5105_v33, %v9042_v19  ;;  %v2035_v26 = vpop.f32.mrf.mxu1  ;;  %v5033_v50 = vld [vmem:[#allocation2 + $0x38] sm:$0x1]  ;;  %v5124_v5 = vrot.slane %v5122_v41, 4  ;;  %v9115_v48 = vld [vmem:[#allocation2 + $0x40] sm:$0xf] }
 0x14f   : > { %7515 = vmatprep.mubr.msk.bf16.mxu1 %vm1216_vm7, %v10158_v55  ;;  %v9104_v55 = vadd.f32 %v7366_v0, %v8690_v17  ;;  %v5127_v28 = vrot.slane %v5125_v11, 5  ;;  %v5146_v47 = vshrl.u32 %v5034_v46, 16  ;;  %v5929_v14 = vrot.slane %v5927_v29, 4  ;;  %v9126_v8 = vld [vmem:[#allocation2 + $0x4c] sm:$0xf] }
 0x150   : > { %10159 = vst [vmem:[#allocation29_spill] sm:$0xff] %v9099_v53  ;;  %v9113_v17 = vrot.slane %v5131_v18, 5  ;;  %v5137_v0 = vrot.slane %v5135_v44, 4  ;;  %v5149_v34 = vshll.u32 %v5034_v46, 16  ;;  %v5120_v7 = vsel %vm8114_vm2, %v5115_v61, %v5119_v20  ;;  %v5824_v18 = vld [vmem:[#allocation2 + $0x3c] sm:$0xe] }
 0x151   : > { %10160 = vst [vmem:[#allocation30_spill] sm:$0xff] %v9104_v55  ;;  %v5148_v55 = vrot.slane %v5146_v47, 4  ;;  %v5155_v49 = vshll.u32 %v5035_v40, 16  ;;  %v5159_v53 = vshrl.u32 %v5035_v40, 16  ;;  %v9119_v19 = vcombine.low %v5086_v9, %v5096_v15  ;;  %v5037_v15 = vld [vmem:[#allocation2 + $0x48] sm:$0xf] }
 0x152   : > { %v9122_v33 = vadd.f32 %v2035_v26, %v8700_v42  ;;  %v5141_v11 = vshll.u32 %v5033_v50, 16  ;;  %v5151_v44 = vrot.slane %v5149_v34, 5  ;;  %v10164_v46 = vcombine.low %v8922_v6, %v8931_v62  ;;  %v5827_v26 = vld [vmem:[#allocation2 + $0x48] sm:$0xe]  ;;  %v5829_v50 = vld [vmem:[#allocation2 + $0x50] sm:$0x1] }
 0x153   : > { %v9124_v41 = vpop.f32.mrf.mxu0  ;;  %v5128_v61 = vor.u32 %v5127_v28, %v5124_v5  ;;  %v5934_v9 = vrot.slane %v9115_v48, 5  ;;  %v9134_v20 = vrot.slane %v5155_v49, 5  ;;  %v5161_v42 = vrot.slane %v5159_v53, 4  ;;  %v5826_v28 = vld [vmem:[#allocation2 + $0x44] sm:$0x1] }
 0x154   : > { %10162 = vst [vmem:[#allocation32_spill] sm:$0xff] %v9122_v33  ;;  %10163 = vst [vmem:[#allocation33_spill] sm:$0xff] %v9124_v41  ;;  %v10165_v40 = vcombine.low %v8939_v21, %v8963_v45  ;;  %v9145_v6 = vsel %vm8087_vm13, %v7012_v27, %v5927_v29  ;;  %v5138_v62 = vor.u32 %v5137_v0, %v9113_v17  ;;  %v5165_v53 = vshll.u32 %v5036_v30, 16  ;;  %v9170_v41 = vld [vmem:[#allocation2 + $0x58] sm:$0xf] }
 0x155   : > { %7546 = vmatmul.mubr.msk.bf16.gmra.mxu0 %vm1216_vm7, %v7693_v24  ;;  %v9141_v24 = vcombine.low %v5110_v12, %v5120_v7  ;;  %v9150_v48 = vpop.f32.mrf.mxu0  ;;  %v9154_v21 = vsel %vm8087_vm13, %v5929_v14, %v5930_v54  ;;  %v5152_v45 = vor.u32 %v5151_v44, %v5148_v55  ;;  %v5162_v12 = vor.u32 %v5161_v42, %v9134_v20  ;;  %v7695_v7 = vld [vmem:[#allocation2 + $0x84] sm:$0xff]  }
 0x156   : > { %7516 = vmatmul.mubr.msk.bf16.gmra.mxu1 %vm1216_vm7, %v10164_v46  ;;  %7549 = vmatprep.mubr.msk.bf16.mxu0 %vm1216_vm7, %v7694_v1  ;;  %v9148_v49 = vpop.f32.mrf.mxu1  ;;  %10166 = vst [vmem:[#allocation34_spill] sm:$0xff] %v9150_v48  ;;  %v5038_v1 = vld [vmem:[#allocation2 + $0x4c] sm:$0xf]  ;;  %v5941_v29 = vrot.slane %v9126_v8, 5  ;;  %v9158_v27 = vrot.slane %v5141_v11, 5  ;;  %v7013_v5 = vrot.slane %v5824_v18, 9 }
 0x157   : > { %7519 = vmatprep.mubr.msk.bf16.mxu1 %vm1216_vm7, %v10165_v40  ;;  %v9162_v30 = vpop.f32.mrf.mxu0  ;;  %v5170_v0 = vshrl.u32 %v5037_v15, 16  ;;  %v5173_v34 = vshll.u32 %v5037_v15, 16  ;;  %v7696_v46 = vld [vmem:[#allocation2 + $0x90] sm:$0xff]   ;;  %v5129_v54 = vrot.slane %v5128_v61, 4  ;;  %v5936_v14 = vrot.slane %v5934_v9, 4 }
 0x158   : > { %v9160_v47 = vpop.f32.mrf.mxu1  ;;  %10168 = vst [vmem:[#allocation36_spill] sm:$0xff] %v9162_v30  ;;  %v5937_v55 = vrot.slane %v5826_v28, 5  ;;  %v5179_v44 = vshll.u32 %v5038_v1, 16  ;;  %v5139_v42 = vrot.slane %v5138_v62, 4  ;;  %v9164_v40 = vrot.slane %v5165_v53, 5 }
 0x159   : > { %10167 = vst [vmem:[#allocation35_spill] sm:$0xff] %v9160_v47  ;;  %v9168_v8 = vpop.f32.mrf.mxu0  ;;  %v7014_v11 = vrot.slane %v5827_v26, 9  ;;  %v5944_v18 = vrot.slane %v5829_v50, 5  ;;  %v5153_v30 = vrot.slane %v5152_v45, 4  ;;  %v5163_v33 = vrot.slane %v5162_v12, 4 }
 0x15a   : > { %v9166_v48 = vpop.f32.mrf.mxu1  ;;  %10170 = vst [vmem:[#allocation38_spill] sm:$0xff] %v9168_v8  ;;  %v5943_v15 = vrot.slane %v5941_v29, 4  ;;  %v5183_v47 = vshrl.u32 %v5038_v1, 16  ;;  %v9176_v62 = vsel %vm8087_vm13, %v7013_v5, %v5934_v9  ;;  %v5172_v53 = vrot.slane %v5170_v0, 4  ;;  %v5041_v50 = vld [vmem:[#allocation2 + $0x58] sm:$0xf] }
 0x15b   : > { %10169 = vst [vmem:[#allocation37_spill] sm:$0xff] %v9166_v48  ;;  %v5175_v8 = vrot.slane %v5173_v34, 5  ;;  %v10172_v45 = vcombine.low %v8943_v36, %v8982_v22  ;;  %v5134_v1 = vsel %vm8114_vm2, %v5129_v54, %v9113_v17  ;;  %v9190_v12 = vsel %vm8087_vm13, %v5936_v14, %v5937_v55  ;;  %v5039_v0 = vld [vmem:[#allocation2 + $0x50] sm:$0x1]  ;;  %v5042_v55 = vld [vmem:[#allocation2 + $0x5c] sm:$0x1] }
 0x15c   : > { %v9178_v28 = vpop.f32.mrf.mxu1  ;;  %v9192_v9 = vrot.slane %v5179_v44, 5  ;;  %v5185_v26 = vrot.slane %v5183_v47, 4  ;;  %v10173_v5 = vcombine.low %v8967_v59, %v8986_v35  ;;  %v5144_v36 = vsel %vm8114_vm2, %v5139_v42, %v9158_v27  ;;  %v5830_v47 = vld [vmem:[#allocation2 + $0x54] sm:$0xe] }
 0x15d   : > { %10171 = vst [vmem:[#allocation39_spill] sm:$0xff] %v9178_v28  ;;  %7550 = vmatmul.mubr.msk.bf16.gmra.mxu0 %vm1216_vm7, %v7695_v7  ;;  %v9204_v22 = vsel %vm8087_vm13, %v7014_v11, %v5941_v29  ;;  %v9206_v17 = vpop.f32.mrf.mxu0  ;;  %v5948_v34 = vrot.slane %v9170_v41, 5  ;;  %v5194_v7 = vshrl.u32 %v5040_v38, 16  ;;  %v5158_v59 = vsel %vm8114_vm2, %v5153_v30, %v9134_v20  ;;  %v5832_v29 = vld [vmem:[#allocation2 + $0x5c] sm:$0x1]  ;;  %v7698_v30 = vld [vmem:[#allocation2 + $0xa8] sm:$0xff]  }
 0x15e   : > { %7520 = vmatmul.mubr.msk.bf16.gmra.mxu1 %vm1216_vm7, %v10172_v45  ;;  %7553 = vmatprep.mubr.msk.bf16.mxu0 %vm1216_vm7, %v7696_v46  ;;  %10174 = vst [vmem:[#allocation40_spill] sm:$0xff] %v9206_v17  ;;  %v5168_v35 = vsel %vm8114_vm2, %v5163_v33, %v9164_v40  ;;  %v9217_v27 = vsel %vm8087_vm13, %v5943_v15, %v5944_v18  ;;  %v5197_v46 = vshll.u32 %v5040_v38, 16  ;;  %v5203_v44 = vshll.u32 %v5041_v50, 16  ;;  %v7697_v20 = vld [vmem:[#allocation2 + $0x9c] sm:$0xff]  }
 0x15f   : > { %7523 = vmatprep.mubr.msk.bf16.mxu1 %vm1216_vm7, %v10173_v5  ;;  %v5176_v54 = vor.u32 %v5175_v8, %v5172_v53  ;;  %v5196_v41 = vrot.slane %v5194_v7, 4  ;;  %v5207_v42 = vshrl.u32 %v5041_v50, 16  ;;  %v9221_v11 = vpop.f32.mrf.mxu0  ;;  %v5186_v45 = vor.u32 %v5185_v26, %v9192_v9  ;;  %v5043_v53 = vld [vmem:[#allocation2 + $0x60] sm:$0xf]  ;;  %v5047_v50 = vld [vmem:[#allocation2 + $0x70] sm:$0xf] }
 0x160   : > { %v9219_v14 = vpop.f32.mrf.mxu1  ;;  %10176 = vst [vmem:[#allocation42_spill] sm:$0xff] %v9221_v11  ;;  %v5189_v33 = vshll.u32 %v5039_v0, 16  ;;  %v7015_v40 = vrot.slane %v5830_v47, 9  ;;  %v5199_v5 = vrot.slane %v5197_v46, 5  ;;  %v5950_v18 = vrot.slane %v5948_v34, 4 }
 0x161   : > { %10175 = vst [vmem:[#allocation41_spill] sm:$0xff] %v9219_v14  ;;  %v5951_v15 = vrot.slane %v5832_v29, 5  ;;  %v9224_v61 = vrot.slane %v5203_v44, 5  ;;  %v5209_v38 = vrot.slane %v5207_v42, 4  ;;  %v9228_v7 = vcombine.low %v5134_v1, %v5144_v36  ;;  %v9232_v14 = vld [vmem:[#allocation2 + $0x64] sm:$0xf]  ;;  %v9243_v46 = vpop.f32.mrf.mxu0 }
 0x162   : > { %v9226_v8 = vpop.f32.mrf.mxu1  ;;  %v5200_v11 = vor.u32 %v5199_v5, %v5196_v41  ;;  %v5213_v17 = vshll.u32 %v5042_v55, 16  ;;  %v9236_v26 = vadd.f32 %v9148_v49, %v8710_v4  ;;  %v9238_v0 = vcombine.low %v5158_v59, %v5168_v35  ;;  %10179 = vst [vmem:[#allocation45_spill] sm:$0xff] %v9243_v46  ;;  %v5044_v1 = vld [vmem:[#allocation2 + $0x64] sm:$0xf]  ;;  %v5833_v41 = vld [vmem:[#allocation2 + $0x60] sm:$0xe] }
 0x163   : > { %10177 = vst [vmem:[#allocation43_spill] sm:$0xff] %v9226_v8  ;;  %v9240_v47 = vrot.slane %v5176_v54, 4  ;;  %v5210_v29 = vor.u32 %v5209_v38, %v9224_v61  ;;  %v10180_v36 = vcombine.low %v8996_v39, %v9000_v37  ;;  %v5187_v49 = vrot.slane %v5186_v45, 4  ;;  %v5835_v44 = vld [vmem:[#allocation2 + $0x68] sm:$0x1]  ;;  %v7700_v46 = vld [vmem:[#allocation2 + $0xc0] sm:$0xff]  }
 0x164   : > { %10178 = vst [vmem:[#allocation44_spill] sm:$0xff] %v9236_v26  ;;  %v5191_v59 = vrot.slane %v5189_v33, 5  ;;  %v5218_v35 = vshrl.u32 %v5043_v53, 16  ;;  %v10181_v54 = vcombine.low %v9004_v32, %v9008_v56  ;;  %v9259_v55 = vsel %vm8087_vm13, %v7015_v40, %v5948_v34  ;;  %v9265_v39 = vpop.f32.mrf.mxu1  ;;  %v5045_v56 = vld [vmem:[#allocation2 + $0x68] sm:$0x1]  ;;  %v7699_v34 = vld [vmem:[#allocation2 + $0xb4] sm:$0xff]  }
 0x165   : > { %7554 = vmatmul.mubr.msk.bf16.gmra.mxu0 %vm1216_vm7, %v7697_v20  ;;  %v9263_v37 = vsel %vm8087_vm13, %v5950_v18, %v5951_v15  ;;  %10182 = vst [vmem:[#allocation46_spill] sm:$0xff] %v9265_v39  ;;  %v5955_v42 = vrot.slane %v9232_v14, 5  ;;  %v5221_v20 = vshll.u32 %v5043_v53, 16  ;;  %v5211_v45 = vrot.slane %v5210_v29, 4  ;;  %v5836_v5 = vld [vmem:[#allocation2 + $0x6c] sm:$0xe]  ;;  %v9272_v18 = vpop.f32.mrf.mxu0 }
 0x166   : > { %7524 = vmatmul.mubr.msk.bf16.gmra.mxu1 %vm1216_vm7, %v10180_v36  ;;  %7557 = vmatprep.mubr.msk.bf16.mxu0 %vm1216_vm7, %v7698_v30  ;;  %v5201_v30 = vrot.slane %v5200_v11, 4  ;;  %v5215_v32 = vrot.slane %v5213_v17, 5  ;;  %v5227_v33 = vshll.u32 %v5044_v1, 16  ;;  %v5837_v38 = vld [vmem:[#allocation2 + $0x70] sm:$0xf]  ;;  %v5182_v40 = vsel %vm8114_vm2, %v9240_v47, %v9192_v9  ;;  %10183 = vst [vmem:[#allocation47_spill] sm:$0xff] %v9272_v18  ;;  %v9280_v39 = vpop.f32.mrf.mxu1 }
 0x167   : > { %7527 = vmatprep.mubr.msk.bf16.mxu1 %vm1216_vm7, %v10181_v54  ;;  %v5220_v15 = vrot.slane %v5218_v35, 4  ;;  %v5223_v36 = vrot.slane %v5221_v20, 5  ;;  %v5231_v54 = vshrl.u32 %v5044_v1, 16  ;;  %v5046_v14 = vld [vmem:[#allocation2 + $0x6c] sm:$0xf]  ;;  %v5192_v11 = vsel %vm8114_vm2, %v5187_v49, %v5191_v59  ;;  %10184 = vst [vmem:[#allocation48_spill] sm:$0xff] %v9280_v39 }
 0x168   : > { %v7016_v53 = vrot.slane %v5833_v41, 9  ;;  %v9278_v29 = vrot.slane %v5227_v33, 5  ;;  %v5838_v4 = vld [vmem:[#allocation2 + $0x74] sm:$0x1]  ;;  %v5957_v9 = vrot.slane %v5955_v42, 4  ;;  %v5958_v47 = vrot.slane %v5835_v44, 5 }
 0x169   : > { %v5233_v35 = vrot.slane %v5231_v54, 4  ;;  %v5962_v20 = vrot.slane %v5837_v38, 5  ;;  %v5206_v1 = vsel %vm8114_vm2, %v5201_v30, %v9224_v61  ;;  %v5216_v49 = vsel %vm8114_vm2, %v5211_v45, %v5215_v32  ;;  %v5051_v39 = vld [vmem:[#allocation2 + $0x80] sm:$0x1] }
 0x16a   : > { %v5242_v59 = vshrl.u32 %v5046_v14, 16  ;;  %v5245_v41 = vshll.u32 %v5046_v14, 16  ;;  %v5224_v17 = vor.u32 %v5223_v36, %v5220_v15  ;;  %v5237_v18 = vshll.u32 %v5045_v56, 16  ;;  %v5049_v36 = vld [vmem:[#allocation2 + $0x78] sm:$0xf] }
 0x16b   : > { %v9287_v33 = vpop.f32.mrf.mxu0  ;;  %v7017_v8 = vrot.slane %v5836_v5, 9  ;;  %v5965_v28 = vrot.slane %v5838_v4, 5  ;;  %v10185_v44 = vcombine.low %v9012_v52, %v9026_v60  ;;  %v5234_v61 = vor.u32 %v5233_v35, %v9278_v29  ;;  %v5048_v52 = vld [vmem:[#allocation2 + $0x74] sm:$0x1]  ;;  %v7701_v35 = vld [vmem:[#allocation2 + $0xcc] sm:$0xff]  }
 0x16c   : > { %v5964_v30 = vrot.slane %v5962_v20, 4  ;;  %v5251_v38 = vshll.u32 %v5047_v50, 16  ;;  %v5255_v45 = vshrl.u32 %v5047_v50, 16  ;;  %v9298_v32 = vcombine.low %v5182_v40, %v5192_v11 }
 0x16d   : > { %7558 = vmatmul.mubr.msk.bf16.gmra.mxu0 %vm1216_vm7, %v7699_v34  ;;  %v9302_v4 = vsel %vm8087_vm13, %v7016_v53, %v5955_v42  ;;  %v5244_v60 = vrot.slane %v5242_v59, 4  ;;  %v5247_v5 = vrot.slane %v5245_v41, 5  ;;  %v5840_v34 = vld [vmem:[#allocation2 + $0x7c] sm:$0xf]  ;;  %v9304_v15 = vcombine.low %v5206_v1, %v5216_v49  ;;  %v9315_v40 = vpop.f32.mrf.mxu0  ;;  %v5839_v42 = vld [vmem:[#allocation2 + $0x78] sm:$0xe] }
 0x16e   : > { %7528 = vmatmul.mubr.msk.bf16.gmra.mxu1 %vm1216_vm7, %v10185_v44  ;;  %7561 = vmatprep.mubr.msk.bf16.mxu0 %vm1216_vm7, %v7700_v46  ;;  %v7377_v56 = vpop.f32.mrf.mxu1  ;;  %v9308_v50 = vsel %vm8087_vm13, %v5957_v9, %v5958_v47  ;;  %v9317_v54 = vrot.slane %v5224_v17, 4  ;;  %v9319_v14 = vrot.slane %v5237_v18, 5  ;;  %v9323_v11 = vsel %vm8087_vm13, %v7017_v8, %v5962_v20  ;;  %v5841_v47 = vld [vmem:[#allocation2 + $0x80] sm:$0x1]  ;;  %v5050_v18 = vld [vmem:[#allocation2 + $0x7c] sm:$0xf] }
 0x16f   : > { %7567 = vmatprep.mubr.msk.bf16.mxu1 %vm1216_vm7, %v9119_v19  ;;  %v9311_v46 = vadd.f32 %v7377_v56, %v8866_v63  ;;  %v9313_v19 = vrot.slane %v5251_v38, 5  ;;  %v5257_v53 = vrot.slane %v5255_v45, 4  ;;  %v9325_v63 = vrot.slane %v5234_v61, 4  ;;  %v9335_v45 = vpop.f32.mrf.mxu0 }
 0x170   : > { %v2080_v9 = vpop.f32.mrf.mxu1  ;;  %v9329_v1 = vsel %vm8087_vm13, %v5964_v30, %v5965_v28  ;;  %v5969_v17 = vrot.slane %v5840_v34, 5  ;;  %v5248_v59 = vor.u32 %v5247_v5, %v5244_v60  ;;  %v5261_v41 = vshll.u32 %v5048_v52, 16 }
 0x171   : > { %v9332_v49 = vadd.f32 %v2080_v9, %v8918_v13  ;;  %v5266_v8 = vshrl.u32 %v5049_v36, 16  ;;  %v5269_v20 = vshll.u32 %v5049_v36, 16  ;;  %v5258_v38 = vor.u32 %v5257_v53, %v9313_v19  ;;  %v5052_v36 = vld [vmem:[#allocation2 + $0x84] sm:$0xf] }
 0x172   : > { %v7378_v44 = vpop.f32.mrf.mxu1  ;;  %v7018_v56 = vrot.slane %v5839_v42, 9  ;;  %v5972_v28 = vrot.slane %v5841_v47, 5  ;;  %v5971_v30 = vrot.slane %v5969_v17, 4  ;;  %v5275_v34 = vshll.u32 %v5050_v18, 16  ;;  %v5843_v42 = vld [vmem:[#allocation2 + $0x88] sm:$0xf] }
 0x173   : > { %v9338_v61 = vadd.f32 %v7378_v44, %v8954_v58  ;;  %v5268_v13 = vrot.slane %v5266_v8, 4  ;;  %v5271_v9 = vrot.slane %v5269_v20, 5  ;;  %v5230_v58 = vsel %vm8114_vm2, %v9317_v54, %v9278_v29  ;;  %v5844_v20 = vld [vmem:[#allocation2 + $0x8c] sm:$0x1] }
 0x174   : > { %v5279_v5 = vshrl.u32 %v5050_v18, 16  ;;  %v10186_v53 = vcombine.low %v9030_v23, %v9034_v3  ;;  %v9361_v29 = vrot.slane %v5261_v41, 5  ;;  %v9363_v47 = vrot.slane %v5275_v34, 5  ;;  %v5053_v18 = vld [vmem:[#allocation2 + $0x88] sm:$0xf]  ;;  %v9367_v23 = vpop.f32.mrf.mxu0 }
 0x175   : > { %7562 = vmatmul.mubr.msk.bf16.gmra.mxu0 %vm1216_vm7, %v7701_v35  ;;  %v5272_v54 = vor.u32 %v5271_v9, %v5268_v13  ;;  %v5842_v35 = vld [vmem:[#allocation2 + $0x84] sm:$0xe]  ;;  %v9365_v44 = vrot.slane %v5248_v59, 4  ;;  %10187 = vst [vmem:[#allocation49_spill] sm:$0xff] %v9367_v23  ;;  %v9371_v3 = vsel %vm8087_vm13, %v7018_v56, %v5969_v17  ;;  %v5285_v8 = vshll.u32 %v5051_v39, 16  ;;  %v2083_v13 = vpop.f32.mrf.mxu1 }
 0x176   : > { %7568 = vmatmul.mubr.msk.bf16.vlgmr.msra.gmra.mxu1 %vm1216_vm7, %v9141_v24  ;;  %7601 = vmatprep.mubr.msk.bf16.mxu0 %vm1216_vm7, %v10186_v53  ;;  %v5240_v24 = vsel %vm8114_vm2, %v9325_v63, %v9319_v14  ;;  %v5259_v53 = vrot.slane %v5258_v38, 4  ;;  %v9375_v14 = vsel %vm8087_vm13, %v5971_v30, %v5972_v28  ;;  %v5976_v63 = vrot.slane %v5843_v42, 5  ;;  %v5054_v23 = vld [vmem:[#allocation2 + $0x8c] sm:$0x1] }
 0x177   : > { %7571 = vmatprep.mubr.msk.bf16.mxu1 %vm1216_vm7, %v9228_v7  ;;  %v5281_v7 = vrot.slane %v5279_v5, 4  ;;  %v5290_v41 = vshrl.u32 %v5052_v36, 16  ;;  %v5293_v9 = vshll.u32 %v5052_v36, 16  ;;  %v5299_v34 = vshll.u32 %v5053_v18, 16  ;;  %v5846_v5 = vld [vmem:[#allocation2 + $0x94] sm:$0xf] }
 0x178   : > { %v5303_v60 = vshrl.u32 %v5053_v18, 16  ;;  %v5273_v52 = vrot.slane %v5272_v54, 4  ;;  %v7019_v26 = vrot.slane %v5842_v35, 9  ;;  %v5978_v17 = vrot.slane %v5976_v63, 4  ;;  %v5845_v18 = vld [vmem:[#allocation2 + $0x90] sm:$0xe] }
 0x179   : > { %v5282_v59 = vor.u32 %v5281_v7, %v9363_v47  ;;  %v5979_v56 = vrot.slane %v5844_v20, 5  ;;  %v5287_v48 = vrot.slane %v5285_v8, 5  ;;  %v5292_v28 = vrot.slane %v5290_v41, 4  ;;  %v5847_v7 = vld [vmem:[#allocation2 + $0x98] sm:$0x1] }
 0x17a   : > { %v9378_v39 = vpop.f32.mrf.mxu0  ;;  %v5295_v30 = vrot.slane %v5293_v9, 5  ;;  %v6984_v42 = vcombine.low %v5230_v58, %v5240_v24  ;;  %v5254_v36 = vsel %vm8114_vm2, %v9365_v44, %v9313_v19  ;;  %v5264_v54 = vsel %vm8114_vm2, %v5259_v53, %v9361_v29  ;;  %v5055_v20 = vld [vmem:[#allocation2 + $0x90] sm:$0xf]  ;;  %v5056_v53 = vld [vmem:[#allocation2 + $0x94] sm:$0xf] }
 0x17b   : > { %v5283_v38 = vrot.slane %v5282_v59, 4  ;;  %v9388_v35 = vadd.f32 %v2083_v13, %v8988_v43  ;;  %v10188_v8 = vcombine.low %v9067_v2, %v9071_v10  ;;  %v9398_v24 = vrot.slane %v5299_v34, 5 }
 0x17c   : > { %v5305_v29 = vrot.slane %v5303_v60, 4  ;;  %v9400_v43 = vpop.f32.mrf.mxu0  ;;  %v5983_v44 = vrot.slane %v5846_v5, 5  ;;  %v10189_v41 = vcombine.low %v9145_v6, %v9154_v21  ;;  %v5278_v2 = vsel %vm8114_vm2, %v5273_v52, %v9363_v47  ;;  %v5057_v52 = vld [vmem:[#allocation2 + $0x98] sm:$0x1] }
 0x17d   : > { %7602 = vmatmul.mubr.msk.bf16.vlgmr.msra.gmra.mxu0 %vm1216_vm7, %v10188_v8  ;;  %v7381_v58 = vpop.f32.mrf.mxu1  ;;  %v9413_v10 = vsel %vm8087_vm13, %v7019_v26, %v5976_v63  ;;  %v5288_v6 = vsel %vm8114_vm2, %v5283_v38, %v5287_v48  ;;  %v5296_v21 = vor.u32 %v5295_v30, %v5292_v28  ;;  %v5309_v60 = vshll.u32 %v5054_v23, 16  ;;  %v5848_v30 = vld [vmem:[#allocation2 + $0x9c] sm:$0xe] }
 0x17e   : > { %7572 = vmatmul.mubr.msk.bf16.gmra.mxu1 %vm1216_vm7, %v9238_v0  ;;  %7605 = vmatprep.mubr.msk.bf16.mxu0 %vm1216_vm7, %v10189_v41  ;;  %v9417_v0 = vsel %vm8087_vm13, %v5978_v17, %v5979_v56  ;;  %v5314_v59 = vshrl.u32 %v5055_v20, 16  ;;  %v7020_v9 = vrot.slane %v5845_v18, 9  ;;  %v5986_v34 = vrot.slane %v5847_v7, 5  ;;  %v5849_v56 = vld [vmem:[#allocation2 + $0xa0] sm:$0xf] }
 0x17f   : > { %7575 = vmatprep.mubr.msk.bf16.mxu1 %vm1216_vm7, %v9298_v32  ;;  %v2096_v13 = vpop.f32.mrf.mxu1  ;;  %v9421_v32 = vpop.f32.mrf.mxu0  ;;  %v5317_v47 = vshll.u32 %v5055_v20, 16  ;;  %v5323_v5 = vshll.u32 %v5056_v53, 16  ;;  %v5306_v26 = vor.u32 %v5305_v29, %v9398_v24  ;;  %v5985_v63 = vrot.slane %v5983_v44, 4  ;;  %v5058_v18 = vld [vmem:[#allocation2 + $0x9c] sm:$0xf] }
 0x180   : > { %10190 = vst [vmem:[#allocation50_spill] sm:$0xff] %v9421_v32  ;;  %v5316_v8 = vrot.slane %v5314_v59, 4  ;;  %v5327_v17 = vshrl.u32 %v5056_v53, 16  ;;  %v9424_v41 = vcombine.low %v5254_v36, %v5264_v54  ;;  %v9426_v48 = vcombine.low %v5278_v2, %v5288_v6  ;;  %v5850_v32 = vld [vmem:[#allocation2 + $0xa4] sm:$0x1] }
 0x181   : > { %v7382_v38 = vpop.f32.mrf.mxu1  ;;  %v5319_v28 = vrot.slane %v5317_v47, 5  ;;  %v5297_v7 = vrot.slane %v5296_v21, 4  ;;  %v5311_v20 = vrot.slane %v5309_v60, 5  ;;  %v9430_v19 = vrot.slane %v5323_v5, 5  ;;  %v9432_v59 = vpop.f32.mrf.mxu0  ;;  %v5059_v6 = vld [vmem:[#allocation2 + $0xa0] sm:$0xf] }
 0x182   : > { %v5329_v29 = vrot.slane %v5327_v17, 4  ;;  %v9436_v36 = vsel %vm8087_vm13, %v7020_v9, %v5983_v44  ;;  %v5333_v53 = vshll.u32 %v5057_v52, 16  ;;  %v5990_v2 = vrot.slane %v5849_v56, 5 }
 0x183   : > { %v5320_v54 = vor.u32 %v5319_v28, %v5316_v8  ;;  %v10191_v47 = vcombine.low %v9176_v62, %v9190_v12  ;;  %v5307_v21 = vrot.slane %v5306_v26, 4  ;;  %v9446_v60 = vsel %vm8087_vm13, %v5985_v63, %v5986_v34  ;;  %v2099_v62 = vpop.f32.mrf.mxu1 }
 0x184   : > { %v5330_v44 = vor.u32 %v5329_v29, %v9430_v19  ;;  %v5338_v9 = vshrl.u32 %v5058_v18, 16  ;;  %v10192_v52 = vcombine.low %v9204_v22, %v9217_v27  ;;  %v7021_v5 = vrot.slane %v5848_v30, 9  ;;  %v5060_v27 = vld [vmem:[#allocation2 + $0xa4] sm:$0x1] }
 0x185   : > { %7606 = vmatmul.mubr.msk.bf16.gmra.mxu0 %vm1216_vm7, %v10191_v47  ;;  %v5321_v12 = vrot.slane %v5320_v54, 4  ;;  %v5993_v8 = vrot.slane %v5850_v32, 5  ;;  %v5992_v26 = vrot.slane %v5990_v2, 4  ;;  %v5347_v56 = vshll.u32 %v5059_v6, 16  ;;  %v5061_v54 = vld [vmem:[#allocation2 + $0xa8] sm:$0xf] }
 0x186   : > { %7576 = vmatmul.mubr.msk.bf16.gmra.mxu1 %vm1216_vm7, %v9304_v15  ;;  %7609 = vmatprep.mubr.msk.bf16.mxu0 %vm1216_vm7, %v10192_v52  ;;  %v5341_v15 = vshll.u32 %v5058_v18, 16  ;;  %v5340_v17 = vrot.slane %v5338_v9, 4  ;;  %v5351_v34 = vshrl.u32 %v5059_v6, 16  ;;  %v9455_v63 = vadd.f32 %v7381_v58, %v8685_v16  ;;  %v5062_v6 = vld [vmem:[#allocation2 + $0xac] sm:$0xf] }
 0x187   : > { %7579 = vmatprep.mubr.msk.bf16.mxu1 %vm1216_vm7, %v6984_v42  ;;  %v9457_v28 = vpop.f32.mrf.mxu0  ;;  %v5331_v29 = vrot.slane %v5330_v44, 4  ;;  %v5335_v22 = vrot.slane %v5333_v53, 5  ;;  %v5302_v42 = vsel %vm8114_vm2, %v5297_v7, %v9398_v24  ;;  %v9463_v32 = vadd.f32 %v2096_v13, %v8698_v31  ;;  %v5851_v31 = vld [vmem:[#allocation2 + $0xa8] sm:$0xe] }
 0x188   : > { %v5343_v47 = vrot.slane %v5341_v15, 5  ;;  %v9465_v30 = vrot.slane %v5347_v56, 5  ;;  %v5353_v18 = vrot.slane %v5351_v34, 4  ;;  %v5312_v16 = vsel %vm8114_vm2, %v5307_v21, %v5311_v20  ;;  %v5852_v20 = vld [vmem:[#allocation2 + $0xac] sm:$0xf] }
 0x189   : > { %v9470_v58 = vadd.f32 %v7382_v38, %v8705_v25  ;;  %v9474_v24 = vpop.f32.mrf.mxu0  ;;  %v5326_v13 = vsel %vm8114_vm2, %v5321_v12, %v9430_v19  ;;  %v9481_v7 = vsel %vm8087_vm13, %v7021_v5, %v5990_v2  ;;  %v9485_v25 = vsel %vm8087_vm13, %v5992_v26, %v5993_v8  ;;  %v10194_v12 = vld [vmem:[#allocation5_spill] sm:$0xff] }
 0x18a   : > { %v7385_v44 = vpop.f32.mrf.mxu1  ;;  %v5344_v9 = vor.u32 %v5343_v47, %v5340_v17  ;;  %v5357_v38 = vshll.u32 %v5060_v27, 16  ;;  %v5336_v21 = vsel %vm8114_vm2, %v5331_v29, %v5335_v22  ;;  %v5362_v17 = vshrl.u32 %v5061_v54, 16  ;;  %v5063_v29 = vld [vmem:[#allocation2 + $0xb0] sm:$0x1] }
 0x18b   : > { %v9489_v15 = vpop.f32.mrf.mxu0  ;;  %v5365_v56 = vshll.u32 %v5061_v54, 16  ;;  %v5371_v34 = vshll.u32 %v5062_v6, 16  ;;  %v10193_v19 = vcombine.low %v9259_v55, %v9263_v37  ;;  %v6987_v2 = vcombine.low %v5302_v42, %v5312_v16 }
 0x18c   : > { %v2112_v52 = vpop.f32.mrf.mxu1  ;;  %v9498_v5 = vadd.f32 %v2099_v62, %v10194_v12  ;;  %v5354_v8 = vor.u32 %v5353_v18, %v9465_v30  ;;  %v7022_v26 = vrot.slane %v5851_v31, 9  ;;  %v10195_v22 = vcombine.low %v9302_v4, %v9308_v50  ;;  %v5064_v50 = vld [vmem:[#allocation2 + $0xb4] sm:$0xf] }
 0x18d   : > { %7610 = vmatmul.mubr.msk.bf16.gmra.mxu0 %vm1216_vm7, %v10193_v19  ;;  %v9507_v55 = vrot.slane %v5344_v9, 4  ;;  %v5997_v27 = vrot.slane %v5852_v20, 5  ;;  %v5364_v47 = vrot.slane %v5362_v17, 4  ;;  %v5367_v62 = vrot.slane %v5365_v56, 5  ;;  %v9511_v54 = vpop.f32.mrf.mxu0  ;;  %v10196_v31 = vld [vmem:[#allocation7_spill] sm:$0xff]  ;;  %v10197_v17 = vld [vmem:[#allocation9_spill] sm:$0xff] }
 0x18e   : > { %7580 = vmatmul.mubr.msk.bf16.gmra.mxu1 %vm1216_vm7, %v9424_v41  ;;  %7613 = vmatprep.mubr.msk.bf16.mxu0 %vm1216_vm7, %v10195_v22  ;;  %v7386_v37 = vpop.f32.mrf.mxu1  ;;  %v5853_v41 = vld [vmem:[#allocation2 + $0xb0] sm:$0x1]  ;;  %v6988_v42 = vcombine.low %v5326_v13, %v5336_v21  ;;  %v9513_v16 = vrot.slane %v5371_v34, 5  ;;  %v5375_v4 = vshrl.u32 %v5062_v6, 16  ;;  %v9516_v19 = vadd.f32 %v7385_v44, %v10196_v31  ;;  %v9518_v22 = vld [vmem:[#allocation2 + $0xb8] sm:$0xf] }
 0x18f   : > { %7583 = vmatprep.mubr.msk.bf16.mxu1 %vm1216_vm7, %v9426_v48  ;;  %v5359_v48 = vrot.slane %v5357_v38, 5  ;;  %v5368_v9 = vor.u32 %v5367_v62, %v5364_v47  ;;  %v5381_v12 = vshll.u32 %v5063_v29, 16  ;;  %v5355_v20 = vrot.slane %v5354_v8, 4  ;;  %v5065_v34 = vld [vmem:[#allocation2 + $0xb8] sm:$0xf] }
 0x190   : > { %v9521_v13 = vadd.f32 %v2112_v52, %v10197_v17  ;;  %v9523_v21 = vpop.f32.mrf.mxu1  ;;  %v6000_v56 = vrot.slane %v5853_v41, 5  ;;  %v5377_v18 = vrot.slane %v5375_v4, 4  ;;  %v5350_v6 = vsel %vm8114_vm2, %v9507_v55, %v9465_v30  ;;  %v5066_v29 = vld [vmem:[#allocation2 + $0xbc] sm:$0x1]  ;;  %v5854_v31 = vld [vmem:[#allocation2 + $0xb4] sm:$0xe] }
 0x191   : > { %v9531_v44 = vsel %vm8087_vm13, %v7022_v26, %v5997_v27  ;;  %v5999_v38 = vrot.slane %v5997_v27, 4  ;;  %v5386_v8 = vshrl.u32 %v5064_v50, 16  ;;  %v5369_v52 = vrot.slane %v5368_v9, 4 }
 0x192   : > { %v5378_v62 = vor.u32 %v5377_v18, %v9513_v16  ;;  %v5383_v41 = vrot.slane %v5381_v12, 5  ;;  %v5389_v4 = vshll.u32 %v5064_v50, 16  ;;  %v6004_v17 = vrot.slane %v9518_v22, 5  ;;  %v5856_v18 = vld [vmem:[#allocation2 + $0xbc] sm:$0x1] }
 0x193   : > { %v9533_v47 = vpop.f32.mrf.mxu0  ;;  %v5388_v53 = vrot.slane %v5386_v8, 4  ;;  %v5395_v23 = vshll.u32 %v5065_v34, 16  ;;  %v5399_v30 = vshrl.u32 %v5065_v34, 16  ;;  %v10199_v26 = vcombine.low %v9323_v11, %v9329_v1  ;;  %v10201_v11 = vld [vmem:[#allocation11_spill] sm:$0xff]  ;;  %v5067_v8 = vld [vmem:[#allocation2 + $0xc0] sm:$0xf] }
 0x194   : > { %10198 = vst [vmem:[#allocation5_spill] sm:$0xff] %v9533_v47  ;;  %v5360_v55 = vsel %vm8114_vm2, %v5355_v20, %v5359_v48  ;;  %v5379_v27 = vrot.slane %v5378_v62, 4  ;;  %v5391_v50 = vrot.slane %v5389_v4, 5  ;;  %v5405_v12 = vshll.u32 %v5066_v29, 16 }
 0x195   : > { %7614 = vmatmul.mubr.msk.bf16.gmra.mxu0 %vm1216_vm7, %v10199_v26  ;;  %v10200_v22 = vcombine.low %v9371_v3, %v9375_v14  ;;  %v9552_v1 = vadd.f32 %v7386_v37, %v10201_v11  ;;  %v5397_v48 = vrot.slane %v5395_v23, 5  ;;  %v5401_v20 = vrot.slane %v5399_v30, 4  ;;  %v9558_v34 = vpop.f32.mrf.mxu0  ;;  %v9565_v37 = vld [vmem:[#allocation2 + $0xc4] sm:$0xf]  ;;  %v5857_v11 = vld [vmem:[#allocation2 + $0xc0] sm:$0xe] }
 0x196   : > { %7584 = vmatmul.mubr.msk.bf16.gmra.mxu1 %vm1216_vm7, %v6987_v2  ;;  %v9544_v9 = vpop.f32.mrf.mxu1  ;;  %v9556_v2 = vsel %vm8087_vm13, %v5999_v38, %v6000_v56  ;;  %10202 = vst [vmem:[#allocation7_spill] sm:$0xff] %v9558_v34  ;;  %v5374_v3 = vsel %vm8114_vm2, %v5369_v52, %v9513_v16  ;;  %v5384_v14 = vsel %vm8114_vm2, %v5379_v27, %v5383_v41  ;;  %v6006_v62 = vrot.slane %v6004_v17, 4  ;;  %v5068_v30 = vld [vmem:[#allocation2 + $0xc4] sm:$0xf]  ;;  %v5070_v16 = vld [vmem:[#allocation2 + $0xcc] sm:$0xf] }
 0x197   : > { %7617 = vmatprep.mubr.msk.bf16.mxu0 %vm1216_vm7, %v10200_v22  ;;  %7587 = vmatprep.mubr.msk.bf16.mxu1 %vm1216_vm7, %v6988_v42  ;;  %v7023_v42 = vrot.slane %v5854_v31, 9  ;;  %v5392_v29 = vor.u32 %v5391_v50, %v5388_v53  ;;  %v6007_v4 = vrot.slane %v5856_v18, 5  ;;  %v5402_v56 = vor.u32 %v5401_v20, %v5397_v48  ;;  %v9571_v53 = vpop.f32.mrf.mxu0  ;;  %v5859_v31 = vld [vmem:[#allocation2 + $0xc8] sm:$0x1]  ;;  %v393_v20 = vld [vmem:[#allocation2 + $0xd4] sm:$0x1] }
 0x198   : > { %v5407_v38 = vrot.slane %v5405_v12, 5  ;;  %v9567_v23 = vpop.f32.mrf.mxu1  ;;  %v6989_v26 = vcombine.low %v5350_v6, %v5360_v55  ;;  %v5410_v34 = vshrl.u32 %v5067_v8, 16  ;;  %v5413_v47 = vshll.u32 %v5067_v8, 16  ;;  %10203 = vst [vmem:[#allocation9_spill] sm:$0xff] %v9571_v53  ;;  %v5069_v18 = vld [vmem:[#allocation2 + $0xc8] sm:$0x1] }
 0x199   : > { %v5393_v22 = vrot.slane %v5392_v29, 4  ;;  %v6990_v52 = vcombine.low %v5374_v3, %v5384_v14  ;;  %v5403_v41 = vrot.slane %v5402_v56, 4  ;;  %v6011_v27 = vrot.slane %v9565_v37, 5  ;;  %v5860_v56 = vld [vmem:[#allocation2 + $0xcc] sm:$0xe] }
 0x19a   : > { %v9576_v50 = vsel %vm8087_vm13, %v7023_v42, %v6004_v17  ;;  %v5412_v6 = vrot.slane %v5410_v34, 4  ;;  %v5415_v55 = vrot.slane %v5413_v47, 5  ;;  %v5419_v12 = vshll.u32 %v5068_v30, 16  ;;  %v7390_v29 = vpop.f32.mrf.mxu1 }
 0x19b   : > { %v9580_v8 = vsel %vm8087_vm13, %v6006_v62, %v6007_v4  ;;  %v5398_v3 = vsel %vm8114_vm2, %v5393_v22, %v5397_v48  ;;  %v5408_v14 = vsel %vm8114_vm2, %v5403_v41, %v5407_v38  ;;  %v5423_v37 = vshrl.u32 %v5068_v30, 16  ;;  %v5071_v4 = vld [vmem:[#allocation2 + $0xd0] sm:$0xf]  ;;  %v9596_v38 = vpop.f32.mrf.mxu0 }
 0x19c   : > { %v10204_v17 = vcombine.low %v9413_v10, %v9417_v0  ;;  %v7024_v47 = vrot.slane %v5857_v11, 9  ;;  %v6014_v34 = vrot.slane %v5859_v31, 5  ;;  %v5416_v42 = vor.u32 %v5415_v55, %v5412_v6  ;;  %10206 = vst [vmem:[#allocation11_spill] sm:$0xff] %v9596_v38  ;;  %v5861_v11 = vld [vmem:[#allocation2 + $0xd0] sm:$0xf] }
 0x19d   : > { %v5421_v62 = vrot.slane %v5419_v12, 5  ;;  %v10205_v48 = vcombine.low %v9436_v36, %v9446_v60  ;;  %v6013_v30 = vrot.slane %v6011_v27, 4  ;;  %v5425_v10 = vrot.slane %v5423_v37, 4  ;;  %v2131_v12 = vpop.f32.mrf.mxu1 }
 0x19e   : > { %7618 = vmatmul.mubr.msk.bf16.gmra.mxu0 %vm1216_vm7, %v10204_v17  ;;  %7588 = vmatmul.mubr.msk.bf16.gmra.mxu1 %vm1216_vm7, %v6989_v26  ;;  %v5429_v0 = vshll.u32 %v5069_v18, 16  ;;  %v394_v26 = vsel %vm7782_vm6, 0, %v393_v20  ;;  %v6991_v41 = vcombine.low %v5398_v3, %v5408_v14  ;;  %v5417_v31 = vrot.slane %v5416_v42, 4  ;;  %v10208_v42 = vld [vmem:[#allocation13_spill] sm:$0xff] }
 0x19f   : > { %7621 = vmatprep.mubr.msk.bf16.mxu0 %vm1216_vm7, %v10205_v48  ;;  %7591 = vmatprep.mubr.msk.bf16.mxu1 %vm1216_vm7, %v6990_v52  ;;  %395 = vst [vmem:[#allocation2 + $0xd4] sm:$0x1] %v394_v26  ;;  %v5434_v6 = vshrl.u32 %v5070_v16, 16  ;;  %v5437_v55 = vshll.u32 %v5070_v16, 16  ;;  %v5426_v36 = vor.u32 %v5425_v10, %v5421_v62  ;;  %v5443_v17 = vshll.u32 %v5071_v4, 16 }
 0x1a0   : > { %v5431_v60 = vrot.slane %v5429_v0, 5  ;;  %v5447_v48 = vshrl.u32 %v5071_v4, 16  ;;  %v5422_v52 = vsel %vm8114_vm2, %v5417_v31, %v5421_v62  ;;  %v7025_v38 = vrot.slane %v5860_v56, 9  ;;  %v10209_v62 = vld [vmem:[#allocation15_spill] sm:$0xff] }
 0x1a1   : > { %v6018_v37 = vrot.slane %v5861_v11, 5  ;;  %v5436_v18 = vrot.slane %v5434_v6, 4  ;;  %v5427_v20 = vrot.slane %v5426_v36, 4  ;;  %v5439_v22 = vrot.slane %v5437_v55, 5  ;;  %v10214_v36 = vld [vmem:[#allocation20_spill] sm:$0xff] }
 0x1a2   : > { %v5445_v3 = vrot.slane %v5443_v17, 5  ;;  %v5449_v14 = vrot.slane %v5447_v48, 4  ;;  %v2212_v16 = vadd.f32 %v9523_v21, %v10208_v42  ;;  %v7040_v10 = vcombine.low %v9576_v50, %v9580_v8  ;;  %v10212_v8 = vld [vmem:[#allocation19_spill] sm:$0xff]  ;;  %v10218_v42 = vld [vmem:[#allocation22_spill] sm:$0xff] }
 0x1a3   : > { %v9602_v53 = vpop.f32.mrf.mxu0  ;;  %v6012_v4 = vsel %vm8087_vm13, %v7024_v47, %v6011_v27  ;;  %v6015_v56 = vsel %vm8087_vm13, %v6013_v30, %v6014_v34  ;;  %v2217_v0 = vadd.f32 %v9544_v9, %v10209_v62  ;;  %v5432_v26 = vsel %vm8114_vm2, %v5427_v20, %v5431_v60  ;;  %v10211_v27 = vld [vmem:[#allocation17_spill] sm:$0xff] }
 0x1a4   : > { %v5440_v31 = vor.u32 %v5439_v22, %v5436_v18  ;;  %v5450_v6 = vor.u32 %v5449_v14, %v5445_v3  ;;  %v10210_v21 = vcombine.low %v9481_v7, %v9485_v25  ;;  %v2215_v50 = vadd.f32 %v9567_v23, %v10211_v27  ;;  %v10217_v14 = vld [vmem:[#allocation21_spill] sm:$0xff] }
 0x1a5   : > { %v2713_v55 = vpop.f32.mrf.mxu0  ;;  %v2218_v47 = vadd.f32 %v7390_v29, %v10212_v8  ;;  %v6992_v9 = vcombine.low %v5422_v52, %v5432_v26  ;;  %v6020_v34 = vrot.slane %v6018_v37, 4  ;;  %v10213_v30 = vcombine.low %v9531_v44, %v9556_v2  ;;  %v10215_v44 = vld [vmem:[#allocation28_spill] sm:$0xff]  ;;  %v10216_v2 = vld [vmem:[#allocation25_spill] sm:$0xff] }
 0x1a6   : > { %v7393_v11 = vpop.f32.mrf.mxu1  ;;  %7622 = vmatmul.mubr.msk.bf16.gmra.mxu0 %vm1216_vm7, %v10210_v21  ;;  %7592 = vmatmul.mubr.msk.bf16.gmra.mxu1 %vm1216_vm7, %v6991_v41  ;;  %v2216_v60 = vadd.f32 %v2131_v12, %v10214_v36  ;;  %v7041_v17 = vcombine.low %v6012_v4, %v6015_v56  ;;  %v5862_v7 = vld [vmem:[#allocation2 + $0xd4] sm:$0x1]  ;;  %v9631_v25 = vsel %vm8087_vm13, %v7025_v38, %v6018_v37  ;;  %v5441_v48 = vrot.slane %v5440_v31, 4  ;;  %v10219_v38 = vld [vmem:[#allocation29_spill] sm:$0xff]  ;;  %v10220_v37 = vld [vmem:[#allocation26_spill] sm:$0xff] }
 0x1a7   : > { %7625 = vmatprep.mubr.msk.bf16.mxu0 %vm1216_vm7, %v10213_v30  ;;  %v5072_v41 = vld [vmem:[#allocation2 + $0xd4] sm:$0x1]  ;;  %v7428_v18 = vpop.f32.mrf.mxu0  ;;  %7595 = vmatprep.mubr.msk.bf16.mxu1 %vm1216_vm7, %v6992_v9  ;;  %v6021_v29 = vrot.slane %v5862_v7, 5  ;;  %v5451_v52 = vrot.slane %v5450_v6, 4  ;;  %v2762_v22 = vadd.f32 %v10216_v2, %v10215_v44  ;;  %v2221_v12 = vadd.f32 %v7393_v11, %v10217_v14  ;;  %v10221_v31 = vld [vmem:[#allocation30_spill] sm:$0xff] }
 0x1a8   : > { %v2144_v23 = vpop.f32.mrf.mxu1  ;;  %v5453_v20 = vshll.u32 %v5072_v41, 16  ;;  %v2760_v26 = vadd.f32 %v10220_v37, %v10219_v38  ;;  %v10222_v21 = vld [vmem:[#allocation27_spill] sm:$0xff]  ;;  %v5446_v6 = vsel %vm8114_vm2, %v5441_v48, %v5445_v3  ;;  %v9648_v11 = vadd.f32 %v9287_v33, %v9311_v46  ;;  %v10225_v46 = vld [vmem:[#allocation24_spill] sm:$0xff] }
 0x1a9   : > { %v2219_v4 = vadd.f32 %v2144_v23, %v10218_v42  ;;  %v2716_v62 = vpop.f32.mrf.mxu0  ;;  %v2763_v27 = vadd.f32 %v10222_v21, %v10221_v31  ;;  %v6022_v8 = vsel %vm8087_vm13, %v6020_v34, %v6021_v29  ;;  %v10223_v30 = vld [vmem:[#allocation23_spill] sm:$0xff]  ;;  %v9653_v23 = vadd.f32 %v9315_v40, %v9332_v49  ;;  %v10224_v34 = vld [vmem:[#allocation49_spill] sm:$0xff]  ;;  %v10233_v38 = vld [vmem:[#allocation32_spill] sm:$0xff] }
 0x1aa   : > { %v7394_v56 = vpop.f32.mrf.mxu1  ;;  %v5455_v9 = vrot.slane %v5453_v20, 5  ;;  %v9657_v51 = vadd.f32 %v9335_v45, %v9338_v61  ;;  %v9661_v3 = vadd.f32 %v10224_v34, %v9388_v35  ;;  %v9668_v29 = vadd.f32 %v9378_v39, %v9455_v63  ;;  %v10226_v20 = vld [vmem:[#allocation50_spill] sm:$0xff]  ;;  %v10232_v2 = vld [vmem:[#allocation35_spill] sm:$0xff]  ;;  %v10236_v31 = vld [vmem:[#allocation37_spill] sm:$0xff] }
 0x1ab   : > { %v2222_v36 = vadd.f32 %v7394_v56, %v10223_v30  ;;  %v7467_v41 = vpop.f32.mrf.mxu0  ;;  %v9672_v40 = vadd.f32 %v9400_v43, %v9463_v32  ;;  %v9676_v35 = vadd.f32 %v10226_v20, %v9470_v58  ;;  %v9680_v57 = vadd.f32 %v9432_v59, %v9498_v5  ;;  %v10227_v58 = vld [vmem:[#allocation5_spill] sm:$0xff]  ;;  %v10234_v37 = vld [vmem:[#allocation31_spill] sm:$0xff]  ;;  %v10241_v34 = vld [vmem:[#allocation34_spill] sm:$0xff] }
 0x1ac   : > { %v2147_v7 = vpop.f32.mrf.mxu1  ;;  %v5456_v33 = vsel %vm8114_vm2, %v5451_v52, %v5455_v9  ;;  %v9684_v52 = vadd.f32 %v9457_v28, %v9516_v19  ;;  %v9689_v43 = vadd.f32 %v9474_v24, %v9521_v13  ;;  %v9693_v63 = vadd.f32 %v9489_v15, %v9552_v1  ;;  %v10228_v19 = vld [vmem:[#allocation7_spill] sm:$0xff]  ;;  %v10229_v24 = vld [vmem:[#allocation9_spill] sm:$0xff] }
 0x1ad   : > { %v2220_v48 = vadd.f32 %v2147_v7, %v10225_v46  ;;  %v6993_v49 = vcombine.low %v5446_v6, %v5456_v33  ;;  %v3813_v61 = vpop.f32.mrf.mxu0  ;;  %v9696_v32 = vadd.f32 %v9511_v54, %v2212_v16  ;;  %v9701_v5 = vadd.f32 %v10227_v58, %v2217_v0  ;;  %v10230_v1 = vld [vmem:[#allocation11_spill] sm:$0xff]  ;;  %v10238_v9 = vld [vmem:[#allocation33_spill] sm:$0xff] }
 0x1ae   : > { %v7433_v45 = vpop.f32.mrf.mxu1  ;;  %7626 = vmatmul.mubr.msk.bf16.gmra.mxu0 %vm1216_vm7, %v7040_v10  ;;  %v9704_v10 = vadd.f32 %v10228_v19, %v2215_v50  ;;  %v9707_v13 = vadd.f32 %v10229_v24, %v2218_v47  ;;  %v9710_v44 = vadd.f32 %v10230_v1, %v2216_v60  ;;  %v9713_v54 = vadd.f32 %v9602_v53, %v2221_v12  ;;  %v10246_v1 = vld [vmem:[#allocation43_spill] sm:$0xff] }
 0x1af   : > { %v3184_v39 = vadd.f32 %v7433_v45, %v2762_v22  ;;  %7629 = vmatprep.mubr.msk.bf16.mxu0 %vm1216_vm7, %v7041_v17  ;;  %7596 = vmatmul.mubr.msk.bf16.gmra.mxu1 %vm1216_vm7, %v6993_v49  ;;  %v7468_v28 = vpop.f32.mrf.mxu0  ;;  %v9715_v16 = vadd.f32 %v2713_v55, %v2219_v4  ;;  %v10231_v17 = vld [vmem:[#allocation6_spill] sm:$0xff]  ;;  %v9719_v42 = vadd.f32 %v7428_v18, %v2222_v36  ;;  %v10237_v18 = vld [vmem:[#allocation44_spill] sm:$0xff] }
 0x1b0   : > { %v3023_v59 = vpop.f32.mrf.mxu1  ;;  %v2195_v22 = vadd.f32 %v10232_v2, %v10231_v17  ;;  %v9721_v50 = vadd.f32 %v2716_v62, %v2220_v48  ;;  %v7042_v56 = vcombine.low %v9631_v25, %v6022_v8  ;;  %v2761_v53 = vadd.f32 %v10234_v37, %v10233_v38  ;;  %v10239_v25 = vld [vmem:[#allocation10_spill] sm:$0xff]  ;;  %v10242_v45 = vld [vmem:[#allocation12_spill] sm:$0xff] }
 0x1b1   : > { %v3182_v15 = vadd.f32 %v3023_v59, %v2760_v26  ;;  %v3816_v14 = vpop.f32.mrf.mxu0  ;;  %v9723_v47 = vadd.f32 %v7467_v41, %v3184_v39  ;;  %v10235_v26 = vld [vmem:[#allocation8_spill] sm:$0xff]  ;;  %v2766_v62 = vadd.f32 %v10238_v9, %v10237_v18  ;;  %v10249_v37 = vld [vmem:[#allocation46_spill] sm:$0xff] }
 0x1b2   : > { %v7434_v0 = vpop.f32.mrf.mxu1  ;;  %v2198_v21 = vadd.f32 %v10236_v31, %v10235_v26  ;;  %v2764_v33 = vadd.f32 %v10241_v34, %v2195_v22  ;;  %v10244_v59 = vld [vmem:[#allocation36_spill] sm:$0xff]  ;;  %v10251_v18 = vld [vmem:[#allocation18_spill] sm:$0xff] }
 0x1b3   : > { %v3185_v60 = vadd.f32 %v7434_v0, %v2763_v27  ;;  %v9728_v12 = vadd.f32 %v3813_v61, %v3182_v15  ;;  %v7471_v4 = vpop.f32.mrf.mxu0  ;;  %v10240_v27 = vld [vmem:[#allocation39_spill] sm:$0xff]  ;;  %v10243_v61 = vld [vmem:[#allocation41_spill] sm:$0xff]  ;;  %v10245_v15 = vld [vmem:[#allocation14_spill] sm:$0xff] }
 0x1b4   : > { %v3026_v55 = vpop.f32.mrf.mxu1  ;;  %v2196_v8 = vadd.f32 %v10240_v27, %v10239_v25  ;;  %v2201_v20 = vadd.f32 %v10243_v61, %v10242_v45  ;;  %v2199_v17 = vadd.f32 %v10246_v1, %v10245_v15  ;;  %v10247_v0 = vld [vmem:[#allocation38_spill] sm:$0xff]  ;;  %v10248_v38 = vld [vmem:[#allocation16_spill] sm:$0xff] }
 0x1b5   : > { %v3183_v6 = vadd.f32 %v3026_v55, %v2761_v53  ;;  %v9734_v30 = vadd.f32 %v7468_v28, %v3185_v60  ;;  %v3829_v7 = vpop.f32.mrf.mxu0  ;;  %v2767_v28 = vadd.f32 %v10244_v59, %v2198_v21  ;;  %v2202_v53 = vadd.f32 %v10249_v37, %v10248_v38  ;;  %v10250_v26 = vld [vmem:[#allocation40_spill] sm:$0xff]  ;;  %v10253_v25 = vld [vmem:[#allocation42_spill] sm:$0xff] }
 0x1b6   : > { %v7437_v36 = vpop.f32.mrf.mxu1  ;;  %7630 = vmatmul.mubr.msk.bf16.gmra.mxu0 %vm1216_vm7, %v7042_v56  ;;  %v2765_v22 = vadd.f32 %v10247_v0, %v2196_v8  ;;  %v2770_v31 = vadd.f32 %v10250_v26, %v2201_v20  ;;  %v10252_v9 = vld [vmem:[#allocation48_spill] sm:$0xff]  ;;  %v2768_v27 = vadd.f32 %v10253_v25, %v2199_v17 }
 0x1b7   : > { %v3188_v41 = vadd.f32 %v7437_v36, %v2766_v62  ;;  %v9740_v46 = vadd.f32 %v3816_v14, %v3183_v6  ;;  %v7472_v49 = vpop.f32.mrf.mxu0  ;;  %v2200_v62 = vadd.f32 %v10252_v9, %v10251_v18 }
 0x1b8   : > { %v3039_v48 = vpop.f32.mrf.mxu1 }
 0x1b9   : > { %v3186_v39 = vadd.f32 %v3039_v48, %v2764_v33  ;;  %v9745_v58 = vadd.f32 %v7471_v4, %v3188_v41  ;;  %v3832_v24 = vpop.f32.mrf.mxu0  ;;  %v10254_v33 = vld [vmem:[#allocation45_spill] sm:$0xff] }
 0x1ba   : > { %v7438_v19 = vpop.f32.mrf.mxu1  ;;  %v2771_v48 = vadd.f32 %v10254_v33, %v2202_v53 }
 0x1bb   : > { %v3189_v2 = vadd.f32 %v7438_v19, %v2767_v28  ;;  %v9750_v14 = vadd.f32 %v3829_v7, %v3186_v39  ;;  %v7475_v60 = vpop.f32.mrf.mxu0  ;;  %v10255_v39 = vld [vmem:[#allocation47_spill] sm:$0xff] }
 0x1bc   : > { %v3042_v56 = vpop.f32.mrf.mxu1  ;;  %v2769_v59 = vadd.f32 %v10255_v39, %v2200_v62 }
 0x1bd   : > { %v3187_v55 = vadd.f32 %v3042_v56, %v2765_v22  ;;  %v9755_v4 = vadd.f32 %v7472_v49, %v3189_v2  ;;  %v3845_v6 = vpop.f32.mrf.mxu0 }
 0x1be   : > { %v7441_v21 = vpop.f32.mrf.mxu1 }
 0x1bf   : > { %v3192_v36 = vadd.f32 %v7441_v21, %v2770_v31  ;;  %v9760_v7 = vadd.f32 %v3832_v24, %v3187_v55  ;;  %v7476_v41 = vpop.f32.mrf.mxu0 }
 0x1c0   : > { %v3055_v8 = vpop.f32.mrf.mxu1 }
 0x1c1   : > { %v3190_v34 = vadd.f32 %v3055_v8, %v2768_v27  ;;  %v9763_v45 = vadd.f32 %v7475_v60, %v3192_v36  ;;  %v3848_v49 = vpop.f32.mrf.mxu0 }
 0x1c2   : > { %v7442_v61 = vpop.f32.mrf.mxu1 }
 0x1c3   : > { %v3193_v20 = vadd.f32 %v7442_v61, %v2771_v48  ;;  %v9766_v28 = vadd.f32 %v3845_v6, %v3190_v34  ;;  %v7479_v15 = vpop.f32.mrf.mxu0 }
 0x1c4   : > { %v3058_v19 = vpop.f32.mrf.mxu1 }
 0x1c5   : > { %v3191_v1 = vadd.f32 %v3058_v19, %v2769_v59  ;;  %v9768_v17 = vadd.f32 %v7476_v41, %v3193_v20  ;;  %v3861_v2 = vpop.f32.mrf.mxu0 }
 0x1c6   : > { %v7445_v24 = vpop.f32.mrf.mxu1 }
 0x1c7   : > { %v3196_v0 = vadd.f32 %v7445_v24, %v9648_v11  ;;  %v9771_v22 = vadd.f32 %v3848_v49, %v3191_v1  ;;  %v7480_v60 = vpop.f32.mrf.mxu0 }
 0x1c8   : > { %v3071_v56 = vpop.f32.mrf.mxu1 }
 0x1c9   : > { %v3194_v38 = vadd.f32 %v3071_v56, %v9653_v23  ;;  %v9774_v37 = vadd.f32 %v7479_v15, %v3196_v0  ;;  %v3864_v55 = vpop.f32.mrf.mxu0 }
 0x1ca   : > { %v7446_v53 = vpop.f32.mrf.mxu1 }
 0x1cb   : > { %v3197_v26 = vadd.f32 %v7446_v53, %v9657_v51  ;;  %v9777_v31 = vadd.f32 %v3861_v2, %v3194_v38  ;;  %v7483_v6 = vpop.f32.mrf.mxu0 }
 0x1cc   : > { %v3074_v21 = vpop.f32.mrf.mxu1 }
 0x1cd   : > { %v3195_v18 = vadd.f32 %v3074_v21, %v9661_v3  ;;  %v9780_v9 = vadd.f32 %v7480_v60, %v3197_v26  ;;  %v3877_v62 = vpop.f32.mrf.mxu0 }
 0x1ce   : > { %v7449_v11 = vpop.f32.mrf.mxu1 }
 0x1cf   : > { %v3200_v36 = vadd.f32 %v7449_v11, %v9668_v29  ;;  %v9783_v25 = vadd.f32 %v3864_v55, %v3195_v18  ;;  %v7484_v27 = vpop.f32.mrf.mxu0 }
 0x1d0   : > { %v3087_v23 = vpop.f32.mrf.mxu1 }
 0x1d1   : > { %v3198_v8 = vadd.f32 %v3087_v23, %v9672_v40  ;;  %v9786_v41 = vadd.f32 %v7483_v6, %v3200_v36  ;;  %v3880_v34 = vpop.f32.mrf.mxu0 }
 0x1d2   : > { %v7450_v51 = vpop.f32.mrf.mxu1 }
 0x1d3   : > { %v3201_v33 = vadd.f32 %v7450_v51, %v9676_v35  ;;  %v9789_v48 = vadd.f32 %v3877_v62, %v3198_v8  ;;  %v7487_v61 = vpop.f32.mrf.mxu0 }
 0x1d4   : > { %v3090_v3 = vpop.f32.mrf.mxu1 }
 0x1d5   : > { %v3199_v49 = vadd.f32 %v3090_v3, %v9680_v57  ;;  %v9792_v20 = vadd.f32 %v7484_v27, %v3201_v33  ;;  %v3893_v39 = vpop.f32.mrf.mxu0 }
 0x1d6   : > { %v7453_v29 = vpop.f32.mrf.mxu1 }
 0x1d7   : > { %v3204_v59 = vadd.f32 %v7453_v29, %v9684_v52  ;;  %v9795_v19 = vadd.f32 %v3880_v34, %v3199_v49  ;;  %v7488_v15 = vpop.f32.mrf.mxu0 }
 0x1d8   : > { %v3103_v40 = vpop.f32.mrf.mxu1 }
 0x1d9   : > { %10256 = vst [vmem:[#allocation4_spill] sm:$0xff] %v9795_v19  ;;  %v3202_v1 = vadd.f32 %v3103_v40, %v9689_v43  ;;  %v9798_v24 = vadd.f32 %v7487_v61, %v3204_v59  ;;  %v3896_v2 = vpop.f32.mrf.mxu0 }
 0x1da   : > { %v7454_v35 = vpop.f32.mrf.mxu1 }
 0x1db   : > { %10257 = vst [vmem:[#allocation13_spill] sm:$0xff] %v9798_v24  ;;  %v3205_v0 = vadd.f32 %v7454_v35, %v9693_v63  ;;  %v9801_v56 = vadd.f32 %v3893_v39, %v3202_v1  ;;  %v7491_v38 = vpop.f32.mrf.mxu0 }
 0x1dc   : > { %v3106_v57 = vpop.f32.mrf.mxu1 }
 0x1dd   : > { %10258 = vst [vmem:[#allocation15_spill] sm:$0xff] %v9801_v56  ;;  %v3203_v60 = vadd.f32 %v3106_v57, %v9696_v32  ;;  %v9804_v53 = vadd.f32 %v7488_v15, %v3205_v0  ;;  %v3909_v26 = vpop.f32.mrf.mxu0 }
 0x1de   : > { %v7457_v52 = vpop.f32.mrf.mxu1 }
 0x1df   : > { %10259 = vst [vmem:[#allocation17_spill] sm:$0xff] %v9804_v53  ;;  %v3208_v55 = vadd.f32 %v7457_v52, %v9701_v5  ;;  %v9807_v21 = vadd.f32 %v3896_v2, %v3203_v60  ;;  %v7492_v63 = vpop.f32.mrf.mxu0 }
 0x1e0   : > { %v3119_v43 = vpop.f32.mrf.mxu1 }
 0x1e1   : > { %10260 = vst [vmem:[#allocation19_spill] sm:$0xff] %v9807_v21  ;;  %v3206_v6 = vadd.f32 %v3119_v43, %v9704_v10  ;;  %v9810_v18 = vadd.f32 %v7491_v38, %v3208_v55  ;;  %v3912_v5 = vpop.f32.mrf.mxu0 }
 0x1e2   : > { %v7458_v11 = vpop.f32.mrf.mxu1 }
 0x1e3   : > { %10261 = vst [vmem:[#allocation20_spill] sm:$0xff] %v9810_v18  ;;  %v3209_v62 = vadd.f32 %v7458_v11, %v9707_v13  ;;  %v9813_v36 = vadd.f32 %v3909_v26, %v3206_v6 }
 0x1e4   : > { %v3122_v32 = vpop.f32.mrf.mxu1 }
 0x1e5   : > { %10262 = vst [vmem:[#allocation28_spill] sm:$0xff] %v9813_v36  ;;  %v3207_v23 = vadd.f32 %v3122_v32, %v9710_v44  ;;  %v9816_v27 = vadd.f32 %v7492_v63, %v3209_v62 }
 0x1e7   : > { %10263 = vst [vmem:[#allocation25_spill] sm:$0xff] %v9816_v27  ;;  %v9818_v8 = vadd.f32 %v3912_v5, %v3207_v23 }
 0x1e9   : > { %10264 = vst [vmem:[#allocation21_spill] sm:$0xff] %v9818_v8 }
 0x1ec   : > { %v7461_v51 = vpop.f32.mrf.mxu1 }
 0x1ed   : > { %v3212_v34 = vadd.f32 %v7461_v51, %v9713_v54 }
 0x1ee   : > { %v3135_v10 = vpop.f32.mrf.mxu1 }
 0x1ef   : > { %v3210_v33 = vadd.f32 %v3135_v10, %v9715_v16 }
 0x1f0   : > { %v7462_v3 = vpop.f32.mrf.mxu1 }
 0x1f1   : > { %v3213_v61 = vadd.f32 %v7462_v3, %v9719_v42 }
 0x1f2   : > { %v3138_v13 = vpop.f32.mrf.mxu1 }
 0x1f3   : > { %v3211_v49 = vadd.f32 %v3138_v13, %v9721_v50 }
 0x1f4   : > { %v9824_v39 = vpop.f32.mrf.mxu1 }
 0x1f5   : > { %v7495_v29 = vpop.f32.mrf.mxu0 }
 0x1f6   : > { %v9826_v44 = vadd.f32 %v7495_v29, %v3212_v34  ;;  %v9828_v40 = vpop.f32.mrf.mxu1 }
 0x1f7   : > { %v3925_v59 = vpop.f32.mrf.mxu0 }
 0x1f8   : > { %10265 = vst [vmem:[#allocation22_spill] sm:$0xff] %v9826_v44  ;;  %v9830_v15 = vadd.f32 %v3925_v59, %v3210_v33  ;;  %v9832_v1 = vpop.f32.mrf.mxu1 }
 0x1f9   : > { %v7496_v54 = vpop.f32.mrf.mxu0 }
 0x1fa   : > { %10266 = vst [vmem:[#allocation29_spill] sm:$0xff] %v9830_v15  ;;  %v9834_v16 = vadd.f32 %v7496_v54, %v3213_v61  ;;  %v9836_v42 = vpop.f32.mrf.mxu1 }
 0x1fb   : > { %v3928_v35 = vpop.f32.mrf.mxu0 }
 0x1fc   : > { %10267 = vst [vmem:[#allocation26_spill] sm:$0xff] %v9834_v16  ;;  %v9838_v2 = vadd.f32 %v3928_v35, %v3211_v49  ;;  %v9842_v0 = vpop.f32.mrf.mxu1 }
 0x1fd   : > { %v9840_v50 = vpop.f32.mrf.mxu0 }
 0x1fe   : > { %10268 = vst [vmem:[#allocation30_spill] sm:$0xff] %v9838_v2  ;;  %v9846_v60 = vpop.f32.mrf.mxu1 }
 0x1ff   : > { %v9844_v57 = vpop.f32.mrf.mxu0 }
 0x200   : > { %v9850_v52 = vpop.f32.mrf.mxu1 }
 0x201   : > { %v9848_v38 = vpop.f32.mrf.mxu0 }
 0x202   : > { %v9854_v26 = vpop.f32.mrf.mxu1 }
 0x203   : > { %v9852_v55 = vpop.f32.mrf.mxu0 }
 0x205   : > { %v9856_v43 = vpop.f32.mrf.mxu0 }
 0x206   : > { %v9858_v6 = vpop.f32.mrf.mxu1 }
 0x207   : > { %v9860_v63 = vpop.f32.mrf.mxu0 }
 0x208   : > { %v9862_v11 = vpop.f32.mrf.mxu1 }
 0x209   : > { %v9864_v62 = vpop.f32.mrf.mxu0 }
 0x20a   : > { %v9866_v32 = vpop.f32.mrf.mxu1 }
 0x20b   : > { %v9868_v23 = vpop.f32.mrf.mxu0 }
 0x20c   : > { %v9870_v5 = vpop.f32.mrf.mxu1 }
 0x20d   : > { %v9872_v51 = vpop.f32.mrf.mxu0 }
 0x20e   : > { %v9874_v34 = vpop.f32.mrf.mxu1 }
 0x20f   : > { %v9876_v10 = vpop.f32.mrf.mxu0 }
 0x210   : > { %v9878_v33 = vpop.f32.mrf.mxu1 }
 0x211   : > { %v9880_v3 = vpop.f32.mrf.mxu0 }
 0x212   : > { %v9882_v61 = vpop.f32.mrf.mxu1 }
 0x213   : > { %v9884_v13 = vpop.f32.mrf.mxu0 }
 0x214   : > { %v9886_v49 = vpop.f32.mrf.mxu1 }
 0x215   : > { %v9888_v29 = vpop.f32.mrf.mxu0 }
 0x216   : > { %v9890_v59 = vpop.f32.mrf.mxu1 }
 0x217   : > { %v9892_v54 = vpop.f32.mrf.mxu0 }
 0x218   : > { %v9894_v35 = vpop.f32.mrf.mxu1 }
 0x219   : > { %v9896_v2 = vpop.f32.mrf.mxu0 }
 0x21a   : > { %v9898_v16 = vpop.f32.mrf.mxu1 }
 0x21b   : > { %10269 = vst [vmem:[#allocation27_spill] sm:$0xff] %v9898_v16  ;;  %v9900_v15 = vpop.f32.mrf.mxu0 }
 0x21c   : > { %v9902_v44 = vpop.f32.mrf.mxu1 }
 0x21d   : > { %10270 = vst [vmem:[#allocation23_spill] sm:$0xff] %v9902_v44  ;;  %v9904_v8 = vpop.f32.mrf.mxu0 }
 0x21e   : > { %10271 = vst [vmem:[#allocation49_spill] sm:$0xff] %v9904_v8  ;;  %v9906_v27 = vpop.f32.mrf.mxu1 }
 0x21f   : > { %10272 = vst [vmem:[#allocation24_spill] sm:$0xff] %v9906_v27  ;;  %v9908_v36 = vpop.f32.mrf.mxu0 }
 0x220   : > { %10273 = vst [vmem:[#allocation50_spill] sm:$0xff] %v9908_v36  ;;  %v9910_v18 = vpop.f32.mrf.mxu1 }
 0x221   : > { %10274 = vst [vmem:[#allocation5_spill] sm:$0xff] %v9910_v18  ;;  %v9912_v21 = vpop.f32.mrf.mxu0 }
 0x222   : > { %10275 = vst [vmem:[#allocation7_spill] sm:$0xff] %v9912_v21  ;;  %v9914_v53 = vpop.f32.mrf.mxu1 }
 0x223   : > { %10276 = vst [vmem:[#allocation9_spill] sm:$0xff] %v9914_v53  ;;  %v9916_v56 = vpop.f32.mrf.mxu0 }
 0x224   : > { %10277 = vst [vmem:[#allocation11_spill] sm:$0xff] %v9916_v56  ;;  %v9918_v24 = vpop.f32.mrf.mxu1 }
 0x225   : > { %10278 = vst [vmem:[#allocation6_spill] sm:$0xff] %v9918_v24  ;;  %v9920_v19 = vpop.f32.mrf.mxu0 }
 0x226   : > { %10279 = vst [vmem:[#allocation35_spill] sm:$0xff] %v9920_v19  ;;  %v9922_v16 = vpop.f32.mrf.mxu1 }
 0x227   : > { %10280 = vst [vmem:[#allocation32_spill] sm:$0xff] %v9922_v16  ;;  %v9924_v44 = vpop.f32.mrf.mxu0 }
 0x228   : > { %10281 = vst [vmem:[#allocation31_spill] sm:$0xff] %v9924_v44  ;;  %v9926_v8 = vpop.f32.mrf.mxu1 }
 0x229   : > { %10282 = vst [vmem:[#allocation8_spill] sm:$0xff] %v9926_v8  ;;  %v9928_v27 = vpop.f32.mrf.mxu0 }
 0x22a   : > { %10283 = vst [vmem:[#allocation37_spill] sm:$0xff] %v9928_v27  ;;  %v9930_v36 = vpop.f32.mrf.mxu1 }
 0x22b   : > { %10284 = vst [vmem:[#allocation44_spill] sm:$0xff] %v9930_v36  ;;  %v9932_v18 = vpop.f32.mrf.mxu0 }
 0x22c   : > { %10285 = vst [vmem:[#allocation33_spill] sm:$0xff] %v9932_v18  ;;  %v9934_v21 = vpop.f32.mrf.mxu1 }
 0x22d   : > { %10286 = vst [vmem:[#allocation10_spill] sm:$0xff] %v9934_v21  ;;  %v9936_v53 = vpop.f32.mrf.mxu0  ;;  %v4540_v21 = vadd.f32 %v9824_v39, %v9723_v47  ;;  %v4539_v47 = vadd.f32 %v9836_v42, %v9740_v46 }
 0x22e   : > { %10287 = vst [vmem:[#allocation39_spill] sm:$0xff] %v9936_v53  ;;  %v9938_v56 = vpop.f32.mrf.mxu1 }
 0x22f   : > { %10288 = vst [vmem:[#allocation34_spill] sm:$0xff] %v9938_v56  ;;  %v9940_v24 = vpop.f32.mrf.mxu0  ;;  %v4538_v56 = vadd.f32 %v9828_v40, %v9728_v12  ;;  %v4544_v40 = vadd.f32 %v9842_v0, %v9745_v58  ;;  %v4543_v0 = vadd.f32 %v9854_v26, %v9760_v7  ;;  %v4546_v7 = vadd.f32 %v9862_v11, %v9766_v28 }
 0x230   : > { %10289 = vst [vmem:[#allocation12_spill] sm:$0xff] %v9940_v24  ;;  %v9942_v16 = vpop.f32.mrf.mxu1 }
 0x231   : > { %10290 = vst [vmem:[#allocation41_spill] sm:$0xff] %v9942_v16  ;;  %v9944_v44 = vpop.f32.mrf.mxu0 }
 0x232   : > { %10291 = vst [vmem:[#allocation36_spill] sm:$0xff] %v9944_v44  ;;  %v9946_v8 = vpop.f32.mrf.mxu1  ;;  %v4541_v44 = vadd.f32 %v9832_v1, %v9734_v30  ;;  %v4962_v1 = vadd.f32 %v9852_v55, %v4539_v47  ;;  %v4548_v55 = vadd.f32 %v9858_v6, %v9763_v45 }
 0x233   : > { %10292 = vst [vmem:[#allocation14_spill] sm:$0xff] %v9946_v8  ;;  %v9948_v27 = vpop.f32.mrf.mxu0  ;;  %v4963_v8 = vadd.f32 %v9840_v50, %v4540_v21  ;;  %v4967_v50 = vadd.f32 %v9856_v43, %v4544_v40 }
 0x234   : > { %10293 = vst [vmem:[#allocation43_spill] sm:$0xff] %v9948_v27  ;;  %v9950_v36 = vpop.f32.mrf.mxu1  ;;  %v4964_v30 = vadd.f32 %v9848_v38, %v4541_v44  ;;  %v4545_v44 = vadd.f32 %v9850_v52, %v9755_v4 }
 0x235   : > { %10294 = vst [vmem:[#allocation38_spill] sm:$0xff] %v9950_v36  ;;  %v9954_v18 = vpop.f32.mrf.mxu0 }
 0x236   : > { %10295 = vst [vmem:[#allocation16_spill] sm:$0xff] %v9954_v18  ;;  %v7569_v53 = vpop.f32.mrf.mxu1  ;;  %v4961_v18 = vadd.f32 %v9844_v57, %v4538_v56  ;;  %v4542_v56 = vadd.f32 %v9846_v60, %v9750_v14  ;;  %v4968_v43 = vadd.f32 %v9864_v62, %v4545_v44 }
 0x237   : > { %v9958_v24 = vpop.f32.mrf.mxu0  ;;  %v5753_v39 = vadd.f32 %v7569_v53, %v4963_v8 }
 0x238   : > { %10296 = vst [vmem:[#allocation46_spill] sm:$0xff] %v9958_v24  ;;  %v5592_v16 = vpop.f32.mrf.mxu1  ;;  %v4965_v38 = vadd.f32 %v9860_v63, %v4542_v56  ;;  %v4971_v56 = vadd.f32 %v9872_v51, %v4548_v55  ;;  %v4550_v55 = vadd.f32 %v9878_v33, %v9777_v31 }
 0x239   : > { %v9963_v27 = vpop.f32.mrf.mxu0  ;;  %v5751_v24 = vadd.f32 %v5592_v16, %v4961_v18 }
 0x23a   : > { %v7570_v36 = vpop.f32.mrf.mxu1 }
 0x23b   : > { %v9969_v19 = vpop.f32.mrf.mxu0  ;;  %v5754_v8 = vadd.f32 %v7570_v36, %v4964_v30 }
 0x23c   : > { %v5595_v12 = vpop.f32.mrf.mxu1 }
 0x23d   : > { %v7603_v21 = vpop.f32.mrf.mxu0  ;;  %v5752_v42 = vadd.f32 %v5595_v12, %v4962_v1  ;;  %v4966_v12 = vadd.f32 %v9868_v23, %v4543_v0 }
 0x23e   : > { %v7573_v46 = vpop.f32.mrf.mxu1  ;;  %v6319_v53 = vadd.f32 %v7603_v21, %v5753_v39  ;;  %v4549_v21 = vadd.f32 %v9866_v32, %v9768_v17 }
 0x23f   : > { %v6158_v58 = vpop.f32.mrf.mxu0  ;;  %v5757_v60 = vadd.f32 %v7573_v46, %v4967_v50 }
 0x240   : > { %v5608_v18 = vpop.f32.mrf.mxu1  ;;  %6415 = vst [vmem:[%s9977_s14 + $0x10] sm:$0xff] %v6319_v53  ;;  %v6317_v16 = vadd.f32 %v6158_v58, %v5751_v24  ;;  %v6484_v46 = vmul.f32 %v6319_v53, %v6319_v53  ;;  %v4547_v58 = vadd.f32 %v9870_v5, %v9771_v22 }
 0x241   : > { %v7604_v57 = vpop.f32.mrf.mxu0  ;;  %v5755_v47 = vadd.f32 %v5608_v18, %v4965_v38 }
 0x242   : > { %v7574_v14 = vpop.f32.mrf.mxu1  ;;  %6413 = vst [vmem:[%s9977_s14] sm:$0xff] %v6317_v16  ;;  %v6320_v36 = vadd.f32 %v7604_v57, %v5754_v8  ;;  %v6482_v26 = vmul.f32 %v6317_v16, %v6317_v16 }
 0x243   : > { %v6161_v4 = vpop.f32.mrf.mxu0  ;;  %v5758_v6 = vadd.f32 %v7574_v14, %v4968_v43  ;;  %v4972_v14 = vadd.f32 %v9880_v3, %v4549_v21  ;;  %v4553_v43 = vadd.f32 %v9882_v61, %v9780_v9  ;;  %v4973_v21 = vadd.f32 %v9892_v54, %v4550_v55  ;;  %v10301_v55 = vld [vmem:[#allocation50_spill] sm:$0xff] }
 0x244   : > { %v5611_v52 = vpop.f32.mrf.mxu1  ;;  %6416 = vst [vmem:[%s9977_s14 + $0x18] sm:$0xff] %v6320_v36  ;;  %v6318_v24 = vadd.f32 %v6161_v4, %v5752_v42  ;;  %v6485_v18 = vmul.f32 %v6320_v36, %v6320_v36 }
 0x245   : > { %v7607_v39 = vpop.f32.mrf.mxu0  ;;  %v5756_v23 = vadd.f32 %v5611_v52, %v4966_v12  ;;  %v4970_v52 = vadd.f32 %v9884_v13, %v4547_v58 }
 0x246   : > { %v7577_v40 = vpop.f32.mrf.mxu1  ;;  %6414 = vst [vmem:[%s9977_s14 + $0x8] sm:$0xff] %v6318_v24  ;;  %v6445_v63 = vadd.f32 %v6318_v24, %v6317_v16  ;;  %v6483_v30 = vmul.f32 %v6318_v24, %v6318_v24  ;;  %v6323_v45 = vadd.f32 %v7607_v39, %v5757_v60  ;;  %v4969_v16 = vadd.f32 %v9876_v10, %v4546_v7 }
 0x247   : > { %v6174_v62 = vpop.f32.mrf.mxu0  ;;  %v5761_v51 = vadd.f32 %v7577_v40, %v4971_v56 }
 0x248   : > { %v5624_v28 = vpop.f32.mrf.mxu1  ;;  %v6446_v11 = vadd.f32 %v6445_v63, %v6319_v53  ;;  %v6514_v8 = vadd.f32 %v6483_v30, %v6482_v26  ;;  %6419 = vst [vmem:[%s9977_s14 + $0x30] sm:$0xff] %v6323_v45  ;;  %v6321_v1 = vadd.f32 %v6174_v62, %v5755_v47  ;;  %v4552_v53 = vadd.f32 %v9874_v34, %v9774_v37 }
 0x249   : > { %v7608_v44 = vpop.f32.mrf.mxu0  ;;  %v5759_v57 = vadd.f32 %v5624_v28, %v4969_v16  ;;  %v6488_v7 = vmul.f32 %v6323_v45, %v6323_v45  ;;  %v4551_v63 = vadd.f32 %v9886_v49, %v9783_v25 }
 0x24a   : > { %v7578_v17 = vpop.f32.mrf.mxu1  ;;  %v6515_v32 = vadd.f32 %v6514_v8, %v6484_v46  ;;  %6417 = vst [vmem:[%s9977_s14 + $0x20] sm:$0xff] %v6321_v1  ;;  %v6447_v42 = vadd.f32 %v6446_v11, %v6320_v36  ;;  %v6324_v50 = vadd.f32 %v7608_v44, %v5758_v6  ;;  %v6486_v60 = vmul.f32 %v6321_v1, %v6321_v1 }
 0x24b   : > { %v6177_v0 = vpop.f32.mrf.mxu0  ;;  %v5762_v4 = vadd.f32 %v7578_v17, %v4972_v14  ;;  %v4975_v39 = vadd.f32 %v9888_v29, %v4552_v53  ;;  %v4976_v11 = vadd.f32 %v9896_v2, %v4553_v43  ;;  %v4974_v44 = vadd.f32 %v9900_v15, %v4551_v63  ;;  %v10298_v53 = vld [vmem:[#allocation49_spill] sm:$0xff]  ;;  %v10305_v63 = vld [vmem:[#allocation15_spill] sm:$0xff] }
 0x24c   : > { %v5627_v22 = vpop.f32.mrf.mxu1  ;;  %v6448_v5 = vadd.f32 %v6447_v42, %v6321_v1  ;;  %v6516_v38 = vadd.f32 %v6515_v32, %v6485_v18  ;;  %6420 = vst [vmem:[%s9977_s14 + $0x38] sm:$0xff] %v6324_v50  ;;  %v6322_v10 = vadd.f32 %v6177_v0, %v5756_v23  ;;  %v6489_v30 = vmul.f32 %v6324_v50, %v6324_v50  ;;  %v10297_v32 = vld [vmem:[#allocation27_spill] sm:$0xff] }
 0x24d   : > { %v7611_v36 = vpop.f32.mrf.mxu0  ;;  %v5760_v13 = vadd.f32 %v5627_v22, %v4970_v52  ;;  %v4554_v23 = vadd.f32 %v9894_v35, %v9789_v48  ;;  %v4557_v42 = vadd.f32 %v10297_v32, %v9792_v20  ;;  %v10299_v22 = vld [vmem:[#allocation4_spill] sm:$0xff] }
 0x24e   : > { %v7581_v37 = vpop.f32.mrf.mxu1  ;;  %v6517_v34 = vadd.f32 %v6516_v38, %v6486_v60  ;;  %6418 = vst [vmem:[%s9977_s14 + $0x28] sm:$0xff] %v6322_v10  ;;  %v6449_v24 = vadd.f32 %v6448_v5, %v6322_v10  ;;  %v6487_v47 = vmul.f32 %v6322_v10, %v6322_v10  ;;  %v6327_v3 = vadd.f32 %v7611_v36, %v5761_v51  ;;  %v10300_v5 = vld [vmem:[#allocation23_spill] sm:$0xff] }
 0x24f   : > { %v6190_v26 = vpop.f32.mrf.mxu0  ;;  %v5765_v29 = vadd.f32 %v7581_v37, %v4975_v39  ;;  %v4555_v60 = vadd.f32 %v10300_v5, %v10299_v22  ;;  %v4977_v36 = vadd.f32 %v10301_v55, %v4554_v23 }
 0x250   : > { %v5640_v31 = vpop.f32.mrf.mxu1  ;;  %v6450_v33 = vadd.f32 %v6449_v24, %v6323_v45  ;;  %v6518_v12 = vadd.f32 %v6517_v34, %v6487_v47  ;;  %6423 = vst [vmem:[%s9977_s14 + $0x50] sm:$0xff] %v6327_v3  ;;  %v6325_v40 = vadd.f32 %v6190_v26, %v5759_v57  ;;  %v4556_v45 = vadd.f32 %v9890_v59, %v9786_v41  ;;  %v10302_v24 = vld [vmem:[#allocation13_spill] sm:$0xff]  ;;  %v10303_v47 = vld [vmem:[#allocation24_spill] sm:$0xff]  ;;  %v10304_v26 = vld [vmem:[#allocation7_spill] sm:$0xff] }
 0x251   : > { %v7612_v6 = vpop.f32.mrf.mxu0  ;;  %v5763_v28 = vadd.f32 %v5640_v31, %v4973_v21  ;;  %v4980_v39 = vadd.f32 %v10304_v26, %v4557_v42 }
 0x252   : > { %v7582_v9 = vpop.f32.mrf.mxu1  ;;  %v6519_v61 = vadd.f32 %v6518_v12, %v6488_v7  ;;  %6421 = vst [vmem:[%s9977_s14 + $0x40] sm:$0xff] %v6325_v40  ;;  %v6451_v46 = vadd.f32 %v6450_v33, %v6324_v50  ;;  %v6328_v62 = vadd.f32 %v7612_v6, %v5762_v4  ;;  %v6490_v8 = vmul.f32 %v6325_v40, %v6325_v40 }
 0x253   : > { %v6193_v56 = vpop.f32.mrf.mxu0  ;;  %v5766_v18 = vadd.f32 %v7582_v9, %v4976_v11  ;;  %v6492_v50 = vmul.f32 %v6327_v3, %v6327_v3  ;;  %v4979_v0 = vadd.f32 %v10298_v53, %v4556_v45  ;;  %v10308_v11 = vld [vmem:[#allocation17_spill] sm:$0xff] }
 0x254   : > { %v5643_v25 = vpop.f32.mrf.mxu1  ;;  %v6452_v49 = vadd.f32 %v6451_v46, %v6325_v40  ;;  %v6520_v1 = vadd.f32 %v6519_v61, %v6489_v30  ;;  %6424 = vst [vmem:[%s9977_s14 + $0x58] sm:$0xff] %v6328_v62  ;;  %v6326_v54 = vadd.f32 %v6193_v56, %v5760_v13  ;;  %v6493_v38 = vmul.f32 %v6328_v62, %v6328_v62  ;;  %v10306_v30 = vld [vmem:[#allocation5_spill] sm:$0xff]  ;;  %v10307_v61 = vld [vmem:[#allocation11_spill] sm:$0xff] }
 0x255   : > { %v7615_v58 = vpop.f32.mrf.mxu0  ;;  %v5764_v15 = vadd.f32 %v5643_v25, %v4974_v44  ;;  %v4558_v6 = vadd.f32 %v10306_v30, %v10305_v63  ;;  %v4978_v46 = vadd.f32 %v10307_v61, %v4555_v60  ;;  %v10309_v25 = vld [vmem:[#allocation9_spill] sm:$0xff] }
 0x256   : > { %v7585_v41 = vpop.f32.mrf.mxu1  ;;  %v6521_v59 = vadd.f32 %v6520_v1, %v6490_v8  ;;  %6422 = vst [vmem:[%s9977_s14 + $0x48] sm:$0xff] %v6326_v54  ;;  %v6453_v16 = vadd.f32 %v6452_v49, %v6326_v54  ;;  %v6491_v17 = vmul.f32 %v6326_v54, %v6326_v54  ;;  %v6331_v2 = vadd.f32 %v7615_v58, %v5765_v29  ;;  %v10310_v54 = vld [vmem:[#allocation35_spill] sm:$0xff] }
 0x257   : > { %v6206_v51 = vpop.f32.mrf.mxu0  ;;  %v5769_v34 = vadd.f32 %v7585_v41, %v4979_v0  ;;  %v4561_v49 = vadd.f32 %v10309_v25, %v10308_v11  ;;  %v10324_v11 = vld [vmem:[#allocation10_spill] sm:$0xff] }
 0x258   : > { %v5656_v48 = vpop.f32.mrf.mxu1  ;;  %v6454_v35 = vadd.f32 %v6453_v16, %v6327_v3  ;;  %v6522_v57 = vadd.f32 %v6521_v59, %v6491_v17  ;;  %6427 = vst [vmem:[%s9977_s14 + $0x70] sm:$0xff] %v6331_v2  ;;  %v6329_v14 = vadd.f32 %v6206_v51, %v5763_v28  ;;  %v4560_v3 = vadd.f32 %v10303_v47, %v10302_v24  ;;  %v10311_v16 = vld [vmem:[#allocation19_spill] sm:$0xff]  ;;  %v10312_v17 = vld [vmem:[#allocation6_spill] sm:$0xff]  ;;  %v10318_v24 = vld [vmem:[#allocation8_spill] sm:$0xff] }
 0x259   : > { %v7616_v10 = vpop.f32.mrf.mxu0  ;;  %v5767_v7 = vadd.f32 %v5656_v48, %v4977_v36  ;;  %v6496_v8 = vmul.f32 %v6331_v2, %v6331_v2  ;;  %v4559_v32 = vadd.f32 %v10312_v17, %v10311_v16  ;;  %v10313_v51 = vld [vmem:[#allocation31_spill] sm:$0xff] }
 0x25a   : > { %v7586_v20 = vpop.f32.mrf.mxu1  ;;  %v6523_v4 = vadd.f32 %v6522_v57, %v6492_v50  ;;  %6425 = vst [vmem:[%s9977_s14 + $0x60] sm:$0xff] %v6329_v14  ;;  %v6455_v52 = vadd.f32 %v6454_v35, %v6328_v62  ;;  %v6332_v37 = vadd.f32 %v7616_v10, %v5766_v18  ;;  %v6494_v12 = vmul.f32 %v6329_v14, %v6329_v14 }
 0x25b   : > { %v6209_v43 = vpop.f32.mrf.mxu0  ;;  %v5770_v9 = vadd.f32 %v7586_v20, %v4980_v39  ;;  %v4983_v23 = vadd.f32 %v10310_v54, %v4560_v3  ;;  %v4981_v53 = vadd.f32 %v10313_v51, %v4558_v6 }
 0x25c   : > { %v5659_v31 = vpop.f32.mrf.mxu1  ;;  %v6456_v33 = vadd.f32 %v6455_v52, %v6329_v14  ;;  %v6524_v40 = vadd.f32 %v6523_v4, %v6493_v38  ;;  %6428 = vst [vmem:[%s9977_s14 + $0x78] sm:$0xff] %v6332_v37  ;;  %v6330_v13 = vadd.f32 %v6209_v43, %v5764_v15  ;;  %v6497_v42 = vmul.f32 %v6332_v37, %v6332_v37  ;;  %v10314_v15 = vld [vmem:[#allocation20_spill] sm:$0xff]  ;;  %v10316_v38 = vld [vmem:[#allocation37_spill] sm:$0xff] }
 0x25d   : > { %v5768_v59 = vadd.f32 %v5659_v31, %v4978_v46  ;;  %v4984_v10 = vadd.f32 %v10316_v38, %v4561_v49  ;;  %v10319_v43 = vld [vmem:[#allocation33_spill] sm:$0xff] }
 0x25e   : > { %v7619_v21 = vpop.f32.mrf.mxu0  ;;  %v7589_v62 = vpop.f32.mrf.mxu1  ;;  %v6525_v29 = vadd.f32 %v6524_v40, %v6494_v12  ;;  %6426 = vst [vmem:[%s9977_s14 + $0x68] sm:$0xff] %v6330_v13  ;;  %v6457_v45 = vadd.f32 %v6456_v33, %v6330_v13  ;;  %v6495_v56 = vmul.f32 %v6330_v13, %v6330_v13  ;;  %v10320_v40 = vld [vmem:[#allocation25_spill] sm:$0xff]  ;;  %v10321_v13 = vld [vmem:[#allocation44_spill] sm:$0xff] }
 0x25f   : > { %v6335_v28 = vadd.f32 %v7619_v21, %v5769_v34  ;;  %v5773_v14 = vadd.f32 %v7589_v62, %v4983_v23  ;;  %v10317_v34 = vld [vmem:[#allocation28_spill] sm:$0xff]  ;;  %v4565_v63 = vadd.f32 %v10321_v13, %v10320_v40  ;;  %v10322_v21 = vld [vmem:[#allocation39_spill] sm:$0xff]  ;;  %v10336_v40 = vld [vmem:[#allocation38_spill] sm:$0xff] }
 0x260   : > { %v6222_v1 = vpop.f32.mrf.mxu0  ;;  %v5672_v58 = vpop.f32.mrf.mxu1  ;;  %v6458_v18 = vadd.f32 %v6457_v45, %v6331_v2  ;;  %v6526_v44 = vadd.f32 %v6525_v29, %v6495_v56  ;;  %v10315_v2 = vld [vmem:[#allocation32_spill] sm:$0xff]  ;;  %v4562_v47 = vadd.f32 %v10318_v24, %v10317_v34  ;;  %v10323_v56 = vld [vmem:[#allocation21_spill] sm:$0xff] }
 0x261   : > { %6431 = vst [vmem:[%s9977_s14 + $0x90] sm:$0xff] %v6335_v28  ;;  %v6333_v41 = vadd.f32 %v6222_v1, %v5767_v7  ;;  %v4564_v22 = vadd.f32 %v10315_v2, %v10314_v15  ;;  %v5771_v60 = vadd.f32 %v5672_v58, %v4981_v53  ;;  %v4982_v7 = vadd.f32 %v10319_v43, %v4559_v32  ;;  %v10325_v1 = vld [vmem:[#allocation12_spill] sm:$0xff]  ;;  %v10330_v15 = vld [vmem:[#allocation41_spill] sm:$0xff] }
 0x262   : > { %v7620_v50 = vpop.f32.mrf.mxu0  ;;  %v7590_v0 = vpop.f32.mrf.mxu1  ;;  %v6527_v48 = vadd.f32 %v6526_v44, %v6496_v8  ;;  %v6459_v35 = vadd.f32 %v6458_v18, %v6332_v37  ;;  %v6500_v30 = vmul.f32 %v6335_v28, %v6335_v28  ;;  %v4563_v25 = vadd.f32 %v10324_v11, %v10323_v56 }
 0x263   : > { %6429 = vst [vmem:[%s9977_s14 + $0x80] sm:$0xff] %v6333_v41  ;;  %v6336_v57 = vadd.f32 %v7620_v50, %v5770_v9  ;;  %v6498_v20 = vmul.f32 %v6333_v41, %v6333_v41  ;;  %v5774_v3 = vadd.f32 %v7590_v0, %v4984_v10  ;;  %v4987_v9 = vadd.f32 %v10322_v21, %v4564_v22 }
 0x264   : > { %v6225_v5 = vpop.f32.mrf.mxu0  ;;  %v5675_v55 = vpop.f32.mrf.mxu1  ;;  %v6460_v36 = vadd.f32 %v6459_v35, %v6333_v41  ;;  %v6528_v4 = vadd.f32 %v6527_v48, %v6497_v42  ;;  %v4985_v54 = vadd.f32 %v10325_v1, %v4562_v47  ;;  %v10328_v42 = vld [vmem:[#allocation36_spill] sm:$0xff] }
 0x265   : > { %6432 = vst [vmem:[%s9977_s14 + $0x98] sm:$0xff] %v6336_v57  ;;  %v6334_v52 = vadd.f32 %v6225_v5, %v5768_v59  ;;  %v5772_v45 = vadd.f32 %v5675_v55, %v4982_v7  ;;  %v6501_v49 = vmul.f32 %v6336_v57, %v6336_v57  ;;  %v10326_v59 = vld [vmem:[#allocation22_spill] sm:$0xff]  ;;  %v4988_v50 = vadd.f32 %v10328_v42, %v4565_v63  ;;  %v10331_v5 = vld [vmem:[#allocation43_spill] sm:$0xff] }
 0x266   : > { %v7623_v37 = vpop.f32.mrf.mxu0  ;;  %v7593_v26 = vpop.f32.mrf.mxu1  ;;  %v6529_v39 = vadd.f32 %v6528_v4, %v6498_v20  ;;  %v10332_v4 = vld [vmem:[#allocation26_spill] sm:$0xff] }
 0x267   : > { %6430 = vst [vmem:[%s9977_s14 + $0x88] sm:$0xff] %v6334_v52  ;;  %v6461_v31 = vadd.f32 %v6460_v36, %v6334_v52  ;;  %v6499_v33 = vmul.f32 %v6334_v52, %v6334_v52  ;;  %v6339_v12 = vadd.f32 %v7623_v37, %v5773_v14  ;;  %v5777_v41 = vadd.f32 %v7593_v26, %v4987_v9  ;;  %v10329_v14 = vld [vmem:[#allocation29_spill] sm:$0xff]  ;;  %v10333_v52 = vld [vmem:[#allocation14_spill] sm:$0xff]  ;;  %v10334_v37 = vld [vmem:[#allocation16_spill] sm:$0xff] }
 0x268   : > { %v6238_v6 = vpop.f32.mrf.mxu0  ;;  %v5688_v61 = vpop.f32.mrf.mxu1  ;;  %v4566_v2 = vadd.f32 %v10330_v15, %v10329_v14  ;;  %v4569_v34 = vadd.f32 %v10333_v52, %v10332_v4 }
 0x269   : > { %v6462_v46 = vadd.f32 %v6461_v31, %v6335_v28  ;;  %v6530_v62 = vadd.f32 %v6529_v39, %v6499_v33  ;;  %6435 = vst [vmem:[%s9977_s14 + $0xb0] sm:$0xff] %v6339_v12  ;;  %v6337_v29 = vadd.f32 %v6238_v6, %v5771_v60  ;;  %v10327_v28 = vld [vmem:[#allocation34_spill] sm:$0xff]  ;;  %v5775_v32 = vadd.f32 %v5688_v61, %v4985_v54 }
 0x26a   : > { %v7624_v8 = vpop.f32.mrf.mxu0  ;;  %v7594_v23 = vpop.f32.mrf.mxu1  ;;  %v4568_v16 = vadd.f32 %v10327_v28, %v10326_v59  ;;  %v4986_v60 = vadd.f32 %v10331_v5, %v4563_v25  ;;  %v6504_v24 = vmul.f32 %v6339_v12, %v6339_v12  ;;  %v10335_v33 = vld [vmem:[#allocation30_spill] sm:$0xff]  ;;  %v4992_v56 = vadd.f32 %v9963_v27, %v4569_v34 }
 0x26b   : > { %v6531_v58 = vadd.f32 %v6530_v62, %v6500_v30  ;;  %6433 = vst [vmem:[%s9977_s14 + $0xa0] sm:$0xff] %v6337_v29  ;;  %v6463_v18 = vadd.f32 %v6462_v46, %v6336_v57  ;;  %v6340_v44 = vadd.f32 %v7624_v8, %v5774_v3  ;;  %v6502_v0 = vmul.f32 %v6337_v29, %v6337_v29  ;;  %v10337_v6 = vld [vmem:[#allocation46_spill] sm:$0xff] }
 0x26c   : > { %v6241_v17 = vpop.f32.mrf.mxu0  ;;  %v5691_v51 = vpop.f32.mrf.mxu1  ;;  %v5778_v22 = vadd.f32 %v7594_v23, %v4988_v50  ;;  %v4991_v3 = vadd.f32 %v10334_v37, %v4568_v16  ;;  %v4567_v13 = vadd.f32 %v10336_v40, %v10335_v33  ;;  %v4989_v21 = vadd.f32 %v10337_v6, %v4566_v2 }
 0x26d   : > { %v6464_v53 = vadd.f32 %v6463_v18, %v6337_v29  ;;  %v6532_v48 = vadd.f32 %v6531_v58, %v6501_v49  ;;  %6436 = vst [vmem:[%s9977_s14 + $0xb8] sm:$0xff] %v6340_v44  ;;  %v6338_v35 = vadd.f32 %v6241_v17, %v5772_v45  ;;  %v5776_v39 = vadd.f32 %v5691_v51, %v4986_v60 }
 0x26e   : > { %v7627_v57 = vpop.f32.mrf.mxu0  ;;  %v6505_v63 = vmul.f32 %v6340_v44, %v6340_v44  ;;  %v4990_v23 = vadd.f32 %v9969_v19, %v4567_v13 }
 0x26f   : > { %v6533_v38 = vadd.f32 %v6532_v48, %v6502_v0  ;;  %6434 = vst [vmem:[%s9977_s14 + $0xa8] sm:$0xff] %v6338_v35  ;;  %v6465_v10 = vadd.f32 %v6464_v53, %v6338_v35  ;;  %v6503_v55 = vmul.f32 %v6338_v35, %v6338_v35  ;;  %v6343_v36 = vadd.f32 %v7627_v57, %v5777_v41  ;;  %v7597_v20 = vpop.f32.mrf.mxu1 }
 0x270   : > { %v6254_v47 = vpop.f32.mrf.mxu0  ;;  %v5781_v62 = vadd.f32 %v7597_v20, %v4991_v3 }
 0x271   : > { %v6466_v43 = vadd.f32 %v6465_v10, %v6339_v12  ;;  %v6534_v7 = vadd.f32 %v6533_v38, %v6503_v55  ;;  %6439 = vst [vmem:[%s9977_s14 + $0xd0] sm:$0xff] %v6343_v36  ;;  %v6341_v26 = vadd.f32 %v6254_v47, %v5775_v32  ;;  %v5704_v31 = vpop.f32.mrf.mxu1  ;;  %v6508_v28 = vmul.f32 %v6343_v36, %v6343_v36 }
 0x272   : > { %v7628_v30 = vpop.f32.mrf.mxu0  ;;  %v5779_v45 = vadd.f32 %v5704_v31, %v4989_v21 }
 0x273   : > { %v6535_v9 = vadd.f32 %v6534_v7, %v6504_v24  ;;  %6437 = vst [vmem:[%s9977_s14 + $0xc0] sm:$0xff] %v6341_v26  ;;  %v6467_v61 = vadd.f32 %v6466_v43, %v6340_v44  ;;  %v6344_v46 = vadd.f32 %v7628_v30, %v5778_v22  ;;  %v7598_v12 = vpop.f32.mrf.mxu1  ;;  %v6506_v25 = vmul.f32 %v6341_v26, %v6341_v26 }
 0x274   : > { %v6257_v29 = vpop.f32.mrf.mxu0  ;;  %v5782_v54 = vadd.f32 %v7598_v12, %v4992_v56 }
 0x275   : > { %v6468_v11 = vadd.f32 %v6467_v61, %v6341_v26  ;;  %v6536_v49 = vadd.f32 %v6535_v9, %v6505_v63  ;;  %6440 = vst [vmem:[%s9977_s14 + $0xd8] sm:$0xff] %v6344_v46  ;;  %v6342_v8 = vadd.f32 %v6257_v29, %v5776_v39  ;;  %v5707_v58 = vpop.f32.mrf.mxu1  ;;  %v6509_v51 = vmul.f32 %v6344_v46, %v6344_v46 }
 0x276   : > { %v7631_v1 = vpop.f32.mrf.mxu0  ;;  %v5780_v42 = vadd.f32 %v5707_v58, %v4990_v23 }
 0x277   : > { %v6537_v18 = vadd.f32 %v6536_v49, %v6506_v25  ;;  %6438 = vst [vmem:[%s9977_s14 + $0xc8] sm:$0xff] %v6342_v8  ;;  %v6469_v44 = vadd.f32 %v6468_v11, %v6342_v8  ;;  %v6507_v41 = vmul.f32 %v6342_v8, %v6342_v8  ;;  %v6347_v59 = vadd.f32 %v7631_v1, %v5781_v62 }
 0x278   : > { %v6270_v16 = vpop.f32.mrf.mxu0 }
 0x279   : > { %v6470_v27 = vadd.f32 %v6469_v44, %v6343_v36  ;;  %v6538_v17 = vadd.f32 %v6537_v18, %v6507_v41  ;;  %6443 = vst [vmem:[%s9977_s14 + $0xf0] sm:$0xff] %v6347_v59  ;;  %v6345_v32 = vadd.f32 %v6270_v16, %v5779_v45  ;;  %v6512_v60 = vmul.f32 %v6347_v59, %v6347_v59 }
 0x27a   : > { %v7632_v50 = vpop.f32.mrf.mxu0 }
 0x27b   : > { %v6539_v53 = vadd.f32 %v6538_v17, %v6508_v28  ;;  %6441 = vst [vmem:[%s9977_s14 + $0xe0] sm:$0xff] %v6345_v32  ;;  %v6471_v19 = vadd.f32 %v6470_v27, %v6344_v46  ;;  %v6348_v0 = vadd.f32 %v7632_v50, %v5782_v54  ;;  %v6510_v14 = vmul.f32 %v6345_v32, %v6345_v32 }
 0x27c   : > { %v6273_v48 = vpop.f32.mrf.mxu0 }
 0x27d   : > { %v6472_v35 = vadd.f32 %v6471_v19, %v6345_v32  ;;  %v6540_v15 = vadd.f32 %v6539_v53, %v6509_v51  ;;  %6444 = vst [vmem:[%s9977_s14 + $0xf8] sm:$0xff] %v6348_v0  ;;  %v6346_v2 = vadd.f32 %v6273_v48, %v5780_v42  ;;  %v6513_v55 = vmul.f32 %v6348_v0, %v6348_v0 }
 0x27f   : > { %v6541_v57 = vadd.f32 %v6540_v15, %v6510_v14  ;;  %6442 = vst [vmem:[%s9977_s14 + $0xe8] sm:$0xff] %v6346_v2  ;;  %v6473_v22 = vadd.f32 %v6472_v35, %v6346_v2  ;;  %v6511_v5 = vmul.f32 %v6346_v2, %v6346_v2 }
 0x281   : > { %v6474_v38 = vadd.f32 %v6473_v22, %v6347_v59  ;;  %v6542_v10 = vadd.f32 %v6541_v57, %v6511_v5 }
 0x283   : > { %v6475_v36 = vadd.f32 %v6474_v38, %v6348_v0  ;;  %v6543_v20 = vadd.f32 %v6542_v10, %v6512_v60 }
 0x285   : > { %v6476_v4 = vrot.slane %v6475_v36, 4  ;;  %v6544_v52 = vadd.f32 %v6543_v20, %v6513_v55 }
 0x287   : > { %v6477_v34 = vadd.f32 %v6476_v4, %v6475_v36  ;;  %v6545_v24 = vrot.slane %v6544_v52, 4 }
 0x289   : > { %v6478_v47 = vrot.slane %v6477_v34, 2  ;;  %v6546_v37 = vadd.f32 %v6545_v24, %v6544_v52 }
 0x28b   : > { %v6479_v3 = vadd.f32 %v6478_v47, %v6477_v34  ;;  %v6547_v43 = vrot.slane %v6546_v37, 2 }
 0x28d   : > { %v6480_v7 = vrot.slane %v6479_v3, 1  ;;  %v6548_v26 = vadd.f32 %v6547_v43, %v6546_v37 }
 0x28f   : > { %v6481_v39 = vadd.f32 %v6480_v7, %v6479_v3  ;;  %v6549_v31 = vrot.slane %v6548_v26, 1 }
 0x291   : > { %v6550_v33 = vadd.f32 %v6549_v31, %v6548_v26  ;;  %6551 = vst [vmem:[%s268_s18] sm:$0xff] %v6481_v39 }
 0x293   : > { %6552 = vst [vmem:[%s272_s23] sm:$0xff] %v6550_v33 }
 0x294 PF: > { %s17_s21 = sadd.s32 1, %s7712_s21  }
 0x295   : > { %p14_p4 = scmp.ge.s32.totalorder %s17_s21, 4  }
 0x297   :  { %16 = sbr.rel (!%p14_p4) target bundleno = 1 (0x1), region = 101 }

</bundles_post_ra>
